<compile_context>
chip_gen: v7x
topology: tpu7x:2x2x1
jax: 0.10.0
libtpu: 0.0.40
codegen_flags: <defaults>
</compile_context>

<pallas_src>
import jax
import jax.numpy as jnp
from jax import lax
from jax.experimental import pallas as pl
from jax.experimental.pallas import tpu as pltpu

BN_EPS = 1e-5
K = 7      # spatial-attention conv kernel size
PAD = 3    # its padding


def _make_pass1_kernel(H, W, C, G):
    """Pass 1: channel attention + channel gate + grouped 7x7 conv (+ bias)
    + per-batch partial BatchNorm statistics.  One grid step per batch."""
    HW = H * W
    Cg = C // G
    M = PAD * W + PAD          # flat-index margin: every tap is a static lane slice

    def kernel(x_ref, w1t_ref, w2_ref, wch_ref, bg_ref,
               y_ref, scale_ref, stats_ref):
        x = x_ref[0]                                               # (C, HW)

        # ---- channel attention: GAP -> 1x1 -> ReLU -> 1x1 -> sigmoid ----
        pooled = jnp.mean(x, axis=1, keepdims=True)                # (C, 1)
        h = jnp.maximum(
            jnp.sum(w1t_ref[...] * pooled, axis=0, keepdims=True), 0.0)   # (1, G)
        ca = jnp.sum(w2_ref[...] * h, axis=1, keepdims=True)       # (C, 1)
        scale = jax.nn.sigmoid(ca)                                 # (C, 1)
        scale_ref[0] = scale

        x1 = x * scale                                             # (C, HW), gated

        # ---- grouped 7x7 conv built in-kernel (no HBM im2col) ----
        # Pad the flattened spatial axis by M zeros on both sides: the tap at
        # offset (di, dj) is the static lane slice starting at M + di*W + dj.
        # Vertical out-of-bounds taps land in the zero margins; horizontal
        # wrap-around across rows is killed by a per-dj lane mask.
        zpad = jnp.zeros((C, M), jnp.float32)
        x1p = jnp.concatenate([zpad, x1, zpad], axis=1)            # (C, HW + 2M)

        lane = lax.broadcasted_iota(jnp.int32, (1, HW), 1)
        wpos = lane % W                                            # column index per lane

        acc = jnp.zeros((C, HW), jnp.float32)                      # per-channel conv
        for dj in range(-PAD, PAD + 1):
            col = jnp.zeros((C, HW), jnp.float32)
            for di in range(-PAD, PAD + 1):
                t = (di + PAD) * K + (dj + PAD)                    # tap index (ki*K+kj)
                off = di * W + dj
                tap = x1p[:, M + off:M + off + HW]                 # (C, HW) static slice
                col = col + tap * wch_ref[:, t:t + 1]              # per-channel weight
            if dj == 0:
                acc = acc + col
            else:
                mask = jnp.logical_and(wpos + dj >= 0, wpos + dj < W)
                acc = acc + col * mask.astype(jnp.float32)

        # reduce the Cg channels of each group (one sublane reduce) and add bias
        y = jnp.sum(acc.reshape(G, Cg, HW), axis=1) + bg_ref[...]  # (G, HW)
        y_ref[0] = y

        # ---- per-batch partial BN statistics (globally reduced after pass 1) ----
        s1 = jnp.sum(y, axis=1, keepdims=True)                     # (G, 1)
        s2 = jnp.sum(y * y, axis=1, keepdims=True)                 # (G, 1)
        stats_ref[0] = jnp.concatenate([s1, s2], axis=1)           # (G, 2)

    return kernel


def _make_pass2_kernel(H, W, C, G):
    """Pass 2: BN apply + ReLU + 1x1 conv (G->1) + sigmoid, output gated and
    written exactly once per tile.  One grid step per batch."""
    HW = H * W

    def kernel(x_ref, scale_ref, y_ref, bnscale_ref, bnshift_ref,
               wp_ref, bp_ref, out_ref):
        # recompute x1 from the tiny per-(b, c) gate (cheaper than re-reading
        # a stored x1 slab from HBM)
        x1 = x_ref[0] * scale_ref[0]                               # (C, HW)
        yr = jnp.maximum(y_ref[0] * bnscale_ref[...] + bnshift_ref[...], 0.0)  # (G, HW)
        # 1x1 conv (G -> 1): weighted sublane reduce, then bias + sigmoid
        sa = jnp.sum(yr * wp_ref[...], axis=0, keepdims=True) + bp_ref[...]    # (1, HW)
        gate = jax.nn.sigmoid(sa)
        out_ref[0] = x1 * gate                                     # single lane-dense store

    return kernel


def cbam_forward(x_nchw, params, ratio=16):
    """Pallas CBAM forward. x_nchw: (B, C, H, W) float32 -> (B, C, H, W)."""
    B, C, H, W = x_nchw.shape
    G = C // ratio
    HW = H * W

    x = x_nchw.astype(jnp.float32).reshape(B, C, HW)               # lane-dense spatial axis

    # ---- parameter prep (tiny, layout only) ----
    w1t = jnp.transpose(params["ca_w1"][:, :, 0, 0]).astype(jnp.float32)   # (C, G)
    w2 = params["ca_w2"][:, :, 0, 0].astype(jnp.float32)                   # (C, G)
    # per-channel 7x7 taps: channel c uses group c//Cg, row c%Cg of the grouped weight
    wch = params["sa_wg"].astype(jnp.float32).reshape(C, K * K)            # (C, 49)
    bg = params["sa_bg"].reshape(G, 1).astype(jnp.float32)
    gamma = params["bn_gamma"].reshape(G, 1).astype(jnp.float32)
    beta = params["bn_beta"].reshape(G, 1).astype(jnp.float32)
    wp = params["sa_wp"][0, :, 0, 0].reshape(G, 1).astype(jnp.float32)
    bp = params["sa_bp"].reshape(1, 1).astype(jnp.float32)

    parallel = pltpu.CompilerParams(dimension_semantics=("parallel",))

    # ---------------- pass 1: gate + grouped conv + partial BN stats ----------------
    y, scale, stats = pl.pallas_call(
        _make_pass1_kernel(H, W, C, G),
        grid=(B,),
        in_specs=[
            pl.BlockSpec((1, C, HW), lambda b: (b, 0, 0)),
            pl.BlockSpec((C, G), lambda b: (0, 0)),
            pl.BlockSpec((C, G), lambda b: (0, 0)),
            pl.BlockSpec((C, K * K), lambda b: (0, 0)),
            pl.BlockSpec((G, 1), lambda b: (0, 0)),
        ],
        out_specs=(
            pl.BlockSpec((1, G, HW), lambda b: (b, 0, 0)),
            pl.BlockSpec((1, C, 1), lambda b: (b, 0, 0)),
            pl.BlockSpec((1, G, 2), lambda b: (b, 0, 0)),
        ),
        out_shape=(
            jax.ShapeDtypeStruct((B, G, HW), jnp.float32),   # conv output y
            jax.ShapeDtypeStruct((B, C, 1), jnp.float32),    # channel-attention gate
            jax.ShapeDtypeStruct((B, G, 2), jnp.float32),    # per-batch (sum, sumsq)
        ),
        compiler_params=parallel,
    )(x, w1t, w2, wch, bg)

    # ---------------- global BN constants (G-sized epilogue, training-mode stats) ----------------
    tot = jnp.sum(stats, axis=0)                         # (G, 2) sums over (B, H, W)
    count = float(B * HW)
    mean = tot[:, 0:1] / count                           # (G, 1)
    var = tot[:, 1:2] / count - mean * mean              # biased batch variance
    bnscale = gamma * lax.rsqrt(var + BN_EPS)            # (G, 1)
    bnshift = beta - mean * bnscale                      # (G, 1)

    # ---------------- pass 2: BN apply + ReLU + 1x1 conv + sigmoid + output gate ----------------
    out = pl.pallas_call(
        _make_pass2_kernel(H, W, C, G),
        grid=(B,),
        in_specs=[
            pl.BlockSpec((1, C, HW), lambda b: (b, 0, 0)),
            pl.BlockSpec((1, C, 1), lambda b: (b, 0, 0)),
            pl.BlockSpec((1, G, HW), lambda b: (b, 0, 0)),
            pl.BlockSpec((G, 1), lambda b: (0, 0)),
            pl.BlockSpec((G, 1), lambda b: (0, 0)),
            pl.BlockSpec((G, 1), lambda b: (0, 0)),
            pl.BlockSpec((1, 1), lambda b: (0, 0)),
        ],
        out_specs=pl.BlockSpec((1, C, HW), lambda b: (b, 0, 0)),
        out_shape=jax.ShapeDtypeStruct((B, C, HW), jnp.float32),
        compiler_params=parallel,
    )(x, scale, y, bnscale, bnshift, wp, bp)

    return out.reshape(B, C, H, W)


def cbam_reference(x, params, ratio=16):
    """Pure-JAX reference of the PyTorch forward (training-mode BatchNorm)."""
    B, C, H, W = x.shape
    G = C // ratio
    hp = lax.Precision.HIGHEST
    pooled = jnp.mean(x, axis=(2, 3), keepdims=True)                      # (B,C,1,1)
    w1 = params["ca_w1"][:, :, 0, 0]                                      # (G,C)
    w2 = params["ca_w2"][:, :, 0, 0]                                      # (C,G)
    h = jax.nn.relu(jnp.einsum("bcij,gc->bgij", pooled, w1, precision=hp))
    ca = jnp.einsum("bgij,cg->bcij", h, w2, precision=hp)
    x1 = x * jax.nn.sigmoid(ca)
    y = lax.conv_general_dilated(
        x1, params["sa_wg"], window_strides=(1, 1), padding=((3, 3), (3, 3)),
        dimension_numbers=("NCHW", "OIHW", "NCHW"),
        feature_group_count=G, precision=hp)
    y = y + params["sa_bg"].reshape(1, G, 1, 1)
    mean = jnp.mean(y, axis=(0, 2, 3), keepdims=True)
    var = jnp.mean((y - mean) ** 2, axis=(0, 2, 3), keepdims=True)
    ybn = (y - mean) * lax.rsqrt(var + BN_EPS) * params["bn_gamma"].reshape(1, G, 1, 1) \
        + params["bn_beta"].reshape(1, G, 1, 1)
    yr = jax.nn.relu(ybn)
    sa = jnp.einsum("bghw,og->bohw", yr, params["sa_wp"][:, :, 0, 0], precision=hp) \
        + params["sa_bp"].reshape(1, 1, 1, 1)
    return x1 * jax.nn.sigmoid(sa)


if __name__ == "__main__":
    B, C, H, W = 2, 32, 16, 16
    ratio = 16
    G = C // ratio        # = 2
    Cg = C // G           # = 16 (input channels per group)

    key = jax.random.PRNGKey(0)
    ks = jax.random.split(key, 7)
    params = {
        # channel attention: Conv2d(C, G, 1, bias=False), Conv2d(G, C, 1, bias=False)
        "ca_w1": 0.1 * jax.random.normal(ks[0], (G, C, 1, 1), jnp.float32),
        "ca_w2": 0.1 * jax.random.normal(ks[1], (C, G, 1, 1), jnp.float32),
        # spatial attention: Conv2d(C, G, 7, padding=3, groups=G) (has bias)
        "sa_wg": 0.05 * jax.random.normal(ks[2], (G, Cg, 7, 7), jnp.float32),
        "sa_bg": 0.1 * jax.random.normal(ks[3], (G,), jnp.float32),
        # BatchNorm2d(G) affine params
        "bn_gamma": jnp.ones((G,), jnp.float32),
        "bn_beta": jnp.zeros((G,), jnp.float32),
        # Conv2d(G, 1, 1) (has bias)
        "sa_wp": 0.1 * jax.random.normal(ks[4], (1, G, 1, 1), jnp.float32),
        "sa_bp": 0.1 * jax.random.normal(ks[5], (1,), jnp.float32),
    }
    x = jax.random.normal(ks[6], (B, C, H, W), jnp.float32)

    out = jax.jit(lambda xx: cbam_forward(xx, params, ratio))(x)
    out = jax.block_until_ready(out)

    ref = cbam_reference(x, params, ratio)
    assert out.shape == (B, C, H, W)
    max_err = float(jnp.max(jnp.abs(out - ref)))
    if not bool(jnp.allclose(out, ref, atol=1e-2, rtol=1e-2)):
        raise AssertionError(f"Pallas CBAM mismatch vs reference, max abs err = {max_err}")
    print("KERNEL_OK")
</pallas_src>

<mosaic_0001>
module attributes {stable_mosaic.version = 11 : i64} {
  func.func @kernel(%arg0: i32, %arg1: memref<1x32x256xf32, #tpu.memory_space<vmem>>, %arg2: memref<32x2xf32, #tpu.memory_space<vmem>>, %arg3: memref<32x2xf32, #tpu.memory_space<vmem>>, %arg4: memref<32x49xf32, #tpu.memory_space<vmem>>, %arg5: memref<2x1xf32, #tpu.memory_space<vmem>>, %arg6: memref<1x2x256xf32, #tpu.memory_space<vmem>>, %arg7: memref<1x32x1xf32, #tpu.memory_space<vmem>>, %arg8: memref<1x2x2xf32, #tpu.memory_space<vmem>>) attributes {dimension_semantics = [#tpu.dimension_semantics<parallel>], iteration_bounds = array<i64: 2>, scalar_prefetch = 0 : i64, scratch_operands = 0 : i64, tpu.core_type = #tpu.core_type<tc>, window_params = [{transform_indices = @transform_0, window_bounds = array<i64: 1, 32, 256>}, {pipeline_mode = #tpu.pipeline_mode<synchronous>, transform_indices = @transform_1, window_bounds = array<i64: 32, 2>}, {pipeline_mode = #tpu.pipeline_mode<synchronous>, transform_indices = @transform_2, window_bounds = array<i64: 32, 2>}, {pipeline_mode = #tpu.pipeline_mode<synchronous>, transform_indices = @transform_3, window_bounds = array<i64: 32, 49>}, {pipeline_mode = #tpu.pipeline_mode<synchronous>, transform_indices = @transform_4, window_bounds = array<i64: 2, 1>}, {transform_indices = @transform_5, window_bounds = array<i64: 1, 2, 256>}, {transform_indices = @transform_6, window_bounds = array<i64: 1, 32, 1>}, {transform_indices = @transform_7, window_bounds = array<i64: 1, 2, 2>}]} {
    %c0 = arith.constant 0 : index
    %c0_0 = arith.constant 0 : index
    %c0_1 = arith.constant 0 : index
    %0 = vector.load %arg1[%c0, %c0_0, %c0_1] : memref<1x32x256xf32, #tpu.memory_space<vmem>>, vector<1x32x256xf32>
    %1 = vector.shape_cast %0 : vector<1x32x256xf32> to vector<32x256xf32>
    %cst = arith.constant dense<0.000000e+00> : vector<32xf32>
    %2 = vector.multi_reduction <add>, %1, %cst [1] : vector<32x256xf32> to vector<32xf32>
    %3 = vector.shape_cast %2 : vector<32xf32> to vector<32x1xf32>
    %cst_2 = arith.constant 2.560000e+02 : f32
    %4 = vector.broadcast %cst_2 : f32 to vector<32x1xf32>
    %5 = arith.divf %3, %4 : vector<32x1xf32>
    %c0_3 = arith.constant 0 : index
    %c0_4 = arith.constant 0 : index
    %6 = vector.load %arg2[%c0_3, %c0_4] : memref<32x2xf32, #tpu.memory_space<vmem>>, vector<32x2xf32>
    %7 = vector.broadcast %5 : vector<32x1xf32> to vector<32x2xf32>
    %8 = arith.mulf %6, %7 : vector<32x2xf32>
    %cst_5 = arith.constant dense<0.000000e+00> : vector<2xf32>
    %9 = vector.multi_reduction <add>, %8, %cst_5 [0] : vector<32x2xf32> to vector<2xf32>
    %10 = vector.shape_cast %9 : vector<2xf32> to vector<1x2xf32>
    %cst_6 = arith.constant 0.000000e+00 : f32
    %11 = vector.broadcast %cst_6 : f32 to vector<1x2xf32>
    %12 = arith.maximumf %10, %11 : vector<1x2xf32>
    %c0_7 = arith.constant 0 : index
    %c0_8 = arith.constant 0 : index
    %13 = vector.load %arg3[%c0_7, %c0_8] : memref<32x2xf32, #tpu.memory_space<vmem>>, vector<32x2xf32>
    %14 = vector.broadcast %12 : vector<1x2xf32> to vector<32x2xf32>
    %15 = arith.mulf %13, %14 : vector<32x2xf32>
    %cst_9 = arith.constant dense<0.000000e+00> : vector<32xf32>
    %16 = vector.multi_reduction <add>, %15, %cst_9 [1] : vector<32x2xf32> to vector<32xf32>
    %17 = vector.shape_cast %16 : vector<32xf32> to vector<32x1xf32>
    %18 = arith.negf %17 : vector<32x1xf32>
    %19 = math.exp %18 : vector<32x1xf32>
    %cst_10 = arith.constant 1.000000e+00 : f32
    %20 = vector.broadcast %cst_10 : f32 to vector<32x1xf32>
    %21 = arith.addf %20, %19 : vector<32x1xf32>
    %22 = arith.divf %20, %21 : vector<32x1xf32>
    %c0_11 = arith.constant 0 : index
    %c0_12 = arith.constant 0 : index
    %c0_13 = arith.constant 0 : index
    %23 = vector.load %arg7[%c0_11, %c0_12, %c0_13] : memref<1x32x1xf32, #tpu.memory_space<vmem>>, vector<1x32x1xf32>
    %24 = vector.shape_cast %23 : vector<1x32x1xf32> to vector<32x1xf32>
    %25 = vector.shape_cast %22 : vector<32x1xf32> to vector<1x32x1xf32>
    tpu.vector_store %arg7[%c0_11, %c0_12, %c0_13], %25 {strides = array<i32>} : memref<1x32x1xf32, #tpu.memory_space<vmem>>, vector<1x32x1xf32>,
    %26 = vector.broadcast %22 : vector<32x1xf32> to vector<32x256xf32>
    %27 = arith.mulf %1, %26 : vector<32x256xf32>
    %cst_14 = arith.constant 0.000000e+00 : f32
    %28 = vector.broadcast %cst_14 : f32 to vector<32x51xf32>
    %29 = tpu.concatenate %28, %27, %28 in 1 : vector<32x51xf32>, vector<32x256xf32>, vector<32x51xf32> -> vector<32x358xf32>
    %30 = tpu.iota {dimensions = array<i32: 1>} : vector<1x256xi32>
    %c16_i32 = arith.constant 16 : i32
    %c0_i32 = arith.constant 0 : i32
    %31 = arith.cmpi eq, %c16_i32, %c0_i32 : i32
    %c1_i32 = arith.constant 1 : i32
    %32 = arith.select %31, %c1_i32, %c16_i32 : i32
    %33 = vector.broadcast %32 : i32 to vector<1x256xi32>
    %34 = arith.remsi %30, %33 : vector<1x256xi32>
    %c0_i32_15 = arith.constant 0 : i32
    %35 = vector.broadcast %c0_i32_15 : i32 to vector<1x256xi32>
    %36 = arith.cmpi ne, %34, %35 : vector<1x256xi32>
    %c0_i32_16 = arith.constant 0 : i32
    %37 = vector.broadcast %c0_i32_16 : i32 to vector<1x256xi32>
    %38 = arith.cmpi slt, %34, %37 : vector<1x256xi32>
    %c0_i32_17 = arith.constant 0 : i32
    %39 = arith.cmpi slt, %32, %c0_i32_17 : i32
    %40 = vector.broadcast %39 : i1 to vector<1x256xi1>
    %41 = vector.broadcast %40 : vector<1x256xi1> to vector<1x256xi1>
    %42 = arith.xori %38, %41 : vector<1x256xi1>
    %43 = arith.andi %42, %36 : vector<1x256xi1>
    %44 = vector.broadcast %32 : i32 to vector<1x256xi32>
    %45 = arith.addi %34, %44 : vector<1x256xi32>
    %46 = arith.select %43, %45, %34 : vector<1x256xi1>, vector<1x256xi32>
    %cst_18 = arith.constant 0.000000e+00 : f32
    %47 = vector.broadcast %cst_18 : f32 to vector<32x256xf32>
    %cst_19 = arith.constant 0.000000e+00 : f32
    %48 = vector.broadcast %cst_19 : f32 to vector<32x256xf32>
    %49 = vector.extract_strided_slice %29 {offsets = [0, 0], sizes = [32, 256], strides = [1, 1]} : vector<32x358xf32> to vector<32x256xf32>
    %c0_20 = arith.constant 0 : index
    %c0_21 = arith.constant 0 : index
    %50 = vector.load %arg4[%c0_20, %c0_21] : memref<32x49xf32, #tpu.memory_space<vmem>>, vector<32x1xf32>
    %51 = vector.broadcast %50 : vector<32x1xf32> to vector<32x256xf32>
    %52 = arith.mulf %49, %51 : vector<32x256xf32>
    %53 = arith.addf %48, %52 : vector<32x256xf32>
    %54 = vector.extract_strided_slice %29 {offsets = [0, 16], sizes = [32, 256], strides = [1, 1]} : vector<32x358xf32> to vector<32x256xf32>
    %c0_22 = arith.constant 0 : index
    %c7 = arith.constant 7 : index
    %55 = vector.load %arg4[%c0_22, %c7] : memref<32x49xf32, #tpu.memory_space<vmem>>, vector<32x1xf32>
    %56 = vector.broadcast %55 : vector<32x1xf32> to vector<32x256xf32>
    %57 = arith.mulf %54, %56 : vector<32x256xf32>
    %58 = arith.addf %53, %57 : vector<32x256xf32>
    %59 = vector.extract_strided_slice %29 {offsets = [0, 32], sizes = [32, 256], strides = [1, 1]} : vector<32x358xf32> to vector<32x256xf32>
    %c0_23 = arith.constant 0 : index
    %c14 = arith.constant 14 : index
    %60 = vector.load %arg4[%c0_23, %c14] : memref<32x49xf32, #tpu.memory_space<vmem>>, vector<32x1xf32>
    %61 = vector.broadcast %60 : vector<32x1xf32> to vector<32x256xf32>
    %62 = arith.mulf %59, %61 : vector<32x256xf32>
    %63 = arith.addf %58, %62 : vector<32x256xf32>
    %64 = vector.extract_strided_slice %29 {offsets = [0, 48], sizes = [32, 256], strides = [1, 1]} : vector<32x358xf32> to vector<32x256xf32>
    %c0_24 = arith.constant 0 : index
    %c21 = arith.constant 21 : index
    %65 = vector.load %arg4[%c0_24, %c21] : memref<32x49xf32, #tpu.memory_space<vmem>>, vector<32x1xf32>
    %66 = vector.broadcast %65 : vector<32x1xf32> to vector<32x256xf32>
    %67 = arith.mulf %64, %66 : vector<32x256xf32>
    %68 = arith.addf %63, %67 : vector<32x256xf32>
    %69 = vector.extract_strided_slice %29 {offsets = [0, 64], sizes = [32, 256], strides = [1, 1]} : vector<32x358xf32> to vector<32x256xf32>
    %c0_25 = arith.constant 0 : index
    %c28 = arith.constant 28 : index
    %70 = vector.load %arg4[%c0_25, %c28] : memref<32x49xf32, #tpu.memory_space<vmem>>, vector<32x1xf32>
    %71 = vector.broadcast %70 : vector<32x1xf32> to vector<32x256xf32>
    %72 = arith.mulf %69, %71 : vector<32x256xf32>
    %73 = arith.addf %68, %72 : vector<32x256xf32>
    %74 = vector.extract_strided_slice %29 {offsets = [0, 80], sizes = [32, 256], strides = [1, 1]} : vector<32x358xf32> to vector<32x256xf32>
    %c0_26 = arith.constant 0 : index
    %c35 = arith.constant 35 : index
    %75 = vector.load %arg4[%c0_26, %c35] : memref<32x49xf32, #tpu.memory_space<vmem>>, vector<32x1xf32>
    %76 = vector.broadcast %75 : vector<32x1xf32> to vector<32x256xf32>
    %77 = arith.mulf %74, %76 : vector<32x256xf32>
    %78 = arith.addf %73, %77 : vector<32x256xf32>
    %79 = vector.extract_strided_slice %29 {offsets = [0, 96], sizes = [32, 256], strides = [1, 1]} : vector<32x358xf32> to vector<32x256xf32>
    %c0_27 = arith.constant 0 : index
    %c42 = arith.constant 42 : index
    %80 = vector.load %arg4[%c0_27, %c42] : memref<32x49xf32, #tpu.memory_space<vmem>>, vector<32x1xf32>
    %81 = vector.broadcast %80 : vector<32x1xf32> to vector<32x256xf32>
    %82 = arith.mulf %79, %81 : vector<32x256xf32>
    %83 = arith.addf %78, %82 : vector<32x256xf32>
    %c-3_i32 = arith.constant -3 : i32
    %84 = vector.broadcast %c-3_i32 : i32 to vector<1x256xi32>
    %85 = arith.addi %46, %84 : vector<1x256xi32>
    %c0_i32_28 = arith.constant 0 : i32
    %86 = vector.broadcast %c0_i32_28 : i32 to vector<1x256xi32>
    %87 = arith.cmpi sge, %85, %86 : vector<1x256xi32>
    %c-3_i32_29 = arith.constant -3 : i32
    %88 = vector.broadcast %c-3_i32_29 : i32 to vector<1x256xi32>
    %89 = arith.addi %46, %88 : vector<1x256xi32>
    %c16_i32_30 = arith.constant 16 : i32
    %90 = vector.broadcast %c16_i32_30 : i32 to vector<1x256xi32>
    %91 = arith.cmpi slt, %89, %90 : vector<1x256xi32>
    %92 = arith.andi %87, %91 : vector<1x256xi1>
    %93 = arith.extui %92 : vector<1x256xi1> to vector<1x256xi32>
    %94 = arith.sitofp %93 : vector<1x256xi32> to vector<1x256xf32>
    %95 = vector.broadcast %94 : vector<1x256xf32> to vector<32x256xf32>
    %96 = arith.mulf %83, %95 : vector<32x256xf32>
    %97 = arith.addf %47, %96 : vector<32x256xf32>
    %cst_31 = arith.constant 0.000000e+00 : f32
    %98 = vector.broadcast %cst_31 : f32 to vector<32x256xf32>
    %99 = vector.extract_strided_slice %29 {offsets = [0, 1], sizes = [32, 256], strides = [1, 1]} : vector<32x358xf32> to vector<32x256xf32>
    %c0_32 = arith.constant 0 : index
    %c1 = arith.constant 1 : index
    %100 = vector.load %arg4[%c0_32, %c1] : memref<32x49xf32, #tpu.memory_space<vmem>>, vector<32x1xf32>
    %101 = vector.broadcast %100 : vector<32x1xf32> to vector<32x256xf32>
    %102 = arith.mulf %99, %101 : vector<32x256xf32>
    %103 = arith.addf %98, %102 : vector<32x256xf32>
    %104 = vector.extract_strided_slice %29 {offsets = [0, 17], sizes = [32, 256], strides = [1, 1]} : vector<32x358xf32> to vector<32x256xf32>
    %c0_33 = arith.constant 0 : index
    %c8 = arith.constant 8 : index
    %105 = vector.load %arg4[%c0_33, %c8] : memref<32x49xf32, #tpu.memory_space<vmem>>, vector<32x1xf32>
    %106 = vector.broadcast %105 : vector<32x1xf32> to vector<32x256xf32>
    %107 = arith.mulf %104, %106 : vector<32x256xf32>
    %108 = arith.addf %103, %107 : vector<32x256xf32>
    %109 = vector.extract_strided_slice %29 {offsets = [0, 33], sizes = [32, 256], strides = [1, 1]} : vector<32x358xf32> to vector<32x256xf32>
    %c0_34 = arith.constant 0 : index
    %c15 = arith.constant 15 : index
    %110 = vector.load %arg4[%c0_34, %c15] : memref<32x49xf32, #tpu.memory_space<vmem>>, vector<32x1xf32>
    %111 = vector.broadcast %110 : vector<32x1xf32> to vector<32x256xf32>
    %112 = arith.mulf %109, %111 : vector<32x256xf32>
    %113 = arith.addf %108, %112 : vector<32x256xf32>
    %114 = vector.extract_strided_slice %29 {offsets = [0, 49], sizes = [32, 256], strides = [1, 1]} : vector<32x358xf32> to vector<32x256xf32>
    %c0_35 = arith.constant 0 : index
    %c22 = arith.constant 22 : index
    %115 = vector.load %arg4[%c0_35, %c22] : memref<32x49xf32, #tpu.memory_space<vmem>>, vector<32x1xf32>
    %116 = vector.broadcast %115 : vector<32x1xf32> to vector<32x256xf32>
    %117 = arith.mulf %114, %116 : vector<32x256xf32>
    %118 = arith.addf %113, %117 : vector<32x256xf32>
    %119 = vector.extract_strided_slice %29 {offsets = [0, 65], sizes = [32, 256], strides = [1, 1]} : vector<32x358xf32> to vector<32x256xf32>
    %c0_36 = arith.constant 0 : index
    %c29 = arith.constant 29 : index
    %120 = vector.load %arg4[%c0_36, %c29] : memref<32x49xf32, #tpu.memory_space<vmem>>, vector<32x1xf32>
    %121 = vector.broadcast %120 : vector<32x1xf32> to vector<32x256xf32>
    %122 = arith.mulf %119, %121 : vector<32x256xf32>
    %123 = arith.addf %118, %122 : vector<32x256xf32>
    %124 = vector.extract_strided_slice %29 {offsets = [0, 81], sizes = [32, 256], strides = [1, 1]} : vector<32x358xf32> to vector<32x256xf32>
    %c0_37 = arith.constant 0 : index
    %c36 = arith.constant 36 : index
    %125 = vector.load %arg4[%c0_37, %c36] : memref<32x49xf32, #tpu.memory_space<vmem>>, vector<32x1xf32>
    %126 = vector.broadcast %125 : vector<32x1xf32> to vector<32x256xf32>
    %127 = arith.mulf %124, %126 : vector<32x256xf32>
    %128 = arith.addf %123, %127 : vector<32x256xf32>
    %129 = vector.extract_strided_slice %29 {offsets = [0, 97], sizes = [32, 256], strides = [1, 1]} : vector<32x358xf32> to vector<32x256xf32>
    %c0_38 = arith.constant 0 : index
    %c43 = arith.constant 43 : index
    %130 = vector.load %arg4[%c0_38, %c43] : memref<32x49xf32, #tpu.memory_space<vmem>>, vector<32x1xf32>
    %131 = vector.broadcast %130 : vector<32x1xf32> to vector<32x256xf32>
    %132 = arith.mulf %129, %131 : vector<32x256xf32>
    %133 = arith.addf %128, %132 : vector<32x256xf32>
    %c-2_i32 = arith.constant -2 : i32
    %134 = vector.broadcast %c-2_i32 : i32 to vector<1x256xi32>
    %135 = arith.addi %46, %134 : vector<1x256xi32>
    %c0_i32_39 = arith.constant 0 : i32
    %136 = vector.broadcast %c0_i32_39 : i32 to vector<1x256xi32>
    %137 = arith.cmpi sge, %135, %136 : vector<1x256xi32>
    %c-2_i32_40 = arith.constant -2 : i32
    %138 = vector.broadcast %c-2_i32_40 : i32 to vector<1x256xi32>
    %139 = arith.addi %46, %138 : vector<1x256xi32>
    %c16_i32_41 = arith.constant 16 : i32
    %140 = vector.broadcast %c16_i32_41 : i32 to vector<1x256xi32>
    %141 = arith.cmpi slt, %139, %140 : vector<1x256xi32>
    %142 = arith.andi %137, %141 : vector<1x256xi1>
    %143 = arith.extui %142 : vector<1x256xi1> to vector<1x256xi32>
    %144 = arith.sitofp %143 : vector<1x256xi32> to vector<1x256xf32>
    %145 = vector.broadcast %144 : vector<1x256xf32> to vector<32x256xf32>
    %146 = arith.mulf %133, %145 : vector<32x256xf32>
    %147 = arith.addf %97, %146 : vector<32x256xf32>
    %cst_42 = arith.constant 0.000000e+00 : f32
    %148 = vector.broadcast %cst_42 : f32 to vector<32x256xf32>
    %149 = vector.extract_strided_slice %29 {offsets = [0, 2], sizes = [32, 256], strides = [1, 1]} : vector<32x358xf32> to vector<32x256xf32>
    %c0_43 = arith.constant 0 : index
    %c2 = arith.constant 2 : index
    %150 = vector.load %arg4[%c0_43, %c2] : memref<32x49xf32, #tpu.memory_space<vmem>>, vector<32x1xf32>
    %151 = vector.broadcast %150 : vector<32x1xf32> to vector<32x256xf32>
    %152 = arith.mulf %149, %151 : vector<32x256xf32>
    %153 = arith.addf %148, %152 : vector<32x256xf32>
    %154 = vector.extract_strided_slice %29 {offsets = [0, 18], sizes = [32, 256], strides = [1, 1]} : vector<32x358xf32> to vector<32x256xf32>
    %c0_44 = arith.constant 0 : index
    %c9 = arith.constant 9 : index
    %155 = vector.load %arg4[%c0_44, %c9] : memref<32x49xf32, #tpu.memory_space<vmem>>, vector<32x1xf32>
    %156 = vector.broadcast %155 : vector<32x1xf32> to vector<32x256xf32>
    %157 = arith.mulf %154, %156 : vector<32x256xf32>
    %158 = arith.addf %153, %157 : vector<32x256xf32>
    %159 = vector.extract_strided_slice %29 {offsets = [0, 34], sizes = [32, 256], strides = [1, 1]} : vector<32x358xf32> to vector<32x256xf32>
    %c0_45 = arith.constant 0 : index
    %c16 = arith.constant 16 : index
    %160 = vector.load %arg4[%c0_45, %c16] : memref<32x49xf32, #tpu.memory_space<vmem>>, vector<32x1xf32>
    %161 = vector.broadcast %160 : vector<32x1xf32> to vector<32x256xf32>
    %162 = arith.mulf %159, %161 : vector<32x256xf32>
    %163 = arith.addf %158, %162 : vector<32x256xf32>
    %164 = vector.extract_strided_slice %29 {offsets = [0, 50], sizes = [32, 256], strides = [1, 1]} : vector<32x358xf32> to vector<32x256xf32>
    %c0_46 = arith.constant 0 : index
    %c23 = arith.constant 23 : index
    %165 = vector.load %arg4[%c0_46, %c23] : memref<32x49xf32, #tpu.memory_space<vmem>>, vector<32x1xf32>
    %166 = vector.broadcast %165 : vector<32x1xf32> to vector<32x256xf32>
    %167 = arith.mulf %164, %166 : vector<32x256xf32>
    %168 = arith.addf %163, %167 : vector<32x256xf32>
    %169 = vector.extract_strided_slice %29 {offsets = [0, 66], sizes = [32, 256], strides = [1, 1]} : vector<32x358xf32> to vector<32x256xf32>
    %c0_47 = arith.constant 0 : index
    %c30 = arith.constant 30 : index
    %170 = vector.load %arg4[%c0_47, %c30] : memref<32x49xf32, #tpu.memory_space<vmem>>, vector<32x1xf32>
    %171 = vector.broadcast %170 : vector<32x1xf32> to vector<32x256xf32>
    %172 = arith.mulf %169, %171 : vector<32x256xf32>
    %173 = arith.addf %168, %172 : vector<32x256xf32>
    %174 = vector.extract_strided_slice %29 {offsets = [0, 82], sizes = [32, 256], strides = [1, 1]} : vector<32x358xf32> to vector<32x256xf32>
    %c0_48 = arith.constant 0 : index
    %c37 = arith.constant 37 : index
    %175 = vector.load %arg4[%c0_48, %c37] : memref<32x49xf32, #tpu.memory_space<vmem>>, vector<32x1xf32>
    %176 = vector.broadcast %175 : vector<32x1xf32> to vector<32x256xf32>
    %177 = arith.mulf %174, %176 : vector<32x256xf32>
    %178 = arith.addf %173, %177 : vector<32x256xf32>
    %179 = vector.extract_strided_slice %29 {offsets = [0, 98], sizes = [32, 256], strides = [1, 1]} : vector<32x358xf32> to vector<32x256xf32>
    %c0_49 = arith.constant 0 : index
    %c44 = arith.constant 44 : index
    %180 = vector.load %arg4[%c0_49, %c44] : memref<32x49xf32, #tpu.memory_space<vmem>>, vector<32x1xf32>
    %181 = vector.broadcast %180 : vector<32x1xf32> to vector<32x256xf32>
    %182 = arith.mulf %179, %181 : vector<32x256xf32>
    %183 = arith.addf %178, %182 : vector<32x256xf32>
    %c-1_i32 = arith.constant -1 : i32
    %184 = vector.broadcast %c-1_i32 : i32 to vector<1x256xi32>
    %185 = arith.addi %46, %184 : vector<1x256xi32>
    %c0_i32_50 = arith.constant 0 : i32
    %186 = vector.broadcast %c0_i32_50 : i32 to vector<1x256xi32>
    %187 = arith.cmpi sge, %185, %186 : vector<1x256xi32>
    %c-1_i32_51 = arith.constant -1 : i32
    %188 = vector.broadcast %c-1_i32_51 : i32 to vector<1x256xi32>
    %189 = arith.addi %46, %188 : vector<1x256xi32>
    %c16_i32_52 = arith.constant 16 : i32
    %190 = vector.broadcast %c16_i32_52 : i32 to vector<1x256xi32>
    %191 = arith.cmpi slt, %189, %190 : vector<1x256xi32>
    %192 = arith.andi %187, %191 : vector<1x256xi1>
    %193 = arith.extui %192 : vector<1x256xi1> to vector<1x256xi32>
    %194 = arith.sitofp %193 : vector<1x256xi32> to vector<1x256xf32>
    %195 = vector.broadcast %194 : vector<1x256xf32> to vector<32x256xf32>
    %196 = arith.mulf %183, %195 : vector<32x256xf32>
    %197 = arith.addf %147, %196 : vector<32x256xf32>
    %cst_53 = arith.constant 0.000000e+00 : f32
    %198 = vector.broadcast %cst_53 : f32 to vector<32x256xf32>
    %199 = vector.extract_strided_slice %29 {offsets = [0, 3], sizes = [32, 256], strides = [1, 1]} : vector<32x358xf32> to vector<32x256xf32>
    %c0_54 = arith.constant 0 : index
    %c3 = arith.constant 3 : index
    %200 = vector.load %arg4[%c0_54, %c3] : memref<32x49xf32, #tpu.memory_space<vmem>>, vector<32x1xf32>
    %201 = vector.broadcast %200 : vector<32x1xf32> to vector<32x256xf32>
    %202 = arith.mulf %199, %201 : vector<32x256xf32>
    %203 = arith.addf %198, %202 : vector<32x256xf32>
    %204 = vector.extract_strided_slice %29 {offsets = [0, 19], sizes = [32, 256], strides = [1, 1]} : vector<32x358xf32> to vector<32x256xf32>
    %c0_55 = arith.constant 0 : index
    %c10 = arith.constant 10 : index
    %205 = vector.load %arg4[%c0_55, %c10] : memref<32x49xf32, #tpu.memory_space<vmem>>, vector<32x1xf32>
    %206 = vector.broadcast %205 : vector<32x1xf32> to vector<32x256xf32>
    %207 = arith.mulf %204, %206 : vector<32x256xf32>
    %208 = arith.addf %203, %207 : vector<32x256xf32>
    %209 = vector.extract_strided_slice %29 {offsets = [0, 35], sizes = [32, 256], strides = [1, 1]} : vector<32x358xf32> to vector<32x256xf32>
    %c0_56 = arith.constant 0 : index
    %c17 = arith.constant 17 : index
    %210 = vector.load %arg4[%c0_56, %c17] : memref<32x49xf32, #tpu.memory_space<vmem>>, vector<32x1xf32>
    %211 = vector.broadcast %210 : vector<32x1xf32> to vector<32x256xf32>
    %212 = arith.mulf %209, %211 : vector<32x256xf32>
    %213 = arith.addf %208, %212 : vector<32x256xf32>
    %214 = vector.extract_strided_slice %29 {offsets = [0, 51], sizes = [32, 256], strides = [1, 1]} : vector<32x358xf32> to vector<32x256xf32>
    %c0_57 = arith.constant 0 : index
    %c24 = arith.constant 24 : index
    %215 = vector.load %arg4[%c0_57, %c24] : memref<32x49xf32, #tpu.memory_space<vmem>>, vector<32x1xf32>
    %216 = vector.broadcast %215 : vector<32x1xf32> to vector<32x256xf32>
    %217 = arith.mulf %214, %216 : vector<32x256xf32>
    %218 = arith.addf %213, %217 : vector<32x256xf32>
    %219 = vector.extract_strided_slice %29 {offsets = [0, 67], sizes = [32, 256], strides = [1, 1]} : vector<32x358xf32> to vector<32x256xf32>
    %c0_58 = arith.constant 0 : index
    %c31 = arith.constant 31 : index
    %220 = vector.load %arg4[%c0_58, %c31] : memref<32x49xf32, #tpu.memory_space<vmem>>, vector<32x1xf32>
    %221 = vector.broadcast %220 : vector<32x1xf32> to vector<32x256xf32>
    %222 = arith.mulf %219, %221 : vector<32x256xf32>
    %223 = arith.addf %218, %222 : vector<32x256xf32>
    %224 = vector.extract_strided_slice %29 {offsets = [0, 83], sizes = [32, 256], strides = [1, 1]} : vector<32x358xf32> to vector<32x256xf32>
    %c0_59 = arith.constant 0 : index
    %c38 = arith.constant 38 : index
    %225 = vector.load %arg4[%c0_59, %c38] : memref<32x49xf32, #tpu.memory_space<vmem>>, vector<32x1xf32>
    %226 = vector.broadcast %225 : vector<32x1xf32> to vector<32x256xf32>
    %227 = arith.mulf %224, %226 : vector<32x256xf32>
    %228 = arith.addf %223, %227 : vector<32x256xf32>
    %229 = vector.extract_strided_slice %29 {offsets = [0, 99], sizes = [32, 256], strides = [1, 1]} : vector<32x358xf32> to vector<32x256xf32>
    %c0_60 = arith.constant 0 : index
    %c45 = arith.constant 45 : index
    %230 = vector.load %arg4[%c0_60, %c45] : memref<32x49xf32, #tpu.memory_space<vmem>>, vector<32x1xf32>
    %231 = vector.broadcast %230 : vector<32x1xf32> to vector<32x256xf32>
    %232 = arith.mulf %229, %231 : vector<32x256xf32>
    %233 = arith.addf %228, %232 : vector<32x256xf32>
    %234 = arith.addf %197, %233 : vector<32x256xf32>
    %cst_61 = arith.constant 0.000000e+00 : f32
    %235 = vector.broadcast %cst_61 : f32 to vector<32x256xf32>
    %236 = vector.extract_strided_slice %29 {offsets = [0, 4], sizes = [32, 256], strides = [1, 1]} : vector<32x358xf32> to vector<32x256xf32>
    %c0_62 = arith.constant 0 : index
    %c4 = arith.constant 4 : index
    %237 = vector.load %arg4[%c0_62, %c4] : memref<32x49xf32, #tpu.memory_space<vmem>>, vector<32x1xf32>
    %238 = vector.broadcast %237 : vector<32x1xf32> to vector<32x256xf32>
    %239 = arith.mulf %236, %238 : vector<32x256xf32>
    %240 = arith.addf %235, %239 : vector<32x256xf32>
    %241 = vector.extract_strided_slice %29 {offsets = [0, 20], sizes = [32, 256], strides = [1, 1]} : vector<32x358xf32> to vector<32x256xf32>
    %c0_63 = arith.constant 0 : index
    %c11 = arith.constant 11 : index
    %242 = vector.load %arg4[%c0_63, %c11] : memref<32x49xf32, #tpu.memory_space<vmem>>, vector<32x1xf32>
    %243 = vector.broadcast %242 : vector<32x1xf32> to vector<32x256xf32>
    %244 = arith.mulf %241, %243 : vector<32x256xf32>
    %245 = arith.addf %240, %244 : vector<32x256xf32>
    %246 = vector.extract_strided_slice %29 {offsets = [0, 36], sizes = [32, 256], strides = [1, 1]} : vector<32x358xf32> to vector<32x256xf32>
    %c0_64 = arith.constant 0 : index
    %c18 = arith.constant 18 : index
    %247 = vector.load %arg4[%c0_64, %c18] : memref<32x49xf32, #tpu.memory_space<vmem>>, vector<32x1xf32>
    %248 = vector.broadcast %247 : vector<32x1xf32> to vector<32x256xf32>
    %249 = arith.mulf %246, %248 : vector<32x256xf32>
    %250 = arith.addf %245, %249 : vector<32x256xf32>
    %251 = vector.extract_strided_slice %29 {offsets = [0, 52], sizes = [32, 256], strides = [1, 1]} : vector<32x358xf32> to vector<32x256xf32>
    %c0_65 = arith.constant 0 : index
    %c25 = arith.constant 25 : index
    %252 = vector.load %arg4[%c0_65, %c25] : memref<32x49xf32, #tpu.memory_space<vmem>>, vector<32x1xf32>
    %253 = vector.broadcast %252 : vector<32x1xf32> to vector<32x256xf32>
    %254 = arith.mulf %251, %253 : vector<32x256xf32>
    %255 = arith.addf %250, %254 : vector<32x256xf32>
    %256 = vector.extract_strided_slice %29 {offsets = [0, 68], sizes = [32, 256], strides = [1, 1]} : vector<32x358xf32> to vector<32x256xf32>
    %c0_66 = arith.constant 0 : index
    %c32 = arith.constant 32 : index
    %257 = vector.load %arg4[%c0_66, %c32] : memref<32x49xf32, #tpu.memory_space<vmem>>, vector<32x1xf32>
    %258 = vector.broadcast %257 : vector<32x1xf32> to vector<32x256xf32>
    %259 = arith.mulf %256, %258 : vector<32x256xf32>
    %260 = arith.addf %255, %259 : vector<32x256xf32>
    %261 = vector.extract_strided_slice %29 {offsets = [0, 84], sizes = [32, 256], strides = [1, 1]} : vector<32x358xf32> to vector<32x256xf32>
    %c0_67 = arith.constant 0 : index
    %c39 = arith.constant 39 : index
    %262 = vector.load %arg4[%c0_67, %c39] : memref<32x49xf32, #tpu.memory_space<vmem>>, vector<32x1xf32>
    %263 = vector.broadcast %262 : vector<32x1xf32> to vector<32x256xf32>
    %264 = arith.mulf %261, %263 : vector<32x256xf32>
    %265 = arith.addf %260, %264 : vector<32x256xf32>
    %266 = vector.extract_strided_slice %29 {offsets = [0, 100], sizes = [32, 256], strides = [1, 1]} : vector<32x358xf32> to vector<32x256xf32>
    %c0_68 = arith.constant 0 : index
    %c46 = arith.constant 46 : index
    %267 = vector.load %arg4[%c0_68, %c46] : memref<32x49xf32, #tpu.memory_space<vmem>>, vector<32x1xf32>
    %268 = vector.broadcast %267 : vector<32x1xf32> to vector<32x256xf32>
    %269 = arith.mulf %266, %268 : vector<32x256xf32>
    %270 = arith.addf %265, %269 : vector<32x256xf32>
    %c1_i32_69 = arith.constant 1 : i32
    %271 = vector.broadcast %c1_i32_69 : i32 to vector<1x256xi32>
    %272 = arith.addi %46, %271 : vector<1x256xi32>
    %c0_i32_70 = arith.constant 0 : i32
    %273 = vector.broadcast %c0_i32_70 : i32 to vector<1x256xi32>
    %274 = arith.cmpi sge, %272, %273 : vector<1x256xi32>
    %c1_i32_71 = arith.constant 1 : i32
    %275 = vector.broadcast %c1_i32_71 : i32 to vector<1x256xi32>
    %276 = arith.addi %46, %275 : vector<1x256xi32>
    %c16_i32_72 = arith.constant 16 : i32
    %277 = vector.broadcast %c16_i32_72 : i32 to vector<1x256xi32>
    %278 = arith.cmpi slt, %276, %277 : vector<1x256xi32>
    %279 = arith.andi %274, %278 : vector<1x256xi1>
    %280 = arith.extui %279 : vector<1x256xi1> to vector<1x256xi32>
    %281 = arith.sitofp %280 : vector<1x256xi32> to vector<1x256xf32>
    %282 = vector.broadcast %281 : vector<1x256xf32> to vector<32x256xf32>
    %283 = arith.mulf %270, %282 : vector<32x256xf32>
    %284 = arith.addf %234, %283 : vector<32x256xf32>
    %cst_73 = arith.constant 0.000000e+00 : f32
    %285 = vector.broadcast %cst_73 : f32 to vector<32x256xf32>
    %286 = vector.extract_strided_slice %29 {offsets = [0, 5], sizes = [32, 256], strides = [1, 1]} : vector<32x358xf32> to vector<32x256xf32>
    %c0_74 = arith.constant 0 : index
    %c5 = arith.constant 5 : index
    %287 = vector.load %arg4[%c0_74, %c5] : memref<32x49xf32, #tpu.memory_space<vmem>>, vector<32x1xf32>
    %288 = vector.broadcast %287 : vector<32x1xf32> to vector<32x256xf32>
    %289 = arith.mulf %286, %288 : vector<32x256xf32>
    %290 = arith.addf %285, %289 : vector<32x256xf32>
    %291 = vector.extract_strided_slice %29 {offsets = [0, 21], sizes = [32, 256], strides = [1, 1]} : vector<32x358xf32> to vector<32x256xf32>
    %c0_75 = arith.constant 0 : index
    %c12 = arith.constant 12 : index
    %292 = vector.load %arg4[%c0_75, %c12] : memref<32x49xf32, #tpu.memory_space<vmem>>, vector<32x1xf32>
    %293 = vector.broadcast %292 : vector<32x1xf32> to vector<32x256xf32>
    %294 = arith.mulf %291, %293 : vector<32x256xf32>
    %295 = arith.addf %290, %294 : vector<32x256xf32>
    %296 = vector.extract_strided_slice %29 {offsets = [0, 37], sizes = [32, 256], strides = [1, 1]} : vector<32x358xf32> to vector<32x256xf32>
    %c0_76 = arith.constant 0 : index
    %c19 = arith.constant 19 : index
    %297 = vector.load %arg4[%c0_76, %c19] : memref<32x49xf32, #tpu.memory_space<vmem>>, vector<32x1xf32>
    %298 = vector.broadcast %297 : vector<32x1xf32> to vector<32x256xf32>
    %299 = arith.mulf %296, %298 : vector<32x256xf32>
    %300 = arith.addf %295, %299 : vector<32x256xf32>
    %301 = vector.extract_strided_slice %29 {offsets = [0, 53], sizes = [32, 256], strides = [1, 1]} : vector<32x358xf32> to vector<32x256xf32>
    %c0_77 = arith.constant 0 : index
    %c26 = arith.constant 26 : index
    %302 = vector.load %arg4[%c0_77, %c26] : memref<32x49xf32, #tpu.memory_space<vmem>>, vector<32x1xf32>
    %303 = vector.broadcast %302 : vector<32x1xf32> to vector<32x256xf32>
    %304 = arith.mulf %301, %303 : vector<32x256xf32>
    %305 = arith.addf %300, %304 : vector<32x256xf32>
    %306 = vector.extract_strided_slice %29 {offsets = [0, 69], sizes = [32, 256], strides = [1, 1]} : vector<32x358xf32> to vector<32x256xf32>
    %c0_78 = arith.constant 0 : index
    %c33 = arith.constant 33 : index
    %307 = vector.load %arg4[%c0_78, %c33] : memref<32x49xf32, #tpu.memory_space<vmem>>, vector<32x1xf32>
    %308 = vector.broadcast %307 : vector<32x1xf32> to vector<32x256xf32>
    %309 = arith.mulf %306, %308 : vector<32x256xf32>
    %310 = arith.addf %305, %309 : vector<32x256xf32>
    %311 = vector.extract_strided_slice %29 {offsets = [0, 85], sizes = [32, 256], strides = [1, 1]} : vector<32x358xf32> to vector<32x256xf32>
    %c0_79 = arith.constant 0 : index
    %c40 = arith.constant 40 : index
    %312 = vector.load %arg4[%c0_79, %c40] : memref<32x49xf32, #tpu.memory_space<vmem>>, vector<32x1xf32>
    %313 = vector.broadcast %312 : vector<32x1xf32> to vector<32x256xf32>
    %314 = arith.mulf %311, %313 : vector<32x256xf32>
    %315 = arith.addf %310, %314 : vector<32x256xf32>
    %316 = vector.extract_strided_slice %29 {offsets = [0, 101], sizes = [32, 256], strides = [1, 1]} : vector<32x358xf32> to vector<32x256xf32>
    %c0_80 = arith.constant 0 : index
    %c47 = arith.constant 47 : index
    %317 = vector.load %arg4[%c0_80, %c47] : memref<32x49xf32, #tpu.memory_space<vmem>>, vector<32x1xf32>
    %318 = vector.broadcast %317 : vector<32x1xf32> to vector<32x256xf32>
    %319 = arith.mulf %316, %318 : vector<32x256xf32>
    %320 = arith.addf %315, %319 : vector<32x256xf32>
    %c2_i32 = arith.constant 2 : i32
    %321 = vector.broadcast %c2_i32 : i32 to vector<1x256xi32>
    %322 = arith.addi %46, %321 : vector<1x256xi32>
    %c0_i32_81 = arith.constant 0 : i32
    %323 = vector.broadcast %c0_i32_81 : i32 to vector<1x256xi32>
    %324 = arith.cmpi sge, %322, %323 : vector<1x256xi32>
    %c2_i32_82 = arith.constant 2 : i32
    %325 = vector.broadcast %c2_i32_82 : i32 to vector<1x256xi32>
    %326 = arith.addi %46, %325 : vector<1x256xi32>
    %c16_i32_83 = arith.constant 16 : i32
    %327 = vector.broadcast %c16_i32_83 : i32 to vector<1x256xi32>
    %328 = arith.cmpi slt, %326, %327 : vector<1x256xi32>
    %329 = arith.andi %324, %328 : vector<1x256xi1>
    %330 = arith.extui %329 : vector<1x256xi1> to vector<1x256xi32>
    %331 = arith.sitofp %330 : vector<1x256xi32> to vector<1x256xf32>
    %332 = vector.broadcast %331 : vector<1x256xf32> to vector<32x256xf32>
    %333 = arith.mulf %320, %332 : vector<32x256xf32>
    %334 = arith.addf %284, %333 : vector<32x256xf32>
    %cst_84 = arith.constant 0.000000e+00 : f32
    %335 = vector.broadcast %cst_84 : f32 to vector<32x256xf32>
    %336 = vector.extract_strided_slice %29 {offsets = [0, 6], sizes = [32, 256], strides = [1, 1]} : vector<32x358xf32> to vector<32x256xf32>
    %c0_85 = arith.constant 0 : index
    %c6 = arith.constant 6 : index
    %337 = vector.load %arg4[%c0_85, %c6] : memref<32x49xf32, #tpu.memory_space<vmem>>, vector<32x1xf32>
    %338 = vector.broadcast %337 : vector<32x1xf32> to vector<32x256xf32>
    %339 = arith.mulf %336, %338 : vector<32x256xf32>
    %340 = arith.addf %335, %339 : vector<32x256xf32>
    %341 = vector.extract_strided_slice %29 {offsets = [0, 22], sizes = [32, 256], strides = [1, 1]} : vector<32x358xf32> to vector<32x256xf32>
    %c0_86 = arith.constant 0 : index
    %c13 = arith.constant 13 : index
    %342 = vector.load %arg4[%c0_86, %c13] : memref<32x49xf32, #tpu.memory_space<vmem>>, vector<32x1xf32>
    %343 = vector.broadcast %342 : vector<32x1xf32> to vector<32x256xf32>
    %344 = arith.mulf %341, %343 : vector<32x256xf32>
    %345 = arith.addf %340, %344 : vector<32x256xf32>
    %346 = vector.extract_strided_slice %29 {offsets = [0, 38], sizes = [32, 256], strides = [1, 1]} : vector<32x358xf32> to vector<32x256xf32>
    %c0_87 = arith.constant 0 : index
    %c20 = arith.constant 20 : index
    %347 = vector.load %arg4[%c0_87, %c20] : memref<32x49xf32, #tpu.memory_space<vmem>>, vector<32x1xf32>
    %348 = vector.broadcast %347 : vector<32x1xf32> to vector<32x256xf32>
    %349 = arith.mulf %346, %348 : vector<32x256xf32>
    %350 = arith.addf %345, %349 : vector<32x256xf32>
    %351 = vector.extract_strided_slice %29 {offsets = [0, 54], sizes = [32, 256], strides = [1, 1]} : vector<32x358xf32> to vector<32x256xf32>
    %c0_88 = arith.constant 0 : index
    %c27 = arith.constant 27 : index
    %352 = vector.load %arg4[%c0_88, %c27] : memref<32x49xf32, #tpu.memory_space<vmem>>, vector<32x1xf32>
    %353 = vector.broadcast %352 : vector<32x1xf32> to vector<32x256xf32>
    %354 = arith.mulf %351, %353 : vector<32x256xf32>
    %355 = arith.addf %350, %354 : vector<32x256xf32>
    %356 = vector.extract_strided_slice %29 {offsets = [0, 70], sizes = [32, 256], strides = [1, 1]} : vector<32x358xf32> to vector<32x256xf32>
    %c0_89 = arith.constant 0 : index
    %c34 = arith.constant 34 : index
    %357 = vector.load %arg4[%c0_89, %c34] : memref<32x49xf32, #tpu.memory_space<vmem>>, vector<32x1xf32>
    %358 = vector.broadcast %357 : vector<32x1xf32> to vector<32x256xf32>
    %359 = arith.mulf %356, %358 : vector<32x256xf32>
    %360 = arith.addf %355, %359 : vector<32x256xf32>
    %361 = vector.extract_strided_slice %29 {offsets = [0, 86], sizes = [32, 256], strides = [1, 1]} : vector<32x358xf32> to vector<32x256xf32>
    %c0_90 = arith.constant 0 : index
    %c41 = arith.constant 41 : index
    %362 = vector.load %arg4[%c0_90, %c41] : memref<32x49xf32, #tpu.memory_space<vmem>>, vector<32x1xf32>
    %363 = vector.broadcast %362 : vector<32x1xf32> to vector<32x256xf32>
    %364 = arith.mulf %361, %363 : vector<32x256xf32>
    %365 = arith.addf %360, %364 : vector<32x256xf32>
    %366 = vector.extract_strided_slice %29 {offsets = [0, 102], sizes = [32, 256], strides = [1, 1]} : vector<32x358xf32> to vector<32x256xf32>
    %c0_91 = arith.constant 0 : index
    %c48 = arith.constant 48 : index
    %367 = vector.load %arg4[%c0_91, %c48] : memref<32x49xf32, #tpu.memory_space<vmem>>, vector<32x1xf32>
    %368 = vector.broadcast %367 : vector<32x1xf32> to vector<32x256xf32>
    %369 = arith.mulf %366, %368 : vector<32x256xf32>
    %370 = arith.addf %365, %369 : vector<32x256xf32>
    %c3_i32 = arith.constant 3 : i32
    %371 = vector.broadcast %c3_i32 : i32 to vector<1x256xi32>
    %372 = arith.addi %46, %371 : vector<1x256xi32>
    %c0_i32_92 = arith.constant 0 : i32
    %373 = vector.broadcast %c0_i32_92 : i32 to vector<1x256xi32>
    %374 = arith.cmpi sge, %372, %373 : vector<1x256xi32>
    %c3_i32_93 = arith.constant 3 : i32
    %375 = vector.broadcast %c3_i32_93 : i32 to vector<1x256xi32>
    %376 = arith.addi %46, %375 : vector<1x256xi32>
    %c16_i32_94 = arith.constant 16 : i32
    %377 = vector.broadcast %c16_i32_94 : i32 to vector<1x256xi32>
    %378 = arith.cmpi slt, %376, %377 : vector<1x256xi32>
    %379 = arith.andi %374, %378 : vector<1x256xi1>
    %380 = arith.extui %379 : vector<1x256xi1> to vector<1x256xi32>
    %381 = arith.sitofp %380 : vector<1x256xi32> to vector<1x256xf32>
    %382 = vector.broadcast %381 : vector<1x256xf32> to vector<32x256xf32>
    %383 = arith.mulf %370, %382 : vector<32x256xf32>
    %384 = arith.addf %334, %383 : vector<32x256xf32>
    %385 = vector.shape_cast %384 : vector<32x256xf32> to vector<2x16x256xf32>
    %cst_95 = arith.constant dense<0.000000e+00> : vector<2x256xf32>
    %386 = vector.multi_reduction <add>, %385, %cst_95 [1] : vector<2x16x256xf32> to vector<2x256xf32>
    %c0_96 = arith.constant 0 : index
    %c0_97 = arith.constant 0 : index
    %387 = vector.load %arg5[%c0_96, %c0_97] : memref<2x1xf32, #tpu.memory_space<vmem>>, vector<2x1xf32>
    %388 = vector.broadcast %387 : vector<2x1xf32> to vector<2x256xf32>
    %389 = arith.addf %386, %388 : vector<2x256xf32>
    %c0_98 = arith.constant 0 : index
    %c0_99 = arith.constant 0 : index
    %c0_100 = arith.constant 0 : index
    %390 = vector.load %arg6[%c0_98, %c0_99, %c0_100] : memref<1x2x256xf32, #tpu.memory_space<vmem>>, vector<1x2x256xf32>
    %391 = vector.shape_cast %390 : vector<1x2x256xf32> to vector<2x256xf32>
    %392 = vector.shape_cast %389 : vector<2x256xf32> to vector<1x2x256xf32>
    tpu.vector_store %arg6[%c0_98, %c0_99, %c0_100], %392 {strides = array<i32>} : memref<1x2x256xf32, #tpu.memory_space<vmem>>, vector<1x2x256xf32>,
    %cst_101 = arith.constant dense<0.000000e+00> : vector<2xf32>
    %393 = vector.multi_reduction <add>, %389, %cst_101 [1] : vector<2x256xf32> to vector<2xf32>
    %394 = vector.shape_cast %393 : vector<2xf32> to vector<2x1xf32>
    %395 = arith.mulf %389, %389 : vector<2x256xf32>
    %cst_102 = arith.constant dense<0.000000e+00> : vector<2xf32>
    %396 = vector.multi_reduction <add>, %395, %cst_102 [1] : vector<2x256xf32> to vector<2xf32>
    %397 = vector.shape_cast %396 : vector<2xf32> to vector<2x1xf32>
    %398 = tpu.concatenate %394, %397 in 1 : vector<2x1xf32>, vector<2x1xf32> -> vector<2x2xf32>
    %c0_103 = arith.constant 0 : index
    %c0_104 = arith.constant 0 : index
    %c0_105 = arith.constant 0 : index
    %399 = vector.load %arg8[%c0_103, %c0_104, %c0_105] : memref<1x2x2xf32, #tpu.memory_space<vmem>>, vector<1x2x2xf32>
    %400 = vector.shape_cast %399 : vector<1x2x2xf32> to vector<2x2xf32>
    %401 = vector.shape_cast %398 : vector<2x2xf32> to vector<1x2x2xf32>
    tpu.vector_store %arg8[%c0_103, %c0_104, %c0_105], %401 {strides = array<i32>} : memref<1x2x2xf32, #tpu.memory_space<vmem>>, vector<1x2x2xf32>,
    return
  }
  func.func @transform_0(%arg0: i32) -> (i32, i32, i32) {
    %c0_i32 = arith.constant 0 : i32
    %c0_i32_0 = arith.constant 0 : i32
    %c0_i32_1 = arith.constant 0 : i32
    return %arg0, %c0_i32, %c0_i32_0 : i32, i32, i32
  }
  func.func @transform_1(%arg0: i32) -> (i32, i32) {
    %c0_i32 = arith.constant 0 : i32
    %c0_i32_0 = arith.constant 0 : i32
    %c0_i32_1 = arith.constant 0 : i32
    return %c0_i32, %c0_i32_0 : i32, i32
  }
  func.func @transform_2(%arg0: i32) -> (i32, i32) {
    %c0_i32 = arith.constant 0 : i32
    %c0_i32_0 = arith.constant 0 : i32
    %c0_i32_1 = arith.constant 0 : i32
    return %c0_i32, %c0_i32_0 : i32, i32
  }
  func.func @transform_3(%arg0: i32) -> (i32, i32) {
    %c0_i32 = arith.constant 0 : i32
    %c0_i32_0 = arith.constant 0 : i32
    %c0_i32_1 = arith.constant 0 : i32
    return %c0_i32, %c0_i32_0 : i32, i32
  }
  func.func @transform_4(%arg0: i32) -> (i32, i32) {
    %c0_i32 = arith.constant 0 : i32
    %c0_i32_0 = arith.constant 0 : i32
    %c0_i32_1 = arith.constant 0 : i32
    return %c0_i32, %c0_i32_0 : i32, i32
  }
  func.func @transform_5(%arg0: i32) -> (i32, i32, i32) {
    %c0_i32 = arith.constant 0 : i32
    %c0_i32_0 = arith.constant 0 : i32
    %c0_i32_1 = arith.constant 0 : i32
    return %arg0, %c0_i32, %c0_i32_0 : i32, i32, i32
  }
  func.func @transform_6(%arg0: i32) -> (i32, i32, i32) {
    %c0_i32 = arith.constant 0 : i32
    %c0_i32_0 = arith.constant 0 : i32
    %c0_i32_1 = arith.constant 0 : i32
    return %arg0, %c0_i32, %c0_i32_0 : i32, i32, i32
  }
  func.func @transform_7(%arg0: i32) -> (i32, i32, i32) {
    %c0_i32 = arith.constant 0 : i32
    %c0_i32_0 = arith.constant 0 : i32
    %c0_i32_1 = arith.constant 0 : i32
    return %arg0, %c0_i32, %c0_i32_0 : i32, i32, i32
  }
}

module attributes {stable_mosaic.version = 11 : i64} {
  func.func @kernel(%arg0: i32, %arg1: memref<1x32x256xf32, #tpu.memory_space<vmem>>, %arg2: memref<1x32x1xf32, #tpu.memory_space<vmem>>, %arg3: memref<1x2x256xf32, #tpu.memory_space<vmem>>, %arg4: memref<2x1xf32, #tpu.memory_space<vmem>>, %arg5: memref<2x1xf32, #tpu.memory_space<vmem>>, %arg6: memref<2x1xf32, #tpu.memory_space<vmem>>, %arg7: memref<1x1xf32, #tpu.memory_space<vmem>>, %arg8: memref<1x32x256xf32, #tpu.memory_space<vmem>>) attributes {dimension_semantics = [#tpu.dimension_semantics<parallel>], iteration_bounds = array<i64: 2>, scalar_prefetch = 0 : i64, scratch_operands = 0 : i64, tpu.core_type = #tpu.core_type<tc>, window_params = [{transform_indices = @transform_0, window_bounds = array<i64: 1, 32, 256>}, {transform_indices = @transform_1, window_bounds = array<i64: 1, 32, 1>}, {transform_indices = @transform_2, window_bounds = array<i64: 1, 2, 256>}, {pipeline_mode = #tpu.pipeline_mode<synchronous>, transform_indices = @transform_3, window_bounds = array<i64: 2, 1>}, {pipeline_mode = #tpu.pipeline_mode<synchronous>, transform_indices = @transform_4, window_bounds = array<i64: 2, 1>}, {pipeline_mode = #tpu.pipeline_mode<synchronous>, transform_indices = @transform_5, window_bounds = array<i64: 2, 1>}, {pipeline_mode = #tpu.pipeline_mode<synchronous>, transform_indices = @transform_6, window_bounds = array<i64: 1, 1>}, {transform_indices = @transform_7, window_bounds = array<i64: 1, 32, 256>}]} {
    %c0 = arith.constant 0 : index
    %c0_0 = arith.constant 0 : index
    %c0_1 = arith.constant 0 : index
    %0 = vector.load %arg1[%c0, %c0_0, %c0_1] : memref<1x32x256xf32, #tpu.memory_space<vmem>>, vector<1x32x256xf32>
    %1 = vector.shape_cast %0 : vector<1x32x256xf32> to vector<32x256xf32>
    %c0_2 = arith.constant 0 : index
    %c0_3 = arith.constant 0 : index
    %c0_4 = arith.constant 0 : index
    %2 = vector.load %arg2[%c0_2, %c0_3, %c0_4] : memref<1x32x1xf32, #tpu.memory_space<vmem>>, vector<1x32x1xf32>
    %3 = vector.shape_cast %2 : vector<1x32x1xf32> to vector<32x1xf32>
    %4 = vector.broadcast %3 : vector<32x1xf32> to vector<32x256xf32>
    %5 = arith.mulf %1, %4 : vector<32x256xf32>
    %c0_5 = arith.constant 0 : index
    %c0_6 = arith.constant 0 : index
    %c0_7 = arith.constant 0 : index
    %6 = vector.load %arg3[%c0_5, %c0_6, %c0_7] : memref<1x2x256xf32, #tpu.memory_space<vmem>>, vector<1x2x256xf32>
    %7 = vector.shape_cast %6 : vector<1x2x256xf32> to vector<2x256xf32>
    %c0_8 = arith.constant 0 : index
    %c0_9 = arith.constant 0 : index
    %8 = vector.load %arg4[%c0_8, %c0_9] : memref<2x1xf32, #tpu.memory_space<vmem>>, vector<2x1xf32>
    %9 = vector.broadcast %8 : vector<2x1xf32> to vector<2x256xf32>
    %10 = arith.mulf %7, %9 : vector<2x256xf32>
    %c0_10 = arith.constant 0 : index
    %c0_11 = arith.constant 0 : index
    %11 = vector.load %arg5[%c0_10, %c0_11] : memref<2x1xf32, #tpu.memory_space<vmem>>, vector<2x1xf32>
    %12 = vector.broadcast %11 : vector<2x1xf32> to vector<2x256xf32>
    %13 = arith.addf %10, %12 : vector<2x256xf32>
    %cst = arith.constant 0.000000e+00 : f32
    %14 = vector.broadcast %cst : f32 to vector<2x256xf32>
    %15 = arith.maximumf %13, %14 : vector<2x256xf32>
    %c0_12 = arith.constant 0 : index
    %c0_13 = arith.constant 0 : index
    %16 = vector.load %arg6[%c0_12, %c0_13] : memref<2x1xf32, #tpu.memory_space<vmem>>, vector<2x1xf32>
    %17 = vector.broadcast %16 : vector<2x1xf32> to vector<2x256xf32>
    %18 = arith.mulf %15, %17 : vector<2x256xf32>
    %cst_14 = arith.constant dense<0.000000e+00> : vector<256xf32>
    %19 = vector.multi_reduction <add>, %18, %cst_14 [0] : vector<2x256xf32> to vector<256xf32>
    %20 = vector.shape_cast %19 : vector<256xf32> to vector<1x256xf32>
    %c0_15 = arith.constant 0 : index
    %c0_16 = arith.constant 0 : index
    %21 = vector.load %arg7[%c0_15, %c0_16] : memref<1x1xf32, #tpu.memory_space<vmem>>, vector<1x1xf32>
    %22 = vector.broadcast %21 : vector<1x1xf32> to vector<1x256xf32>
    %23 = arith.addf %20, %22 : vector<1x256xf32>
    %24 = arith.negf %23 : vector<1x256xf32>
    %25 = math.exp %24 : vector<1x256xf32>
    %cst_17 = arith.constant 1.000000e+00 : f32
    %26 = vector.broadcast %cst_17 : f32 to vector<1x256xf32>
    %27 = arith.addf %26, %25 : vector<1x256xf32>
    %28 = arith.divf %26, %27 : vector<1x256xf32>
    %29 = vector.broadcast %28 : vector<1x256xf32> to vector<32x256xf32>
    %30 = arith.mulf %5, %29 : vector<32x256xf32>
    %c0_18 = arith.constant 0 : index
    %c0_19 = arith.constant 0 : index
    %c0_20 = arith.constant 0 : index
    %31 = vector.load %arg8[%c0_18, %c0_19, %c0_20] : memref<1x32x256xf32, #tpu.memory_space<vmem>>, vector<1x32x256xf32>
    %32 = vector.shape_cast %31 : vector<1x32x256xf32> to vector<32x256xf32>
    %33 = vector.shape_cast %30 : vector<32x256xf32> to vector<1x32x256xf32>
    tpu.vector_store %arg8[%c0_18, %c0_19, %c0_20], %33 {strides = array<i32>} : memref<1x32x256xf32, #tpu.memory_space<vmem>>, vector<1x32x256xf32>,
    return
  }
  func.func @transform_0(%arg0: i32) -> (i32, i32, i32) {
    %c0_i32 = arith.constant 0 : i32
    %c0_i32_0 = arith.constant 0 : i32
    %c0_i32_1 = arith.constant 0 : i32
    return %arg0, %c0_i32, %c0_i32_0 : i32, i32, i32
  }
  func.func @transform_1(%arg0: i32) -> (i32, i32, i32) {
    %c0_i32 = arith.constant 0 : i32
    %c0_i32_0 = arith.constant 0 : i32
    %c0_i32_1 = arith.constant 0 : i32
    return %arg0, %c0_i32, %c0_i32_0 : i32, i32, i32
  }
  func.func @transform_2(%arg0: i32) -> (i32, i32, i32) {
    %c0_i32 = arith.constant 0 : i32
    %c0_i32_0 = arith.constant 0 : i32
    %c0_i32_1 = arith.constant 0 : i32
    return %arg0, %c0_i32, %c0_i32_0 : i32, i32, i32
  }
  func.func @transform_3(%arg0: i32) -> (i32, i32) {
    %c0_i32 = arith.constant 0 : i32
    %c0_i32_0 = arith.constant 0 : i32
    %c0_i32_1 = arith.constant 0 : i32
    return %c0_i32, %c0_i32_0 : i32, i32
  }
  func.func @transform_4(%arg0: i32) -> (i32, i32) {
    %c0_i32 = arith.constant 0 : i32
    %c0_i32_0 = arith.constant 0 : i32
    %c0_i32_1 = arith.constant 0 : i32
    return %c0_i32, %c0_i32_0 : i32, i32
  }
  func.func @transform_5(%arg0: i32) -> (i32, i32) {
    %c0_i32 = arith.constant 0 : i32
    %c0_i32_0 = arith.constant 0 : i32
    %c0_i32_1 = arith.constant 0 : i32
    return %c0_i32, %c0_i32_0 : i32, i32
  }
  func.func @transform_6(%arg0: i32) -> (i32, i32) {
    %c0_i32 = arith.constant 0 : i32
    %c0_i32_0 = arith.constant 0 : i32
    %c0_i32_1 = arith.constant 0 : i32
    return %c0_i32, %c0_i32_0 : i32, i32
  }
  func.func @transform_7(%arg0: i32) -> (i32, i32, i32) {
    %c0_i32 = arith.constant 0 : i32
    %c0_i32_0 = arith.constant 0 : i32
    %c0_i32_1 = arith.constant 0 : i32
    return %arg0, %c0_i32, %c0_i32_0 : i32, i32, i32
  }
}

</mosaic_0001>

<bundles_post_ra>
// kernel: _lambda_.3
= control target key start
LH: loop header
LB: loop body
LE: loop exit
PB: predicated region body
PF: predicated region fallthrough
CT: control target
= control target key end

     0   :  { %s646_s26 = smov 0   ;;  %s683_s0 = inlined_call_operand.vmem [shape: f32[2,32,256], index: 0, kind: input, shape index: {}]   ;;  %s684_s1 = inlined_call_operand.vmem [shape: f32[2,32,1], index: 1, kind: input, shape index: {}]   ;;  %s685_s2 = inlined_call_operand.vmem [shape: f32[2,2,256], index: 2, kind: input, shape index: {}]   ;;  %s686_s3 = inlined_call_operand.vmem [shape: f32[2,1], index: 3, kind: input, shape index: {}]   ;;  %s687_s4 = inlined_call_operand.vmem [shape: f32[2,1], index: 4, kind: input, shape index: {}]   ;;  %s688_s5 = inlined_call_operand.vmem [shape: f32[2,1], index: 5, kind: input, shape index: {}]   ;;  %s689_s6 = inlined_call_operand.<no memory space> [shape: f32[1,1], index: 6, kind: input, shape index: {}]   ;;  %s690_s7 = inlined_call_operand.vmem [shape: f32[2,32,256], index: 7, kind: output, shape index: {}]  }
   0x1   :  { %v12_v0 = vstv %s689_s6 }
   0x2   :  { %13 = vst [vmem:[#allocation2] sm:$0x1] %v12_v0 }
   0x3 LB: > { %s550_s27 = sadd.s32 4294967295, %s598_s26   ;;  %p554_p0 = scmp.ge.s32.totalorder %s598_s26, 1  ;;  %s598_s26 = sphi %s646_s26, %s19_s26  }
   0x4   : > { %p259_p1 = scmp.lt.s32.totalorder %s598_s26, 3 }
   0x6   : > { %p260_p2 = pnand %p554_p0, %p259_p1 }
   0x7   : > { %v391_v1 = vld [vmem:[%s688_s5] sm:$0x3] (!%p260_p2)  ;;  %p301_p3 = scmp.lt.s32.totalorder (!%p260_p2), %s550_s27, 1  ;;  %v600_v3 = vmov (!%p260_p2), 0   ;;  %v601_v10 = vmov (!%p260_p2), 269488144   ;;  %v370_v12 = vlaneseq (!%p260_p2) }
   0x8   : > { %263 = sbr.rel (%p260_p2) target bundleno = 198 (0xc6), region = 48  ;;  %v362_v2 = vld [vmem:[%s686_s3] sm:$0x3] (!%p260_p2)  ;;  %583 = vset.pattern.permute.xlu1 (!%p260_p2), %v600_v3  ;;  %582 = vset.pattern.permute.xlu0 (!%p260_p2), %v600_v3  ;;  %v368_v11 = vunpack.c.l.s4 (!%p260_p2), %v601_v10  ;;  %v602_v18 = vmov (!%p260_p2), 1983009808   ;;  %vm416_vm0 = vcmask (!%p260_p2), 1041408  }
   0x9   : > { %394 = vperm.xlu1 (!%p260_p2), %583, %v391_v1   ;;  %365 = vperm.xlu0 (!%p260_p2), %582, %v362_v2   ;;  %v431_v4 = vld [vmem:[#allocation2] sm:$0x1] (!%p260_p2)  ;;  %v371_v14 = vshrl.u32 (!%p260_p2), %v370_v12, 7  ;;  %v407_v19 = vunpack.c.l.s4 (!%p260_p2), %v602_v18 }
   0xa   : > { %v376_v5 = vld [vmem:[%s687_s4] sm:$0x3] (!%p260_p2)  ;;  %v369_v13 = vunpack.c.0.s8 (!%p260_p2), %v368_v11 }
   0xb   : > { %v408_v23 = vunpack.c.0.s8 (!%p260_p2), %v407_v19  ;;  %v439_v40 = vsub.s32 (!%p260_p2), 0, %v371_v14 }
   0xc   : > { %v372_v15 = vsub.s32 (!%p260_p2), %v369_v13, %v371_v14 }
   0xd   : > { %434 = vperm.xlu1 (!%p260_p2), %583, %v431_v4   ;;  %379 = vperm.xlu0 (!%p260_p2), %582, %v376_v5   ;;  %v411_v28 = vsub.s32 (!%p260_p2), %v408_v23, %v371_v14 }
   0xf   : > { %s692_s27 = smov (!%p301_p3, %s550_s27), 1 }
  0x10   : > { %s568_s10 = sshll.u32 %s692_s27, 5  ;;  %s569_s14 = sshll.u32 %s692_s27, 2 }
  0x11   : > { %s310_s13 = scalar_lea.vmem %s684_s1, %s568_s10  ;;  %s315_s17 = scalar_lea.vmem %s685_s2, %s569_s14 }
  0x12   : > { %v330_v6 = vld [vmem:[%s310_s13 + $0x8] sm:$0xff]  ;;  %v329_v7 = vld [vmem:[%s310_s13] sm:$0xff]  ;;  %v332_v8 = vld [vmem:[%s310_s13 + $0x18] sm:$0xff]  ;;  %s567_s18 = sshll.u32 %s692_s27, 6 }
  0x13   : > { %340 = vperm.xlu1 %583, %v330_v6   ;;  %335 = vperm.xlu0 %582, %v329_v7   ;;  %v331_v9 = vld [vmem:[%s310_s13 + $0x10] sm:$0xff]  ;;  %v361_v20 = vld [vmem:[%s315_s17] sm:$0xf]  ;;  %s305_s21 = scalar_lea.vmem %s683_s0, %s567_s18  ;;  %s320_s24 = scalar_lea.vmem %s690_s7, %s567_s18 }
  0x14   : > { %v323_v60 = vld [vmem:[%s305_s21 + $0x10] sm:$0xff]  ;;  %v324_v61 = vld [vmem:[%s305_s21 + $0x18] sm:$0xff]  ;;  %v321_v62 = vld [vmem:[%s305_s21] sm:$0xff] }
  0x15   : > { %v327_v0 = vld [vmem:[%s305_s21 + $0x30] sm:$0xff]  ;;  %v325_v2 = vld [vmem:[%s305_s21 + $0x20] sm:$0xff]  ;;  %v322_v3 = vld [vmem:[%s305_s21 + $0x8] sm:$0xff] }
  0x16   : > { %v328_v4 = vld [vmem:[%s305_s21 + $0x38] sm:$0xff]  ;;  %v326_v5 = vld [vmem:[%s305_s21 + $0x28] sm:$0xff] }
  0x17   : > { %350 = vperm.xlu1 %583, %v332_v8   ;;  %345 = vperm.xlu0 %582, %v331_v9  }
  0x88   : > { %v366_v16 = vpop.permute.xlu0 %365  ;;  %v395_v25 = vpop.permute.xlu1 %394 }
  0x89   : > { %v373_v17 = vrot.slane %v366_v16, %v372_v15  ;;  %v402_v26 = vrot.slane %v395_v25, %v372_v15 }
  0x8b   : > { %v375_v22 = vmul.f32 %v373_v17, %v361_v20 }
  0x8c   : > { %v380_v21 = vpop.permute.xlu0 %379  ;;  %v435_v45 = vpop.permute.xlu1 %434 }
  0x8d   : > { %v387_v24 = vrot.slane %v380_v21, %v372_v15  ;;  %v440_v46 = vrot.slane %v435_v45, %v439_v40 }
  0x8f   : > { %v389_v27 = vadd.f32 %v387_v24, %v375_v22 }
  0x91   : > { %v390_v29 = vmax.f32 %v389_v27, 0.0 }
  0x92   : > { %v341_v58 = vpop.permute.xlu1 %340  ;;  %v336_v59 = vpop.permute.xlu0 %335 }
  0x93   : > { %v404_v30 = vmul.f32 %v402_v26, %v390_v29  ;;  %v355_v6 = vmul.f32 %v341_v58, %v323_v60  ;;  %v353_v7 = vmul.f32 %v336_v59, %v321_v62  ;;  %v356_v11 = vmul.f32 %v341_v58, %v324_v61 }
  0x94   : > { %v354_v12 = vmul.f32 %v336_v59, %v322_v3 }
  0x95   : > { %v412_v31 = vrot.slane %v404_v30, %v411_v28 }
  0x96   : > { %v351_v63 = vpop.permute.xlu1 %350  ;;  %v346_v1 = vpop.permute.xlu0 %345 }
  0x97   : > { %v413_v32 = vcombine.high %v412_v31, %v412_v31  ;;  %v417_v33 = vsel %vm416_vm0, %v412_v31, 0.0  ;;  %v359_v8 = vmul.f32 %v351_v63, %v327_v0  ;;  %v357_v9 = vmul.f32 %v346_v1, %v325_v2 }
  0x98   : > { %v418_v34 = vrot.slane %v417_v33, 4  ;;  %v360_v13 = vmul.f32 %v351_v63, %v328_v4  ;;  %v358_v14 = vmul.f32 %v346_v1, %v326_v5 }
  0x99   : > { %v424_v35 = vsel %vm416_vm0, %v413_v32, 0.0 }
  0x9a   : > { %v419_v36 = vadd.f32 %v418_v34, %v417_v33  ;;  %v425_v37 = vrot.slane %v424_v35, 4 }
  0x9c   : > { %v420_v38 = vrot.slane %v419_v36, 2  ;;  %v426_v39 = vadd.f32 %v425_v37, %v424_v35 }
  0x9e   : > { %v421_v41 = vadd.f32 %v420_v38, %v419_v36  ;;  %v427_v42 = vrot.slane %v426_v39, 2 }
  0xa0   : > { %v422_v43 = vrot.slane %v421_v41, 1  ;;  %v428_v44 = vadd.f32 %v427_v42, %v426_v39 }
  0xa2   : > { %v423_v47 = vadd.f32 %v422_v43, %v421_v41  ;;  %v429_v48 = vrot.slane %v428_v44, 1 }
  0xa4   : > { %v430_v49 = vadd.f32 %v429_v48, %v428_v44  ;;  %v441_v50 = vadd.f32 %v440_v46, %v423_v47 }
  0xa6   : > { %v442_v51 = vadd.f32 %v440_v46, %v430_v49  ;;  %v563_v52 = vmul.f32 -1.442695, %v441_v50 }
  0xa8   : > { %584 = vpow2.f32 %v563_v52  ;;  %v564_v53 = vmul.f32 -1.442695, %v442_v51 }
  0xaa   : > { %586 = vpow2.f32 %v564_v53 }
  0xb2   : > { %v585_v54 = vpop.eup %584 }
  0xb3   : > { %v449_v55 = vadd.f32 1.0, %v585_v54 }
  0xb4   : > { %v587_v56 = vpop.eup %586 }
  0xb5   : > { %v450_v57 = vadd.f32 1.0, %v587_v56  ;;  %588 = vrcp.f32 %v449_v55 }
  0xb7   : > { %590 = vrcp.f32 %v450_v57 }
  0xbf   : > { %v589_v10 = vpop.eup %588 }
  0xc0   : > { %v457_v15 = vmul.f32 %v589_v10, %v355_v6  ;;  %v455_v16 = vmul.f32 %v589_v10, %v353_v7  ;;  %v461_v17 = vmul.f32 %v589_v10, %v359_v8  ;;  %v459_v18 = vmul.f32 %v589_v10, %v357_v9 }
  0xc1   : > { %v591_v19 = vpop.eup %590 }
  0xc2   : > { %v458_v20 = vmul.f32 %v591_v19, %v356_v11  ;;  %465 = vst [vmem:[%s320_s24 + $0x10] sm:$0xff] %v457_v15  ;;  %v456_v21 = vmul.f32 %v591_v19, %v354_v12  ;;  %463 = vst [vmem:[%s320_s24] sm:$0xff] %v455_v16  ;;  %v462_v22 = vmul.f32 %v591_v19, %v360_v13 }
  0xc3   : > { %469 = vst [vmem:[%s320_s24 + $0x30] sm:$0xff] %v461_v17  ;;  %v460_v23 = vmul.f32 %v591_v19, %v358_v14  ;;  %467 = vst [vmem:[%s320_s24 + $0x20] sm:$0xff] %v459_v18 }
  0xc4   : > { %466 = vst [vmem:[%s320_s24 + $0x18] sm:$0xff] %v458_v20  ;;  %464 = vst [vmem:[%s320_s24 + $0x8] sm:$0xff] %v456_v21 }
  0xc5   : > { %470 = vst [vmem:[%s320_s24 + $0x38] sm:$0xff] %v462_v22  ;;  %468 = vst [vmem:[%s320_s24 + $0x28] sm:$0xff] %v460_v23 }
  0xc6 PF: > { %s19_s26 = sadd.s32 1, %s598_s26  }
  0xc7   : > { %p16_p4 = scmp.ge.s32.totalorder %s19_s26, 4  }
  0xc9   :  { %18 = sbr.rel (!%p16_p4) target bundleno = 3 (0x3), region = 84 }

// kernel: _lambda_.2
= control target key start
LH: loop header
LB: loop body
LE: loop exit
PB: predicated region body
PF: predicated region fallthrough
CT: control target
= control target key end

     0   :  { %s5933_s24 = smov 0   ;;  %s10199_s0 = inlined_call_operand.vmem [shape: f32[2,32,256], index: 0, kind: input, shape index: {}]   ;;  %s10200_s1 = inlined_call_operand.vmem [shape: f32[32,2], index: 1, kind: input, shape index: {}]   ;;  %s10201_s2 = inlined_call_operand.vmem [shape: f32[32,2], index: 2, kind: input, shape index: {}]   ;;  %s10202_s3 = inlined_call_operand.vmem [shape: f32[32,49], index: 3, kind: input, shape index: {}]   ;;  %s10203_s4 = inlined_call_operand.vmem [shape: f32[2,1], index: 4, kind: input, shape index: {}]   ;;  %s10204_s5 = inlined_call_operand.vmem [shape: f32[2,2,256], index: 5, kind: output, shape index: {0}]   ;;  %s10205_s6 = inlined_call_operand.vmem [shape: f32[2,32,1], index: 6, kind: output, shape index: {1}]   ;;  %s10206_s7 = inlined_call_operand.vmem [shape: f32[2,2,2], index: 7, kind: output, shape index: {2}]  }
   0x1 LB: > { %s5548_s25 = sadd.s32 4294967295, %s5822_s24   ;;  %p5552_p0 = scmp.ge.s32.totalorder %s5822_s24, 1  ;;  %s5822_s24 = sphi %s5933_s24, %s18_s24  }
   0x2   : > { %p242_p1 = scmp.lt.s32.totalorder %s5822_s24, 3 }
   0x4   : > { %p243_p2 = pnand %p5552_p0, %p242_p1 }
   0x6   : > { %246 = sbr.rel (%p243_p2) target bundleno = 5834 (0x16ca), region = 40 }
   0xd   : > { %v5944_v0 = vld [vmem:[%s10202_s3 + $0x8] sm:$0xff]  ;;  %p283_p3 = scmp.lt.s32.totalorder %s5548_s25, 1  ;;  %v10207_v1 = vmov 0   ;;  %v5976_v11 = vld [vmem:[%s10202_s3] sm:$0xff]  ;;  %v5988_v15 = vld [vmem:[%s10202_s3 + $0x18] sm:$0xff]  ;;  %v5825_v16 = vmov 7  }
   0xe   : > { %5659 = vset.pattern.permute.xlu1 %v10207_v1  ;;  %5658 = vset.pattern.permute.xlu0 %v10207_v1  ;;  %v5826_v17 = vmov 14   ;;  %v5997_v18 = vld [vmem:[%s10202_s3 + $0x10] sm:$0xff]  ;;  %v5827_v19 = vmov 21   ;;  %v5828_v20 = vmov 28   ;;  %v5829_v21 = vmov 35   ;;  %v327_v34 = vld [vmem:[%s10200_s1] sm:$0xff] }
   0xf   : > { %494 = vperm.xlu1 %5659, %v5944_v0   ;;  %s11127_s25 = smov (!%p283_p3, %s5548_s25), 1  ;;  %v5830_v22 = vmov 42   ;;  %v5831_v23 = vmov 1   ;;  %v5832_v24 = vmov 8   ;;  %v5833_v25 = vmov 15   ;;  %v328_v35 = vld [vmem:[%s10200_s1 + $0x8] sm:$0xff] }
  0x10   : > { %s5578_s28 = sshll.u32 %s11127_s25, 6  ;;  %v5834_v26 = vmov 22   ;;  %v5835_v27 = vmov 29   ;;  %v5836_v28 = vmov 36   ;;  %v5837_v29 = vmov 43   ;;  %v329_v39 = vld [vmem:[%s10200_s1 + $0x10] sm:$0xff] }
  0x11   : > { %s287_s8 = scalar_lea.vmem %s10199_s0, %s5578_s28  ;;  %vm335_vm0 = vcmask 15360   ;;  %v330_v46 = vld [vmem:[%s10200_s1 + $0x18] sm:$0xff]  ;;  %s5580_s10 = sshll.u32 %s11127_s25, 5  ;;  %vm394_vm1 = vcmask 7168   ;;  %vm431_vm2 = vcmask 416768   ;;  %vm587_vm5 = vcmask 916480  }
  0x12   : > { %v5955_v2 = vld [vmem:[%s287_s8] sm:$0xff]  ;;  %v5957_v3 = vld [vmem:[%s287_s8 + $0x8] sm:$0xff]  ;;  %v5959_v4 = vld [vmem:[%s287_s8 + $0x10] sm:$0xff]  ;;  %s6195_s13 = scalar_lea.vmem %s10205_s6, %s5580_s10  ;;  %s5838_s14 = smov 51   ;;  %vm676_vm6 = vcmask 785408   ;;  %vm765_vm7 = vcmask 654336  }
  0x13   : > { %v310_v5 = vadd.f32 %v5957_v3, %v5955_v2  ;;  %v5963_v6 = vld [vmem:[%s287_s8 + $0x18] sm:$0xff]  ;;  %v5967_v8 = vld [vmem:[%s287_s8 + $0x20] sm:$0xff]  ;;  %v5969_v9 = vld [vmem:[%s287_s8 + $0x28] sm:$0xff]  ;;  %s5839_s15 = smov 112   ;;  %s5840_s16 = smov 96   ;;  %vm854_vm8 = vcmask 523264  }
  0x14   : > { %v313_v7 = vadd.f32 %v5963_v6, %v5959_v4  ;;  %v316_v10 = vadd.f32 %v5969_v9, %v5967_v8  ;;  %v5978_v12 = vld [vmem:[%s287_s8 + $0x30] sm:$0xff]  ;;  %v5980_v13 = vld [vmem:[%s287_s8 + $0x38] sm:$0xff]  ;;  %s5841_s17 = smov 80   ;;  %s5842_s18 = smov 64   ;;  %vm943_vm9 = vcmask 392192   ;;  %vm1032_vm10 = vcmask 261120  }
  0x15   : > { %311 = vadd.xlane.f32.xlu0 %v310_v5  ;;  %v319_v14 = vadd.f32 %v5980_v13, %v5978_v12  ;;  %s5843_s19 = smov 48   ;;  %s5844_s20 = smov 32   ;;  %vm3818_vm15 = vcmask 31744  }
  0x16   : > { %s5847_s21 = smov 1   ;;  %s5852_s9 = smov 127  }
  0x17   : > { %s5855_s10 = smov 2   ;;  %s5857_s11 = smov 126  }
  0x18   : > { %s5865_s28 = smov 125  }
  0x19   : > { %314 = vadd.xlane.f32.xlu0 %v313_v7 }
  0x2f   : > { %489 = vperm.xlu0 %5658, %v5976_v11  }
  0x33   : > { %317 = vadd.xlane.f32.xlu1 %v316_v10  ;;  %504 = vperm.xlu0 %5658, %v5988_v15   ;;  %v352_v10 = vld [vmem:[%s10201_s2 + $0x10] sm:$0xff] }
  0x37   : > { %320 = vadd.xlane.f32.xlu1 %v319_v14  ;;  %5661 = vset.pattern.permute.xlu0 %v5825_v16 }
  0x38   : > { %528 = vperm.xlu0 %5661, %v5944_v0  }
  0x3c   : > { %5662 = vset.pattern.permute.xlu0 %v5826_v17 }
  0x3d   : > { %613 = vperm.xlu0 %5662, %v5976_v11  }
  0x41   : > { %625 = vperm.xlu0 %5662, %v5988_v15  }
  0x45   : > { %5665 = vset.pattern.permute.xlu0 %v5827_v19 }
  0x46   : > { %706 = vperm.xlu0 %5665, %v5944_v0  }
  0x48   : > { %499 = vperm.xlu1 %5659, %v5997_v18  }
  0x4a   : > { %5666 = vset.pattern.permute.xlu0 %v5828_v20 }
  0x4b   : > { %791 = vperm.xlu0 %5666, %v5976_v11  }
  0x4c   : > { %5660 = vset.pattern.permute.xlu1 %v5825_v16 }
  0x4d   : > { %524 = vperm.xlu1 %5660, %v5976_v11  }
  0x4f   : > { %803 = vperm.xlu0 %5666, %v5988_v15  }
  0x51   : > { %532 = vperm.xlu1 %5660, %v5997_v18  }
  0x53   : > { %5669 = vset.pattern.permute.xlu0 %v5829_v21 }
  0x54   : > { %884 = vperm.xlu0 %5669, %v5944_v0  }
  0x55   : > { %536 = vperm.xlu1 %5660, %v5988_v15  }
  0x58   : > { %5670 = vset.pattern.permute.xlu0 %v5830_v22 }
  0x59   : > { %5663 = vset.pattern.permute.xlu1 %v5826_v17  ;;  %969 = vperm.xlu0 %5670, %v5976_v11  }
  0x5a   : > { %617 = vperm.xlu1 %5663, %v5944_v0  }
  0x5d   : > { %981 = vperm.xlu0 %5670, %v5988_v15  }
  0x5e   : > { %621 = vperm.xlu1 %5663, %v5997_v18  }
  0x61   : > { %5673 = vset.pattern.permute.xlu0 %v5831_v23 }
  0x62   : > { %5664 = vset.pattern.permute.xlu1 %v5827_v19  ;;  %1090 = vperm.xlu0 %5673, %v5944_v0  }
  0x63   : > { %702 = vperm.xlu1 %5664, %v5976_v11  }
  0x66   : > { %5674 = vset.pattern.permute.xlu0 %v5832_v24 }
  0x67   : > { %710 = vperm.xlu1 %5664, %v5997_v18   ;;  %1126 = vperm.xlu0 %5674, %v5976_v11  }
  0x6b   : > { %714 = vperm.xlu1 %5664, %v5988_v15   ;;  %1138 = vperm.xlu0 %5674, %v5988_v15  }
  0x6f   : > { %5667 = vset.pattern.permute.xlu1 %v5828_v20  ;;  %5677 = vset.pattern.permute.xlu0 %v5833_v25 }
  0x70   : > { %795 = vperm.xlu1 %5667, %v5944_v0   ;;  %1226 = vperm.xlu0 %5677, %v5944_v0  }
  0x74   : > { %799 = vperm.xlu1 %5667, %v5997_v18   ;;  %5678 = vset.pattern.permute.xlu0 %v5834_v26 }
  0x75   : > { %1318 = vperm.xlu0 %5678, %v5976_v11  }
  0x78   : > { %5668 = vset.pattern.permute.xlu1 %v5829_v21  ;;  %v351_v21 = vld [vmem:[%s10201_s2 + $0x8] sm:$0xff] }
  0x79   : > { %880 = vperm.xlu1 %5668, %v5976_v11   ;;  %1330 = vperm.xlu0 %5678, %v5988_v15  }
  0x7d   : > { %888 = vperm.xlu1 %5668, %v5997_v18   ;;  %5681 = vset.pattern.permute.xlu0 %v5835_v27 }
  0x7e   : > { %1418 = vperm.xlu0 %5681, %v5944_v0  }
  0x81   : > { %892 = vperm.xlu1 %5668, %v5988_v15  }
  0x82   : > { %5682 = vset.pattern.permute.xlu0 %v5836_v28 }
  0x83   : > { %1510 = vperm.xlu0 %5682, %v5976_v11  }
  0x85   : > { %5671 = vset.pattern.permute.xlu1 %v5830_v22 }
  0x86   : > { %973 = vperm.xlu1 %5671, %v5944_v0  }
  0x87   : > { %1522 = vperm.xlu0 %5682, %v5988_v15  }
  0x8a   : > { %977 = vperm.xlu1 %5671, %v5997_v18  }
  0x8b   : > { %5685 = vset.pattern.permute.xlu0 %v5837_v29 }
  0x8c   : > { %1610 = vperm.xlu0 %5685, %v5944_v0  }
  0x8e   : > { %5672 = vset.pattern.permute.xlu1 %v5831_v23  ;;  %v6048_v36 = vpop.permute.xlu1 %494 }
  0x8f   : > { %1086 = vperm.xlu1 %5672, %v5976_v11   ;;  %10455 = vst [vmem:[#allocation2_spill] sm:$0xff] %v6048_v36 }
  0x93   : > { %1094 = vperm.xlu1 %5672, %v5997_v18  }
  0x97   : > { %1098 = vperm.xlu1 %5672, %v5988_v15  }
  0x9b   : > { %5675 = vset.pattern.permute.xlu1 %v5832_v24  ;;  %v353_v24 = vld [vmem:[%s10201_s2 + $0x18] sm:$0xff] }
  0x9c   : > { %1130 = vperm.xlu1 %5675, %v5944_v0  }
  0xa0   : > { %1134 = vperm.xlu1 %5675, %v5997_v18  }
  0xa2   : > { %v312_v30 = vpop.xlane.xlu0 %311 }
  0xa3   : > { %v323_v32 = vmul.f32 0.00390625, %v312_v30 }
  0xa4   : > { %5676 = vset.pattern.permute.xlu1 %v5833_v25 }
  0xa5   : > { %1222 = vperm.xlu1 %5676, %v5976_v11   ;;  %v331_v37 = vmul.f32 %v327_v34, %v323_v32 }
  0xa6   : > { %v315_v31 = vpop.xlane.xlu0 %314 }
  0xa7   : > { %v324_v33 = vmul.f32 0.00390625, %v315_v31  ;;  %v336_v41 = vsel %vm335_vm0, %v331_v37, 0.0 }
  0xa9   : > { %1230 = vperm.xlu1 %5676, %v5997_v18   ;;  %v332_v38 = vmul.f32 %v328_v35, %v324_v33 }
  0xab   : > { %v337_v42 = vsel %vm335_vm0, %v332_v38, 0.0 }
  0xac   : > { %v338_v45 = vadd.f32 %v337_v42, %v336_v41 }
  0xad   : > { %1234 = vperm.xlu1 %5676, %v5988_v15  }
  0xb1   : > { %5679 = vset.pattern.permute.xlu1 %v5834_v26  ;;  %v6103_v26 = vpop.permute.xlu0 %489 }
  0xb2   : > { %1322 = vperm.xlu1 %5679, %v5944_v0   ;;  %10457 = vst [vmem:[#allocation4_spill] sm:$0xff] %v6103_v26 }
  0xb5   : > { %v6109_v31 = vpop.permute.xlu0 %504 }
  0xb6   : > { %1326 = vperm.xlu1 %5679, %v5997_v18   ;;  %10458 = vst [vmem:[#allocation5_spill] sm:$0xff] %v6109_v31 }
  0xb9   : > { %v6111_v32 = vpop.permute.xlu0 %528 }
  0xba   : > { %5680 = vset.pattern.permute.xlu1 %v5835_v27 }
  0xbb   : > { %1414 = vperm.xlu1 %5680, %v5976_v11  }
  0xbd   : > { %v6115_v34 = vpop.permute.xlu0 %613 }
  0xbf   : > { %1422 = vperm.xlu1 %5680, %v5997_v18  }
  0xc0   : > { %v318_v40 = vpop.xlane.xlu1 %317 }
  0xc1   : > { %v325_v43 = vmul.f32 0.00390625, %v318_v40  ;;  %v6119_v37 = vpop.permute.xlu0 %625 }
  0xc3   : > { %v333_v44 = vmul.f32 %v329_v39, %v325_v43  ;;  %1426 = vperm.xlu1 %5680, %v5988_v15  }
  0xc4   : > { %v321_v47 = vpop.xlane.xlu1 %320 }
  0xc5   : > { %v339_v48 = vsel %vm335_vm0, %v333_v44, 0.0  ;;  %v326_v49 = vmul.f32 0.00390625, %v321_v47  ;;  %v6123_v39 = vpop.permute.xlu0 %706 }
  0xc6   : > { %v340_v51 = vadd.f32 %v339_v48, %v338_v45 }
  0xc7   : > { %v334_v50 = vmul.f32 %v330_v46, %v326_v49  ;;  %5683 = vset.pattern.permute.xlu1 %v5836_v28 }
  0xc8   : > { %1514 = vperm.xlu1 %5683, %v5944_v0   ;;  %v6062_v52 = vpop.permute.xlu1 %499  ;;  %v350_v0 = vld [vmem:[%s10201_s2] sm:$0xff] }
  0xc9   : > { %10456 = vst [vmem:[#allocation3_spill] sm:$0xff] %v6062_v52  ;;  %v341_v53 = vsel %vm335_vm0, %v334_v50, 0.0 }
  0xca   : > { %v342_v54 = vadd.f32 %v341_v53, %v340_v51  ;;  %v6127_v41 = vpop.permute.xlu0 %791 }
  0xcc   : > { %v343_v55 = vrot.slane %v342_v54, 4  ;;  %1518 = vperm.xlu1 %5683, %v5997_v18   ;;  %v6066_v56 = vpop.permute.xlu1 %524 }
  0xce   : > { %v344_v57 = vadd.f32 %v343_v55, %v342_v54  ;;  %v6131_v43 = vpop.permute.xlu0 %803 }
  0xd0   : > { %v345_v58 = vrot.slane %v344_v57, 2  ;;  %5684 = vset.pattern.permute.xlu1 %v5837_v29  ;;  %v6068_v59 = vpop.permute.xlu1 %532 }
  0xd1   : > { %1606 = vperm.xlu1 %5684, %v5976_v11  }
  0xd2   : > { %v346_v60 = vadd.f32 %v345_v58, %v344_v57 }
  0xd3   : > { %v6135_v45 = vpop.permute.xlu0 %884 }
  0xd4   : > { %v347_v61 = vrot.slane %v346_v60, 1  ;;  %v6071_v62 = vpop.permute.xlu1 %536 }
  0xd5   : > { %1614 = vperm.xlu1 %5684, %v5997_v18  }
  0xd6   : > { %v348_v63 = vadd.f32 %v347_v61, %v346_v60 }
  0xd8   : > { %v349_v5 = vmax.f32 %v348_v63, 0.0  ;;  %v6139_v47 = vpop.permute.xlu0 %969 }
  0xd9   : > { %1618 = vperm.xlu1 %5684, %v5988_v15   ;;  %v6078_v7 = vpop.permute.xlu1 %617 }
  0xda   : > { %v354_v11 = vmul.f32 %v350_v0, %v349_v5  ;;  %v356_v16 = vmul.f32 %v352_v10, %v349_v5  ;;  %v355_v23 = vmul.f32 %v351_v21, %v349_v5  ;;  %v357_v28 = vmul.f32 %v353_v24, %v349_v5 }
  0xdc   : > { %v358_v14 = vsel %vm335_vm0, %v354_v11, 0.0  ;;  %v364_v18 = vsel %vm335_vm0, %v356_v16, 0.0  ;;  %v361_v27 = vsel %vm335_vm0, %v355_v23, 0.0  ;;  %v367_v29 = vsel %vm335_vm0, %v357_v28, 0.0  ;;  %v6143_v49 = vpop.permute.xlu0 %981 }
  0xdd   : > { %359 = vadd.xlane.f32.xlu0 %v358_v14  ;;  %v6084_v17 = vpop.permute.xlu1 %621 }
  0xe1   : > { %365 = vadd.xlane.f32.xlu0 %v364_v18  ;;  %v6145_v50 = vpop.permute.xlu0 %1090 }
  0xe2   : > { %v6087_v19 = vpop.permute.xlu1 %702  ;;  %10462 = vst [vmem:[#allocation9_spill] sm:$0xff] %v6145_v50 }
  0xe6   : > { %v6089_v20 = vpop.permute.xlu1 %710  ;;  %v6149_v53 = vpop.permute.xlu0 %1126 }
  0xea   : > { %v6091_v15 = vpop.permute.xlu1 %714  ;;  %v6153_v55 = vpop.permute.xlu0 %1138 }
  0xef   : > { %v6096_v22 = vpop.permute.xlu1 %795  ;;  %v6157_v58 = vpop.permute.xlu0 %1226 }
  0xf3   : > { %v6101_v25 = vpop.permute.xlu1 %799 }
  0xf4   : > { %v6161_v61 = vpop.permute.xlu0 %1318 }
  0xf8   : > { %v6107_v30 = vpop.permute.xlu1 %880  ;;  %v6165_v0 = vpop.permute.xlu0 %1330 }
  0xfc   : > { %v6113_v33 = vpop.permute.xlu1 %888 }
  0xfd   : > { %362 = vadd.xlane.f32.xlu1 %v361_v27  ;;  %v6169_v10 = vpop.permute.xlu0 %1418 }
 0x100   : > { %v6117_v35 = vpop.permute.xlu1 %892 }
 0x101   : > { %368 = vadd.xlane.f32.xlu1 %v367_v29 }
 0x102   : > { %v6173_v14 = vpop.permute.xlu0 %1510 }
 0x105   : > { %v6121_v38 = vpop.permute.xlu1 %973 }
 0x106   : > { %v6177_v18 = vpop.permute.xlu0 %1522 }
 0x109   : > { %v6125_v40 = vpop.permute.xlu1 %977 }
 0x10b   : > { %v6179_v21 = vpop.permute.xlu0 %1610 }
 0x10e   : > { %v6129_v42 = vpop.permute.xlu1 %1086 }
 0x10f   : > { %10459 = vst [vmem:[#allocation6_spill] sm:$0xff] %v6129_v42 }
 0x112   : > { %v6133_v44 = vpop.permute.xlu1 %1094 }
 0x113   : > { %10460 = vst [vmem:[#allocation7_spill] sm:$0xff] %v6133_v44 }
 0x116   : > { %v6137_v46 = vpop.permute.xlu1 %1098 }
 0x117   : > { %10461 = vst [vmem:[#allocation8_spill] sm:$0xff] %v6137_v46 }
 0x11b   : > { %v6141_v48 = vpop.permute.xlu1 %1130 }
 0x11f   : > { %v6147_v51 = vpop.permute.xlu1 %1134 }
 0x124   : > { %v6151_v54 = vpop.permute.xlu1 %1222 }
 0x128   : > { %v6155_v57 = vpop.permute.xlu1 %1230 }
 0x12c   : > { %v6159_v60 = vpop.permute.xlu1 %1234 }
 0x131   : > { %v6163_v63 = vpop.permute.xlu1 %1322 }
 0x135   : > { %v6167_v5 = vpop.permute.xlu1 %1326 }
 0x13a   : > { %v6171_v11 = vpop.permute.xlu1 %1414 }
 0x13e   : > { %v6175_v16 = vpop.permute.xlu1 %1422 }
 0x142   : > { %v6181_v23 = vpop.permute.xlu1 %1426 }
 0x147   : > { %v6183_v28 = vpop.permute.xlu1 %1514 }
 0x14b   : > { %v6185_v31 = vpop.permute.xlu1 %1518 }
 0x150   : > { %v6187_v26 = vpop.permute.xlu1 %1606 }
 0x154   : > { %v6190_v44 = vpop.permute.xlu1 %1614 }
 0x16a   : > { %v360_v24 = vpop.xlane.xlu0 %359 }
 0x16b   : > { %v5560_v27 = vmul.f32 -1.442695, %v360_v24 }
 0x16d   : > { %5784 = vpow2.f32 %v5560_v27 }
 0x16e   : > { %v366_v29 = vpop.xlane.xlu0 %365 }
 0x16f   : > { %v5562_v1 = vmul.f32 -1.442695, %v366_v29 }
 0x171   : > { %5786 = vpow2.f32 %v5562_v1 }
 0x177   : > { %v5785_v36 = vpop.eup %5784 }
 0x178   : > { %v382_v52 = vadd.f32 1.0, %v5785_v36 }
 0x17a   : > { %5788 = vrcp.f32 %v382_v52  ;;  %v6201_v52 = vpop.permute.xlu1 %1618 }
 0x17b   : > { %v5787_v46 = vpop.eup %5786  ;;  %10463 = vst [vmem:[#allocation10_spill] sm:$0xff] %v6201_v52 }
 0x17c   : > { %v384_v50 = vadd.f32 1.0, %v5787_v46 }
 0x17e   : > { %5790 = vrcp.f32 %v384_v50 }
 0x184   : > { %v5789_v1 = vpop.eup %5788 }
 0x185   : > { %v400_v36 = vmul.f32 %v5789_v1, %v5957_v3  ;;  %v399_v24 = vmul.f32 %v5789_v1, %v5955_v2  ;;  %395 = vst.msk [vmem:[%s6195_s13] sm:$0xff] %vm394_vm1, %v5789_v1 }
 0x187   : > { %417 = vrot.lane.b32.xlu1 %v400_v36, %s5838_s14  ;;  %415 = vrot.lane.b32.xlu0 %v399_v24, %s5838_s14 }
 0x188   : > { %v5791_v46 = vpop.eup %5790 }
 0x189   : > { %v403_v50 = vmul.f32 %v5791_v46, %v5967_v8  ;;  %397 = vst.msk [vmem:[%s6195_s13 + $0x10] sm:$0xff] %vm394_vm1, %v5791_v46 }
 0x18a   : > { %v363_v27 = vpop.xlane.xlu1 %362 }
 0x18b   : > { %v5561_v29 = vmul.f32 -1.442695, %v363_v27  ;;  %423 = vrot.lane.b32.xlu0 %v403_v50, %s5838_s14 }
 0x18d   : > { %5792 = vpow2.f32 %v5561_v29 }
 0x18e   : > { %v369_v2 = vpop.xlane.xlu1 %368 }
 0x18f   : > { %v5563_v3 = vmul.f32 -1.442695, %v369_v2 }
 0x191   : > { %5794 = vpow2.f32 %v5563_v3 }
 0x197   : > { %v5793_v1 = vpop.eup %5792 }
 0x198   : > { %v383_v42 = vadd.f32 1.0, %v5793_v1 }
 0x19a   : > { %5796 = vrcp.f32 %v383_v42  ;;  %v404_v42 = vmul.f32 %v5791_v46, %v5969_v9 }
 0x19b   : > { %v5795_v36 = vpop.eup %5794 }
 0x19c   : > { %v385_v24 = vadd.f32 1.0, %v5795_v36 }
 0x19e   : > { %5798 = vrcp.f32 %v385_v24 }
 0x1a4   : > { %v5797_v52 = vpop.eup %5796 }
 0x1a5   : > { %v401_v8 = vmul.f32 %v5797_v52, %v5959_v4  ;;  %396 = vst.msk [vmem:[%s6195_s13 + $0x8] sm:$0xff] %vm394_vm1, %v5797_v52  ;;  %v402_v50 = vmul.f32 %v5797_v52, %v5963_v6 }
 0x1a7   : > { %419 = vrot.lane.b32.xlu1 %v401_v8, %s5838_s14 }
 0x1a8   : > { %v5799_v27 = vpop.eup %5798 }
 0x1a9   : > { %v405_v29 = vmul.f32 %v5799_v27, %v5978_v12  ;;  %398 = vst.msk [vmem:[%s6195_s13 + $0x18] sm:$0xff] %vm394_vm1, %v5799_v27  ;;  %v406_v4 = vmul.f32 %v5799_v27, %v5980_v13  ;;  %s5559_s13 = sshll.u32 %s11127_s25, 1 }
 0x1aa   : > { %s301_s22 = scalar_lea.vmem %s10206_s7, %s5559_s13 }
 0x1ab   : > { %421 = vrot.lane.b32.xlu1 %v402_v50, %s5838_s14  ;;  %427 = vrot.lane.b32.xlu0 %v405_v29, %s5838_s14 }
 0x1af   : > { %425 = vrot.lane.b32.xlu1 %v404_v42, %s5838_s14 }
 0x1b3   : > { %429 = vrot.lane.b32.xlu1 %v406_v4, %s5838_s14  ;;  %s5872_s14 = smov 4  }
 0x1f9   : > { %v418_v2 = vpop.permute.xlu1 %417  ;;  %v416_v3 = vpop.permute.xlu0 %415 }
 0x1fa   : > { %v6224_v6 = vsel %vm431_vm2, %v416_v3, %v418_v2  ;;  %v6227_v12 = vsel %vm431_vm2, 0.0, %v416_v3  ;;  %v6234_v46 = vsel %vm431_vm2, %v418_v2, 0.0 }
 0x1fb   : > { %10464 = vst [vmem:[#allocation11_spill] sm:$0xff] %v6224_v6  ;;  %10465 = vst [vmem:[#allocation12_spill] sm:$0xff] %v6227_v12  ;;  %v539_v52 = vmul.f32 %v6066_v56, %v6227_v12  ;;  %v540_v9 = vmul.f32 %v6066_v56, %v6224_v6  ;;  %v541_v13 = vmul.f32 %v6066_v56, %v6234_v46 }
 0x1fc   : > { %10466 = vst [vmem:[#allocation13_spill] sm:$0xff] %v6234_v46 }
 0x1fd   : > { %563 = vrot.lane.b32.xlu0 %v539_v52, %s5839_s15  ;;  %565 = vrot.lane.b32.xlu1 %v540_v9, %s5839_s15  ;;  %v424_v50 = vpop.permute.xlu0 %423 }
 0x1fe   : > { %v6253_v56 = vsel %vm431_vm2, 0.0, %v424_v50 }
 0x1ff   : > { %10469 = vst [vmem:[#allocation16_spill] sm:$0xff] %v6253_v56  ;;  %v545_v4 = vmul.f32 %v6068_v59, %v6253_v56 }
 0x201   : > { %567 = vrot.lane.b32.xlu0 %v541_v13, %s5839_s15 }
 0x219   : > { %v420_v1 = vpop.permute.xlu1 %419 }
 0x21a   : > { %v6242_v36 = vsel %vm431_vm2, 0.0, %v420_v1 }
 0x21b   : > { %10467 = vst [vmem:[#allocation14_spill] sm:$0xff] %v6242_v36  ;;  %v542_v24 = vmul.f32 %v6111_v32, %v6242_v36 }
 0x21d   : > { %569 = vrot.lane.b32.xlu1 %v542_v24, %s5839_s15  ;;  %v422_v8 = vpop.permute.xlu1 %421  ;;  %v428_v13 = vpop.permute.xlu0 %427 }
 0x21e   : > { %v6248_v27 = vsel %vm431_vm2, %v420_v1, %v422_v8  ;;  %v6257_v42 = vsel %vm431_vm2, %v422_v8, 0.0 }
 0x21f   : > { %10468 = vst [vmem:[#allocation15_spill] sm:$0xff] %v6248_v27  ;;  %v543_v29 = vmul.f32 %v6111_v32, %v6248_v27  ;;  %10470 = vst [vmem:[#allocation17_spill] sm:$0xff] %v6257_v42  ;;  %v544_v3 = vmul.f32 %v6111_v32, %v6257_v42  ;;  %v6276_v32 = vsel %vm431_vm2, 0.0, %v428_v13 }
 0x220   : > { %10473 = vst [vmem:[#allocation20_spill] sm:$0xff] %v6276_v32 }
 0x221   : > { %571 = vrot.lane.b32.xlu0 %v543_v29, %s5839_s15  ;;  %v426_v2 = vpop.permute.xlu1 %425  ;;  %573 = vrot.lane.b32.xlu1 %v544_v3, %s5839_s15  ;;  %v629_v3 = vmul.f32 %v6115_v34, %v6224_v6 }
 0x222   : > { %v6266_v52 = vsel %vm431_vm2, %v424_v50, %v426_v2  ;;  %v6269_v9 = vsel %vm431_vm2, %v426_v2, 0.0  ;;  %v548_v50 = vmul.f32 %v6071_v62, %v6276_v32 }
 0x223   : > { %10471 = vst [vmem:[#allocation18_spill] sm:$0xff] %v6266_v52  ;;  %10472 = vst [vmem:[#allocation19_spill] sm:$0xff] %v6269_v9  ;;  %v546_v24 = vmul.f32 %v6068_v59, %v6266_v52  ;;  %v547_v8 = vmul.f32 %v6068_v59, %v6269_v9 }
 0x225   : > { %575 = vrot.lane.b32.xlu0 %v545_v4, %s5839_s15  ;;  %v430_v1 = vpop.permute.xlu1 %429  ;;  %577 = vrot.lane.b32.xlu1 %v546_v24, %s5839_s15  ;;  %v633_v24 = vmul.f32 %v6078_v7, %v6257_v42 }
 0x226   : > { %v6279_v29 = vsel %vm431_vm2, %v428_v13, %v430_v1  ;;  %v6288_v2 = vsel %vm431_vm2, %v430_v1, 0.0  ;;  %v628_v13 = vmul.f32 %v6115_v34, %v6227_v12  ;;  %v631_v1 = vmul.f32 %v6078_v7, %v6242_v36 }
 0x227   : > { %10474 = vst [vmem:[#allocation21_spill] sm:$0xff] %v6279_v29  ;;  %v549_v4 = vmul.f32 %v6071_v62, %v6279_v29  ;;  %10475 = vst [vmem:[#allocation22_spill] sm:$0xff] %v6288_v2  ;;  %v550_v59 = vmul.f32 %v6071_v62, %v6288_v2  ;;  %v630_v62 = vmul.f32 %v6115_v34, %v6234_v46 }
 0x228   : > { %v634_v34 = vmul.f32 %v6084_v17, %v6253_v56 }
 0x229   : > { %579 = vrot.lane.b32.xlu0 %v547_v8, %s5839_s15  ;;  %581 = vrot.lane.b32.xlu1 %v548_v50, %s5839_s15  ;;  %v632_v8 = vmul.f32 %v6078_v7, %v6248_v27  ;;  %v635_v50 = vmul.f32 %v6084_v17, %v6266_v52  ;;  %v636_v7 = vmul.f32 %v6084_v17, %v6269_v9 }
 0x22a   : > { %v718_v17 = vmul.f32 %v6087_v19, %v6224_v6 }
 0x22d   : > { %583 = vrot.lane.b32.xlu0 %v549_v4, %s5839_s15  ;;  %585 = vrot.lane.b32.xlu1 %v550_v59, %s5839_s15  ;;  %v637_v4 = vmul.f32 %v6119_v37, %v6276_v32  ;;  %v639_v59 = vmul.f32 %v6119_v37, %v6288_v2 }
 0x231   : > { %654 = vrot.lane.b32.xlu0 %v629_v3, %s5840_s16  ;;  %652 = vrot.lane.b32.xlu1 %v628_v13, %s5840_s16  ;;  %v638_v3 = vmul.f32 %v6119_v37, %v6279_v29  ;;  %v717_v13 = vmul.f32 %v6087_v19, %v6227_v12  ;;  %v720_v37 = vmul.f32 %v6123_v39, %v6242_v36 }
 0x235   : > { %658 = vrot.lane.b32.xlu0 %v631_v1, %s5840_s16  ;;  %656 = vrot.lane.b32.xlu1 %v630_v62, %s5840_s16  ;;  %v719_v1 = vmul.f32 %v6087_v19, %v6234_v46  ;;  %v721_v62 = vmul.f32 %v6123_v39, %v6248_v27  ;;  %v723_v19 = vmul.f32 %v6089_v20, %v6253_v56 }
 0x239   : > { %662 = vrot.lane.b32.xlu0 %v633_v24, %s5840_s16  ;;  %660 = vrot.lane.b32.xlu1 %v632_v8, %s5840_s16  ;;  %v722_v24 = vmul.f32 %v6123_v39, %v6257_v42  ;;  %v724_v8 = vmul.f32 %v6089_v20, %v6266_v52  ;;  %v726_v39 = vmul.f32 %v6091_v15, %v6276_v32 }
 0x23d   : > { %666 = vrot.lane.b32.xlu0 %v635_v50, %s5840_s16  ;;  %664 = vrot.lane.b32.xlu1 %v634_v34, %s5840_s16  ;;  %v725_v50 = vmul.f32 %v6089_v20, %v6269_v9  ;;  %v727_v34 = vmul.f32 %v6091_v15, %v6279_v29  ;;  %v807_v20 = vmul.f32 %v6127_v41, %v6224_v6 }
 0x241   : > { %670 = vrot.lane.b32.xlu0 %v637_v4, %s5840_s16  ;;  %668 = vrot.lane.b32.xlu1 %v636_v7, %s5840_s16  ;;  %v728_v4 = vmul.f32 %v6091_v15, %v6288_v2  ;;  %v806_v7 = vmul.f32 %v6127_v41, %v6227_v12  ;;  %v808_v15 = vmul.f32 %v6127_v41, %v6234_v46 }
 0x242   : > { %v812_v41 = vmul.f32 %v6101_v25, %v6253_v56 }
 0x245   : > { %674 = vrot.lane.b32.xlu0 %v639_v59, %s5840_s16  ;;  %672 = vrot.lane.b32.xlu1 %v638_v3, %s5840_s16  ;;  %v809_v59 = vmul.f32 %v6096_v22, %v6242_v36  ;;  %v811_v3 = vmul.f32 %v6096_v22, %v6257_v42 }
 0x249   : > { %741 = vrot.lane.b32.xlu0 %v717_v13, %s5841_s17  ;;  %743 = vrot.lane.b32.xlu1 %v718_v17, %s5841_s17  ;;  %v810_v13 = vmul.f32 %v6096_v22, %v6248_v27  ;;  %v813_v17 = vmul.f32 %v6101_v25, %v6266_v52  ;;  %v814_v22 = vmul.f32 %v6101_v25, %v6269_v9 }
 0x24a   : > { %v897_v25 = vmul.f32 %v6107_v30, %v6234_v46 }
 0x24d   : > { %745 = vrot.lane.b32.xlu0 %v719_v1, %s5841_s17  ;;  %747 = vrot.lane.b32.xlu1 %v720_v37, %s5841_s17  ;;  %v815_v1 = vmul.f32 %v6131_v43, %v6276_v32  ;;  %v817_v37 = vmul.f32 %v6131_v43, %v6288_v2 }
 0x251   : > { %749 = vrot.lane.b32.xlu0 %v721_v62, %s5841_s17  ;;  %751 = vrot.lane.b32.xlu1 %v722_v24, %s5841_s17  ;;  %v895_v62 = vmul.f32 %v6107_v30, %v6227_v12  ;;  %v816_v24 = vmul.f32 %v6131_v43, %v6279_v29  ;;  %v899_v43 = vmul.f32 %v6135_v45, %v6248_v27 }
 0x255   : > { %753 = vrot.lane.b32.xlu0 %v723_v19, %s5841_s17  ;;  %755 = vrot.lane.b32.xlu1 %v724_v8, %s5841_s17  ;;  %v896_v19 = vmul.f32 %v6107_v30, %v6224_v6  ;;  %v898_v8 = vmul.f32 %v6135_v45, %v6242_v36  ;;  %v900_v30 = vmul.f32 %v6135_v45, %v6257_v42 }
 0x256   : > { %v905_v45 = vmul.f32 %v6117_v35, %v6279_v29 }
 0x259   : > { %757 = vrot.lane.b32.xlu0 %v725_v50, %s5841_s17  ;;  %759 = vrot.lane.b32.xlu1 %v726_v39, %s5841_s17  ;;  %v901_v50 = vmul.f32 %v6113_v33, %v6253_v56 }
 0x25d   : > { %761 = vrot.lane.b32.xlu0 %v727_v34, %s5841_s17  ;;  %763 = vrot.lane.b32.xlu1 %v728_v4, %s5841_s17  ;;  %v902_v34 = vmul.f32 %v6113_v33, %v6266_v52  ;;  %v903_v4 = vmul.f32 %v6113_v33, %v6269_v9  ;;  %v985_v33 = vmul.f32 %v6139_v47, %v6224_v6 }
 0x261   : > { %832 = vrot.lane.b32.xlu0 %v807_v20, %s5842_s18  ;;  %830 = vrot.lane.b32.xlu1 %v806_v7, %s5842_s18  ;;  %v904_v20 = vmul.f32 %v6117_v35, %v6276_v32 }
 0x265   : > { %836 = vrot.lane.b32.xlu0 %v809_v59, %s5842_s18  ;;  %834 = vrot.lane.b32.xlu1 %v808_v15, %s5842_s18  ;;  %v906_v15 = vmul.f32 %v6117_v35, %v6288_v2 }
 0x269   : > { %840 = vrot.lane.b32.xlu0 %v811_v3, %s5842_s18  ;;  %838 = vrot.lane.b32.xlu1 %v810_v13, %s5842_s18 }
 0x26d   : > { %844 = vrot.lane.b32.xlu0 %v813_v17, %s5842_s18  ;;  %842 = vrot.lane.b32.xlu1 %v812_v41, %s5842_s18  ;;  %v984_v17 = vmul.f32 %v6139_v47, %v6227_v12  ;;  %v987_v41 = vmul.f32 %v6121_v38, %v6242_v36 }
 0x26f   : > { %v6422_v39 = vpop.permute.xlu0 %563  ;;  %v6436_v7 = vpop.permute.xlu1 %565 }
 0x270   : > { %10476 = vst [vmem:[#allocation23_spill] sm:$0xff] %v6422_v39  ;;  %10477 = vst [vmem:[#allocation24_spill] sm:$0xff] %v6436_v7 }
 0x271   : > { %848 = vrot.lane.b32.xlu0 %v815_v1, %s5842_s18  ;;  %846 = vrot.lane.b32.xlu1 %v814_v22, %s5842_s18  ;;  %v986_v22 = vmul.f32 %v6139_v47, %v6234_v46  ;;  %v990_v47 = vmul.f32 %v6125_v40, %v6253_v56 }
 0x273   : > { %v6438_v59 = vpop.permute.xlu0 %567 }
 0x274   : > { %10478 = vst [vmem:[#allocation25_spill] sm:$0xff] %v6438_v59 }
 0x275   : > { %852 = vrot.lane.b32.xlu0 %v817_v37, %s5842_s18  ;;  %850 = vrot.lane.b32.xlu1 %v816_v24, %s5842_s18  ;;  %v989_v37 = vmul.f32 %v6121_v38, %v6257_v42  ;;  %v991_v24 = vmul.f32 %v6125_v40, %v6266_v52 }
 0x279   : > { %919 = vrot.lane.b32.xlu0 %v895_v62, %s5843_s19  ;;  %921 = vrot.lane.b32.xlu1 %v896_v19, %s5843_s19  ;;  %v988_v62 = vmul.f32 %v6121_v38, %v6248_v27 }
 0x27d   : > { %923 = vrot.lane.b32.xlu0 %v897_v25, %s5843_s19  ;;  %925 = vrot.lane.b32.xlu1 %v898_v8, %s5843_s19  ;;  %v993_v8 = vmul.f32 %v6143_v49, %v6276_v32 }
 0x281   : > { %927 = vrot.lane.b32.xlu0 %v899_v43, %s5843_s19  ;;  %929 = vrot.lane.b32.xlu1 %v900_v30, %s5843_s19  ;;  %v995_v30 = vmul.f32 %v6143_v49, %v6288_v2 }
 0x285   : > { %931 = vrot.lane.b32.xlu0 %v901_v50, %s5843_s19  ;;  %933 = vrot.lane.b32.xlu1 %v902_v34, %s5843_s19  ;;  %v992_v50 = vmul.f32 %v6125_v40, %v6269_v9 }
 0x289   : > { %935 = vrot.lane.b32.xlu0 %v903_v4, %s5843_s19  ;;  %937 = vrot.lane.b32.xlu1 %v904_v20, %s5843_s19  ;;  %v1142_v20 = vmul.f32 %v6149_v53, %v6224_v6 }
 0x28d   : > { %939 = vrot.lane.b32.xlu0 %v905_v45, %s5843_s19  ;;  %941 = vrot.lane.b32.xlu1 %v906_v15, %s5843_s19  ;;  %v994_v45 = vmul.f32 %v6143_v49, %v6279_v29  ;;  %v1141_v15 = vmul.f32 %v6149_v53, %v6227_v12  ;;  %v1143_v49 = vmul.f32 %v6149_v53, %v6234_v46 }
 0x28f   : > { %v6446_v3 = vpop.permute.xlu1 %569 }
 0x290   : > { %10479 = vst [vmem:[#allocation26_spill] sm:$0xff] %v6446_v3 }
 0x291   : > { %1010 = vrot.lane.b32.xlu0 %v985_v33, %s5844_s20  ;;  %1008 = vrot.lane.b32.xlu1 %v984_v17, %s5844_s20  ;;  %v1144_v17 = vmul.f32 %v6141_v48, %v6242_v36 }
 0x293   : > { %v6448_v13 = vpop.permute.xlu0 %571  ;;  %v6457_v1 = vpop.permute.xlu1 %573 }
 0x294   : > { %10480 = vst [vmem:[#allocation27_spill] sm:$0xff] %v6448_v13  ;;  %10481 = vst [vmem:[#allocation28_spill] sm:$0xff] %v6457_v1 }
 0x295   : > { %1014 = vrot.lane.b32.xlu0 %v987_v41, %s5844_s20  ;;  %1012 = vrot.lane.b32.xlu1 %v986_v22, %s5844_s20 }
 0x297   : > { %v6460_v35 = vpop.permute.xlu0 %575  ;;  %v6472_v25 = vpop.permute.xlu1 %577 }
 0x298   : > { %10482 = vst [vmem:[#allocation29_spill] sm:$0xff] %v6460_v35  ;;  %10483 = vst [vmem:[#allocation30_spill] sm:$0xff] %v6472_v25 }
 0x299   : > { %1018 = vrot.lane.b32.xlu0 %v989_v37, %s5844_s20  ;;  %1016 = vrot.lane.b32.xlu1 %v988_v62, %s5844_s20  ;;  %v1146_v37 = vmul.f32 %v6141_v48, %v6257_v42 }
 0x29b   : > { %v6474_v19 = vpop.permute.xlu0 %579  ;;  %v6482_v43 = vpop.permute.xlu1 %581 }
 0x29c   : > { %10484 = vst [vmem:[#allocation31_spill] sm:$0xff] %v6474_v19  ;;  %10485 = vst [vmem:[#allocation32_spill] sm:$0xff] %v6482_v43 }
 0x29d   : > { %1022 = vrot.lane.b32.xlu0 %v991_v24, %s5844_s20  ;;  %1020 = vrot.lane.b32.xlu1 %v990_v47, %s5844_s20  ;;  %v1145_v47 = vmul.f32 %v6141_v48, %v6248_v27 }
 0x29f   : > { %v6484_v38 = vpop.permute.xlu0 %583  ;;  %v6492_v34 = vpop.permute.xlu1 %585 }
 0x2a0   : > { %10486 = vst [vmem:[#allocation33_spill] sm:$0xff] %v6484_v38  ;;  %10487 = vst [vmem:[#allocation34_spill] sm:$0xff] %v6492_v34 }
 0x2a1   : > { %1026 = vrot.lane.b32.xlu0 %v993_v8, %s5844_s20  ;;  %1024 = vrot.lane.b32.xlu1 %v992_v50, %s5844_s20  ;;  %v1148_v8 = vmul.f32 %v6147_v51, %v6266_v52 }
 0x2a3   : > { %v6494_v4 = vpop.permute.xlu0 %654  ;;  %v6502_v33 = vpop.permute.xlu1 %652 }
 0x2a4   : > { %10488 = vst [vmem:[#allocation35_spill] sm:$0xff] %v6494_v4  ;;  %10489 = vst [vmem:[#allocation36_spill] sm:$0xff] %v6502_v33  ;;  %v5849_v4 = vmov 16  }
 0x2a5   : > { %1030 = vrot.lane.b32.xlu0 %v995_v30, %s5844_s20  ;;  %1028 = vrot.lane.b32.xlu1 %v994_v45, %s5844_s20  ;;  %v1147_v30 = vmul.f32 %v6147_v51, %v6253_v56 }
 0x2a7   : > { %v6504_v40 = vpop.permute.xlu0 %658  ;;  %v6512_v41 = vpop.permute.xlu1 %656 }
 0x2a8   : > { %10490 = vst [vmem:[#allocation37_spill] sm:$0xff] %v6504_v40  ;;  %10491 = vst [vmem:[#allocation38_spill] sm:$0xff] %v6512_v41 }
 0x2a9   : > { %1167 = vrot.lane.b32.xlu0 %v1142_v20, %s5839_s15  ;;  %1165 = vrot.lane.b32.xlu1 %v1141_v15, %s5839_s15  ;;  %v1150_v20 = vmul.f32 %v6153_v55, %v6276_v32  ;;  %v1149_v15 = vmul.f32 %v6147_v51, %v6269_v9  ;;  %v1151_v51 = vmul.f32 %v6153_v55, %v6279_v29 }
 0x2ab   : > { %v6514_v22 = vpop.permute.xlu0 %662  ;;  %v6522_v62 = vpop.permute.xlu1 %660 }
 0x2ac   : > { %10492 = vst [vmem:[#allocation39_spill] sm:$0xff] %v6514_v22  ;;  %10493 = vst [vmem:[#allocation40_spill] sm:$0xff] %v6522_v62 }
 0x2ad   : > { %1171 = vrot.lane.b32.xlu0 %v1144_v17, %s5839_s15  ;;  %1169 = vrot.lane.b32.xlu1 %v1143_v49, %s5839_s15  ;;  %v1152_v17 = vmul.f32 %v6153_v55, %v6288_v2  ;;  %v1240_v55 = vmul.f32 %v6157_v58, %v6242_v36 }
 0x2af   : > { %v6524_v24 = vpop.permute.xlu0 %666  ;;  %v6532_v50 = vpop.permute.xlu1 %664 }
 0x2b0   : > { %10494 = vst [vmem:[#allocation41_spill] sm:$0xff] %v6524_v24  ;;  %10495 = vst [vmem:[#allocation42_spill] sm:$0xff] %v6532_v50 }
 0x2b1   : > { %1175 = vrot.lane.b32.xlu0 %v1146_v37, %s5839_s15  ;;  %1173 = vrot.lane.b32.xlu1 %v1145_v47, %s5839_s15  ;;  %v5845_v47 = vmov 2  }
 0x2b2   : > { %5691 = vset.pattern.permute.xlu1 %v5845_v47  ;;  %5692 = vset.pattern.permute.xlu0 %v5845_v47  ;;  %v1239_v47 = vmul.f32 %v6151_v54, %v6234_v46 }
 0x2b3   : > { %v6534_v53 = vpop.permute.xlu0 %670  ;;  %v6542_v45 = vpop.permute.xlu1 %668 }
 0x2b4   : > { %10496 = vst [vmem:[#allocation43_spill] sm:$0xff] %v6534_v53  ;;  %10497 = vst [vmem:[#allocation44_spill] sm:$0xff] %v6542_v45 }
 0x2b5   : > { %1179 = vrot.lane.b32.xlu0 %v1148_v8, %s5839_s15  ;;  %1177 = vrot.lane.b32.xlu1 %v1147_v30, %s5839_s15  ;;  %v1237_v8 = vmul.f32 %v6151_v54, %v6227_v12 }
 0x2b7   : > { %v6544_v48 = vpop.permute.xlu0 %674  ;;  %v6552_v49 = vpop.permute.xlu1 %672 }
 0x2b8   : > { %10498 = vst [vmem:[#allocation45_spill] sm:$0xff] %v6544_v48  ;;  %10499 = vst [vmem:[#allocation46_spill] sm:$0xff] %v6552_v49 }
 0x2b9   : > { %1183 = vrot.lane.b32.xlu0 %v1150_v20, %s5839_s15  ;;  %1181 = vrot.lane.b32.xlu1 %v1149_v15, %s5839_s15  ;;  %v1238_v15 = vmul.f32 %v6151_v54, %v6224_v6  ;;  %v1243_v54 = vmul.f32 %v6155_v57, %v6253_v56 }
 0x2bb   : > { %v6554_v37 = vpop.permute.xlu0 %741  ;;  %v6562_v30 = vpop.permute.xlu1 %743 }
 0x2bc   : > { %10500 = vst [vmem:[#allocation47_spill] sm:$0xff] %v6554_v37  ;;  %10501 = vst [vmem:[#allocation48_spill] sm:$0xff] %v6562_v30  ;;  %v6908_v30 = vld [vmem:[%s10202_s3 + $0x18] sm:$0xff] }
 0x2bd   : > { %1187 = vrot.lane.b32.xlu0 %v1152_v17, %s5839_s15  ;;  %1185 = vrot.lane.b32.xlu1 %v1151_v51, %s5839_s15  ;;  %10554 = vst [vmem:[#allocation99_spill] sm:$0xff] %v6908_v30 }
 0x2bf   : > { %v6564_v20 = vpop.permute.xlu0 %745  ;;  %v6572_v17 = vpop.permute.xlu1 %747 }
 0x2c0   : > { %10502 = vst [vmem:[#allocation49_spill] sm:$0xff] %v6564_v20  ;;  %10503 = vst [vmem:[#allocation50_spill] sm:$0xff] %v6572_v17 }
 0x2c1   : > { %1261 = vrot.lane.b32.xlu0 %v1237_v8, %s5840_s16  ;;  %1263 = vrot.lane.b32.xlu1 %v1238_v15, %s5840_s16  ;;  %v1241_v8 = vmul.f32 %v6157_v58, %v6248_v27 }
 0x2c3   : > { %v6574_v37 = vpop.permute.xlu0 %749  ;;  %v6582_v51 = vpop.permute.xlu1 %751 }
 0x2c4   : > { %10504 = vst [vmem:[#allocation51_spill] sm:$0xff] %v6574_v37  ;;  %10505 = vst [vmem:[#allocation52_spill] sm:$0xff] %v6582_v51 }
 0x2c5   : > { %1265 = vrot.lane.b32.xlu0 %v1239_v47, %s5840_s16  ;;  %1267 = vrot.lane.b32.xlu1 %v1240_v55, %s5840_s16  ;;  %v1242_v47 = vmul.f32 %v6157_v58, %v6257_v42  ;;  %v1245_v55 = vmul.f32 %v6155_v57, %v6269_v9  ;;  %v1246_v58 = vmul.f32 %v6159_v60, %v6276_v32 }
 0x2c7   : > { %v6584_v20 = vpop.permute.xlu0 %753  ;;  %v6592_v15 = vpop.permute.xlu1 %755 }
 0x2c8   : > { %10506 = vst [vmem:[#allocation53_spill] sm:$0xff] %v6584_v20  ;;  %10507 = vst [vmem:[#allocation54_spill] sm:$0xff] %v6592_v15  ;;  %v1244_v20 = vmul.f32 %v6155_v57, %v6266_v52  ;;  %v1334_v57 = vmul.f32 %v6161_v61, %v6224_v6 }
 0x2c9   : > { %1269 = vrot.lane.b32.xlu0 %v1241_v8, %s5840_s16  ;;  %1271 = vrot.lane.b32.xlu1 %v1242_v47, %s5840_s16 }
 0x2cb   : > { %v6594_v17 = vpop.permute.xlu0 %757  ;;  %v6602_v8 = vpop.permute.xlu1 %759 }
 0x2cc   : > { %10508 = vst [vmem:[#allocation55_spill] sm:$0xff] %v6594_v17  ;;  %10509 = vst [vmem:[#allocation56_spill] sm:$0xff] %v6602_v8 }
 0x2cd   : > { %1273 = vrot.lane.b32.xlu0 %v1243_v54, %s5840_s16  ;;  %1275 = vrot.lane.b32.xlu1 %v1244_v20, %s5840_s16  ;;  %v1247_v54 = vmul.f32 %v6159_v60, %v6279_v29  ;;  %v1248_v20 = vmul.f32 %v6159_v60, %v6288_v2  ;;  %v1335_v60 = vmul.f32 %v6161_v61, %v6234_v46 }
 0x2cf   : > { %v6604_v51 = vpop.permute.xlu0 %761  ;;  %v6612_v47 = vpop.permute.xlu1 %763 }
 0x2d0   : > { %10510 = vst [vmem:[#allocation57_spill] sm:$0xff] %v6604_v51  ;;  %10511 = vst [vmem:[#allocation58_spill] sm:$0xff] %v6612_v47 }
 0x2d1   : > { %1277 = vrot.lane.b32.xlu0 %v1245_v55, %s5840_s16  ;;  %1279 = vrot.lane.b32.xlu1 %v1246_v58, %s5840_s16  ;;  %v1336_v58 = vmul.f32 %v6163_v63, %v6242_v36 }
 0x2d3   : > { %v6614_v17 = vpop.permute.xlu0 %832  ;;  %v6622_v55 = vpop.permute.xlu1 %830 }
 0x2d4   : > { %10512 = vst [vmem:[#allocation59_spill] sm:$0xff] %v6614_v17  ;;  %10513 = vst [vmem:[#allocation60_spill] sm:$0xff] %v6622_v55  ;;  %v1333_v17 = vmul.f32 %v6161_v61, %v6227_v12 }
 0x2d5   : > { %1281 = vrot.lane.b32.xlu0 %v1247_v54, %s5840_s16  ;;  %1283 = vrot.lane.b32.xlu1 %v1248_v20, %s5840_s16 }
 0x2d7   : > { %v6624_v8 = vpop.permute.xlu0 %836  ;;  %v6632_v54 = vpop.permute.xlu1 %834 }
 0x2d8   : > { %10514 = vst [vmem:[#allocation61_spill] sm:$0xff] %v6624_v8  ;;  %10515 = vst [vmem:[#allocation62_spill] sm:$0xff] %v6632_v54 }
 0x2d9   : > { %1359 = vrot.lane.b32.xlu0 %v1334_v57, %s5841_s17  ;;  %1357 = vrot.lane.b32.xlu1 %v1333_v17, %s5841_s17  ;;  %v1338_v57 = vmul.f32 %v6163_v63, %v6257_v42  ;;  %v1340_v17 = vmul.f32 %v6167_v5, %v6266_v52 }
 0x2db   : > { %v6634_v47 = vpop.permute.xlu0 %840  ;;  %v6642_v20 = vpop.permute.xlu1 %838 }
 0x2dc   : > { %10516 = vst [vmem:[#allocation63_spill] sm:$0xff] %v6634_v47  ;;  %10517 = vst [vmem:[#allocation64_spill] sm:$0xff] %v6642_v20  ;;  %v1337_v47 = vmul.f32 %v6163_v63, %v6248_v27  ;;  %v10550_v20 = vld [vmem:[#allocation10_spill] sm:$0xff] }
 0x2dd   : > { %1363 = vrot.lane.b32.xlu0 %v1336_v58, %s5841_s17  ;;  %1361 = vrot.lane.b32.xlu1 %v1335_v60, %s5841_s17  ;;  %v1342_v60 = vmul.f32 %v6165_v0, %v6276_v32  ;;  %v1630_v54 = vmul.f32 %v10550_v20, %v6276_v32 }
 0x2df   : > { %v6644_v8 = vpop.permute.xlu0 %844  ;;  %v6652_v58 = vpop.permute.xlu1 %842 }
 0x2e0   : > { %10518 = vst [vmem:[#allocation65_spill] sm:$0xff] %v6644_v8  ;;  %10519 = vst [vmem:[#allocation66_spill] sm:$0xff] %v6652_v58  ;;  %v1339_v8 = vmul.f32 %v6167_v5, %v6253_v56 }
 0x2e1   : > { %1367 = vrot.lane.b32.xlu0 %v1338_v57, %s5841_s17  ;;  %1365 = vrot.lane.b32.xlu1 %v1337_v47, %s5841_s17  ;;  %v1344_v47 = vmul.f32 %v6165_v0, %v6288_v2 }
 0x2e3   : > { %v6654_v61 = vpop.permute.xlu0 %848  ;;  %v6662_v57 = vpop.permute.xlu1 %846 }
 0x2e4   : > { %10520 = vst [vmem:[#allocation67_spill] sm:$0xff] %v6654_v61  ;;  %10521 = vst [vmem:[#allocation68_spill] sm:$0xff] %v6662_v57  ;;  %v1341_v61 = vmul.f32 %v6167_v5, %v6269_v9  ;;  %v10232_v57 = vmov 0.0  }
 0x2e5   : > { %1371 = vrot.lane.b32.xlu0 %v1340_v17, %s5841_s17  ;;  %1369 = vrot.lane.b32.xlu1 %v1339_v8, %s5841_s17  ;;  %v1343_v8 = vmul.f32 %v6165_v0, %v6279_v29  ;;  %v1432_v0 = vmul.f32 %v6169_v10, %v6242_v36 }
 0x2e7   : > { %v6664_v63 = vpop.permute.xlu0 %852  ;;  %v6672_v17 = vpop.permute.xlu1 %850 }
 0x2e8   : > { %10522 = vst [vmem:[#allocation69_spill] sm:$0xff] %v6664_v63  ;;  %10523 = vst [vmem:[#allocation70_spill] sm:$0xff] %v6672_v17  ;;  %v1429_v63 = vmul.f32 %v6171_v11, %v6227_v12 }
 0x2e9   : > { %1375 = vrot.lane.b32.xlu0 %v1342_v60, %s5841_s17  ;;  %1373 = vrot.lane.b32.xlu1 %v1341_v61, %s5841_s17  ;;  %v1430_v61 = vmul.f32 %v6171_v11, %v6224_v6 }
 0x2eb   : > { %v6674_v58 = vpop.permute.xlu0 %919  ;;  %v6682_v60 = vpop.permute.xlu1 %921 }
 0x2ec   : > { %10524 = vst [vmem:[#allocation71_spill] sm:$0xff] %v6674_v58  ;;  %10525 = vst [vmem:[#allocation72_spill] sm:$0xff] %v6682_v60  ;;  %v1431_v58 = vmul.f32 %v6171_v11, %v6234_v46  ;;  %v1435_v11 = vmul.f32 %v6175_v16, %v6253_v56 }
 0x2ed   : > { %1379 = vrot.lane.b32.xlu0 %v1344_v47, %s5841_s17  ;;  %1377 = vrot.lane.b32.xlu1 %v1343_v8, %s5841_s17 }
 0x2ef   : > { %v6684_v5 = vpop.permute.xlu0 %923  ;;  %v6692_v47 = vpop.permute.xlu1 %925 }
 0x2f0   : > { %10526 = vst [vmem:[#allocation73_spill] sm:$0xff] %v6684_v5  ;;  %10527 = vst [vmem:[#allocation74_spill] sm:$0xff] %v6692_v47 }
 0x2f1   : > { %1453 = vrot.lane.b32.xlu0 %v1429_v63, %s5842_s18  ;;  %1455 = vrot.lane.b32.xlu1 %v1430_v61, %s5842_s18  ;;  %v1433_v63 = vmul.f32 %v6169_v10, %v6248_v27 }
 0x2f3   : > { %v6694_v17 = vpop.permute.xlu0 %927  ;;  %v6702_v8 = vpop.permute.xlu1 %929 }
 0x2f4   : > { %10528 = vst [vmem:[#allocation75_spill] sm:$0xff] %v6694_v17  ;;  %10529 = vst [vmem:[#allocation76_spill] sm:$0xff] %v6702_v8 }
 0x2f5   : > { %1457 = vrot.lane.b32.xlu0 %v1431_v58, %s5842_s18  ;;  %1459 = vrot.lane.b32.xlu1 %v1432_v0, %s5842_s18  ;;  %v1434_v58 = vmul.f32 %v6169_v10, %v6257_v42  ;;  %v1437_v0 = vmul.f32 %v6175_v16, %v6269_v9  ;;  %v1438_v10 = vmul.f32 %v6181_v23, %v6276_v32 }
 0x2f7   : > { %v6704_v5 = vpop.permute.xlu0 %931  ;;  %v6712_v61 = vpop.permute.xlu1 %933 }
 0x2f8   : > { %10530 = vst [vmem:[#allocation77_spill] sm:$0xff] %v6704_v5  ;;  %10531 = vst [vmem:[#allocation78_spill] sm:$0xff] %v6712_v61  ;;  %v1436_v5 = vmul.f32 %v6175_v16, %v6266_v52  ;;  %v1526_v16 = vmul.f32 %v6173_v14, %v6224_v6 }
 0x2f9   : > { %1461 = vrot.lane.b32.xlu0 %v1433_v63, %s5842_s18  ;;  %1463 = vrot.lane.b32.xlu1 %v1434_v58, %s5842_s18 }
 0x2fb   : > { %v6714_v47 = vpop.permute.xlu0 %935  ;;  %v6722_v63 = vpop.permute.xlu1 %937 }
 0x2fc   : > { %10532 = vst [vmem:[#allocation79_spill] sm:$0xff] %v6714_v47  ;;  %10533 = vst [vmem:[#allocation80_spill] sm:$0xff] %v6722_v63 }
 0x2fd   : > { %1465 = vrot.lane.b32.xlu0 %v1435_v11, %s5842_s18  ;;  %1467 = vrot.lane.b32.xlu1 %v1436_v5, %s5842_s18  ;;  %v1439_v11 = vmul.f32 %v6181_v23, %v6279_v29  ;;  %v1440_v5 = vmul.f32 %v6181_v23, %v6288_v2  ;;  %v1527_v23 = vmul.f32 %v6173_v14, %v6234_v46 }
 0x2ff   : > { %v6724_v8 = vpop.permute.xlu0 %939  ;;  %v6732_v58 = vpop.permute.xlu1 %941 }
 0x300   : > { %10534 = vst [vmem:[#allocation81_spill] sm:$0xff] %v6724_v8  ;;  %10535 = vst [vmem:[#allocation82_spill] sm:$0xff] %v6732_v58  ;;  %v1525_v8 = vmul.f32 %v6173_v14, %v6227_v12 }
 0x301   : > { %1469 = vrot.lane.b32.xlu0 %v1437_v0, %s5842_s18  ;;  %1471 = vrot.lane.b32.xlu1 %v1438_v10, %s5842_s18  ;;  %v1528_v10 = vmul.f32 %v6183_v28, %v6242_v36 }
 0x303   : > { %v6734_v47 = vpop.permute.xlu0 %1010  ;;  %v6742_v0 = vpop.permute.xlu1 %1008 }
 0x304   : > { %10536 = vst [vmem:[#allocation83_spill] sm:$0xff] %v6734_v47  ;;  %10537 = vst [vmem:[#allocation84_spill] sm:$0xff] %v6742_v0 }
 0x305   : > { %1473 = vrot.lane.b32.xlu0 %v1439_v11, %s5842_s18  ;;  %1475 = vrot.lane.b32.xlu1 %v1440_v5, %s5842_s18 }
 0x307   : > { %v6744_v63 = vpop.permute.xlu0 %1014  ;;  %v6752_v11 = vpop.permute.xlu1 %1012 }
 0x308   : > { %10538 = vst [vmem:[#allocation85_spill] sm:$0xff] %v6744_v63  ;;  %10539 = vst [vmem:[#allocation86_spill] sm:$0xff] %v6752_v11 }
 0x309   : > { %1551 = vrot.lane.b32.xlu0 %v1526_v16, %s5843_s19  ;;  %1549 = vrot.lane.b32.xlu1 %v1525_v8, %s5843_s19  ;;  %v1530_v16 = vmul.f32 %v6183_v28, %v6257_v42  ;;  %v1532_v8 = vmul.f32 %v6185_v31, %v6266_v52 }
 0x30b   : > { %v6754_v58 = vpop.permute.xlu0 %1018  ;;  %v6762_v5 = vpop.permute.xlu1 %1016 }
 0x30c   : > { %10540 = vst [vmem:[#allocation87_spill] sm:$0xff] %v6754_v58  ;;  %10541 = vst [vmem:[#allocation88_spill] sm:$0xff] %v6762_v5  ;;  %v1529_v58 = vmul.f32 %v6183_v28, %v6248_v27 }
 0x30d   : > { %1555 = vrot.lane.b32.xlu0 %v1528_v10, %s5843_s19  ;;  %1553 = vrot.lane.b32.xlu1 %v1527_v23, %s5843_s19  ;;  %v1534_v23 = vmul.f32 %v6177_v18, %v6276_v32 }
 0x30f   : > { %v6764_v63 = vpop.permute.xlu0 %1022  ;;  %v6772_v10 = vpop.permute.xlu1 %1020 }
 0x310   : > { %10542 = vst [vmem:[#allocation89_spill] sm:$0xff] %v6764_v63  ;;  %10543 = vst [vmem:[#allocation90_spill] sm:$0xff] %v6772_v10  ;;  %v1531_v63 = vmul.f32 %v6185_v31, %v6253_v56 }
 0x311   : > { %1559 = vrot.lane.b32.xlu0 %v1530_v16, %s5843_s19  ;;  %1557 = vrot.lane.b32.xlu1 %v1529_v58, %s5843_s19  ;;  %v1536_v58 = vmul.f32 %v6177_v18, %v6288_v2 }
 0x313   : > { %v6774_v14 = vpop.permute.xlu0 %1026  ;;  %v6782_v16 = vpop.permute.xlu1 %1024 }
 0x314   : > { %10544 = vst [vmem:[#allocation91_spill] sm:$0xff] %v6774_v14  ;;  %10545 = vst [vmem:[#allocation92_spill] sm:$0xff] %v6782_v16  ;;  %v1533_v14 = vmul.f32 %v6185_v31, %v6269_v9 }
 0x315   : > { %1563 = vrot.lane.b32.xlu0 %v1532_v8, %s5843_s19  ;;  %1561 = vrot.lane.b32.xlu1 %v1531_v63, %s5843_s19  ;;  %v1535_v63 = vmul.f32 %v6177_v18, %v6279_v29 }
 0x317   : > { %v6784_v28 = vpop.permute.xlu0 %1030  ;;  %v6792_v8 = vpop.permute.xlu1 %1028 }
 0x318   : > { %10546 = vst [vmem:[#allocation93_spill] sm:$0xff] %v6784_v28  ;;  %10547 = vst [vmem:[#allocation94_spill] sm:$0xff] %v6792_v8  ;;  %v1621_v28 = vmul.f32 %v6187_v26, %v6227_v12 }
 0x319   : > { %1567 = vrot.lane.b32.xlu0 %v1534_v23, %s5843_s19  ;;  %1565 = vrot.lane.b32.xlu1 %v1533_v14, %s5843_s19  ;;  %v10225_v23 = vlaneseq  ;;  %v1623_v14 = vmul.f32 %v6187_v26, %v6234_v46 }
 0x31b   : > { %v6794_v10 = vpop.permute.xlu0 %1167  ;;  %v6802_v16 = vpop.permute.xlu1 %1165  ;;  %v457_v8 = vand.u32 127, %v10225_v23 }
 0x31d   : > { %1571 = vrot.lane.b32.xlu0 %v1536_v58, %s5843_s19  ;;  %1569 = vrot.lane.b32.xlu1 %v1535_v63, %s5843_s19  ;;  %v1622_v58 = vmul.f32 %v6187_v26, %v6224_v6  ;;  %v458_v11 = vadd.s32 128, %v457_v8  ;;  %v1625_v63 = vmul.f32 %v6179_v21, %v6248_v27  ;;  %v6831_v47 = vand.u32 15, %v457_v8 }
 0x31e   : > { %v1628_v8 = vmul.f32 %v6190_v44, %v6266_v52 }
 0x31f   : > { %v6804_v31 = vpop.permute.xlu0 %1171  ;;  %v6813_v5 = vpop.permute.xlu1 %1169  ;;  %v6827_v23 = vand.u32 15, %v458_v11  ;;  %10549 = vst [vmem:[#allocation96_spill] sm:$0xff] %v6831_v47  ;;  %v1701_v60 = vadd.s32 4294967294, %v6831_v47 }
 0x321   : > { %1645 = vrot.lane.b32.xlu0 %v1621_v28, %s5844_s20  ;;  %1647 = vrot.lane.b32.xlu1 %v1622_v58, %s5844_s20  ;;  %v1624_v28 = vmul.f32 %v6179_v21, %v6242_v36  ;;  %10548 = vst [vmem:[#allocation95_spill] sm:$0xff] %v6827_v23  ;;  %v1626_v58 = vmul.f32 %v6179_v21, %v6257_v42  ;;  %v1702_v11 = vadd.s32 4294967294, %v6827_v23  ;;  %vm1703_vm3 = vcmp.ge.s32.totalorder %v1701_v60, 0 }
 0x323   : > { %v6815_v18 = vpop.permute.xlu0 %1175  ;;  %v6823_v0 = vpop.permute.xlu1 %1173  ;;  %vm1704_vm4 = vcmp.ge.s32.totalorder %v1702_v11, 0  ;;  %v1632_v11 = vmul.f32 %v10550_v20, %v6288_v2 }
 0x325   : > { %1649 = vrot.lane.b32.xlu0 %v1623_v14, %s5844_s20  ;;  %1651 = vrot.lane.b32.xlu1 %v1624_v28, %s5844_s20  ;;  %v1627_v14 = vmul.f32 %v6190_v44, %v6253_v56  ;;  %v1629_v28 = vmul.f32 %v6190_v44, %v6269_v9  ;;  %v1631_v44 = vmul.f32 %v10550_v20, %v6279_v29  ;;  %v6887_v20 = vld [vmem:[%s10202_s3 + $0x8] sm:$0xff] }
 0x326   : > { %10552 = vst [vmem:[#allocation97_spill] sm:$0xff] %v6887_v20 }
 0x327   : > { %v6825_v26 = vpop.permute.xlu0 %1179  ;;  %v6837_v61 = vpop.permute.xlu1 %1177 }
 0x329   : > { %1653 = vrot.lane.b32.xlu0 %v1625_v63, %s5844_s20  ;;  %1655 = vrot.lane.b32.xlu1 %v1626_v58, %s5844_s20  ;;  %v5566_v58 = vsel %vm1703_vm3, 1.0, %v10232_v57  ;;  %vm4530_vm3 = vcmask 39936  }
 0x32b   : > { %v6839_v17 = vpop.permute.xlu0 %1183  ;;  %v6849_v63 = vpop.permute.xlu1 %1181 }
 0x32d   : > { %1657 = vrot.lane.b32.xlu0 %v1627_v14, %s5844_s20  ;;  %1659 = vrot.lane.b32.xlu1 %v1628_v8, %s5844_s20  ;;  %v5567_v14 = vsel %vm1704_vm4, 1.0, %v10232_v57 }
 0x32e   : > { %v5686_v60 = vpack.i.bf16 %v5567_v14, %v5566_v58 }
 0x32f   : > { %v6851_v21 = vpop.permute.xlu0 %1187  ;;  %v6861_v55 = vpop.permute.xlu1 %1185 }
 0x331   : > { %1661 = vrot.lane.b32.xlu0 %v1629_v28, %s5844_s20  ;;  %1663 = vrot.lane.b32.xlu1 %v1630_v54, %s5844_s20  ;;  %v6881_v54 = vld [vmem:[%s10202_s3] sm:$0xff] }
 0x332   : > { %10551 = vst [vmem:[#allocation10_spill] sm:$0xff] %v6881_v54 }
 0x333   : > { %v6863_v51 = vpop.permute.xlu0 %1261  ;;  %v6869_v8 = vpop.permute.xlu1 %1263 }
 0x335   : > { %1665 = vrot.lane.b32.xlu0 %v1631_v44, %s5844_s20  ;;  %1667 = vrot.lane.b32.xlu1 %v1632_v11, %s5844_s20  ;;  %v6897_v44 = vld [vmem:[%s10202_s3 + $0x10] sm:$0xff] }
 0x336   : > { %10553 = vst [vmem:[#allocation98_spill] sm:$0xff] %v6897_v44 }
 0x337   : > { %v6871_v28 = vpop.permute.xlu0 %1265  ;;  %v6874_v57 = vpop.permute.xlu1 %1267 }
 0x339   : > { %5687 = vrot.lane.b32.xlu0 %v5686_v60, %s5847_s21  ;;  %1797 = vperm.xlu1 %5691, %v6881_v54   ;;  %v5848_v60 = vmov 9   ;;  %s5874_s21 = smov 124  }
 0x33b   : > { %v6876_v15 = vpop.permute.xlu0 %1269  ;;  %v6890_v58 = vpop.permute.xlu1 %1271 }
 0x33d   : > { %1801 = vperm.xlu0 %5692, %v6887_v20   ;;  %1805 = vperm.xlu1 %5691, %v6897_v44  }
 0x33f   : > { %v6892_v14 = vpop.permute.xlu0 %1273  ;;  %v6901_v11 = vpop.permute.xlu1 %1275 }
 0x341   : > { %5693 = vset.pattern.permute.xlu0 %v5848_v60  ;;  %1809 = vperm.xlu1 %5691, %v6908_v30  }
 0x342   : > { %1837 = vperm.xlu0 %5693, %v6881_v54  }
 0x343   : > { %v6903_v37 = vpop.permute.xlu0 %1277  ;;  %v6912_v48 = vpop.permute.xlu1 %1279 }
 0x345   : > { %5694 = vset.pattern.permute.xlu1 %v5848_v60 }
 0x346   : > { %1849 = vperm.xlu0 %5693, %v6908_v30   ;;  %1841 = vperm.xlu1 %5694, %v6887_v20  }
 0x347   : > { %v6914_v53 = vpop.permute.xlu0 %1281  ;;  %v6917_v49 = vpop.permute.xlu1 %1283 }
 0x34a   : > { %1845 = vperm.xlu1 %5694, %v6897_v44   ;;  %5696 = vset.pattern.permute.xlu0 %v5849_v4 }
 0x34b   : > { %v6919_v45 = vpop.permute.xlu0 %1359  ;;  %v6922_v50 = vpop.permute.xlu1 %1357 }
 0x34e   : > { %5695 = vset.pattern.permute.xlu1 %v5849_v4 }
 0x34f   : > { %v6924_v24 = vpop.permute.xlu0 %1363  ;;  %v6926_v22 = vpop.permute.xlu1 %1361 }
 0x353   : > { %v6928_v40 = vpop.permute.xlu0 %1367  ;;  %v6930_v62 = vpop.permute.xlu1 %1365 }
 0x357   : > { %v6932_v41 = vpop.permute.xlu0 %1371  ;;  %v6934_v60 = vpop.permute.xlu1 %1369 }
 0x35b   : > { %v6936_v33 = vpop.permute.xlu0 %1375  ;;  %v6938_v34 = vpop.permute.xlu1 %1373 }
 0x35c   : > { %10555 = vst [vmem:[#allocation100_spill] sm:$0xff] %v6936_v33  ;;  %10556 = vst [vmem:[#allocation101_spill] sm:$0xff] %v6938_v34 }
 0x35f   : > { %v6940_v43 = vpop.permute.xlu0 %1379  ;;  %v6942_v38 = vpop.permute.xlu1 %1377 }
 0x360   : > { %10557 = vst [vmem:[#allocation102_spill] sm:$0xff] %v6942_v38 }
 0x363   : > { %v6944_v19 = vpop.permute.xlu0 %1453  ;;  %v6946_v35 = vpop.permute.xlu1 %1455 }
 0x364   : > { %10558 = vst [vmem:[#allocation103_spill] sm:$0xff] %v6944_v19  ;;  %10559 = vst [vmem:[#allocation104_spill] sm:$0xff] %v6946_v35 }
 0x367   : > { %v6948_v25 = vpop.permute.xlu0 %1457  ;;  %v6950_v1 = vpop.permute.xlu1 %1459 }
 0x368   : > { %10560 = vst [vmem:[#allocation105_spill] sm:$0xff] %v6950_v1 }
 0x36b   : > { %v6952_v3 = vpop.permute.xlu0 %1461  ;;  %v6954_v13 = vpop.permute.xlu1 %1463 }
 0x36c   : > { %10561 = vst [vmem:[#allocation106_spill] sm:$0xff] %v6952_v3 }
 0x36f   : > { %v6956_v59 = vpop.permute.xlu0 %1465  ;;  %v6958_v4 = vpop.permute.xlu1 %1467 }
 0x370   : > { %10562 = vst [vmem:[#allocation107_spill] sm:$0xff] %v6956_v59  ;;  %10563 = vst [vmem:[#allocation108_spill] sm:$0xff] %v6958_v4 }
 0x373   : > { %v6960_v39 = vpop.permute.xlu0 %1469  ;;  %v6962_v7 = vpop.permute.xlu1 %1471 }
 0x374   : > { %10564 = vst [vmem:[#allocation109_spill] sm:$0xff] %v6960_v39  ;;  %10565 = vst [vmem:[#allocation110_spill] sm:$0xff] %v6962_v7 }
 0x377   : > { %v6964_v23 = vpop.permute.xlu0 %1473  ;;  %v6966_v47 = vpop.permute.xlu1 %1475 }
 0x378   : > { %10566 = vst [vmem:[#allocation111_spill] sm:$0xff] %v6964_v23  ;;  %10567 = vst [vmem:[#allocation112_spill] sm:$0xff] %v6966_v47 }
 0x37b   : > { %v6968_v33 = vpop.permute.xlu0 %1551  ;;  %v6970_v38 = vpop.permute.xlu1 %1549 }
 0x37c   : > { %10568 = vst [vmem:[#allocation113_spill] sm:$0xff] %v6968_v33  ;;  %10569 = vst [vmem:[#allocation114_spill] sm:$0xff] %v6970_v38 }
 0x37f   : > { %v6972_v1 = vpop.permute.xlu0 %1555  ;;  %v6974_v3 = vpop.permute.xlu1 %1553 }
 0x380   : > { %10570 = vst [vmem:[#allocation115_spill] sm:$0xff] %v6972_v1  ;;  %10571 = vst [vmem:[#allocation116_spill] sm:$0xff] %v6974_v3 }
 0x383   : > { %v6976_v19 = vpop.permute.xlu0 %1559  ;;  %v6978_v59 = vpop.permute.xlu1 %1557 }
 0x384   : > { %10572 = vst [vmem:[#allocation117_spill] sm:$0xff] %v6978_v59 }
 0x387   : > { %v6980_v4 = vpop.permute.xlu0 %1563  ;;  %v6982_v39 = vpop.permute.xlu1 %1561 }
 0x388   : > { %10573 = vst [vmem:[#allocation118_spill] sm:$0xff] %v6980_v4  ;;  %10574 = vst [vmem:[#allocation119_spill] sm:$0xff] %v6982_v39 }
 0x38b   : > { %v6984_v7 = vpop.permute.xlu0 %1567  ;;  %v6986_v23 = vpop.permute.xlu1 %1565 }
 0x38c   : > { %10575 = vst [vmem:[#allocation120_spill] sm:$0xff] %v6984_v7  ;;  %10576 = vst [vmem:[#allocation121_spill] sm:$0xff] %v6986_v23 }
 0x38f   : > { %v6988_v35 = vpop.permute.xlu0 %1571  ;;  %v6990_v33 = vpop.permute.xlu1 %1569 }
 0x390   : > { %10577 = vst [vmem:[#allocation122_spill] sm:$0xff] %v6988_v35  ;;  %10578 = vst [vmem:[#allocation123_spill] sm:$0xff] %v6990_v33 }
 0x393   : > { %v6992_v38 = vpop.permute.xlu0 %1645  ;;  %v6994_v1 = vpop.permute.xlu1 %1647 }
 0x394   : > { %10579 = vst [vmem:[#allocation124_spill] sm:$0xff] %v6992_v38  ;;  %10580 = vst [vmem:[#allocation125_spill] sm:$0xff] %v6994_v1 }
 0x397   : > { %v6996_v3 = vpop.permute.xlu0 %1649  ;;  %v6998_v34 = vpop.permute.xlu1 %1651 }
 0x398   : > { %10581 = vst [vmem:[#allocation126_spill] sm:$0xff] %v6996_v3  ;;  %10582 = vst [vmem:[#allocation127_spill] sm:$0xff] %v6998_v34 }
 0x39b   : > { %v7000_v59 = vpop.permute.xlu0 %1653  ;;  %v7002_v4 = vpop.permute.xlu1 %1655 }
 0x39c   : > { %10583 = vst [vmem:[#allocation128_spill] sm:$0xff] %v7000_v59  ;;  %10584 = vst [vmem:[#allocation129_spill] sm:$0xff] %v7002_v4 }
 0x39f   : > { %v7004_v39 = vpop.permute.xlu0 %1657  ;;  %v7006_v7 = vpop.permute.xlu1 %1659 }
 0x3a0   : > { %10585 = vst [vmem:[#allocation130_spill] sm:$0xff] %v7004_v39  ;;  %10586 = vst [vmem:[#allocation131_spill] sm:$0xff] %v7006_v7 }
 0x3a3   : > { %v7008_v23 = vpop.permute.xlu0 %1661  ;;  %v7010_v35 = vpop.permute.xlu1 %1663 }
 0x3a4   : > { %10587 = vst [vmem:[#allocation132_spill] sm:$0xff] %v7008_v23  ;;  %10588 = vst [vmem:[#allocation133_spill] sm:$0xff] %v7010_v35 }
 0x3a7   : > { %v7012_v33 = vpop.permute.xlu0 %1665  ;;  %v7014_v38 = vpop.permute.xlu1 %1667 }
 0x3a8   : > { %10589 = vst [vmem:[#allocation134_spill] sm:$0xff] %v7012_v33  ;;  %10590 = vst [vmem:[#allocation135_spill] sm:$0xff] %v7014_v38 }
 0x3ab   : > { %v7016_v1 = vpop.permute.xlu0 %5687 }
 0x3b8   : > { %v7018_v3 = vpop.permute.xlu1 %1797 }
 0x3b9   : > { %10591 = vst [vmem:[#allocation136_spill] sm:$0xff] %v7018_v3 }
 0x3bc   : > { %v7020_v34 = vpop.permute.xlu0 %1801  ;;  %v7022_v59 = vpop.permute.xlu1 %1805 }
 0x3bd   : > { %10592 = vst [vmem:[#allocation137_spill] sm:$0xff] %v7020_v34  ;;  %10593 = vst [vmem:[#allocation138_spill] sm:$0xff] %v7022_v59 }
 0x3c0   : > { %v7026_v23 = vpop.permute.xlu1 %1809 }
 0x3c1   : > { %v1838_v4 = vpop.permute.xlu0 %1837  ;;  %10594 = vst [vmem:[#allocation139_spill] sm:$0xff] %v7026_v23 }
 0x3c2   : > { %v1852_v39 = vmul.f32 %v1838_v4, %v6227_v12  ;;  %v1853_v7 = vmul.f32 %v1838_v4, %v6224_v6  ;;  %v1854_v35 = vmul.f32 %v1838_v4, %v6234_v46 }
 0x3c4   : > { %1878 = vrot.lane.b32.xlu0 %v1853_v7, %s5839_s15  ;;  %1876 = vrot.lane.b32.xlu1 %v1852_v39, %s5839_s15 }
 0x3c5   : > { %v1842_v3 = vpop.permute.xlu1 %1841  ;;  %v1850_v4 = vpop.permute.xlu0 %1849 }
 0x3c6   : > { %v1855_v34 = vmul.f32 %v1842_v3, %v6242_v36  ;;  %v1856_v59 = vmul.f32 %v1842_v3, %v6248_v27  ;;  %v1857_v23 = vmul.f32 %v1842_v3, %v6257_v42  ;;  %v1863_v3 = vmul.f32 %v1850_v4, %v6288_v2 }
 0x3c8   : > { %1880 = vrot.lane.b32.xlu1 %v1854_v35, %s5839_s15  ;;  %1882 = vrot.lane.b32.xlu0 %v1855_v34, %s5839_s15  ;;  %v1862_v34 = vmul.f32 %v1850_v4, %v6279_v29 }
 0x3c9   : > { %v1846_v33 = vpop.permute.xlu1 %1845 }
 0x3ca   : > { %v1858_v7 = vmul.f32 %v1846_v33, %v6253_v56  ;;  %v1859_v39 = vmul.f32 %v1846_v33, %v6266_v52  ;;  %v1860_v35 = vmul.f32 %v1846_v33, %v6269_v9  ;;  %v5850_v33 = vmov 23  }
 0x3cc   : > { %1884 = vrot.lane.b32.xlu1 %v1856_v59, %s5839_s15  ;;  %1886 = vrot.lane.b32.xlu0 %v1857_v23, %s5839_s15  ;;  %v1861_v59 = vmul.f32 %v1850_v4, %v6276_v32 }
 0x3d0   : > { %1888 = vrot.lane.b32.xlu1 %v1858_v7, %s5839_s15  ;;  %1890 = vrot.lane.b32.xlu0 %v1859_v39, %s5839_s15 }
 0x3d4   : > { %1892 = vrot.lane.b32.xlu1 %v1860_v35, %s5839_s15  ;;  %1894 = vrot.lane.b32.xlu0 %v1861_v59, %s5839_s15 }
 0x3d8   : > { %1896 = vrot.lane.b32.xlu1 %v1862_v34, %s5839_s15  ;;  %1898 = vrot.lane.b32.xlu0 %v1863_v3, %s5839_s15 }
 0x3dc   : > { %1933 = vperm.xlu1 %5695, %v6881_v54   ;;  %1937 = vperm.xlu0 %5696, %v6887_v20  }
 0x3e0   : > { %1941 = vperm.xlu1 %5695, %v6897_v44   ;;  %5697 = vset.pattern.permute.xlu0 %v5850_v33 }
 0x3e4   : > { %1945 = vperm.xlu1 %5695, %v6908_v30  }
 0x3e8   : > { %5698 = vset.pattern.permute.xlu1 %v5850_v33 }
 0x436   : > { %v7054_v23 = vpop.permute.xlu1 %1876  ;;  %v7056_v7 = vpop.permute.xlu0 %1878 }
 0x437   : > { %10595 = vst [vmem:[#allocation140_spill] sm:$0xff] %v7054_v23  ;;  %10596 = vst [vmem:[#allocation141_spill] sm:$0xff] %v7056_v7 }
 0x43a   : > { %v7058_v39 = vpop.permute.xlu1 %1880  ;;  %v7060_v35 = vpop.permute.xlu0 %1882 }
 0x43b   : > { %10597 = vst [vmem:[#allocation142_spill] sm:$0xff] %v7058_v39  ;;  %10598 = vst [vmem:[#allocation143_spill] sm:$0xff] %v7060_v35 }
 0x43e   : > { %v7062_v4 = vpop.permute.xlu1 %1884  ;;  %v7064_v59 = vpop.permute.xlu0 %1886 }
 0x43f   : > { %10599 = vst [vmem:[#allocation144_spill] sm:$0xff] %v7062_v4  ;;  %10600 = vst [vmem:[#allocation145_spill] sm:$0xff] %v7064_v59  ;;  %v10615_v59 = vld [vmem:[#allocation6_spill] sm:$0xff] }
 0x440   : > { %v1101_v4 = vmul.f32 %v10615_v59, %v6227_v12 }
 0x442   : > { %v7066_v34 = vpop.permute.xlu1 %1888  ;;  %v7068_v3 = vpop.permute.xlu0 %1890 }
 0x443   : > { %10601 = vst [vmem:[#allocation146_spill] sm:$0xff] %v7066_v34  ;;  %10602 = vst [vmem:[#allocation147_spill] sm:$0xff] %v7068_v3 }
 0x446   : > { %v7070_v38 = vpop.permute.xlu1 %1892  ;;  %v7072_v47 = vpop.permute.xlu0 %1894 }
 0x447   : > { %10603 = vst [vmem:[#allocation148_spill] sm:$0xff] %v7070_v38  ;;  %10604 = vst [vmem:[#allocation149_spill] sm:$0xff] %v7072_v47 }
 0x44a   : > { %v7074_v33 = vpop.permute.xlu1 %1896  ;;  %v7076_v23 = vpop.permute.xlu0 %1898 }
 0x44b   : > { %10605 = vst [vmem:[#allocation150_spill] sm:$0xff] %v7074_v33  ;;  %10606 = vst [vmem:[#allocation151_spill] sm:$0xff] %v7076_v23 }
 0x45b   : > { %v1934_v7 = vpop.permute.xlu1 %1933  ;;  %v1938_v34 = vpop.permute.xlu0 %1937 }
 0x45c   : > { %v1948_v39 = vmul.f32 %v1934_v7, %v6227_v12  ;;  %v1949_v35 = vmul.f32 %v1934_v7, %v6224_v6  ;;  %v1950_v3 = vmul.f32 %v1934_v7, %v6234_v46  ;;  %v1951_v38 = vmul.f32 %v1938_v34, %v6242_v36 }
 0x45d   : > { %v1952_v23 = vmul.f32 %v1938_v34, %v6248_v27  ;;  %v1953_v33 = vmul.f32 %v1938_v34, %v6257_v42 }
 0x45e   : > { %1974 = vrot.lane.b32.xlu1 %v1949_v35, %s5840_s16  ;;  %1972 = vrot.lane.b32.xlu0 %v1948_v39, %s5840_s16 }
 0x45f   : > { %v1942_v47 = vpop.permute.xlu1 %1941 }
 0x460   : > { %v1954_v39 = vmul.f32 %v1942_v47, %v6253_v56  ;;  %v1955_v35 = vmul.f32 %v1942_v47, %v6266_v52 }
 0x462   : > { %1976 = vrot.lane.b32.xlu0 %v1950_v3, %s5840_s16  ;;  %1978 = vrot.lane.b32.xlu1 %v1951_v38, %s5840_s16  ;;  %v1956_v38 = vmul.f32 %v1942_v47, %v6269_v9  ;;  %v5851_v47 = vmov 30  }
 0x463   : > { %v1946_v7 = vpop.permute.xlu1 %1945 }
 0x464   : > { %v1957_v3 = vmul.f32 %v1946_v7, %v6276_v32  ;;  %v1959_v34 = vmul.f32 %v1946_v7, %v6288_v2 }
 0x466   : > { %1980 = vrot.lane.b32.xlu0 %v1952_v23, %s5840_s16  ;;  %1982 = vrot.lane.b32.xlu1 %v1953_v33, %s5840_s16  ;;  %v1958_v23 = vmul.f32 %v1946_v7, %v6279_v29 }
 0x46a   : > { %1984 = vrot.lane.b32.xlu0 %v1954_v39, %s5840_s16  ;;  %1986 = vrot.lane.b32.xlu1 %v1955_v35, %s5840_s16 }
 0x46e   : > { %1988 = vrot.lane.b32.xlu0 %v1956_v38, %s5840_s16  ;;  %1990 = vrot.lane.b32.xlu1 %v1957_v3, %s5840_s16 }
 0x472   : > { %1992 = vrot.lane.b32.xlu0 %v1958_v23, %s5840_s16  ;;  %1994 = vrot.lane.b32.xlu1 %v1959_v34, %s5840_s16 }
 0x476   : > { %2029 = vperm.xlu0 %5697, %v6881_v54   ;;  %2033 = vperm.xlu1 %5698, %v6887_v20   ;;  %v1190_v54 = vsel %vm587_vm5, %v6794_v10, %v6813_v5 }
 0x47a   : > { %2041 = vperm.xlu0 %5697, %v6908_v30   ;;  %2037 = vperm.xlu1 %5698, %v6897_v44  }
 0x47e   : > { %5700 = vset.pattern.permute.xlu0 %v5851_v47  ;;  %5699 = vset.pattern.permute.xlu1 %v5851_v47  ;;  %v1102_v47 = vmul.f32 %v10615_v59, %v6224_v6 }
 0x4d0   : > { %v7106_v33 = vpop.permute.xlu0 %1972  ;;  %v7108_v39 = vpop.permute.xlu1 %1974 }
 0x4d1   : > { %10607 = vst [vmem:[#allocation152_spill] sm:$0xff] %v7106_v33  ;;  %10608 = vst [vmem:[#allocation153_spill] sm:$0xff] %v7108_v39  ;;  %v10616_v33 = vld [vmem:[#allocation7_spill] sm:$0xff] }
 0x4d2   : > { %v1107_v39 = vmul.f32 %v10616_v33, %v6253_v56  ;;  %v1108_v44 = vmul.f32 %v10616_v33, %v6266_v52 }
 0x4d4   : > { %v7110_v35 = vpop.permute.xlu0 %1976  ;;  %v7112_v7 = vpop.permute.xlu1 %1978 }
 0x4d5   : > { %10609 = vst [vmem:[#allocation154_spill] sm:$0xff] %v7110_v35  ;;  %10610 = vst [vmem:[#allocation155_spill] sm:$0xff] %v7112_v7  ;;  %v10618_v7 = vld [vmem:[#allocation9_spill] sm:$0xff] }
 0x4d8   : > { %v7114_v38 = vpop.permute.xlu0 %1980  ;;  %v7116_v3 = vpop.permute.xlu1 %1982 }
 0x4d9   : > { %10611 = vst [vmem:[#allocation156_spill] sm:$0xff] %v7114_v38  ;;  %10612 = vst [vmem:[#allocation157_spill] sm:$0xff] %v7116_v3  ;;  %v1104_v38 = vmul.f32 %v10618_v7, %v6242_v36  ;;  %v1105_v3 = vmul.f32 %v10618_v7, %v6248_v27 }
 0x4dc   : > { %v7118_v23 = vpop.permute.xlu0 %1984  ;;  %v7120_v34 = vpop.permute.xlu1 %1986 }
 0x4dd   : > { %10613 = vst [vmem:[#allocation158_spill] sm:$0xff] %v7118_v23  ;;  %10614 = vst [vmem:[#allocation159_spill] sm:$0xff] %v7120_v34  ;;  %v1103_v23 = vmul.f32 %v10615_v59, %v6234_v46  ;;  %v10619_v34 = vld [vmem:[#allocation8_spill] sm:$0xff]  ;;  %v1106_v59 = vmul.f32 %v10618_v7, %v6257_v42 }
 0x4de   : > { %v1110_v30 = vmul.f32 %v10619_v34, %v6276_v32  ;;  %v1111_v20 = vmul.f32 %v10619_v34, %v6279_v29  ;;  %v1109_v32 = vmul.f32 %v10616_v33, %v6269_v9  ;;  %v1191_v29 = vsel %vm587_vm5, %v6804_v31, %v6823_v0 }
 0x4df   : > { %v1112_v7 = vmul.f32 %v10619_v34, %v6288_v2  ;;  %v1211_v33 = vadd.f32 %v6813_v5, %v1103_v23  ;;  %v1210_v31 = vadd.f32 %v1190_v54, %v1102_v47  ;;  %v1214_v9 = vadd.f32 %v6815_v18, %v1106_v59 }
 0x4e0   : > { %v7128_v35 = vpop.permute.xlu0 %1988  ;;  %v7152_v56 = vpop.permute.xlu1 %1990  ;;  %v1217_v23 = vadd.f32 %v6849_v63, %v1109_v32  ;;  %v1382_v59 = vsel %vm765_vm7, %v6919_v45, %v6926_v22 }
 0x4e1   : > { %10617 = vst [vmem:[#allocation6_spill] sm:$0xff] %v7128_v35  ;;  %v1189_v35 = vsel %vm587_vm5, %v6802_v16, %v6794_v10  ;;  %10620 = vst [vmem:[#allocation7_spill] sm:$0xff] %v7152_v56  ;;  %v1192_v16 = vsel %vm587_vm5, %v6823_v0, %v6815_v18  ;;  %v1193_v10 = vsel %vm587_vm5, %v6837_v61, %v6825_v26 }
 0x4e2   : > { %v1209_v52 = vadd.f32 %v1189_v35, %v1101_v4  ;;  %v1194_v56 = vsel %vm587_vm5, %v6825_v26, %v6849_v63  ;;  %v1195_v0 = vsel %vm587_vm5, %v6839_v17, %v6861_v55  ;;  %v1196_v61 = vsel %vm587_vm5, %v6861_v55, %v6851_v21 }
 0x4e3   : > { %v1212_v4 = vadd.f32 %v1191_v29, %v1104_v38  ;;  %v1213_v35 = vadd.f32 %v1192_v16, %v1105_v3  ;;  %v1215_v5 = vadd.f32 %v1193_v10, %v1107_v39  ;;  %v1216_v2 = vadd.f32 %v1194_v56, %v1108_v44 }
 0x4e4   : > { %v7176_v34 = vpop.permute.xlu0 %1992  ;;  %v1220_v26 = vadd.f32 %v6851_v21, %v1112_v7  ;;  %v1285_v18 = vsel %vm676_vm6, %v6863_v51, %v6869_v8  ;;  %v1286_v17 = vsel %vm676_vm6, %v6869_v8, %v6871_v28  ;;  %v1218_v54 = vadd.f32 %v1195_v0, %v1110_v30  ;;  %v7194_v32 = vpop.permute.xlu1 %1994 }
 0x4e5   : > { %v7186_v55 = vadd.f32 %v1196_v61, %v1111_v20  ;;  %v1287_v29 = vsel %vm676_vm6, %v6874_v57, %v6876_v15  ;;  %v1288_v56 = vsel %vm676_vm6, %v6876_v15, %v6890_v58  ;;  %v1310_v51 = vadd.f32 %v6890_v58, %v1214_v9 }
 0x4e6   : > { %v1289_v63 = vsel %vm676_vm6, %v6892_v14, %v6901_v11  ;;  %v1290_v30 = vsel %vm676_vm6, %v6901_v11, %v6903_v37  ;;  %v1291_v57 = vsel %vm676_vm6, %v6912_v48, %v6914_v53  ;;  %v1305_v8 = vadd.f32 %v1285_v18, %v1209_v52 }
 0x4e7   : > { %v1306_v15 = vadd.f32 %v1286_v17, %v1210_v31  ;;  %v1307_v20 = vadd.f32 %v6871_v28, %v1211_v33  ;;  %v1308_v9 = vadd.f32 %v1287_v29, %v1212_v4  ;;  %v1309_v58 = vadd.f32 %v1288_v56, %v1213_v35  ;;  %v10621_v4 = vld [vmem:[#allocation112_spill] sm:$0xff] }
 0x4e8   : > { %v1406_v14 = vadd.f32 %v6928_v40, %v1310_v51  ;;  %v1311_v38 = vadd.f32 %v1289_v63, %v1215_v5  ;;  %v1312_v11 = vadd.f32 %v1290_v30, %v1216_v2  ;;  %v1313_v3 = vadd.f32 %v6903_v37, %v1217_v23  ;;  %v10622_v5 = vld [vmem:[#allocation129_spill] sm:$0xff]  ;;  %v10624_v17 = vld [vmem:[#allocation104_spill] sm:$0xff]  ;;  %v10626_v51 = vld [vmem:[#allocation122_spill] sm:$0xff] }
 0x4e9   : > { %v7211_v47 = vadd.f32 %v1291_v57, %v1218_v54  ;;  %v1316_v52 = vadd.f32 %v6917_v49, %v1220_v26  ;;  %v1381_v28 = vsel %vm765_vm7, %v6922_v50, %v6919_v45  ;;  %v7228_v37 = vsel %vm676_vm6, %v6914_v53, %v6917_v49  ;;  %v10623_v26 = vld [vmem:[#allocation101_spill] sm:$0xff] }
 0x4ea   : > { %v1502_v2 = vadd.f32 %v6954_v13, %v1406_v14  ;;  %v1403_v16 = vadd.f32 %v6926_v22, %v1307_v20  ;;  %v1383_v10 = vsel %vm765_vm7, %v6924_v24, %v6930_v62  ;;  %v5690_v33 = vunpack.i.h.bf16 %v7016_v1  ;;  %v10627_v57 = vld [vmem:[#allocation109_spill] sm:$0xff] }
 0x4eb   : > { %v1412_v7 = vadd.f32 %v6940_v43, %v1316_v52  ;;  %v1401_v0 = vadd.f32 %v1381_v28, %v1305_v8  ;;  %v1402_v53 = vadd.f32 %v1382_v59, %v1306_v15  ;;  %v1384_v22 = vsel %vm765_vm7, %v6930_v62, %v6928_v40  ;;  %v10625_v62 = vld [vmem:[#allocation116_spill] sm:$0xff]  ;;  %v10628_v8 = vld [vmem:[#allocation113_spill] sm:$0xff]  ;;  %v10632_v52 = vld [vmem:[#allocation106_spill] sm:$0xff] }
 0x4ec   : > { %v1598_v45 = vadd.f32 %v6976_v19, %v1502_v2  ;;  %v1499_v49 = vadd.f32 %v6948_v25, %v1403_v16  ;;  %v1404_v24 = vadd.f32 %v1383_v10, %v1308_v9  ;;  %v1385_v61 = vsel %vm765_vm7, %v6934_v60, %v6932_v41  ;;  %v10633_v28 = vld [vmem:[#allocation105_spill] sm:$0xff] }
 0x4ed   : > { %v1508_v35 = vadd.f32 %v10621_v4, %v1412_v7  ;;  %v1409_v18 = vadd.f32 %v10623_v26, %v1313_v3  ;;  %v1478_v40 = vsel %vm854_vm8, %v10624_v17, %v6948_v25  ;;  %v1405_v56 = vadd.f32 %v1384_v22, %v1309_v58  ;;  %v10629_v25 = vld [vmem:[#allocation126_spill] sm:$0xff]  ;;  %v10630_v58 = vld [vmem:[#allocation103_spill] sm:$0xff]  ;;  %v10634_v2 = vld [vmem:[#allocation121_spill] sm:$0xff] }
 0x4ee   : > { %v1694_v23 = vadd.f32 %v10622_v5, %v1598_v45  ;;  %v1595_v54 = vadd.f32 %v10625_v62, %v1499_v49  ;;  %v1386_v60 = vsel %vm765_vm7, %v6932_v41, %v10623_v26  ;;  %v1574_v15 = vsel %vm943_vm9, %v10628_v8, %v10625_v62  ;;  %v10635_v16 = vld [vmem:[#allocation125_spill] sm:$0xff]  ;;  %v10636_v7 = vld [vmem:[#allocation114_spill] sm:$0xff] }
 0x4ef   : > { %v1604_v63 = vadd.f32 %v10626_v51, %v1508_v35  ;;  %v1407_v9 = vadd.f32 %v1385_v61, %v1311_v38  ;;  %v1477_v41 = vsel %vm854_vm8, %v10630_v58, %v10624_v17  ;;  %v1498_v14 = vadd.f32 %v1478_v40, %v1402_v53  ;;  %v10637_v49 = vld [vmem:[#allocation117_spill] sm:$0xff]  ;;  %v10638_v61 = vld [vmem:[#allocation115_spill] sm:$0xff]  ;;  %v10640_v40 = vld [vmem:[#allocation124_spill] sm:$0xff] }
 0x4f0   : > { %v1728_v30 = vmul.f32 %v5690_v33, %v1694_v23  ;;  %v1691_v20 = vadd.f32 %v10629_v25, %v1595_v54  ;;  %v1479_v59 = vsel %vm854_vm8, %v10633_v28, %v10632_v52  ;;  %v1670_v38 = vsel %vm1032_vm10, %v10635_v16, %v10629_v25  ;;  %v10639_v23 = vld [vmem:[#allocation132_spill] sm:$0xff] }
 0x4f1   : > { %v1573_v45 = vsel %vm943_vm9, %v10636_v7, %v10628_v8  ;;  %v1497_v22 = vadd.f32 %v1477_v41, %v1401_v0  ;;  %v1575_v35 = vsel %vm943_vm9, %v10638_v61, %v10637_v49  ;;  %v1500_v17 = vadd.f32 %v1479_v59, %v1404_v24  ;;  %v10641_v54 = vld [vmem:[#allocation108_spill] sm:$0xff]  ;;  %v10652_v61 = vld [vmem:[#allocation123_spill] sm:$0xff] }
 0x4f2   : > { %v1725_v10 = vmul.f32 %v5690_v33, %v1691_v20  ;;  %v1669_v0 = vsel %vm1032_vm10, %v10640_v40, %v10635_v16  ;;  %v1576_v20 = vsel %vm943_vm9, %v10637_v49, %v6976_v19 }
 0x4f3   : > { %v1596_v25 = vadd.f32 %v1575_v35, %v1500_v17  ;;  %v10653_v35 = vld [vmem:[#allocation120_spill] sm:$0xff]  ;;  %v10654_v17 = vld [vmem:[#allocation130_spill] sm:$0xff] }
 0x4f5   : > { %v2030_v21 = vpop.permute.xlu0 %2029  ;;  %v7213_v48 = vpop.permute.xlu1 %2033 }
 0x4f6   : > { %v2044_v44 = vmul.f32 %v2030_v21, %v6227_v12  ;;  %v2045_v39 = vmul.f32 %v2030_v21, %v6224_v6  ;;  %v2046_v50 = vmul.f32 %v2030_v21, %v6234_v46  ;;  %v2047_v31 = vmul.f32 %v7213_v48, %v6242_v36 }
 0x4f7   : > { %v2048_v29 = vmul.f32 %v7213_v48, %v6248_v27  ;;  %v1505_v21 = vadd.f32 %v10627_v57, %v1409_v18 }
 0x4f8   : > { %2068 = vrot.lane.b32.xlu1 %v2044_v44, %s5841_s17  ;;  %2070 = vrot.lane.b32.xlu0 %v2045_v39, %s5841_s17  ;;  %v7268_v44 = vunpack.i.l.bf16 %v7016_v1  ;;  %v10631_v39 = vld [vmem:[#allocation135_spill] sm:$0xff] }
 0x4f9   : > { %v1700_v3 = vadd.f32 %v10631_v39, %v1604_v63  ;;  %v1601_v1 = vadd.f32 %v10634_v2, %v1505_v21  ;;  %v10642_v63 = vld [vmem:[#allocation128_spill] sm:$0xff] }
 0x4fa   : > { %v1719_v18 = vsel %vm394_vm1, %v7268_v44, %v5690_v33  ;;  %v1672_v19 = vsel %vm1032_vm10, %v10642_v63, %v10622_v5 }
 0x4fb   : > { %v1734_v53 = vmul.f32 %v5690_v33, %v1700_v3  ;;  %v1697_v26 = vadd.f32 %v10639_v23, %v1601_v1 }
 0x4fc   : > { %2072 = vrot.lane.b32.xlu1 %v2046_v50, %s5841_s17  ;;  %2074 = vrot.lane.b32.xlu0 %v2047_v31, %s5841_s17  ;;  %v1408_v50 = vadd.f32 %v1386_v60, %v1312_v11  ;;  %v1594_v31 = vadd.f32 %v1574_v15, %v1498_v14  ;;  %v1480_v11 = vsel %vm854_vm8, %v10632_v52, %v6954_v13  ;;  %v10644_v15 = vld [vmem:[#allocation102_spill] sm:$0xff]  ;;  %v10645_v13 = vld [vmem:[#allocation100_spill] sm:$0xff]  ;;  %v10647_v52 = vld [vmem:[#allocation107_spill] sm:$0xff] }
 0x4fd   : > { %v1593_v60 = vadd.f32 %v1573_v45, %v1497_v22  ;;  %v1731_v8 = vmul.f32 %v5690_v33, %v1697_v26  ;;  %v1387_v24 = vsel %vm765_vm7, %v10645_v13, %v10644_v15  ;;  %v1501_v41 = vadd.f32 %v1480_v11, %v1405_v56  ;;  %v10646_v14 = vld [vmem:[#allocation118_spill] sm:$0xff]  ;;  %v10651_v45 = vld [vmem:[#allocation119_spill] sm:$0xff] }
 0x4fe   : > { %v1690_v62 = vadd.f32 %v1670_v38, %v1594_v31  ;;  %v1578_v3 = vsel %vm943_vm9, %v10646_v14, %v10634_v2  ;;  %v1481_v28 = vsel %vm854_vm8, %v10647_v52, %v10641_v54  ;;  %v10649_v56 = vld [vmem:[#allocation110_spill] sm:$0xff]  ;;  %v10650_v38 = vld [vmem:[#allocation131_spill] sm:$0xff]  ;;  %v1577_v5 = vsel %vm943_vm9, %v10651_v45, %v10646_v14 }
 0x4ff   : > { %v1689_v33 = vadd.f32 %v1669_v0, %v1593_v60  ;;  %v1597_v2 = vadd.f32 %v1576_v20, %v1501_v41  ;;  %v1315_v22 = vadd.f32 %v7228_v37, %v7186_v55  ;;  %v1503_v49 = vadd.f32 %v1481_v28, %v1407_v9  ;;  %v10655_v9 = vld [vmem:[#allocation134_spill] sm:$0xff] }
 0x500   : > { %2076 = vrot.lane.b32.xlu1 %v2048_v29, %s5841_s17  ;;  %1757 = vrot.lane.b32.xlu0 %v1728_v30, %s5852_s9  ;;  %v1482_v29 = vsel %vm854_vm8, %v10641_v54, %v10627_v57  ;;  %v10643_v30 = vld [vmem:[#allocation127_spill] sm:$0xff]  ;;  %v1724_v58 = vmul.f32 %v1719_v18, %v1690_v62  ;;  %v1388_v57 = vsel %vm765_vm7, %v10644_v15, %v6940_v43  ;;  %v10656_v62 = vld [vmem:[#allocation133_spill] sm:$0xff]  ;;  %v10658_v14 = vld [vmem:[#allocation18_spill] sm:$0xff] }
 0x501   : > { %v1671_v21 = vsel %vm1032_vm10, %v10643_v30, %v10642_v63  ;;  %v1504_v59 = vadd.f32 %v1482_v29, %v1408_v50  ;;  %v10648_v43 = vld [vmem:[#allocation111_spill] sm:$0xff]  ;;  %v1723_v7 = vmul.f32 %v7268_v44, %v1689_v33  ;;  %v1410_v50 = vadd.f32 %v1387_v24, %v7211_v47  ;;  %v2042_v33 = vpop.permute.xlu0 %2041 }
 0x502   : > { %v1692_v1 = vadd.f32 %v1671_v21, %v1596_v25  ;;  %v1483_v16 = vsel %vm854_vm8, %v10649_v56, %v10648_v43  ;;  %v1579_v26 = vsel %vm943_vm9, %v10653_v35, %v10652_v61  ;;  %v1484_v47 = vsel %vm854_vm8, %v10648_v43, %v10621_v4  ;;  %v10663_v43 = vld [vmem:[#allocation10_spill] sm:$0xff]  ;;  %v10664_v56 = vld [vmem:[#allocation97_spill] sm:$0xff] }
 0x503   : > { %v1600_v31 = vadd.f32 %v1578_v3, %v1504_v59  ;;  %v1506_v11 = vadd.f32 %v1483_v16, %v1410_v50  ;;  %v1673_v40 = vsel %vm1032_vm10, %v10654_v17, %v10650_v38  ;;  %v1411_v55 = vadd.f32 %v1388_v57, %v1315_v22  ;;  %v2038_v57 = vpop.permute.xlu1 %2037  ;;  %v10665_v16 = vld [vmem:[#allocation98_spill] sm:$0xff] }
 0x504   : > { %1751 = vrot.lane.b32.xlu1 %v1725_v10, %s5852_s9  ;;  %1769 = vrot.lane.b32.xlu0 %v1734_v53, %s5852_s9  ;;  %v1674_v10 = vsel %vm1032_vm10, %v10650_v38, %v10639_v23  ;;  %v1726_v53 = vmul.f32 %v7268_v44, %v1692_v1  ;;  %v1693_v23 = vadd.f32 %v1672_v19, %v1597_v2  ;;  %v10662_v19 = vld [vmem:[#allocation22_spill] sm:$0xff]  ;;  %v10666_v2 = vld [vmem:[#allocation99_spill] sm:$0xff]  ;;  %v5853_v38 = vmov 37  }
 0x505   : > { %v1696_v0 = vadd.f32 %v1674_v10, %v1600_v31  ;;  %v1599_v37 = vadd.f32 %v1577_v5, %v1503_v49  ;;  %v1675_v54 = vsel %vm1032_vm10, %v10656_v62, %v10655_v9  ;;  %v1602_v60 = vadd.f32 %v1579_v26, %v1506_v11 }
 0x506   : > { %v1727_v29 = vmul.f32 %v1719_v18, %v1693_v23  ;;  %v1580_v4 = vsel %vm943_vm9, %v10652_v61, %v10626_v51  ;;  %v1507_v30 = vadd.f32 %v1484_v47, %v1411_v55  ;;  %v2051_v3 = vmul.f32 %v2038_v57, %v10658_v14 }
 0x507   : > { %v1730_v63 = vmul.f32 %v1719_v18, %v1696_v0  ;;  %v1695_v21 = vadd.f32 %v1673_v40, %v1599_v37  ;;  %v1698_v15 = vadd.f32 %v1675_v54, %v1602_v60  ;;  %v2055_v1 = vmul.f32 %v2042_v33, %v10662_v19 }
 0x508   : > { %1763 = vrot.lane.b32.xlu1 %v1731_v8, %s5852_s9  ;;  %1749 = vrot.lane.b32.xlu0 %v1724_v58, %s5852_s9  ;;  %v1676_v8 = vsel %vm1032_vm10, %v10655_v9, %v10631_v39  ;;  %v1603_v13 = vadd.f32 %v1580_v4, %v1507_v30  ;;  %v2049_v58 = vmul.f32 %v7213_v48, %v6257_v42  ;;  %v10657_v39 = vld [vmem:[#allocation16_spill] sm:$0xff]  ;;  %v10661_v48 = vld [vmem:[#allocation21_spill] sm:$0xff] }
 0x509   : > { %v1729_v24 = vmul.f32 %v7268_v44, %v1695_v21  ;;  %v1732_v25 = vmul.f32 %v7268_v44, %v1698_v15  ;;  %v2050_v41 = vmul.f32 %v2038_v57, %v10657_v39  ;;  %v10659_v44 = vld [vmem:[#allocation19_spill] sm:$0xff]  ;;  %v2054_v59 = vmul.f32 %v2042_v33, %v10661_v48 }
 0x50a   : > { %v1699_v20 = vadd.f32 %v1676_v8, %v1603_v13  ;;  %v2052_v52 = vmul.f32 %v2038_v57, %v10659_v44 }
 0x50c   : > { %1747 = vrot.lane.b32.xlu1 %v1723_v7, %s5852_s9  ;;  %1753 = vrot.lane.b32.xlu0 %v1726_v53, %s5852_s9  ;;  %v1733_v51 = vmul.f32 %v1719_v18, %v1699_v20  ;;  %v10660_v18 = vld [vmem:[#allocation20_spill] sm:$0xff] }
 0x50d   : > { %v2053_v28 = vmul.f32 %v2042_v33, %v10660_v18  ;;  %v5854_v33 = vmov 44  }
 0x510   : > { %1755 = vrot.lane.b32.xlu1 %v1727_v29, %s5852_s9  ;;  %1761 = vrot.lane.b32.xlu0 %v1730_v63, %s5852_s9 }
 0x514   : > { %1759 = vrot.lane.b32.xlu1 %v1729_v24, %s5852_s9  ;;  %1765 = vrot.lane.b32.xlu0 %v1732_v25, %s5852_s9 }
 0x518   : > { %1767 = vrot.lane.b32.xlu1 %v1733_v51, %s5852_s9  ;;  %2078 = vrot.lane.b32.xlu0 %v2049_v58, %s5841_s17  ;;  %s5881_s9 = smov 5  }
 0x51c   : > { %2080 = vrot.lane.b32.xlu1 %v2050_v41, %s5841_s17  ;;  %2082 = vrot.lane.b32.xlu0 %v2051_v3, %s5841_s17 }
 0x520   : > { %2084 = vrot.lane.b32.xlu1 %v2052_v52, %s5841_s17  ;;  %2086 = vrot.lane.b32.xlu0 %v2053_v28, %s5841_s17 }
 0x524   : > { %2088 = vrot.lane.b32.xlu1 %v2054_v59, %s5841_s17  ;;  %2090 = vrot.lane.b32.xlu0 %v2055_v1, %s5841_s17 }
 0x528   : > { %2125 = vperm.xlu1 %5699, %v10663_v43   ;;  %2129 = vperm.xlu0 %5700, %v10664_v56  }
 0x52c   : > { %2133 = vperm.xlu1 %5699, %v10665_v16   ;;  %5701 = vset.pattern.permute.xlu0 %v5853_v38 }
 0x530   : > { %2137 = vperm.xlu1 %5699, %v10666_v2  }
 0x534   : > { %5702 = vset.pattern.permute.xlu1 %v5853_v38 }
 0x56a   : > { %v7386_v10 = vpop.permute.xlu1 %2068  ;;  %v7388_v7 = vpop.permute.xlu0 %2070 }
 0x56e   : > { %v7390_v50 = vpop.permute.xlu1 %2072  ;;  %v7392_v45 = vpop.permute.xlu0 %2074 }
 0x572   : > { %v7394_v5 = vpop.permute.xlu1 %2076  ;;  %v7396_v31 = vpop.permute.xlu0 %1757 }
 0x573   : > { %10667 = vst [vmem:[#allocation9_spill] sm:$0xff] %v7396_v31 }
 0x576   : > { %v7398_v53 = vpop.permute.xlu1 %1751  ;;  %v7400_v22 = vpop.permute.xlu0 %1769 }
 0x577   : > { %10668 = vst [vmem:[#allocation8_spill] sm:$0xff] %v7398_v53  ;;  %10669 = vst [vmem:[#allocation112_spill] sm:$0xff] %v7400_v22 }
 0x57a   : > { %v7402_v49 = vpop.permute.xlu1 %1763  ;;  %v7404_v61 = vpop.permute.xlu0 %1749 }
 0x57b   : > { %10670 = vst [vmem:[#allocation129_spill] sm:$0xff] %v7402_v49  ;;  %10671 = vst [vmem:[#allocation101_spill] sm:$0xff] %v7404_v61 }
 0x57e   : > { %v7406_v35 = vpop.permute.xlu1 %1747  ;;  %v7408_v26 = vpop.permute.xlu0 %1753 }
 0x57f   : > { %10672 = vst [vmem:[#allocation104_spill] sm:$0xff] %v7406_v35  ;;  %10673 = vst [vmem:[#allocation116_spill] sm:$0xff] %v7408_v26 }
 0x582   : > { %v7410_v23 = vpop.permute.xlu1 %1755  ;;  %v7412_v47 = vpop.permute.xlu0 %1761 }
 0x583   : > { %10674 = vst [vmem:[#allocation122_spill] sm:$0xff] %v7410_v23  ;;  %10675 = vst [vmem:[#allocation109_spill] sm:$0xff] %v7412_v47  ;;  %v10694_v23 = vld [vmem:[#allocation95_spill] sm:$0xff] }
 0x584   : > { %v2413_v35 = vadd.s32 4294967295, %v10694_v23 }
 0x586   : > { %v7414_v11 = vpop.permute.xlu1 %1759  ;;  %v7416_v17 = vpop.permute.xlu0 %1765  ;;  %vm2415_vm12 = vcmp.ge.s32.totalorder %v2413_v35, 0  ;;  %v5856_v35 = vmov 3  }
 0x587   : > { %10676 = vst [vmem:[#allocation113_spill] sm:$0xff] %v7414_v11  ;;  %10677 = vst [vmem:[#allocation126_spill] sm:$0xff] %v7416_v17 }
 0x58a   : > { %v7418_v40 = vpop.permute.xlu1 %1767  ;;  %v7420_v0 = vpop.permute.xlu0 %2078 }
 0x58b   : > { %10678 = vst [vmem:[#allocation103_spill] sm:$0xff] %v7418_v40 }
 0x58e   : > { %v7422_v55 = vpop.permute.xlu1 %2080  ;;  %v7424_v37 = vpop.permute.xlu0 %2082 }
 0x592   : > { %v7426_v9 = vpop.permute.xlu1 %2084  ;;  %v7428_v62 = vpop.permute.xlu0 %2086 }
 0x593   : > { %10679 = vst [vmem:[#allocation135_spill] sm:$0xff] %v7428_v62 }
 0x596   : > { %v7430_v54 = vpop.permute.xlu1 %2088  ;;  %v7432_v29 = vpop.permute.xlu0 %2090 }
 0x597   : > { %10680 = vst [vmem:[#allocation106_spill] sm:$0xff] %v7430_v54  ;;  %10681 = vst [vmem:[#allocation105_spill] sm:$0xff] %v7432_v29  ;;  %v10706_v29 = vld [vmem:[#allocation147_spill] sm:$0xff]  ;;  %v10709_v54 = vld [vmem:[#allocation150_spill] sm:$0xff] }
 0x5a7   : > { %v2126_v60 = vpop.permute.xlu1 %2125  ;;  %v2130_v30 = vpop.permute.xlu0 %2129 }
 0x5a8   : > { %v2140_v4 = vmul.f32 %v2126_v60, %v6227_v12  ;;  %v2141_v63 = vmul.f32 %v2126_v60, %v6224_v6  ;;  %v2142_v21 = vmul.f32 %v2126_v60, %v6234_v46  ;;  %v2143_v8 = vmul.f32 %v2130_v30, %v6242_v36 }
 0x5a9   : > { %v2144_v13 = vmul.f32 %v2130_v30, %v6248_v27  ;;  %v2145_v24 = vmul.f32 %v2130_v30, %v6257_v42 }
 0x5aa   : > { %2166 = vrot.lane.b32.xlu1 %v2141_v63, %s5842_s18  ;;  %2164 = vrot.lane.b32.xlu0 %v2140_v4, %s5842_s18 }
 0x5ab   : > { %v2134_v15 = vpop.permute.xlu1 %2133 }
 0x5ac   : > { %v2146_v25 = vmul.f32 %v2134_v15, %v10657_v39  ;;  %v2147_v20 = vmul.f32 %v2134_v15, %v10658_v14  ;;  %v2148_v58 = vmul.f32 %v2134_v15, %v10659_v44 }
 0x5ae   : > { %2168 = vrot.lane.b32.xlu0 %v2142_v21, %s5842_s18  ;;  %2170 = vrot.lane.b32.xlu1 %v2143_v8, %s5842_s18 }
 0x5af   : > { %v2138_v51 = vpop.permute.xlu1 %2137 }
 0x5b0   : > { %v2149_v57 = vmul.f32 %v2138_v51, %v10660_v18  ;;  %v2150_v41 = vmul.f32 %v2138_v51, %v10661_v48  ;;  %v2151_v3 = vmul.f32 %v2138_v51, %v10662_v19 }
 0x5b2   : > { %2172 = vrot.lane.b32.xlu0 %v2144_v13, %s5842_s18  ;;  %2174 = vrot.lane.b32.xlu1 %v2145_v24, %s5842_s18 }
 0x5b6   : > { %2176 = vrot.lane.b32.xlu0 %v2146_v25, %s5842_s18  ;;  %2178 = vrot.lane.b32.xlu1 %v2147_v20, %s5842_s18 }
 0x5ba   : > { %2180 = vrot.lane.b32.xlu0 %v2148_v58, %s5842_s18  ;;  %2182 = vrot.lane.b32.xlu1 %v2149_v57, %s5842_s18 }
 0x5be   : > { %2184 = vrot.lane.b32.xlu0 %v2150_v41, %s5842_s18  ;;  %2186 = vrot.lane.b32.xlu1 %v2151_v3, %s5842_s18 }
 0x5c2   : > { %2221 = vperm.xlu0 %5701, %v10663_v43   ;;  %2225 = vperm.xlu1 %5702, %v10664_v56  }
 0x5c6   : > { %2233 = vperm.xlu0 %5701, %v10666_v2   ;;  %2229 = vperm.xlu1 %5702, %v10665_v16  }
 0x5ca   : > { %5704 = vset.pattern.permute.xlu0 %v5854_v33  ;;  %5703 = vset.pattern.permute.xlu1 %v5854_v33 }
 0x61c   : > { %v7462_v52 = vpop.permute.xlu0 %2164  ;;  %v7464_v28 = vpop.permute.xlu1 %2166 }
 0x620   : > { %v7466_v59 = vpop.permute.xlu0 %2168  ;;  %v7468_v1 = vpop.permute.xlu1 %2170 }
 0x624   : > { %v7470_v38 = vpop.permute.xlu0 %2172  ;;  %v7472_v60 = vpop.permute.xlu1 %2174 }
 0x628   : > { %v7474_v4 = vpop.permute.xlu0 %2176  ;;  %v7476_v63 = vpop.permute.xlu1 %2178 }
 0x629   : > { %10682 = vst [vmem:[#allocation121_spill] sm:$0xff] %v7474_v4 }
 0x62c   : > { %v7478_v30 = vpop.permute.xlu0 %2180  ;;  %v7480_v21 = vpop.permute.xlu1 %2182 }
 0x62d   : > { %10683 = vst [vmem:[#allocation125_spill] sm:$0xff] %v7478_v30  ;;  %10684 = vst [vmem:[#allocation114_spill] sm:$0xff] %v7480_v21  ;;  %v10711_v30 = vld [vmem:[#allocation151_spill] sm:$0xff] }
 0x630   : > { %v7482_v8 = vpop.permute.xlu0 %2184  ;;  %v7484_v15 = vpop.permute.xlu1 %2186 }
 0x631   : > { %10685 = vst [vmem:[#allocation117_spill] sm:$0xff] %v7482_v8  ;;  %10686 = vst [vmem:[#allocation115_spill] sm:$0xff] %v7484_v15  ;;  %v10704_v15 = vld [vmem:[#allocation143_spill] sm:$0xff]  ;;  %v10708_v8 = vld [vmem:[#allocation148_spill] sm:$0xff] }
 0x641   : > { %v2222_v13 = vpop.permute.xlu0 %2221  ;;  %v2226_v20 = vpop.permute.xlu1 %2225 }
 0x642   : > { %v2236_v24 = vmul.f32 %v2222_v13, %v6227_v12  ;;  %v2237_v25 = vmul.f32 %v2222_v13, %v6224_v6  ;;  %v2238_v51 = vmul.f32 %v2222_v13, %v6234_v46  ;;  %v2239_v58 = vmul.f32 %v2226_v20, %v6242_v36 }
 0x643   : > { %v2240_v57 = vmul.f32 %v2226_v20, %v6248_v27  ;;  %v2241_v41 = vmul.f32 %v2226_v20, %v6257_v42 }
 0x644   : > { %2260 = vrot.lane.b32.xlu1 %v2236_v24, %s5843_s19  ;;  %2262 = vrot.lane.b32.xlu0 %v2237_v25, %s5843_s19 }
 0x645   : > { %v2230_v3 = vpop.permute.xlu1 %2229  ;;  %v2234_v13 = vpop.permute.xlu0 %2233 }
 0x646   : > { %v2242_v33 = vmul.f32 %v2230_v3, %v10657_v39  ;;  %v2243_v24 = vmul.f32 %v2230_v3, %v10658_v14  ;;  %v2244_v25 = vmul.f32 %v2230_v3, %v10659_v44  ;;  %v2246_v20 = vmul.f32 %v2234_v13, %v10661_v48 }
 0x648   : > { %2264 = vrot.lane.b32.xlu1 %v2238_v51, %s5843_s19  ;;  %2266 = vrot.lane.b32.xlu0 %v2239_v58, %s5843_s19  ;;  %v2245_v51 = vmul.f32 %v2234_v13, %v10660_v18  ;;  %v2247_v58 = vmul.f32 %v2234_v13, %v10662_v19 }
 0x64c   : > { %2268 = vrot.lane.b32.xlu1 %v2240_v57, %s5843_s19  ;;  %2270 = vrot.lane.b32.xlu0 %v2241_v41, %s5843_s19 }
 0x650   : > { %2272 = vrot.lane.b32.xlu1 %v2242_v33, %s5843_s19  ;;  %2274 = vrot.lane.b32.xlu0 %v2243_v24, %s5843_s19 }
 0x654   : > { %2276 = vrot.lane.b32.xlu1 %v2244_v25, %s5843_s19  ;;  %2278 = vrot.lane.b32.xlu0 %v2245_v51, %s5843_s19 }
 0x658   : > { %2280 = vrot.lane.b32.xlu1 %v2246_v20, %s5843_s19  ;;  %2282 = vrot.lane.b32.xlu0 %v2247_v58, %s5843_s19 }
 0x65c   : > { %2317 = vperm.xlu1 %5703, %v10663_v43   ;;  %2321 = vperm.xlu0 %5704, %v10664_v56  }
 0x660   : > { %2325 = vperm.xlu1 %5703, %v10665_v16   ;;  %5711 = vset.pattern.permute.xlu0 %v5856_v35 }
 0x664   : > { %2329 = vperm.xlu1 %5703, %v10666_v2  }
 0x668   : > { %5710 = vset.pattern.permute.xlu1 %v5856_v35  ;;  %v10698_v35 = vld [vmem:[#allocation138_spill] sm:$0xff] }
 0x669   : > { %v1818_v23 = vmul.f32 %v10698_v35, %v10657_v39 }
 0x6b6   : > { %v7514_v57 = vpop.permute.xlu1 %2260  ;;  %v7516_v41 = vpop.permute.xlu0 %2262 }
 0x6ba   : > { %v7518_v3 = vpop.permute.xlu1 %2264  ;;  %v7520_v33 = vpop.permute.xlu0 %2266 }
 0x6be   : > { %v7522_v24 = vpop.permute.xlu1 %2268  ;;  %v7524_v13 = vpop.permute.xlu0 %2270 }
 0x6c2   : > { %v7526_v25 = vpop.permute.xlu1 %2272  ;;  %v7528_v43 = vpop.permute.xlu0 %2274 }
 0x6c3   : > { %10687 = vst [vmem:[#allocation132_spill] sm:$0xff] %v7526_v25  ;;  %10688 = vst [vmem:[#allocation124_spill] sm:$0xff] %v7528_v43 }
 0x6c6   : > { %v7530_v56 = vpop.permute.xlu1 %2276  ;;  %v7532_v16 = vpop.permute.xlu0 %2278 }
 0x6c7   : > { %10689 = vst [vmem:[#allocation108_spill] sm:$0xff] %v7530_v56  ;;  %10690 = vst [vmem:[#allocation128_spill] sm:$0xff] %v7532_v16 }
 0x6ca   : > { %v7534_v2 = vpop.permute.xlu1 %2280  ;;  %v7536_v51 = vpop.permute.xlu0 %2282 }
 0x6cb   : > { %10691 = vst [vmem:[#allocation127_spill] sm:$0xff] %v7534_v2  ;;  %10692 = vst [vmem:[#allocation102_spill] sm:$0xff] %v7536_v51  ;;  %v10701_v51 = vld [vmem:[#allocation142_spill] sm:$0xff]  ;;  %v1820_v2 = vmul.f32 %v10698_v35, %v10659_v44 }
 0x6db   : > { %v2318_v20 = vpop.permute.xlu1 %2317  ;;  %v2322_v22 = vpop.permute.xlu0 %2321 }
 0x6dc   : > { %v2332_v58 = vmul.f32 %v2318_v20, %v6227_v12  ;;  %v2333_v31 = vmul.f32 %v2318_v20, %v6224_v6  ;;  %v2334_v17 = vmul.f32 %v2318_v20, %v6234_v46  ;;  %v2335_v40 = vmul.f32 %v2322_v22, %v6242_v36  ;;  %v10693_v20 = vld [vmem:[#allocation96_spill] sm:$0xff] }
 0x6dd   : > { %v2336_v47 = vmul.f32 %v2322_v22, %v6248_v27  ;;  %v2337_v49 = vmul.f32 %v2322_v22, %v6257_v42  ;;  %v2412_v26 = vadd.s32 4294967295, %v10693_v20  ;;  %v1819_v20 = vmul.f32 %v10698_v35, %v10658_v14  ;;  %v10710_v35 = vld [vmem:[#allocation149_spill] sm:$0xff] }
 0x6de   : > { %2358 = vrot.lane.b32.xlu1 %v2333_v31, %s5844_s20  ;;  %2356 = vrot.lane.b32.xlu0 %v2332_v58, %s5844_s20 }
 0x6df   : > { %v2326_v11 = vpop.permute.xlu1 %2325  ;;  %vm2414_vm11 = vcmp.ge.s32.totalorder %v2412_v26, 0 }
 0x6e0   : > { %v2338_v31 = vmul.f32 %v2326_v11, %v10657_v39  ;;  %v2339_v58 = vmul.f32 %v2326_v11, %v10658_v14  ;;  %v10705_v39 = vld [vmem:[#allocation145_spill] sm:$0xff] }
 0x6e2   : > { %2360 = vrot.lane.b32.xlu0 %v2334_v17, %s5844_s20  ;;  %2362 = vrot.lane.b32.xlu1 %v2335_v40, %s5844_s20  ;;  %v2340_v40 = vmul.f32 %v2326_v11, %v10659_v44  ;;  %v1906_v44 = vsel %vm587_vm5, %v10710_v35, %v10709_v54  ;;  %v2093_v35 = vsel %vm765_vm7, %v7388_v7, %v7390_v50 }
 0x6e3   : > { %v2330_v17 = vpop.permute.xlu1 %2329 }
 0x6e4   : > { %v2341_v22 = vmul.f32 %v2330_v17, %v10660_v18  ;;  %v2342_v53 = vmul.f32 %v2330_v17, %v10661_v48 }
 0x6e6   : > { %2364 = vrot.lane.b32.xlu0 %v2336_v47, %s5844_s20  ;;  %2366 = vrot.lane.b32.xlu1 %v2337_v49, %s5844_s20  ;;  %v10695_v49 = vmov 0.0  }
 0x6e7   : > { %v5568_v47 = vsel %vm2414_vm11, 1.0, %v10695_v49  ;;  %v5569_v61 = vsel %vm2415_vm12, 1.0, %v10695_v49  ;;  %vm5242_vm12 = vcmask 48128  }
 0x6e8   : > { %v5705_v11 = vpack.i.bf16 %v5569_v61, %v5568_v47 }
 0x6ea   : > { %2368 = vrot.lane.b32.xlu0 %v2338_v31, %s5844_s20  ;;  %2370 = vrot.lane.b32.xlu1 %v2339_v58, %s5844_s20  ;;  %v2343_v31 = vmul.f32 %v2330_v17, %v10662_v19 }
 0x6ee   : > { %2372 = vrot.lane.b32.xlu0 %v2340_v40, %s5844_s20  ;;  %2374 = vrot.lane.b32.xlu1 %v2341_v22, %s5844_s20  ;;  %v10696_v40 = vld [vmem:[#allocation136_spill] sm:$0xff] }
 0x6ef   : > { %v1812_v22 = vmul.f32 %v10696_v40, %v6227_v12  ;;  %v1813_v17 = vmul.f32 %v10696_v40, %v6224_v6  ;;  %v1814_v47 = vmul.f32 %v10696_v40, %v6234_v46  ;;  %v10699_v6 = vld [vmem:[#allocation141_spill] sm:$0xff]  ;;  %v10700_v12 = vld [vmem:[#allocation140_spill] sm:$0xff]  ;;  %v10702_v46 = vld [vmem:[#allocation139_spill] sm:$0xff] }
 0x6f2   : > { %2376 = vrot.lane.b32.xlu0 %v2342_v53, %s5844_s20  ;;  %2378 = vrot.lane.b32.xlu1 %v2343_v31, %s5844_s20  ;;  %v10697_v53 = vld [vmem:[#allocation137_spill] sm:$0xff] }
 0x6f3   : > { %v1815_v49 = vmul.f32 %v10697_v53, %v6242_v36  ;;  %v1816_v61 = vmul.f32 %v10697_v53, %v6248_v27  ;;  %v1817_v31 = vmul.f32 %v10697_v53, %v6257_v42  ;;  %v1900_v36 = vsel %vm587_vm5, %v10700_v12, %v10699_v6  ;;  %v10703_v42 = vld [vmem:[#allocation144_spill] sm:$0xff] }
 0x6f4   : > { %v1901_v27 = vsel %vm587_vm5, %v10699_v6, %v10701_v51  ;;  %v1821_v53 = vmul.f32 %v10702_v46, %v10660_v18  ;;  %v1902_v16 = vsel %vm587_vm5, %v10704_v15, %v10703_v42  ;;  %v1903_v14 = vsel %vm587_vm5, %v10703_v42, %v10705_v39  ;;  %v10707_v6 = vld [vmem:[#allocation146_spill] sm:$0xff] }
 0x6f5   : > { %v1822_v12 = vmul.f32 %v10702_v46, %v10661_v48  ;;  %v1904_v21 = vsel %vm587_vm5, %v10707_v6, %v10706_v29  ;;  %v1905_v18 = vsel %vm587_vm5, %v10706_v29, %v10708_v8  ;;  %v1823_v15 = vmul.f32 %v10702_v46, %v10662_v19 }
 0x6f6   : > { %5706 = vrot.lane.b32.xlu0 %v5705_v11, %s5855_s10  ;;  %v1920_v56 = vadd.f32 %v1900_v36, %v1812_v22  ;;  %v1921_v62 = vadd.f32 %v1901_v27, %v1813_v17  ;;  %v1922_v42 = vadd.f32 %v10701_v51, %v1814_v47  ;;  %v1923_v25 = vadd.f32 %v1902_v16, %v1815_v49  ;;  %v10712_v27 = vld [vmem:[#allocation153_spill] sm:$0xff]  ;;  %v10713_v51 = vld [vmem:[#allocation152_spill] sm:$0xff]  ;;  %v10714_v16 = vld [vmem:[#allocation154_spill] sm:$0xff]  ;;  %s5884_s10 = smov 123  }
 0x6f7   : > { %v1924_v43 = vadd.f32 %v1903_v14, %v1816_v61  ;;  %v1925_v6 = vadd.f32 %v10705_v39, %v1817_v31  ;;  %v1907_v29 = vsel %vm587_vm5, %v10709_v54, %v10711_v30  ;;  %v1926_v4 = vadd.f32 %v1904_v21, %v1818_v23  ;;  %v10715_v14 = vld [vmem:[#allocation156_spill] sm:$0xff]  ;;  %v10716_v49 = vld [vmem:[#allocation155_spill] sm:$0xff]  ;;  %v10717_v21 = vld [vmem:[#allocation157_spill] sm:$0xff] }
 0x6f8   : > { %v1927_v46 = vadd.f32 %v1905_v18, %v1819_v20  ;;  %v1928_v36 = vadd.f32 %v10708_v8, %v1820_v2  ;;  %v1996_v22 = vsel %vm676_vm6, %v10713_v51, %v10712_v27  ;;  %v1929_v17 = vadd.f32 %v1906_v44, %v1821_v53  ;;  %v10718_v2 = vld [vmem:[#allocation159_spill] sm:$0xff]  ;;  %v10719_v44 = vld [vmem:[#allocation158_spill] sm:$0xff] }
 0x6f9   : > { %v7629_v47 = vadd.f32 %v10711_v30, %v1823_v15  ;;  %v1997_v39 = vsel %vm676_vm6, %v10712_v27, %v10714_v16  ;;  %v1998_v54 = vsel %vm676_vm6, %v10716_v49, %v10715_v14  ;;  %v7637_v18 = vadd.f32 %v1907_v29, %v1822_v12  ;;  %v10720_v15 = vld [vmem:[#allocation6_spill] sm:$0xff] }
 0x6fa   : > { %v1999_v8 = vsel %vm676_vm6, %v10715_v14, %v10717_v21  ;;  %v2000_v30 = vsel %vm676_vm6, %v10719_v44, %v10718_v2  ;;  %v2092_v20 = vsel %vm765_vm7, %v7386_v10, %v7388_v7  ;;  %v2016_v31 = vadd.f32 %v1996_v22, %v1920_v56 }
 0x6fb   : > { %v2018_v53 = vadd.f32 %v10714_v16, %v1922_v42  ;;  %v2001_v12 = vsel %vm676_vm6, %v10718_v2, %v10720_v15  ;;  %v2017_v29 = vadd.f32 %v1997_v39, %v1921_v62  ;;  %v2021_v27 = vadd.f32 %v10717_v21, %v1925_v6 }
 0x6fc   : > { %v2019_v51 = vadd.f32 %v1998_v54, %v1923_v25  ;;  %v2188_v10 = vsel %vm854_vm8, %v7462_v52, %v7464_v28  ;;  %v2020_v14 = vadd.f32 %v1999_v8, %v1924_v43  ;;  %v2022_v56 = vadd.f32 %v2000_v30, %v1926_v4  ;;  %v10721_v52 = vld [vmem:[#allocation7_spill] sm:$0xff] }
 0x6fd   : > { %v2112_v22 = vadd.f32 %v2092_v20, %v2016_v31  ;;  %v2189_v42 = vsel %vm854_vm8, %v7464_v28, %v7466_v59  ;;  %v2023_v16 = vadd.f32 %v2001_v12, %v1927_v46  ;;  %v7665_v49 = vadd.f32 %v10720_v15, %v1928_v36 }
 0x6fe   : > { %v2113_v7 = vadd.f32 %v2093_v35, %v2017_v29  ;;  %v2284_v62 = vsel %vm943_vm9, %v7514_v57, %v7516_v41  ;;  %v2002_v4 = vsel %vm676_vm6, %v10721_v52, %v7176_v34  ;;  %v2094_v43 = vsel %vm765_vm7, %v7392_v45, %v7394_v5 }
 0x6ff   : > { %v2208_v28 = vadd.f32 %v2188_v10, %v2112_v22  ;;  %v2285_v6 = vsel %vm943_vm9, %v7516_v41, %v7518_v3  ;;  %v7684_v57 = vsel %vm676_vm6, %v7176_v34, %v7194_v32  ;;  %v2114_v36 = vadd.f32 %v7390_v50, %v2018_v53  ;;  %v10722_v22 = vld [vmem:[#allocation121_spill] sm:$0xff] }
 0x700   : > { %v2209_v39 = vadd.f32 %v2189_v42, %v2113_v7  ;;  %v2095_v45 = vsel %vm765_vm7, %v7394_v5, %v7420_v0  ;;  %v2190_v41 = vsel %vm854_vm8, %v7468_v1, %v7470_v38  ;;  %v2115_v34 = vadd.f32 %v2094_v43, %v2019_v51  ;;  %v10724_v43 = vld [vmem:[#allocation124_spill] sm:$0xff] }
 0x701   : > { %v2304_v21 = vadd.f32 %v2284_v62, %v2208_v28  ;;  %v2117_v2 = vadd.f32 %v7420_v0, %v2021_v27  ;;  %v2210_v50 = vadd.f32 %v7466_v59, %v2114_v36  ;;  %v2116_v1 = vadd.f32 %v2095_v45, %v2020_v14  ;;  %v10725_v28 = vld [vmem:[#allocation132_spill] sm:$0xff]  ;;  %v10726_v36 = vld [vmem:[#allocation106_spill] sm:$0xff] }
 0x702   : > { %v2305_v44 = vadd.f32 %v2285_v6, %v2209_v39  ;;  %v2211_v53 = vadd.f32 %v2190_v41, %v2115_v34  ;;  %v2096_v29 = vsel %vm765_vm7, %v7422_v55, %v7424_v37  ;;  %v2097_v51 = vsel %vm765_vm7, %v7424_v37, %v7426_v9  ;;  %v10723_v37 = vld [vmem:[#allocation125_spill] sm:$0xff]  ;;  %v10727_v39 = vld [vmem:[#allocation135_spill] sm:$0xff]  ;;  %v10728_v45 = vld [vmem:[#allocation108_spill] sm:$0xff] }
 0x703   : > { %v2306_v59 = vadd.f32 %v7518_v3, %v2210_v50  ;;  %v2287_v3 = vsel %vm943_vm9, %v7522_v24, %v7524_v13  ;;  %v2213_v55 = vadd.f32 %v7472_v60, %v2117_v2  ;;  %v2192_v42 = vsel %vm854_vm8, %v10722_v22, %v7476_v63  ;;  %v10729_v2 = vld [vmem:[#allocation117_spill] sm:$0xff]  ;;  %v10730_v50 = vld [vmem:[#allocation114_spill] sm:$0xff] }
 0x704   : > { %v2118_v7 = vadd.f32 %v2096_v29, %v2022_v56  ;;  %v2288_v6 = vsel %vm943_vm9, %v10725_v28, %v10724_v43  ;;  %v2098_v56 = vsel %vm765_vm7, %v10727_v39, %v10726_v36  ;;  %v10734_v29 = vld [vmem:[#allocation115_spill] sm:$0xff]  ;;  %v7808_v28 = vld [vmem:[%s10202_s3] sm:$0xff] }
 0x705   : > { %10736 = vst [vmem:[#allocation100_spill] sm:$0xff] %v7808_v28 }
 0x750   : > { %v7566_v26 = vpop.permute.xlu0 %2356  ;;  %v2359_v40 = vpop.permute.xlu1 %2358 }
 0x751   : > { %v2380_v54 = vsel %vm1032_vm10, %v7566_v26, %v2359_v40  ;;  %v2286_v26 = vsel %vm943_vm9, %v7520_v33, %v7522_v24 }
 0x752   : > { %v2400_v5 = vadd.f32 %v2380_v54, %v2304_v21  ;;  %v2214_v54 = vadd.f32 %v2192_v42, %v2118_v7 }
 0x754   : > { %v7568_v58 = vpop.permute.xlu0 %2360  ;;  %v2363_v23 = vpop.permute.xlu1 %2362 }
 0x755   : > { %v2381_v8 = vsel %vm1032_vm10, %v2359_v40, %v7568_v58  ;;  %v2191_v40 = vsel %vm854_vm8, %v7470_v38, %v7472_v60  ;;  %v2307_v38 = vadd.f32 %v2286_v26, %v2211_v53  ;;  %v2402_v14 = vadd.f32 %v7568_v58, %v2306_v59  ;;  %v10733_v59 = vld [vmem:[#allocation128_spill] sm:$0xff] }
 0x756   : > { %v2401_v0 = vadd.f32 %v2381_v8, %v2305_v44  ;;  %v2212_v10 = vadd.f32 %v2191_v40, %v2116_v1  ;;  %v2193_v58 = vsel %vm854_vm8, %v7476_v63, %v10723_v37  ;;  %v2309_v60 = vadd.f32 %v7524_v13, %v2213_v55  ;;  %v10731_v40 = vld [vmem:[#allocation105_spill] sm:$0xff] }
 0x757   : > { %v2289_v63 = vsel %vm943_vm9, %v10724_v43, %v10728_v45  ;;  %v2120_v13 = vadd.f32 %v7426_v9, %v7665_v49  ;;  %v2194_v44 = vsel %vm854_vm8, %v10730_v50, %v10729_v2  ;;  %v2099_v9 = vsel %vm765_vm7, %v10726_v36, %v10731_v40 }
 0x758   : > { %v7582_v11 = vpop.permute.xlu0 %2364  ;;  %v2367_v46 = vpop.permute.xlu1 %2366  ;;  %v2308_v62 = vadd.f32 %v2287_v3, %v2212_v10 }
 0x759   : > { %v2382_v15 = vsel %vm1032_vm10, %v2363_v23, %v7582_v11  ;;  %v2025_v23 = vadd.f32 %v2002_v4, %v1929_v17  ;;  %v2383_v24 = vsel %vm1032_vm10, %v7582_v11, %v2367_v46  ;;  %v2119_v4 = vadd.f32 %v2097_v51, %v2023_v16 }
 0x75a   : > { %v2403_v17 = vadd.f32 %v2382_v15, %v2307_v38  ;;  %v2404_v41 = vadd.f32 %v2383_v24, %v2308_v62  ;;  %v2405_v8 = vadd.f32 %v2367_v46, %v2309_v60  ;;  %v2026_v46 = vadd.f32 %v7684_v57, %v7637_v18 }
 0x75b   : > { %v2215_v16 = vadd.f32 %v2193_v58, %v2119_v4  ;;  %v2121_v1 = vadd.f32 %v2098_v56, %v2025_v23  ;;  %v2216_v53 = vadd.f32 %v10723_v37, %v2120_v13  ;;  %v2195_v38 = vsel %vm854_vm8, %v10729_v2, %v10734_v29 }
 0x75c   : > { %v7618_v48 = vpop.permute.xlu0 %2368  ;;  %v2371_v12 = vpop.permute.xlu1 %2370  ;;  %v2122_v18 = vadd.f32 %v2099_v9, %v2026_v46 }
 0x75d   : > { %v2384_v34 = vsel %vm1032_vm10, %v7618_v48, %v2371_v12  ;;  %v2311_v49 = vadd.f32 %v2289_v63, %v2215_v16  ;;  %v2217_v3 = vadd.f32 %v2194_v44, %v2121_v1  ;;  %v2312_v57 = vadd.f32 %v10728_v45, %v2216_v53  ;;  %v10753_v1 = vld [vmem:[#allocation11_spill] sm:$0xff]  ;;  %v10755_v53 = vld [vmem:[#allocation14_spill] sm:$0xff] }
 0x75e   : > { %v2218_v42 = vadd.f32 %v2195_v38, %v2122_v18  ;;  %v10758_v38 = vld [vmem:[#allocation16_spill] sm:$0xff] }
 0x760   : > { %v7648_v61 = vpop.permute.xlu0 %2372  ;;  %v2375_v21 = vpop.permute.xlu1 %2374 }
 0x761   : > { %v2385_v26 = vsel %vm1032_vm10, %v2371_v12, %v7648_v61  ;;  %v2408_v24 = vadd.f32 %v7648_v61, %v2312_v57 }
 0x764   : > { %v7670_v25 = vpop.permute.xlu0 %2376  ;;  %v2379_v23 = vpop.permute.xlu1 %2378 }
 0x765   : > { %v2386_v51 = vsel %vm1032_vm10, %v2375_v21, %v7670_v25  ;;  %v2387_v7 = vsel %vm1032_vm10, %v7670_v25, %v2379_v23 }
 0x768   : > { %v5707_v30 = vpop.permute.xlu0 %5706 }
 0x769   : > { %v7702_v20 = vunpack.i.h.bf16 %v5707_v30  ;;  %v7704_v31 = vunpack.i.l.bf16 %v5707_v30  ;;  %v2310_v30 = vadd.f32 %v2288_v6, %v2214_v54  ;;  %v7827_v6 = vld [vmem:[%s10202_s3 + $0x18] sm:$0xff] }
 0x76a   : > { %10739 = vst [vmem:[#allocation111_spill] sm:$0xff] %v7827_v6 }
 0x76b   : > { %v2434_v33 = vmul.f32 %v7704_v31, %v2400_v5  ;;  %v7716_v35 = vsel %vm335_vm0, %v7704_v31, %v7702_v20  ;;  %v2436_v52 = vmul.f32 %v7702_v20, %v2402_v14  ;;  %v2437_v11 = vmul.f32 %v7704_v31, %v2403_v17 }
 0x76c   : > { %v2435_v27 = vmul.f32 %v7716_v35, %v2401_v0  ;;  %v2438_v5 = vmul.f32 %v7716_v35, %v2404_v41  ;;  %v2439_v48 = vmul.f32 %v7702_v20, %v2405_v8  ;;  %v10732_v0 = vld [vmem:[#allocation127_spill] sm:$0xff]  ;;  %v2406_v12 = vadd.f32 %v2384_v34, %v2310_v30 }
 0x76d   : > { %2458 = vrot.lane.b32.xlu1 %v2434_v33, %s5857_s11  ;;  %v2290_v15 = vsel %vm943_vm9, %v10733_v59, %v10732_v0  ;;  %v2027_v33 = vadd.f32 %v7194_v32, %v7629_v47  ;;  %v10735_v47 = vld [vmem:[#allocation102_spill] sm:$0xff]  ;;  %v2442_v62 = vmul.f32 %v7702_v20, %v2408_v24  ;;  %v10756_v59 = vld [vmem:[#allocation15_spill] sm:$0xff] }
 0x76e   : > { %2460 = vrot.lane.b32.xlu0 %v2435_v27, %s5857_s11  ;;  %v2407_v27 = vadd.f32 %v2385_v26, %v2311_v49  ;;  %v2440_v10 = vmul.f32 %v7704_v31, %v2406_v12  ;;  %v2313_v32 = vadd.f32 %v2290_v15, %v2217_v3  ;;  %v2291_v55 = vsel %vm943_vm9, %v10732_v0, %v10735_v47  ;;  %v10752_v26 = vld [vmem:[#allocation12_spill] sm:$0xff]  ;;  %v10754_v49 = vld [vmem:[#allocation13_spill] sm:$0xff] }
 0x76f   : > { %v2123_v14 = vadd.f32 %v10731_v40, %v2027_v33  ;;  %v2314_v58 = vadd.f32 %v2291_v55, %v2218_v42  ;;  %v10757_v33 = vld [vmem:[#allocation17_spill] sm:$0xff] }
 0x770   : > { %v2441_v22 = vmul.f32 %v7716_v35, %v2407_v27  ;;  %v2409_v37 = vadd.f32 %v2386_v51, %v2313_v32  ;;  %v10759_v27 = vld [vmem:[#allocation18_spill] sm:$0xff]  ;;  %v10762_v32 = vld [vmem:[#allocation21_spill] sm:$0xff] }
 0x771   : > { %2462 = vrot.lane.b32.xlu1 %v2436_v52, %s5857_s11  ;;  %v2219_v17 = vadd.f32 %v10734_v29, %v2123_v14  ;;  %v2410_v60 = vadd.f32 %v2387_v7, %v2314_v58 }
 0x772   : > { %2464 = vrot.lane.b32.xlu0 %v2437_v11, %s5857_s11  ;;  %v2443_v4 = vmul.f32 %v7704_v31, %v2409_v37  ;;  %v7814_v31 = vld [vmem:[%s10202_s3 + $0x8] sm:$0xff]  ;;  %v5859_v11 = vmov 17  }
 0x773   : > { %v2315_v52 = vadd.f32 %v10735_v47, %v2219_v17  ;;  %v2444_v43 = vmul.f32 %v7716_v35, %v2410_v60  ;;  %10737 = vst [vmem:[#allocation118_spill] sm:$0xff] %v7814_v31  ;;  %v5858_v35 = vmov 10  }
 0x775   : > { %2466 = vrot.lane.b32.xlu1 %v2438_v5, %s5857_s11  ;;  %v2411_v61 = vadd.f32 %v2379_v23, %v2315_v52  ;;  %v10760_v23 = vld [vmem:[#allocation19_spill] sm:$0xff] }
 0x776   : > { %2468 = vrot.lane.b32.xlu0 %v2439_v48, %s5857_s11 }
 0x777   : > { %v2445_v25 = vmul.f32 %v7702_v20, %v2411_v61  ;;  %v7820_v20 = vld [vmem:[%s10202_s3 + $0x10] sm:$0xff] }
 0x778   : > { %10738 = vst [vmem:[#allocation107_spill] sm:$0xff] %v7820_v20 }
 0x779   : > { %2470 = vrot.lane.b32.xlu1 %v2440_v10, %s5857_s11  ;;  %v10761_v10 = vld [vmem:[#allocation20_spill] sm:$0xff] }
 0x77a   : > { %2472 = vrot.lane.b32.xlu0 %v2441_v22, %s5857_s11  ;;  %v5860_v22 = vmov 24  }
 0x77d   : > { %2474 = vrot.lane.b32.xlu1 %v2442_v62, %s5857_s11 }
 0x77e   : > { %2476 = vrot.lane.b32.xlu0 %v2443_v4, %s5857_s11 }
 0x781   : > { %2478 = vrot.lane.b32.xlu1 %v2444_v43, %s5857_s11 }
 0x782   : > { %2480 = vrot.lane.b32.xlu0 %v2445_v25, %s5857_s11 }
 0x785   : > { %2508 = vperm.xlu1 %5710, %v7808_v28  }
 0x786   : > { %2512 = vperm.xlu0 %5711, %v7814_v31  }
 0x789   : > { %2516 = vperm.xlu1 %5710, %v7820_v20  }
 0x78a   : > { %5712 = vset.pattern.permute.xlu0 %v5858_v35 }
 0x78b   : > { %2548 = vperm.xlu0 %5712, %v7808_v28  }
 0x78d   : > { %2520 = vperm.xlu1 %5710, %v7827_v6  }
 0x78f   : > { %2560 = vperm.xlu0 %5712, %v7827_v6  }
 0x791   : > { %5713 = vset.pattern.permute.xlu1 %v5858_v35 }
 0x792   : > { %2552 = vperm.xlu1 %5713, %v7814_v31  }
 0x793   : > { %5715 = vset.pattern.permute.xlu0 %v5859_v11 }
 0x796   : > { %2556 = vperm.xlu1 %5713, %v7820_v20  }
 0x79a   : > { %5714 = vset.pattern.permute.xlu1 %v5859_v11 }
 0x7df   : > { %v7833_v36 = vpop.permute.xlu1 %2458 }
 0x7e0   : > { %10740 = vst [vmem:[#allocation110_spill] sm:$0xff] %v7833_v36  ;;  %v7835_v39 = vpop.permute.xlu0 %2460 }
 0x7e1   : > { %10741 = vst [vmem:[#allocation131_spill] sm:$0xff] %v7835_v39 }
 0x7e3   : > { %v7837_v56 = vpop.permute.xlu1 %2462 }
 0x7e4   : > { %10742 = vst [vmem:[#allocation119_spill] sm:$0xff] %v7837_v56  ;;  %v7839_v54 = vpop.permute.xlu0 %2464 }
 0x7e5   : > { %10743 = vst [vmem:[#allocation123_spill] sm:$0xff] %v7839_v54 }
 0x7e7   : > { %v7841_v45 = vpop.permute.xlu1 %2466 }
 0x7e8   : > { %10744 = vst [vmem:[#allocation120_spill] sm:$0xff] %v7841_v45  ;;  %v7843_v63 = vpop.permute.xlu0 %2468 }
 0x7e9   : > { %10745 = vst [vmem:[#allocation130_spill] sm:$0xff] %v7843_v63 }
 0x7eb   : > { %v7845_v41 = vpop.permute.xlu1 %2470 }
 0x7ec   : > { %10746 = vst [vmem:[#allocation134_spill] sm:$0xff] %v7845_v41  ;;  %v7847_v21 = vpop.permute.xlu0 %2472 }
 0x7ed   : > { %10747 = vst [vmem:[#allocation133_spill] sm:$0xff] %v7847_v21 }
 0x7ef   : > { %v7849_v13 = vpop.permute.xlu1 %2474 }
 0x7f0   : > { %10748 = vst [vmem:[#allocation10_spill] sm:$0xff] %v7849_v13  ;;  %v7851_v16 = vpop.permute.xlu0 %2476 }
 0x7f1   : > { %10749 = vst [vmem:[#allocation97_spill] sm:$0xff] %v7851_v16 }
 0x7f3   : > { %v7853_v8 = vpop.permute.xlu1 %2478 }
 0x7f4   : > { %10750 = vst [vmem:[#allocation98_spill] sm:$0xff] %v7853_v8  ;;  %v7855_v34 = vpop.permute.xlu0 %2480 }
 0x7f5   : > { %10751 = vst [vmem:[#allocation99_spill] sm:$0xff] %v7855_v34 }
 0x804   : > { %v7857_v2 = vpop.permute.xlu1 %2508 }
 0x805   : > { %v7859_v50 = vpop.permute.xlu0 %2512 }
 0x808   : > { %v7861_v44 = vpop.permute.xlu1 %2516 }
 0x80a   : > { %v2549_v30 = vpop.permute.xlu0 %2548 }
 0x80b   : > { %v2563_v5 = vmul.f32 %v2549_v30, %v10752_v26  ;;  %v2564_v40 = vmul.f32 %v2549_v30, %v10753_v1  ;;  %v2565_v48 = vmul.f32 %v2549_v30, %v10754_v49 }
 0x80c   : > { %v7865_v9 = vpop.permute.xlu1 %2520 }
 0x80d   : > { %2589 = vrot.lane.b32.xlu0 %v2564_v40, %s5839_s15  ;;  %2587 = vrot.lane.b32.xlu1 %v2563_v5, %s5839_s15 }
 0x80e   : > { %v2561_v57 = vpop.permute.xlu0 %2560 }
 0x80f   : > { %v2572_v14 = vmul.f32 %v2561_v57, %v10761_v10  ;;  %v2573_v47 = vmul.f32 %v2561_v57, %v10762_v32  ;;  %v2574_v55 = vmul.f32 %v2561_v57, %v10662_v19 }
 0x811   : > { %v2553_v46 = vpop.permute.xlu1 %2552  ;;  %2591 = vrot.lane.b32.xlu1 %v2565_v48, %s5839_s15 }
 0x812   : > { %v2566_v0 = vmul.f32 %v2553_v46, %v10755_v53  ;;  %v2567_v15 = vmul.f32 %v2553_v46, %v10756_v59  ;;  %v2568_v29 = vmul.f32 %v2553_v46, %v10757_v33 }
 0x814   : > { %2593 = vrot.lane.b32.xlu0 %v2566_v0, %s5839_s15 }
 0x815   : > { %v2557_v12 = vpop.permute.xlu1 %2556  ;;  %2595 = vrot.lane.b32.xlu1 %v2567_v15, %s5839_s15 }
 0x816   : > { %v2569_v3 = vmul.f32 %v2557_v12, %v10758_v38  ;;  %v2570_v18 = vmul.f32 %v2557_v12, %v10759_v27  ;;  %v2571_v51 = vmul.f32 %v2557_v12, %v10760_v23 }
 0x818   : > { %2597 = vrot.lane.b32.xlu0 %v2568_v29, %s5839_s15 }
 0x819   : > { %2599 = vrot.lane.b32.xlu1 %v2569_v3, %s5839_s15 }
 0x81c   : > { %2601 = vrot.lane.b32.xlu0 %v2570_v18, %s5839_s15 }
 0x81d   : > { %2603 = vrot.lane.b32.xlu1 %v2571_v51, %s5839_s15 }
 0x820   : > { %2605 = vrot.lane.b32.xlu0 %v2572_v14, %s5839_s15  ;;  %v5861_v14 = vmov 31  }
 0x821   : > { %2607 = vrot.lane.b32.xlu1 %v2573_v47, %s5839_s15 }
 0x824   : > { %2609 = vrot.lane.b32.xlu0 %v2574_v55, %s5839_s15 }
 0x825   : > { %2644 = vperm.xlu1 %5714, %v7808_v28  }
 0x828   : > { %2648 = vperm.xlu0 %5715, %v7814_v31  }
 0x829   : > { %2652 = vperm.xlu1 %5714, %v7820_v20  }
 0x82c   : > { %5716 = vset.pattern.permute.xlu0 %v5860_v22 }
 0x82d   : > { %2656 = vperm.xlu1 %5714, %v7827_v6  }
 0x831   : > { %5717 = vset.pattern.permute.xlu1 %v5860_v22 }
 0x87f   : > { %v7893_v42 = vpop.permute.xlu1 %2587  ;;  %v7895_v24 = vpop.permute.xlu0 %2589 }
 0x883   : > { %v7897_v17 = vpop.permute.xlu1 %2591 }
 0x886   : > { %v7899_v7 = vpop.permute.xlu0 %2593 }
 0x887   : > { %v7901_v37 = vpop.permute.xlu1 %2595 }
 0x88a   : > { %v7903_v58 = vpop.permute.xlu0 %2597 }
 0x88b   : > { %v7905_v62 = vpop.permute.xlu1 %2599 }
 0x88e   : > { %v7907_v52 = vpop.permute.xlu0 %2601 }
 0x88f   : > { %v7909_v4 = vpop.permute.xlu1 %2603 }
 0x892   : > { %v7911_v60 = vpop.permute.xlu0 %2605 }
 0x893   : > { %v7913_v61 = vpop.permute.xlu1 %2607 }
 0x896   : > { %v7915_v43 = vpop.permute.xlu0 %2609 }
 0x8a4   : > { %v2645_v25 = vpop.permute.xlu1 %2644 }
 0x8a5   : > { %v2659_v35 = vmul.f32 %v2645_v25, %v10752_v26  ;;  %v2660_v11 = vmul.f32 %v2645_v25, %v10753_v1  ;;  %v2661_v40 = vmul.f32 %v2645_v25, %v10754_v49 }
 0x8a7   : > { %2685 = vrot.lane.b32.xlu1 %v2660_v11, %s5840_s16  ;;  %2683 = vrot.lane.b32.xlu0 %v2659_v35, %s5840_s16  ;;  %v2649_v30 = vpop.permute.xlu0 %2648 }
 0x8a8   : > { %v2662_v5 = vmul.f32 %v2649_v30, %v10755_v53  ;;  %v2653_v48 = vpop.permute.xlu1 %2652  ;;  %v2663_v46 = vmul.f32 %v2649_v30, %v10756_v59  ;;  %v2664_v0 = vmul.f32 %v2649_v30, %v10757_v33 }
 0x8a9   : > { %v2665_v15 = vmul.f32 %v2653_v48, %v10758_v38  ;;  %v2666_v12 = vmul.f32 %v2653_v48, %v10759_v27  ;;  %v2667_v3 = vmul.f32 %v2653_v48, %v10760_v23 }
 0x8ab   : > { %2687 = vrot.lane.b32.xlu0 %v2661_v40, %s5840_s16  ;;  %2689 = vrot.lane.b32.xlu1 %v2662_v5, %s5840_s16 }
 0x8ac   : > { %v2657_v29 = vpop.permute.xlu1 %2656 }
 0x8ad   : > { %v2668_v18 = vmul.f32 %v2657_v29, %v10761_v10  ;;  %v2669_v57 = vmul.f32 %v2657_v29, %v10762_v32  ;;  %v2670_v51 = vmul.f32 %v2657_v29, %v10662_v19 }
 0x8af   : > { %2691 = vrot.lane.b32.xlu0 %v2663_v46, %s5840_s16  ;;  %2693 = vrot.lane.b32.xlu1 %v2664_v0, %s5840_s16 }
 0x8b3   : > { %2695 = vrot.lane.b32.xlu0 %v2665_v15, %s5840_s16  ;;  %2697 = vrot.lane.b32.xlu1 %v2666_v12, %s5840_s16 }
 0x8b7   : > { %2699 = vrot.lane.b32.xlu0 %v2667_v3, %s5840_s16  ;;  %2701 = vrot.lane.b32.xlu1 %v2668_v18, %s5840_s16 }
 0x8bb   : > { %2703 = vrot.lane.b32.xlu0 %v2669_v57, %s5840_s16  ;;  %2705 = vrot.lane.b32.xlu1 %v2670_v51, %s5840_s16 }
 0x8bf   : > { %2740 = vperm.xlu0 %5716, %v7808_v28   ;;  %2744 = vperm.xlu1 %5717, %v7814_v31  }
 0x8c3   : > { %2752 = vperm.xlu0 %5716, %v7827_v6   ;;  %2748 = vperm.xlu1 %5717, %v7820_v20  }
 0x8c7   : > { %5719 = vset.pattern.permute.xlu0 %v5861_v14  ;;  %5718 = vset.pattern.permute.xlu1 %v5861_v14 }
 0x919   : > { %v7945_v47 = vpop.permute.xlu0 %2683  ;;  %v7947_v55 = vpop.permute.xlu1 %2685 }
 0x91d   : > { %v7949_v22 = vpop.permute.xlu0 %2687  ;;  %v7951_v25 = vpop.permute.xlu1 %2689 }
 0x921   : > { %v7953_v35 = vpop.permute.xlu0 %2691  ;;  %v7955_v11 = vpop.permute.xlu1 %2693 }
 0x925   : > { %v7957_v30 = vpop.permute.xlu0 %2695  ;;  %v7959_v5 = vpop.permute.xlu1 %2697 }
 0x929   : > { %v7961_v40 = vpop.permute.xlu0 %2699  ;;  %v7963_v48 = vpop.permute.xlu1 %2701 }
 0x92a   : > { %10763 = vst [vmem:[#allocation136_spill] sm:$0xff] %v7963_v48 }
 0x92d   : > { %v7965_v46 = vpop.permute.xlu0 %2703  ;;  %v7967_v0 = vpop.permute.xlu1 %2705 }
 0x92e   : > { %10764 = vst [vmem:[#allocation137_spill] sm:$0xff] %v7965_v46  ;;  %10765 = vst [vmem:[#allocation138_spill] sm:$0xff] %v7967_v0 }
 0x93e   : > { %v2741_v15 = vpop.permute.xlu0 %2740  ;;  %v2745_v3 = vpop.permute.xlu1 %2744 }
 0x93f   : > { %v2755_v12 = vmul.f32 %v2741_v15, %v10752_v26  ;;  %v2756_v29 = vmul.f32 %v2741_v15, %v10753_v1  ;;  %v2757_v18 = vmul.f32 %v2741_v15, %v10754_v49  ;;  %v2758_v57 = vmul.f32 %v2745_v3, %v10755_v53 }
 0x940   : > { %v2759_v51 = vmul.f32 %v2745_v3, %v10756_v59  ;;  %v2760_v14 = vmul.f32 %v2745_v3, %v10757_v33 }
 0x941   : > { %2779 = vrot.lane.b32.xlu1 %v2755_v12, %s5841_s17  ;;  %2781 = vrot.lane.b32.xlu0 %v2756_v29, %s5841_s17 }
 0x942   : > { %v2749_v63 = vpop.permute.xlu1 %2748  ;;  %v2753_v15 = vpop.permute.xlu0 %2752 }
 0x943   : > { %v2761_v12 = vmul.f32 %v2749_v63, %v10758_v38  ;;  %v2762_v29 = vmul.f32 %v2749_v63, %v10759_v27  ;;  %v2765_v3 = vmul.f32 %v2753_v15, %v10762_v32 }
 0x945   : > { %2783 = vrot.lane.b32.xlu1 %v2757_v18, %s5841_s17  ;;  %2785 = vrot.lane.b32.xlu0 %v2758_v57, %s5841_s17  ;;  %v2763_v18 = vmul.f32 %v2749_v63, %v10760_v23  ;;  %v2764_v57 = vmul.f32 %v2753_v15, %v10761_v10  ;;  %v5862_v63 = vmov 38  }
 0x949   : > { %2787 = vrot.lane.b32.xlu1 %v2759_v51, %s5841_s17  ;;  %2789 = vrot.lane.b32.xlu0 %v2760_v14, %s5841_s17  ;;  %v2766_v51 = vmul.f32 %v2753_v15, %v10662_v19 }
 0x94d   : > { %2791 = vrot.lane.b32.xlu1 %v2761_v12, %s5841_s17  ;;  %2793 = vrot.lane.b32.xlu0 %v2762_v29, %s5841_s17 }
 0x951   : > { %2795 = vrot.lane.b32.xlu1 %v2763_v18, %s5841_s17  ;;  %2797 = vrot.lane.b32.xlu0 %v2764_v57, %s5841_s17 }
 0x955   : > { %2799 = vrot.lane.b32.xlu1 %v2765_v3, %s5841_s17  ;;  %2801 = vrot.lane.b32.xlu0 %v2766_v51, %s5841_s17 }
 0x959   : > { %2836 = vperm.xlu1 %5718, %v7808_v28   ;;  %2840 = vperm.xlu0 %5719, %v7814_v31  }
 0x95d   : > { %2844 = vperm.xlu1 %5718, %v7820_v20   ;;  %5720 = vset.pattern.permute.xlu0 %v5862_v63 }
 0x961   : > { %2848 = vperm.xlu1 %5718, %v7827_v6  }
 0x965   : > { %5721 = vset.pattern.permute.xlu1 %v5862_v63 }
 0x9b3   : > { %v7997_v14 = vpop.permute.xlu1 %2779  ;;  %v7999_v12 = vpop.permute.xlu0 %2781 }
 0x9b7   : > { %v8001_v29 = vpop.permute.xlu1 %2783  ;;  %v8003_v15 = vpop.permute.xlu0 %2785 }
 0x9bb   : > { %v8005_v18 = vpop.permute.xlu1 %2787  ;;  %v8007_v57 = vpop.permute.xlu0 %2789 }
 0x9bf   : > { %v8009_v3 = vpop.permute.xlu1 %2791  ;;  %v8011_v51 = vpop.permute.xlu0 %2793 }
 0x9c0   : > { %10766 = vst [vmem:[#allocation141_spill] sm:$0xff] %v8009_v3 }
 0x9c3   : > { %v8013_v54 = vpop.permute.xlu1 %2795  ;;  %v8015_v45 = vpop.permute.xlu0 %2797 }
 0x9c4   : > { %10767 = vst [vmem:[#allocation140_spill] sm:$0xff] %v8013_v54  ;;  %10768 = vst [vmem:[#allocation142_spill] sm:$0xff] %v8015_v45 }
 0x9c7   : > { %v8017_v63 = vpop.permute.xlu1 %2799  ;;  %v8019_v56 = vpop.permute.xlu0 %2801 }
 0x9c8   : > { %10769 = vst [vmem:[#allocation139_spill] sm:$0xff] %v8017_v63  ;;  %10770 = vst [vmem:[#allocation144_spill] sm:$0xff] %v8019_v56 }
 0x9d8   : > { %v2837_v36 = vpop.permute.xlu1 %2836  ;;  %v2841_v13 = vpop.permute.xlu0 %2840 }
 0x9d9   : > { %v2851_v39 = vmul.f32 %v2837_v36, %v10752_v26  ;;  %v2852_v34 = vmul.f32 %v2837_v36, %v10753_v1  ;;  %v2853_v16 = vmul.f32 %v2837_v36, %v10754_v49  ;;  %v2854_v8 = vmul.f32 %v2841_v13, %v10755_v53 }
 0x9da   : > { %v2855_v21 = vmul.f32 %v2841_v13, %v10756_v59  ;;  %v2856_v56 = vmul.f32 %v2841_v13, %v10757_v33 }
 0x9db   : > { %2877 = vrot.lane.b32.xlu1 %v2852_v34, %s5842_s18  ;;  %2875 = vrot.lane.b32.xlu0 %v2851_v39, %s5842_s18 }
 0x9dc   : > { %v2845_v41 = vpop.permute.xlu1 %2844 }
 0x9dd   : > { %v2857_v34 = vmul.f32 %v2845_v41, %v10758_v38  ;;  %v2858_v39 = vmul.f32 %v2845_v41, %v10759_v27 }
 0x9df   : > { %2879 = vrot.lane.b32.xlu0 %v2853_v16, %s5842_s18  ;;  %2881 = vrot.lane.b32.xlu1 %v2854_v8, %s5842_s18  ;;  %v2859_v16 = vmul.f32 %v2845_v41, %v10760_v23  ;;  %v5863_v41 = vmov 45  }
 0x9e0   : > { %v2849_v36 = vpop.permute.xlu1 %2848 }
 0x9e1   : > { %v2860_v8 = vmul.f32 %v2849_v36, %v10761_v10 }
 0x9e3   : > { %2883 = vrot.lane.b32.xlu0 %v2855_v21, %s5842_s18  ;;  %2885 = vrot.lane.b32.xlu1 %v2856_v56, %s5842_s18  ;;  %v2861_v21 = vmul.f32 %v2849_v36, %v10762_v32  ;;  %v2862_v56 = vmul.f32 %v2849_v36, %v10662_v19 }
 0x9e7   : > { %2887 = vrot.lane.b32.xlu0 %v2857_v34, %s5842_s18  ;;  %2889 = vrot.lane.b32.xlu1 %v2858_v39, %s5842_s18 }
 0x9eb   : > { %2891 = vrot.lane.b32.xlu0 %v2859_v16, %s5842_s18  ;;  %2893 = vrot.lane.b32.xlu1 %v2860_v8, %s5842_s18 }
 0x9ef   : > { %2895 = vrot.lane.b32.xlu0 %v2861_v21, %s5842_s18  ;;  %2897 = vrot.lane.b32.xlu1 %v2862_v56, %s5842_s18 }
 0x9f3   : > { %2932 = vperm.xlu0 %5720, %v7808_v28   ;;  %2936 = vperm.xlu1 %5721, %v7814_v31  }
 0x9f7   : > { %2944 = vperm.xlu0 %5720, %v7827_v6   ;;  %2940 = vperm.xlu1 %5721, %v7820_v20  }
 0x9fb   : > { %5723 = vset.pattern.permute.xlu0 %v5863_v41  ;;  %5722 = vset.pattern.permute.xlu1 %v5863_v41 }
 0xa4d   : > { %v8049_v13 = vpop.permute.xlu0 %2875  ;;  %v8051_v34 = vpop.permute.xlu1 %2877 }
 0xa51   : > { %v8053_v39 = vpop.permute.xlu0 %2879  ;;  %v8055_v36 = vpop.permute.xlu1 %2881 }
 0xa55   : > { %v8057_v16 = vpop.permute.xlu0 %2883  ;;  %v8059_v8 = vpop.permute.xlu1 %2885 }
 0xa59   : > { %v8061_v21 = vpop.permute.xlu0 %2887  ;;  %v8063_v56 = vpop.permute.xlu1 %2889 }
 0xa5a   : > { %10771 = vst [vmem:[#allocation143_spill] sm:$0xff] %v8061_v21  ;;  %10772 = vst [vmem:[#allocation145_spill] sm:$0xff] %v8063_v56 }
 0xa5d   : > { %v8065_v45 = vpop.permute.xlu0 %2891  ;;  %v8067_v63 = vpop.permute.xlu1 %2893 }
 0xa5e   : > { %10773 = vst [vmem:[#allocation147_spill] sm:$0xff] %v8065_v45  ;;  %10774 = vst [vmem:[#allocation146_spill] sm:$0xff] %v8067_v63 }
 0xa61   : > { %v8069_v41 = vpop.permute.xlu0 %2895  ;;  %v8071_v0 = vpop.permute.xlu1 %2897 }
 0xa62   : > { %10775 = vst [vmem:[#allocation148_spill] sm:$0xff] %v8069_v41  ;;  %10776 = vst [vmem:[#allocation150_spill] sm:$0xff] %v8071_v0 }
 0xa72   : > { %v2933_v54 = vpop.permute.xlu0 %2932  ;;  %v2937_v3 = vpop.permute.xlu1 %2936 }
 0xa73   : > { %v2947_v48 = vmul.f32 %v2933_v54, %v10752_v26  ;;  %v2948_v46 = vmul.f32 %v2933_v54, %v10753_v1  ;;  %v2949_v21 = vmul.f32 %v2933_v54, %v10754_v49  ;;  %v2950_v45 = vmul.f32 %v2937_v3, %v10755_v53 }
 0xa74   : > { %v2951_v0 = vmul.f32 %v2937_v3, %v10756_v59  ;;  %v2952_v63 = vmul.f32 %v2937_v3, %v10757_v33 }
 0xa75   : > { %2971 = vrot.lane.b32.xlu1 %v2947_v48, %s5843_s19  ;;  %2973 = vrot.lane.b32.xlu0 %v2948_v46, %s5843_s19 }
 0xa76   : > { %v2941_v41 = vpop.permute.xlu1 %2940  ;;  %v2945_v54 = vpop.permute.xlu0 %2944 }
 0xa77   : > { %v2953_v48 = vmul.f32 %v2941_v41, %v10758_v38  ;;  %v2954_v46 = vmul.f32 %v2941_v41, %v10759_v27  ;;  %v2958_v3 = vmul.f32 %v2945_v54, %v10662_v19 }
 0xa79   : > { %2975 = vrot.lane.b32.xlu1 %v2949_v21, %s5843_s19  ;;  %2977 = vrot.lane.b32.xlu0 %v2950_v45, %s5843_s19  ;;  %v2955_v45 = vmul.f32 %v2941_v41, %v10760_v23  ;;  %v2956_v21 = vmul.f32 %v2945_v54, %v10761_v10 }
 0xa7d   : > { %2979 = vrot.lane.b32.xlu1 %v2951_v0, %s5843_s19  ;;  %2981 = vrot.lane.b32.xlu0 %v2952_v63, %s5843_s19  ;;  %v2957_v0 = vmul.f32 %v2945_v54, %v10762_v32 }
 0xa81   : > { %2983 = vrot.lane.b32.xlu1 %v2953_v48, %s5843_s19  ;;  %2985 = vrot.lane.b32.xlu0 %v2954_v46, %s5843_s19 }
 0xa85   : > { %2987 = vrot.lane.b32.xlu1 %v2955_v45, %s5843_s19  ;;  %2989 = vrot.lane.b32.xlu0 %v2956_v21, %s5843_s19 }
 0xa89   : > { %2991 = vrot.lane.b32.xlu1 %v2957_v0, %s5843_s19  ;;  %2993 = vrot.lane.b32.xlu0 %v2958_v3, %s5843_s19 }
 0xa8d   : > { %3028 = vperm.xlu1 %5722, %v7808_v28   ;;  %3032 = vperm.xlu0 %5723, %v7814_v31  }
 0xa91   : > { %3036 = vperm.xlu1 %5722, %v7820_v20  }
 0xa95   : > { %3040 = vperm.xlu1 %5722, %v7827_v6  }
 0xae7   : > { %v8101_v63 = vpop.permute.xlu1 %2971  ;;  %v8103_v41 = vpop.permute.xlu0 %2973 }
 0xaeb   : > { %v8105_v48 = vpop.permute.xlu1 %2975  ;;  %v8107_v46 = vpop.permute.xlu0 %2977 }
 0xaec   : > { %10777 = vst [vmem:[#allocation149_spill] sm:$0xff] %v8107_v46 }
 0xaef   : > { %v8109_v54 = vpop.permute.xlu1 %2979  ;;  %v8111_v45 = vpop.permute.xlu0 %2981 }
 0xaf0   : > { %10778 = vst [vmem:[#allocation151_spill] sm:$0xff] %v8109_v54 }
 0xaf3   : > { %v8113_v21 = vpop.permute.xlu1 %2983  ;;  %v8115_v0 = vpop.permute.xlu0 %2985 }
 0xaf4   : > { %10779 = vst [vmem:[#allocation153_spill] sm:$0xff] %v8113_v21  ;;  %10780 = vst [vmem:[#allocation152_spill] sm:$0xff] %v8115_v0  ;;  %v5864_v0 = vmov 4  }
 0xaf5   : > { %5724 = vset.pattern.permute.xlu0 %v5864_v0  ;;  %5725 = vset.pattern.permute.xlu1 %v5864_v0  ;;  %v2523_v0 = vmul.f32 %v7857_v2, %v10752_v26 }
 0xaf7   : > { %v8117_v3 = vpop.permute.xlu1 %2987  ;;  %v8119_v20 = vpop.permute.xlu0 %2989 }
 0xaf8   : > { %10781 = vst [vmem:[#allocation154_spill] sm:$0xff] %v8117_v3  ;;  %10782 = vst [vmem:[#allocation156_spill] sm:$0xff] %v8119_v20 }
 0xafb   : > { %v8121_v31 = vpop.permute.xlu1 %2991  ;;  %v8123_v6 = vpop.permute.xlu0 %2993 }
 0xafc   : > { %10783 = vst [vmem:[#allocation155_spill] sm:$0xff] %v8121_v31  ;;  %10784 = vst [vmem:[#allocation157_spill] sm:$0xff] %v8123_v6 }
 0xb0c   : > { %v3029_v28 = vpop.permute.xlu1 %3028  ;;  %v3033_v54 = vpop.permute.xlu0 %3032 }
 0xb0d   : > { %v3043_v56 = vmul.f32 %v3029_v28, %v10752_v26  ;;  %v3044_v46 = vmul.f32 %v3029_v28, %v10753_v1  ;;  %v3045_v21 = vmul.f32 %v3029_v28, %v10754_v49  ;;  %v3046_v3 = vmul.f32 %v3033_v54, %v10755_v53 }
 0xb0e   : > { %v3047_v6 = vmul.f32 %v3033_v54, %v10756_v59  ;;  %v3048_v31 = vmul.f32 %v3033_v54, %v10757_v33 }
 0xb0f   : > { %3069 = vrot.lane.b32.xlu1 %v3044_v46, %s5844_s20  ;;  %3067 = vrot.lane.b32.xlu0 %v3043_v56, %s5844_s20 }
 0xb10   : > { %v3037_v20 = vpop.permute.xlu1 %3036 }
 0xb11   : > { %v3049_v46 = vmul.f32 %v3037_v20, %v10758_v38  ;;  %v3050_v56 = vmul.f32 %v3037_v20, %v10759_v27 }
 0xb13   : > { %3071 = vrot.lane.b32.xlu0 %v3045_v21, %s5844_s20  ;;  %3073 = vrot.lane.b32.xlu1 %v3046_v3, %s5844_s20  ;;  %v3051_v21 = vmul.f32 %v3037_v20, %v10760_v23  ;;  %v2524_v20 = vmul.f32 %v7857_v2, %v10753_v1  ;;  %v2526_v3 = vmul.f32 %v7859_v50, %v10755_v53 }
 0xb14   : > { %v3041_v28 = vpop.permute.xlu1 %3040 }
 0xb15   : > { %v3052_v54 = vmul.f32 %v3041_v28, %v10761_v10 }
 0xb17   : > { %3075 = vrot.lane.b32.xlu0 %v3047_v6, %s5844_s20  ;;  %3077 = vrot.lane.b32.xlu1 %v3048_v31, %s5844_s20  ;;  %v3053_v31 = vmul.f32 %v3041_v28, %v10762_v32  ;;  %v3054_v6 = vmul.f32 %v3041_v28, %v10662_v19  ;;  %v2529_v28 = vmul.f32 %v7861_v44, %v10758_v38 }
 0xb18   : > { %v2613_v38 = vsel %vm587_vm5, %v7899_v7, %v7901_v37 }
 0xb1b   : > { %3079 = vrot.lane.b32.xlu0 %v3049_v46, %s5844_s20  ;;  %3081 = vrot.lane.b32.xlu1 %v3050_v56, %s5844_s20  ;;  %v2527_v46 = vmul.f32 %v7859_v50, %v10756_v59  ;;  %v2525_v56 = vmul.f32 %v7857_v2, %v10754_v49  ;;  %v2532_v2 = vmul.f32 %v7865_v9, %v10761_v10 }
 0xb1c   : > { %v2533_v59 = vmul.f32 %v7865_v9, %v10762_v32  ;;  %v2707_v10 = vsel %vm676_vm6, %v7945_v47, %v7947_v55  ;;  %v2634_v32 = vadd.f32 %v2613_v38, %v2526_v3  ;;  %v2803_v47 = vsel %vm765_vm7, %v7997_v14, %v7999_v12 }
 0xb1d   : > { %v2618_v38 = vsel %vm587_vm5, %v7913_v61, %v7915_v43 }
 0xb1f   : > { %3083 = vrot.lane.b32.xlu0 %v3051_v21, %s5844_s20  ;;  %3085 = vrot.lane.b32.xlu1 %v3052_v54, %s5844_s20  ;;  %v2611_v21 = vsel %vm587_vm5, %v7893_v42, %v7895_v24  ;;  %v2612_v54 = vsel %vm587_vm5, %v7895_v24, %v7897_v17  ;;  %v2531_v42 = vmul.f32 %v7861_v44, %v10760_v23 }
 0xb20   : > { %v2615_v24 = vsel %vm587_vm5, %v7905_v62, %v7907_v52  ;;  %v2632_v7 = vadd.f32 %v2612_v54, %v2524_v20  ;;  %v2617_v62 = vsel %vm587_vm5, %v7911_v60, %v7913_v61  ;;  %v2899_v60 = vsel %vm854_vm8, %v8049_v13, %v8051_v34 }
 0xb21   : > { %v2637_v20 = vadd.f32 %v2615_v24, %v2529_v28  ;;  %v8214_v3 = vadd.f32 %v2617_v62, %v2532_v2  ;;  %v2804_v61 = vsel %vm765_vm7, %v7999_v12, %v8001_v29  ;;  %v8229_v13 = vadd.f32 %v2618_v38, %v2533_v59 }
 0xb22   : > { %v2805_v59 = vsel %vm765_vm7, %v8003_v15, %v8005_v18  ;;  %v2712_v15 = vsel %vm676_vm6, %v7959_v5, %v7961_v40 }
 0xb23   : > { %3087 = vrot.lane.b32.xlu0 %v3053_v31, %s5844_s20  ;;  %3089 = vrot.lane.b32.xlu1 %v3054_v6, %s5844_s20  ;;  %v2528_v31 = vmul.f32 %v7859_v50, %v10757_v33  ;;  %v2530_v6 = vmul.f32 %v7861_v44, %v10759_v27  ;;  %v2614_v50 = vsel %vm587_vm5, %v7901_v37, %v7903_v58 }
 0xb24   : > { %v2631_v27 = vadd.f32 %v2611_v21, %v2523_v0  ;;  %v2633_v33 = vadd.f32 %v7897_v17, %v2525_v56  ;;  %v8192_v44 = vmul.f32 %v7865_v9, %v10662_v19  ;;  %v2616_v37 = vsel %vm587_vm5, %v7907_v52, %v7909_v4 }
 0xb25   : > { %v2635_v0 = vadd.f32 %v2614_v50, %v2527_v46  ;;  %v2636_v17 = vadd.f32 %v7903_v58, %v2528_v31  ;;  %v2639_v9 = vadd.f32 %v7909_v4, %v2531_v42  ;;  %v2708_v52 = vsel %vm676_vm6, %v7947_v55, %v7949_v22 }
 0xb26   : > { %v2727_v56 = vadd.f32 %v2707_v10, %v2631_v27  ;;  %v2638_v14 = vadd.f32 %v2616_v37, %v2530_v6  ;;  %v2709_v27 = vsel %vm676_vm6, %v7951_v25, %v7953_v35  ;;  %v2729_v58 = vadd.f32 %v7949_v22, %v2633_v33  ;;  %v10785_v37 = vld [vmem:[#allocation141_spill] sm:$0xff] }
 0xb27   : > { %v2710_v4 = vsel %vm676_vm6, %v7953_v35, %v7955_v11  ;;  %v2995_v55 = vsel %vm943_vm9, %v8101_v63, %v8103_v41  ;;  %v2728_v46 = vadd.f32 %v2708_v52, %v2632_v7  ;;  %v2732_v25 = vadd.f32 %v7955_v11, %v2636_v17 }
 0xb28   : > { %v2823_v10 = vadd.f32 %v2803_v47, %v2727_v56  ;;  %v2730_v21 = vadd.f32 %v2709_v27, %v2634_v32  ;;  %v2711_v33 = vsel %vm676_vm6, %v7957_v30, %v7959_v5  ;;  %v2825_v22 = vadd.f32 %v8001_v29, %v2729_v58  ;;  %v10789_v27 = vld [vmem:[#allocation136_spill] sm:$0xff] }
 0xb29   : > { %v2900_v35 = vsel %vm854_vm8, %v8051_v34, %v8053_v39  ;;  %v2731_v12 = vadd.f32 %v2710_v4, %v2635_v0  ;;  %v2824_v54 = vadd.f32 %v2804_v61, %v2728_v46  ;;  %v2806_v32 = vsel %vm765_vm7, %v8005_v18, %v8007_v57  ;;  %v10786_v0 = vld [vmem:[#allocation151_spill] sm:$0xff]  ;;  %v10790_v61 = vld [vmem:[#allocation145_spill] sm:$0xff] }
 0xb2a   : > { %v2919_v28 = vadd.f32 %v2899_v60, %v2823_v10  ;;  %v2921_v30 = vadd.f32 %v8053_v39, %v2825_v22  ;;  %v2996_v29 = vsel %vm943_vm9, %v8103_v41, %v8105_v48  ;;  %v2733_v6 = vadd.f32 %v2711_v33, %v2637_v20  ;;  %v10788_v60 = vld [vmem:[#allocation137_spill] sm:$0xff] }
 0xb2b   : > { %v2920_v2 = vadd.f32 %v2900_v35, %v2824_v54  ;;  %v2735_v50 = vadd.f32 %v7961_v40, %v2639_v9  ;;  %v2901_v18 = vsel %vm854_vm8, %v8055_v36, %v8057_v16  ;;  %v2902_v39 = vsel %vm854_vm8, %v8057_v16, %v8059_v8  ;;  %v10787_v36 = vld [vmem:[#allocation149_spill] sm:$0xff] }
 0xb2c   : > { %v3015_v63 = vadd.f32 %v2995_v55, %v2919_v28  ;;  %v3017_v41 = vadd.f32 %v8105_v48, %v2921_v30  ;;  %v2826_v24 = vadd.f32 %v2805_v59, %v2730_v21  ;;  %v2827_v7 = vadd.f32 %v2806_v32, %v2731_v12  ;;  %v10791_v55 = vld [vmem:[#allocation143_spill] sm:$0xff]  ;;  %v10792_v28 = vld [vmem:[#allocation140_spill] sm:$0xff]  ;;  %v10793_v12 = vld [vmem:[#allocation138_spill] sm:$0xff] }
 0xb2d   : > { %v2807_v5 = vsel %vm765_vm7, %v10785_v37, %v8011_v51  ;;  %v3016_v62 = vadd.f32 %v2996_v29, %v2920_v2  ;;  %v2997_v17 = vsel %vm943_vm9, %v10787_v36, %v10786_v0  ;;  %v2998_v16 = vsel %vm943_vm9, %v10786_v0, %v8111_v45  ;;  %v10795_v54 = vld [vmem:[#allocation153_spill] sm:$0xff] }
 0xb2e   : > { %v2734_v56 = vadd.f32 %v2712_v15, %v2638_v14  ;;  %v2922_v9 = vadd.f32 %v2901_v18, %v2826_v24  ;;  %v2923_v38 = vadd.f32 %v2902_v39, %v2827_v7  ;;  %v2713_v10 = vsel %vm676_vm6, %v10789_v27, %v10788_v60  ;;  %v10796_v15 = vld [vmem:[#allocation147_spill] sm:$0xff]  ;;  %v10798_v18 = vld [vmem:[#allocation142_spill] sm:$0xff]  ;;  %v10799_v7 = vld [vmem:[#allocation144_spill] sm:$0xff] }
 0xb2f   : > { %v2828_v58 = vadd.f32 %v8007_v57, %v2732_v25  ;;  %v2829_v4 = vadd.f32 %v2807_v5, %v2733_v6  ;;  %v2903_v46 = vsel %vm854_vm8, %v10791_v55, %v10790_v61  ;;  %v2808_v21 = vsel %vm765_vm7, %v8011_v51, %v10792_v28  ;;  %v10794_v25 = vld [vmem:[#allocation152_spill] sm:$0xff]  ;;  %v10800_v5 = vld [vmem:[#allocation154_spill] sm:$0xff] }
 0xb30   : > { %v3018_v33 = vadd.f32 %v2997_v17, %v2922_v9  ;;  %v3019_v14 = vadd.f32 %v2998_v16, %v2923_v38  ;;  %v2714_v57 = vsel %vm676_vm6, %v10788_v60, %v10793_v12  ;;  %v2999_v59 = vsel %vm943_vm9, %v10795_v54, %v10794_v25  ;;  %v10801_v16 = vld [vmem:[#allocation148_spill] sm:$0xff] }
 0xb31   : > { %v2736_v29 = vadd.f32 %v2713_v10, %v8214_v3  ;;  %v2831_v6 = vadd.f32 %v10792_v28, %v2735_v50  ;;  %v2904_v2 = vsel %vm854_vm8, %v10790_v61, %v10796_v15  ;;  %v2642_v17 = vadd.f32 %v7915_v43, %v8192_v44  ;;  %v10804_v43 = vld [vmem:[#allocation155_spill] sm:$0xff]  ;;  %v10805_v44 = vld [vmem:[#allocation156_spill] sm:$0xff] }
 0xb33   : > { %v2927_v37 = vadd.f32 %v10796_v15, %v2831_v6  ;;  %v2738_v28 = vadd.f32 %v10793_v12, %v2642_v17  ;;  %v5866_v6 = vmov 11   ;;  %v10810_v15 = vld [vmem:[#allocation107_spill] sm:$0xff] }
 0xb35   : > { %v3023_v38 = vadd.f32 %v10800_v5, %v2927_v37 }
 0xb81   : > { %v3070_v11 = vpop.permute.xlu1 %3069  ;;  %v3068_v31 = vpop.permute.xlu0 %3067 }
 0xb82   : > { %v3091_v34 = vsel %vm1032_vm10, %v3068_v31, %v3070_v11  ;;  %v2925_v31 = vadd.f32 %v2903_v46, %v2829_v4  ;;  %v10806_v4 = vld [vmem:[#allocation157_spill] sm:$0xff] }
 0xb83   : > { %v3111_v42 = vadd.f32 %v3091_v34, %v3015_v63  ;;  %v2830_v34 = vadd.f32 %v2808_v21, %v2734_v56  ;;  %v10803_v56 = vld [vmem:[#allocation150_spill] sm:$0xff]  ;;  %v3002_v61 = vsel %vm943_vm9, %v10804_v43, %v10806_v4 }
 0xb84   : > { %v3021_v24 = vadd.f32 %v2999_v59, %v2925_v31  ;;  %v2906_v9 = vsel %vm854_vm8, %v10801_v16, %v10803_v56 }
 0xb85   : > { %v3074_v47 = vpop.permute.xlu1 %3073  ;;  %3135 = vrot.lane.b32.xlu0 %v3111_v42, %s5865_s28  ;;  %v3072_v40 = vpop.permute.xlu0 %3071  ;;  %v10797_v42 = vld [vmem:[#allocation139_spill] sm:$0xff] }
 0xb86   : > { %v3092_v48 = vsel %vm1032_vm10, %v3070_v11, %v3072_v40  ;;  %v3113_v20 = vadd.f32 %v3072_v40, %v3017_v41  ;;  %v2924_v11 = vadd.f32 %v8059_v8, %v2828_v58  ;;  %v2809_v39 = vsel %vm765_vm7, %v10798_v18, %v10797_v42 }
 0xb87   : > { %v3112_v52 = vadd.f32 %v3092_v48, %v3016_v62  ;;  %v2810_v50 = vsel %vm765_vm7, %v10797_v42, %v10799_v7  ;;  %v3000_v62 = vsel %vm943_vm9, %v10794_v25, %v10800_v5  ;;  %v2926_v40 = vadd.f32 %v2904_v2, %v2830_v34  ;;  %v10802_v48 = vld [vmem:[#allocation146_spill] sm:$0xff] }
 0xb88   : > { %v3020_v41 = vadd.f32 %v8111_v45, %v2924_v11  ;;  %v2737_v45 = vadd.f32 %v2714_v57, %v8229_v13  ;;  %v3001_v58 = vsel %vm943_vm9, %v10805_v44, %v10804_v43  ;;  %v10809_v34 = vld [vmem:[#allocation118_spill] sm:$0xff]  ;;  %v5867_v2 = vmov 18  }
 0xb89   : > { %v3078_v22 = vpop.permute.xlu1 %3077  ;;  %3139 = vrot.lane.b32.xlu0 %v3113_v20, %s5865_s28  ;;  %3137 = vrot.lane.b32.xlu1 %v3112_v52, %s5865_s28  ;;  %v3076_v35 = vpop.permute.xlu0 %3075  ;;  %v2905_v20 = vsel %vm854_vm8, %v10802_v48, %v10801_v16  ;;  %v2832_v52 = vadd.f32 %v2809_v39, %v2736_v29  ;;  %v3022_v27 = vadd.f32 %v3000_v62, %v2926_v40  ;;  %v10808_v29 = vld [vmem:[#allocation111_spill] sm:$0xff]  ;;  %v10826_v43 = vld [vmem:[#allocation18_spill] sm:$0xff] }
 0xb8a   : > { %v3093_v63 = vsel %vm1032_vm10, %v3074_v47, %v3076_v35  ;;  %v3094_v51 = vsel %vm1032_vm10, %v3076_v35, %v3078_v22  ;;  %v3116_v0 = vadd.f32 %v3078_v22, %v3020_v41  ;;  %v2833_v60 = vadd.f32 %v2810_v50, %v2737_v45 }
 0xb8b   : > { %v3114_v32 = vadd.f32 %v3093_v63, %v3018_v33  ;;  %v3115_v30 = vadd.f32 %v3094_v51, %v3019_v14  ;;  %v2928_v21 = vadd.f32 %v2905_v20, %v2832_v52  ;;  %v2834_v22 = vadd.f32 %v10799_v7, %v2738_v28 }
 0xb8c   : > { %v2929_v33 = vadd.f32 %v2906_v9, %v2833_v60  ;;  %v10824_v60 = vld [vmem:[#allocation17_spill] sm:$0xff] }
 0xb8d   : > { %v3082_v8 = vpop.permute.xlu1 %3081  ;;  %3143 = vrot.lane.b32.xlu0 %v3115_v30, %s5865_s28  ;;  %3141 = vrot.lane.b32.xlu1 %v3114_v32, %s5865_s28  ;;  %v3080_v3 = vpop.permute.xlu0 %3079  ;;  %v3024_v35 = vadd.f32 %v3001_v58, %v2928_v21  ;;  %v2930_v51 = vadd.f32 %v10803_v56, %v2834_v22  ;;  %v10807_v30 = vld [vmem:[#allocation100_spill] sm:$0xff] }
 0xb8e   : > { %v3095_v47 = vsel %vm1032_vm10, %v3080_v3, %v3082_v8  ;;  %v3025_v57 = vadd.f32 %v3002_v61, %v2929_v33  ;;  %v10827_v61 = vld [vmem:[#allocation20_spill] sm:$0xff]  ;;  %v5868_v33 = vmov 25  }
 0xb8f   : > { %v3117_v36 = vadd.f32 %v3095_v47, %v3021_v24  ;;  %v3026_v31 = vadd.f32 %v10806_v4, %v2930_v51 }
 0xb91   : > { %v3086_v13 = vpop.permute.xlu1 %3085  ;;  %3145 = vrot.lane.b32.xlu1 %v3116_v0, %s5865_s28  ;;  %3147 = vrot.lane.b32.xlu0 %v3117_v36, %s5865_s28  ;;  %v3084_v10 = vpop.permute.xlu0 %3083 }
 0xb92   : > { %v3096_v55 = vsel %vm1032_vm10, %v3082_v8, %v3084_v10  ;;  %v3119_v46 = vadd.f32 %v3084_v10, %v3023_v38  ;;  %v10823_v38 = vld [vmem:[#allocation15_spill] sm:$0xff] }
 0xb93   : > { %v3118_v14 = vadd.f32 %v3096_v55, %v3022_v27 }
 0xb95   : > { %v3090_v25 = vpop.permute.xlu1 %3089  ;;  %3151 = vrot.lane.b32.xlu0 %v3119_v46, %s5865_s28  ;;  %3149 = vrot.lane.b32.xlu1 %v3118_v14, %s5865_s28  ;;  %v3088_v54 = vpop.permute.xlu0 %3087  ;;  %v10828_v46 = vld [vmem:[#allocation21_spill] sm:$0xff] }
 0xb96   : > { %v3097_v59 = vsel %vm1032_vm10, %v3086_v13, %v3088_v54  ;;  %v3098_v63 = vsel %vm1032_vm10, %v3088_v54, %v3090_v25  ;;  %v3122_v32 = vadd.f32 %v3090_v25, %v3026_v31  ;;  %v10825_v13 = vld [vmem:[#allocation16_spill] sm:$0xff] }
 0xb97   : > { %v3120_v12 = vadd.f32 %v3097_v59, %v3024_v35  ;;  %v3121_v11 = vadd.f32 %v3098_v63, %v3025_v57 }
 0xb99   : > { %3155 = vrot.lane.b32.xlu0 %v3121_v11, %s5865_s28  ;;  %3153 = vrot.lane.b32.xlu1 %v3120_v12, %s5865_s28 }
 0xb9d   : > { %3185 = vperm.xlu0 %5724, %v10807_v30   ;;  %3157 = vrot.lane.b32.xlu1 %v3122_v32, %s5865_s28 }
 0xba1   : > { %3197 = vperm.xlu0 %5724, %v10808_v29   ;;  %3189 = vperm.xlu1 %5725, %v10809_v34  }
 0xba5   : > { %5727 = vset.pattern.permute.xlu0 %v5866_v6  ;;  %3193 = vperm.xlu1 %5725, %v10810_v15  }
 0xba6   : > { %3229 = vperm.xlu0 %5727, %v10809_v34  }
 0xba9   : > { %5726 = vset.pattern.permute.xlu1 %v5866_v6 }
 0xbaa   : > { %3225 = vperm.xlu1 %5726, %v10807_v30   ;;  %5728 = vset.pattern.permute.xlu0 %v5867_v2 }
 0xbae   : > { %3233 = vperm.xlu1 %5726, %v10810_v15  }
 0xbb2   : > { %3237 = vperm.xlu1 %5726, %v10808_v29  }
 0xbb6   : > { %5729 = vset.pattern.permute.xlu1 %v5867_v2 }
 0xbf7   : > { %v8350_v42 = vpop.permute.xlu0 %3135 }
 0xbf8   : > { %10811 = vst [vmem:[#allocation159_spill] sm:$0xff] %v8350_v42 }
 0xbfb   : > { %v8352_v18 = vpop.permute.xlu1 %3137  ;;  %v8354_v39 = vpop.permute.xlu0 %3139 }
 0xbfc   : > { %10812 = vst [vmem:[#allocation158_spill] sm:$0xff] %v8352_v18  ;;  %10813 = vst [vmem:[#allocation6_spill] sm:$0xff] %v8354_v39 }
 0xbff   : > { %v8356_v41 = vpop.permute.xlu1 %3141  ;;  %v8358_v24 = vpop.permute.xlu0 %3143 }
 0xc00   : > { %10814 = vst [vmem:[#allocation7_spill] sm:$0xff] %v8356_v41  ;;  %10815 = vst [vmem:[#allocation121_spill] sm:$0xff] %v8358_v24 }
 0xc03   : > { %v8360_v8 = vpop.permute.xlu1 %3145  ;;  %v8362_v3 = vpop.permute.xlu0 %3147 }
 0xc04   : > { %10816 = vst [vmem:[#allocation125_spill] sm:$0xff] %v8360_v8  ;;  %10817 = vst [vmem:[#allocation124_spill] sm:$0xff] %v8362_v3 }
 0xc07   : > { %v8364_v7 = vpop.permute.xlu1 %3149  ;;  %v8366_v50 = vpop.permute.xlu0 %3151 }
 0xc08   : > { %10818 = vst [vmem:[#allocation132_spill] sm:$0xff] %v8364_v7  ;;  %10819 = vst [vmem:[#allocation106_spill] sm:$0xff] %v8366_v50 }
 0xc0b   : > { %v8368_v37 = vpop.permute.xlu1 %3153  ;;  %v8370_v5 = vpop.permute.xlu0 %3155 }
 0xc0c   : > { %10820 = vst [vmem:[#allocation135_spill] sm:$0xff] %v8368_v37  ;;  %10821 = vst [vmem:[#allocation108_spill] sm:$0xff] %v8370_v5 }
 0xc0f   : > { %v8372_v62 = vpop.permute.xlu1 %3157 }
 0xc10   : > { %10822 = vst [vmem:[#allocation117_spill] sm:$0xff] %v8372_v62 }
 0xc1c   : > { %v8374_v47 = vpop.permute.xlu0 %3185 }
 0xc20   : > { %v8376_v45 = vpop.permute.xlu1 %3189  ;;  %v8380_v0 = vpop.permute.xlu0 %3197 }
 0xc24   : > { %v8378_v40 = vpop.permute.xlu1 %3193 }
 0xc25   : > { %v3230_v48 = vpop.permute.xlu0 %3229 }
 0xc26   : > { %v3243_v20 = vmul.f32 %v3230_v48, %v10755_v53  ;;  %v3244_v52 = vmul.f32 %v3230_v48, %v10823_v38  ;;  %v3245_v27 = vmul.f32 %v3230_v48, %v10824_v60 }
 0xc29   : > { %v3226_v36 = vpop.permute.xlu1 %3225 }
 0xc2a   : > { %v3240_v17 = vmul.f32 %v3226_v36, %v10752_v26  ;;  %v3241_v16 = vmul.f32 %v3226_v36, %v10753_v1  ;;  %v3242_v56 = vmul.f32 %v3226_v36, %v10754_v49 }
 0xc2c   : > { %3266 = vrot.lane.b32.xlu1 %v3241_v16, %s5839_s15  ;;  %3264 = vrot.lane.b32.xlu0 %v3240_v17, %s5839_s15 }
 0xc2d   : > { %v3234_v9 = vpop.permute.xlu1 %3233 }
 0xc2e   : > { %v3246_v10 = vmul.f32 %v3234_v9, %v10825_v13  ;;  %v3247_v44 = vmul.f32 %v3234_v9, %v10826_v43  ;;  %v3248_v4 = vmul.f32 %v3234_v9, %v10760_v23 }
 0xc30   : > { %3268 = vrot.lane.b32.xlu0 %v3242_v56, %s5839_s15  ;;  %3270 = vrot.lane.b32.xlu1 %v3243_v20, %s5839_s15 }
 0xc31   : > { %v3238_v58 = vpop.permute.xlu1 %3237 }
 0xc32   : > { %v3249_v55 = vmul.f32 %v3238_v58, %v10827_v61  ;;  %v3250_v28 = vmul.f32 %v3238_v58, %v10828_v46  ;;  %v3251_v21 = vmul.f32 %v3238_v58, %v10662_v19  ;;  %v8473_v58 = vld [vmem:[%s10202_s3 + $0x10] sm:$0xff] }
 0xc33   : > { %10831 = vst [vmem:[#allocation127_spill] sm:$0xff] %v8473_v58 }
 0xc34   : > { %3272 = vrot.lane.b32.xlu0 %v3244_v52, %s5839_s15  ;;  %3274 = vrot.lane.b32.xlu1 %v3245_v27, %s5839_s15 }
 0xc38   : > { %3276 = vrot.lane.b32.xlu0 %v3246_v10, %s5839_s15  ;;  %3278 = vrot.lane.b32.xlu1 %v3247_v44, %s5839_s15  ;;  %v8461_v10 = vld [vmem:[%s10202_s3] sm:$0xff]  ;;  %v8467_v44 = vld [vmem:[%s10202_s3 + $0x8] sm:$0xff] }
 0xc39   : > { %10829 = vst [vmem:[#allocation114_spill] sm:$0xff] %v8461_v10  ;;  %10830 = vst [vmem:[#allocation105_spill] sm:$0xff] %v8467_v44 }
 0xc3c   : > { %3280 = vrot.lane.b32.xlu0 %v3248_v4, %s5839_s15  ;;  %3282 = vrot.lane.b32.xlu1 %v3249_v55, %s5839_s15  ;;  %v8479_v4 = vld [vmem:[%s10202_s3 + $0x18] sm:$0xff]  ;;  %v5869_v55 = vmov 32  }
 0xc3d   : > { %10832 = vst [vmem:[#allocation128_spill] sm:$0xff] %v8479_v4 }
 0xc40   : > { %3284 = vrot.lane.b32.xlu0 %v3250_v28, %s5839_s15  ;;  %3286 = vrot.lane.b32.xlu1 %v3251_v21, %s5839_s15 }
 0xc44   : > { %3321 = vperm.xlu0 %5728, %v10807_v30   ;;  %3325 = vperm.xlu1 %5729, %v10809_v34  }
 0xc48   : > { %3333 = vperm.xlu0 %5728, %v10808_v29   ;;  %3329 = vperm.xlu1 %5729, %v10810_v15  }
 0xc4c   : > { %5731 = vset.pattern.permute.xlu0 %v5868_v33  ;;  %5730 = vset.pattern.permute.xlu1 %v5868_v33 }
 0xc9e   : > { %v8410_v14 = vpop.permute.xlu0 %3264  ;;  %v8412_v22 = vpop.permute.xlu1 %3266 }
 0xca2   : > { %v8414_v35 = vpop.permute.xlu0 %3268  ;;  %v8416_v57 = vpop.permute.xlu1 %3270 }
 0xca6   : > { %v8418_v25 = vpop.permute.xlu0 %3272  ;;  %v8420_v54 = vpop.permute.xlu1 %3274 }
 0xcaa   : > { %v8422_v59 = vpop.permute.xlu0 %3276  ;;  %v8424_v63 = vpop.permute.xlu1 %3278 }
 0xcae   : > { %v8426_v51 = vpop.permute.xlu0 %3280  ;;  %v8428_v12 = vpop.permute.xlu1 %3282 }
 0xcb2   : > { %v8430_v11 = vpop.permute.xlu0 %3284  ;;  %v8432_v31 = vpop.permute.xlu1 %3286 }
 0xcc3   : > { %v3322_v32 = vpop.permute.xlu0 %3321  ;;  %v3326_v34 = vpop.permute.xlu1 %3325 }
 0xcc4   : > { %v3336_v30 = vmul.f32 %v3322_v32, %v10752_v26  ;;  %v3337_v29 = vmul.f32 %v3322_v32, %v10753_v1  ;;  %v3338_v6 = vmul.f32 %v3322_v32, %v10754_v49  ;;  %v3339_v15 = vmul.f32 %v3326_v34, %v10755_v53 }
 0xcc5   : > { %v3340_v2 = vmul.f32 %v3326_v34, %v10823_v38  ;;  %v3341_v36 = vmul.f32 %v3326_v34, %v10824_v60 }
 0xcc6   : > { %3360 = vrot.lane.b32.xlu1 %v3336_v30, %s5840_s16  ;;  %3362 = vrot.lane.b32.xlu0 %v3337_v29, %s5840_s16 }
 0xcc7   : > { %v3330_v17 = vpop.permute.xlu1 %3329  ;;  %v3334_v20 = vpop.permute.xlu0 %3333 }
 0xcc8   : > { %v3342_v16 = vmul.f32 %v3330_v17, %v10825_v13  ;;  %v3343_v48 = vmul.f32 %v3330_v17, %v10826_v43  ;;  %v3344_v56 = vmul.f32 %v3330_v17, %v10760_v23  ;;  %v3345_v9 = vmul.f32 %v3334_v20, %v10827_v61 }
 0xcc9   : > { %v3346_v52 = vmul.f32 %v3334_v20, %v10828_v46  ;;  %v3347_v27 = vmul.f32 %v3334_v20, %v10662_v19 }
 0xcca   : > { %3364 = vrot.lane.b32.xlu1 %v3338_v6, %s5840_s16  ;;  %3366 = vrot.lane.b32.xlu0 %v3339_v15, %s5840_s16 }
 0xcce   : > { %3368 = vrot.lane.b32.xlu1 %v3340_v2, %s5840_s16  ;;  %3370 = vrot.lane.b32.xlu0 %v3341_v36, %s5840_s16 }
 0xcd2   : > { %3372 = vrot.lane.b32.xlu1 %v3342_v16, %s5840_s16  ;;  %3374 = vrot.lane.b32.xlu0 %v3343_v48, %s5840_s16 }
 0xcd6   : > { %3376 = vrot.lane.b32.xlu1 %v3344_v56, %s5840_s16  ;;  %3378 = vrot.lane.b32.xlu0 %v3345_v9, %s5840_s16 }
 0xcda   : > { %3380 = vrot.lane.b32.xlu1 %v3346_v52, %s5840_s16  ;;  %3382 = vrot.lane.b32.xlu0 %v3347_v27, %s5840_s16 }
 0xcde   : > { %3417 = vperm.xlu1 %5730, %v8461_v10   ;;  %3421 = vperm.xlu0 %5731, %v8467_v44  }
 0xce2   : > { %3425 = vperm.xlu1 %5730, %v8473_v58   ;;  %5732 = vset.pattern.permute.xlu0 %v5869_v55 }
 0xce6   : > { %3429 = vperm.xlu1 %5730, %v8479_v4  }
 0xcea   : > { %5733 = vset.pattern.permute.xlu1 %v5869_v55 }
 0xd38   : > { %v8482_v28 = vpop.permute.xlu1 %3360  ;;  %v8484_v21 = vpop.permute.xlu0 %3362 }
 0xd3c   : > { %v8486_v33 = vpop.permute.xlu1 %3364  ;;  %v8488_v32 = vpop.permute.xlu0 %3366 }
 0xd40   : > { %v8490_v30 = vpop.permute.xlu1 %3368  ;;  %v8492_v29 = vpop.permute.xlu0 %3370 }
 0xd44   : > { %v8494_v34 = vpop.permute.xlu1 %3372  ;;  %v8496_v6 = vpop.permute.xlu0 %3374 }
 0xd48   : > { %v8498_v15 = vpop.permute.xlu1 %3376  ;;  %v8500_v2 = vpop.permute.xlu0 %3378 }
 0xd4c   : > { %v8502_v36 = vpop.permute.xlu1 %3380  ;;  %v8504_v17 = vpop.permute.xlu0 %3382 }
 0xd4d   : > { %10833 = vst [vmem:[#allocation115_spill] sm:$0xff] %v8504_v17 }
 0xd5d   : > { %v3418_v16 = vpop.permute.xlu1 %3417  ;;  %v3422_v56 = vpop.permute.xlu0 %3421 }
 0xd5e   : > { %v3432_v48 = vmul.f32 %v3418_v16, %v10752_v26  ;;  %v3433_v20 = vmul.f32 %v3418_v16, %v10753_v1  ;;  %v3434_v9 = vmul.f32 %v3418_v16, %v10754_v49  ;;  %v3435_v52 = vmul.f32 %v3422_v56, %v10755_v53 }
 0xd5f   : > { %v3436_v55 = vmul.f32 %v3422_v56, %v10823_v38  ;;  %v3437_v8 = vmul.f32 %v3422_v56, %v10824_v60 }
 0xd60   : > { %3458 = vrot.lane.b32.xlu1 %v3433_v20, %s5841_s17  ;;  %3456 = vrot.lane.b32.xlu0 %v3432_v48, %s5841_s17 }
 0xd61   : > { %v3426_v27 = vpop.permute.xlu1 %3425 }
 0xd62   : > { %v3438_v20 = vmul.f32 %v3426_v27, %v10825_v13  ;;  %v3439_v48 = vmul.f32 %v3426_v27, %v10826_v43 }
 0xd64   : > { %3460 = vrot.lane.b32.xlu0 %v3434_v9, %s5841_s17  ;;  %3462 = vrot.lane.b32.xlu1 %v3435_v52, %s5841_s17  ;;  %v3440_v9 = vmul.f32 %v3426_v27, %v10760_v23  ;;  %v5870_v27 = vmov 39  }
 0xd65   : > { %v3430_v16 = vpop.permute.xlu1 %3429 }
 0xd66   : > { %v3441_v52 = vmul.f32 %v3430_v16, %v10827_v61  ;;  %v3442_v56 = vmul.f32 %v3430_v16, %v10828_v46 }
 0xd68   : > { %3464 = vrot.lane.b32.xlu0 %v3436_v55, %s5841_s17  ;;  %3466 = vrot.lane.b32.xlu1 %v3437_v8, %s5841_s17  ;;  %v3443_v8 = vmul.f32 %v3430_v16, %v10662_v19 }
 0xd6c   : > { %3468 = vrot.lane.b32.xlu0 %v3438_v20, %s5841_s17  ;;  %3470 = vrot.lane.b32.xlu1 %v3439_v48, %s5841_s17 }
 0xd70   : > { %3472 = vrot.lane.b32.xlu0 %v3440_v9, %s5841_s17  ;;  %3474 = vrot.lane.b32.xlu1 %v3441_v52, %s5841_s17 }
 0xd74   : > { %3476 = vrot.lane.b32.xlu0 %v3442_v56, %s5841_s17  ;;  %3478 = vrot.lane.b32.xlu1 %v3443_v8, %s5841_s17 }
 0xd78   : > { %3513 = vperm.xlu0 %5732, %v8461_v10   ;;  %3517 = vperm.xlu1 %5733, %v8467_v44  }
 0xd7c   : > { %3525 = vperm.xlu0 %5732, %v8479_v4   ;;  %3521 = vperm.xlu1 %5733, %v8473_v58  }
 0xd80   : > { %5735 = vset.pattern.permute.xlu0 %v5870_v27  ;;  %5734 = vset.pattern.permute.xlu1 %v5870_v27 }
 0xdd2   : > { %v8534_v55 = vpop.permute.xlu0 %3456  ;;  %v8536_v20 = vpop.permute.xlu1 %3458 }
 0xdd6   : > { %v8538_v48 = vpop.permute.xlu0 %3460  ;;  %v8540_v16 = vpop.permute.xlu1 %3462 }
 0xdda   : > { %v8542_v9 = vpop.permute.xlu0 %3464  ;;  %v8544_v52 = vpop.permute.xlu1 %3466 }
 0xdde   : > { %v8546_v56 = vpop.permute.xlu0 %3468  ;;  %v8548_v8 = vpop.permute.xlu1 %3470 }
 0xddf   : > { %10834 = vst [vmem:[#allocation102_spill] sm:$0xff] %v8546_v56  ;;  %10835 = vst [vmem:[#allocation141_spill] sm:$0xff] %v8548_v8 }
 0xde2   : > { %v8550_v41 = vpop.permute.xlu0 %3472  ;;  %v8552_v24 = vpop.permute.xlu1 %3474 }
 0xde3   : > { %10836 = vst [vmem:[#allocation151_spill] sm:$0xff] %v8550_v41  ;;  %10837 = vst [vmem:[#allocation149_spill] sm:$0xff] %v8552_v24 }
 0xde6   : > { %v8554_v27 = vpop.permute.xlu0 %3476  ;;  %v8556_v39 = vpop.permute.xlu1 %3478 }
 0xde7   : > { %10838 = vst [vmem:[#allocation137_spill] sm:$0xff] %v8554_v27  ;;  %10839 = vst [vmem:[#allocation136_spill] sm:$0xff] %v8556_v39 }
 0xdf7   : > { %v3514_v42 = vpop.permute.xlu0 %3513  ;;  %v3518_v62 = vpop.permute.xlu1 %3517 }
 0xdf8   : > { %v3528_v18 = vmul.f32 %v3514_v42, %v10752_v26  ;;  %v3529_v50 = vmul.f32 %v3514_v42, %v10753_v1  ;;  %v3530_v37 = vmul.f32 %v3514_v42, %v10754_v49  ;;  %v3531_v5 = vmul.f32 %v3518_v62, %v10755_v53 }
 0xdf9   : > { %v3532_v3 = vmul.f32 %v3518_v62, %v10823_v38  ;;  %v3533_v7 = vmul.f32 %v3518_v62, %v10824_v60 }
 0xdfa   : > { %3552 = vrot.lane.b32.xlu1 %v3528_v18, %s5842_s18  ;;  %3554 = vrot.lane.b32.xlu0 %v3529_v50, %s5842_s18 }
 0xdfb   : > { %v3522_v39 = vpop.permute.xlu1 %3521  ;;  %v3526_v42 = vpop.permute.xlu0 %3525 }
 0xdfc   : > { %v3534_v18 = vmul.f32 %v3522_v39, %v10825_v13  ;;  %v3535_v50 = vmul.f32 %v3522_v39, %v10826_v43 }
 0xdfe   : > { %3556 = vrot.lane.b32.xlu1 %v3530_v37, %s5842_s18  ;;  %3558 = vrot.lane.b32.xlu0 %v3531_v5, %s5842_s18  ;;  %v3536_v37 = vmul.f32 %v3522_v39, %v10760_v23  ;;  %v3537_v5 = vmul.f32 %v3526_v42, %v10827_v61  ;;  %v5871_v39 = vmov 46  }
 0xe02   : > { %3560 = vrot.lane.b32.xlu1 %v3532_v3, %s5842_s18  ;;  %3562 = vrot.lane.b32.xlu0 %v3533_v7, %s5842_s18  ;;  %v3538_v3 = vmul.f32 %v3526_v42, %v10828_v46  ;;  %v3539_v7 = vmul.f32 %v3526_v42, %v10662_v19 }
 0xe06   : > { %3564 = vrot.lane.b32.xlu1 %v3534_v18, %s5842_s18  ;;  %3566 = vrot.lane.b32.xlu0 %v3535_v50, %s5842_s18 }
 0xe0a   : > { %3568 = vrot.lane.b32.xlu1 %v3536_v37, %s5842_s18  ;;  %3570 = vrot.lane.b32.xlu0 %v3537_v5, %s5842_s18 }
 0xe0e   : > { %3572 = vrot.lane.b32.xlu1 %v3538_v3, %s5842_s18  ;;  %3574 = vrot.lane.b32.xlu0 %v3539_v7, %s5842_s18 }
 0xe12   : > { %3609 = vperm.xlu1 %5734, %v8461_v10   ;;  %3613 = vperm.xlu0 %5735, %v8467_v44  }
 0xe16   : > { %3617 = vperm.xlu1 %5734, %v8473_v58   ;;  %5736 = vset.pattern.permute.xlu0 %v5871_v39 }
 0xe1a   : > { %3621 = vperm.xlu1 %5734, %v8479_v4  }
 0xe1e   : > { %5737 = vset.pattern.permute.xlu1 %v5871_v39 }
 0xe6c   : > { %v8586_v62 = vpop.permute.xlu1 %3552  ;;  %v8588_v18 = vpop.permute.xlu0 %3554 }
 0xe70   : > { %v8590_v50 = vpop.permute.xlu1 %3556  ;;  %v8592_v42 = vpop.permute.xlu0 %3558 }
 0xe71   : > { %10840 = vst [vmem:[#allocation145_spill] sm:$0xff] %v8592_v42 }
 0xe74   : > { %v8594_v37 = vpop.permute.xlu1 %3560  ;;  %v8596_v5 = vpop.permute.xlu0 %3562 }
 0xe75   : > { %10841 = vst [vmem:[#allocation143_spill] sm:$0xff] %v8596_v5 }
 0xe78   : > { %v8598_v3 = vpop.permute.xlu1 %3564  ;;  %v8600_v7 = vpop.permute.xlu0 %3566 }
 0xe79   : > { %10842 = vst [vmem:[#allocation140_spill] sm:$0xff] %v8598_v3  ;;  %10843 = vst [vmem:[#allocation138_spill] sm:$0xff] %v8600_v7 }
 0xe7c   : > { %v8602_v24 = vpop.permute.xlu1 %3568  ;;  %v8604_v27 = vpop.permute.xlu0 %3570 }
 0xe7d   : > { %10844 = vst [vmem:[#allocation152_spill] sm:$0xff] %v8602_v24  ;;  %10845 = vst [vmem:[#allocation153_spill] sm:$0xff] %v8604_v27 }
 0xe80   : > { %v8606_v39 = vpop.permute.xlu1 %3572  ;;  %v8608_v41 = vpop.permute.xlu0 %3574 }
 0xe81   : > { %10846 = vst [vmem:[#allocation147_spill] sm:$0xff] %v8606_v39  ;;  %10847 = vst [vmem:[#allocation139_spill] sm:$0xff] %v8608_v41 }
 0xe91   : > { %v3610_v17 = vpop.permute.xlu1 %3609  ;;  %v3614_v42 = vpop.permute.xlu0 %3613 }
 0xe92   : > { %v3624_v56 = vmul.f32 %v3610_v17, %v10752_v26  ;;  %v3625_v8 = vmul.f32 %v3610_v17, %v10753_v1  ;;  %v3626_v3 = vmul.f32 %v3610_v17, %v10754_v49  ;;  %v3627_v24 = vmul.f32 %v3614_v42, %v10755_v53 }
 0xe93   : > { %v3628_v41 = vmul.f32 %v3614_v42, %v10823_v38  ;;  %v3629_v39 = vmul.f32 %v3614_v42, %v10824_v60 }
 0xe94   : > { %3650 = vrot.lane.b32.xlu1 %v3625_v8, %s5843_s19  ;;  %3648 = vrot.lane.b32.xlu0 %v3624_v56, %s5843_s19 }
 0xe95   : > { %v3618_v27 = vpop.permute.xlu1 %3617 }
 0xe96   : > { %v3630_v8 = vmul.f32 %v3618_v27, %v10825_v13  ;;  %v3631_v56 = vmul.f32 %v3618_v27, %v10826_v43 }
 0xe98   : > { %3652 = vrot.lane.b32.xlu0 %v3626_v3, %s5843_s19  ;;  %3654 = vrot.lane.b32.xlu1 %v3627_v24, %s5843_s19  ;;  %v3632_v24 = vmul.f32 %v3618_v27, %v10760_v23 }
 0xe99   : > { %v3622_v17 = vpop.permute.xlu1 %3621 }
 0xe9a   : > { %v3633_v3 = vmul.f32 %v3622_v17, %v10827_v61  ;;  %v3635_v42 = vmul.f32 %v3622_v17, %v10662_v19 }
 0xe9c   : > { %3656 = vrot.lane.b32.xlu0 %v3628_v41, %s5843_s19  ;;  %3658 = vrot.lane.b32.xlu1 %v3629_v39, %s5843_s19  ;;  %v3634_v41 = vmul.f32 %v3622_v17, %v10828_v46 }
 0xea0   : > { %3660 = vrot.lane.b32.xlu0 %v3630_v8, %s5843_s19  ;;  %3662 = vrot.lane.b32.xlu1 %v3631_v56, %s5843_s19 }
 0xea4   : > { %3664 = vrot.lane.b32.xlu0 %v3632_v24, %s5843_s19  ;;  %3666 = vrot.lane.b32.xlu1 %v3633_v3, %s5843_s19 }
 0xea8   : > { %3668 = vrot.lane.b32.xlu0 %v3634_v41, %s5843_s19  ;;  %3670 = vrot.lane.b32.xlu1 %v3635_v42, %s5843_s19 }
 0xeac   : > { %3705 = vperm.xlu0 %5736, %v8461_v10   ;;  %3709 = vperm.xlu1 %5737, %v8467_v44  }
 0xeb0   : > { %3717 = vperm.xlu0 %5736, %v8479_v4   ;;  %3713 = vperm.xlu1 %5737, %v8473_v58  }
 0xf06   : > { %v8638_v27 = vpop.permute.xlu0 %3648  ;;  %v8640_v39 = vpop.permute.xlu1 %3650 }
 0xf0a   : > { %v8642_v8 = vpop.permute.xlu0 %3652  ;;  %v8644_v56 = vpop.permute.xlu1 %3654 }
 0xf0b   : > { %10848 = vst [vmem:[#allocation142_spill] sm:$0xff] %v8644_v56 }
 0xf0e   : > { %v8646_v17 = vpop.permute.xlu0 %3656  ;;  %v8648_v24 = vpop.permute.xlu1 %3658 }
 0xf0f   : > { %10849 = vst [vmem:[#allocation144_spill] sm:$0xff] %v8646_v17  ;;  %10850 = vst [vmem:[#allocation154_spill] sm:$0xff] %v8648_v24 }
 0xf12   : > { %v8650_v3 = vpop.permute.xlu0 %3660  ;;  %v8652_v41 = vpop.permute.xlu1 %3662 }
 0xf13   : > { %10851 = vst [vmem:[#allocation148_spill] sm:$0xff] %v8650_v3  ;;  %10852 = vst [vmem:[#allocation146_spill] sm:$0xff] %v8652_v41 }
 0xf16   : > { %v8654_v42 = vpop.permute.xlu0 %3664  ;;  %v8656_v4 = vpop.permute.xlu1 %3666 }
 0xf17   : > { %10853 = vst [vmem:[#allocation150_spill] sm:$0xff] %v8654_v42  ;;  %10854 = vst [vmem:[#allocation155_spill] sm:$0xff] %v8656_v4 }
 0xf1a   : > { %v8658_v58 = vpop.permute.xlu0 %3668  ;;  %v8660_v44 = vpop.permute.xlu1 %3670 }
 0xf1b   : > { %10855 = vst [vmem:[#allocation156_spill] sm:$0xff] %v8658_v58  ;;  %10856 = vst [vmem:[#allocation157_spill] sm:$0xff] %v8660_v44 }
 0xf2b   : > { %v3706_v10 = vpop.permute.xlu0 %3705  ;;  %v3710_v56 = vpop.permute.xlu1 %3709 }
 0xf2c   : > { %v3720_v7 = vmul.f32 %v3706_v10, %v10752_v26  ;;  %v3721_v5 = vmul.f32 %v3706_v10, %v10753_v1  ;;  %v3722_v3 = vmul.f32 %v3706_v10, %v10754_v49  ;;  %v3723_v42 = vmul.f32 %v3710_v56, %v10755_v53  ;;  %v10858_v10 = vld [vmem:[#allocation95_spill] sm:$0xff] }
 0xf2d   : > { %v3724_v44 = vmul.f32 %v3710_v56, %v10823_v38  ;;  %v3725_v4 = vmul.f32 %v3710_v56, %v10824_v60  ;;  %v3801_v24 = vadd.s32 1, %v10858_v10 }
 0xf2e   : > { %3744 = vrot.lane.b32.xlu1 %v3720_v7, %s5844_s20  ;;  %3746 = vrot.lane.b32.xlu0 %v3721_v5, %s5844_s20  ;;  %v10857_v5 = vld [vmem:[#allocation96_spill] sm:$0xff] }
 0xf2f   : > { %v3714_v58 = vpop.permute.xlu1 %3713  ;;  %v3800_v41 = vadd.s32 1, %v10857_v5  ;;  %vm3805_vm14 = vcmp.lt.s32.totalorder %v3801_v24, 16 }
 0xf30   : > { %v3726_v7 = vmul.f32 %v3714_v58, %v10825_v13  ;;  %v3727_v17 = vmul.f32 %v3714_v58, %v10826_v43  ;;  %v3728_v56 = vmul.f32 %v3714_v58, %v10760_v23  ;;  %v5873_v58 = vmov 5  }
 0xf31   : > { %vm3804_vm13 = vcmp.lt.s32.totalorder %v3800_v41, 16  ;;  %5743 = vset.pattern.permute.xlu0 %v5873_v58  ;;  %5744 = vset.pattern.permute.xlu1 %v5873_v58  ;;  %v3210_v58 = vmul.f32 %v8380_v0, %v10828_v46 }
 0xf32   : > { %3748 = vrot.lane.b32.xlu1 %v3722_v3, %s5844_s20  ;;  %3750 = vrot.lane.b32.xlu0 %v3723_v42, %s5844_s20  ;;  %v3718_v3 = vpop.permute.xlu0 %3717 }
 0xf33   : > { %v3730_v5 = vmul.f32 %v3718_v3, %v10828_v46  ;;  %v3291_v46 = vsel %vm587_vm5, %v8418_v25, %v8420_v54 }
 0xf36   : > { %3752 = vrot.lane.b32.xlu1 %v3724_v44, %s5844_s20  ;;  %3754 = vrot.lane.b32.xlu0 %v3725_v4, %s5844_s20  ;;  %v3729_v44 = vmul.f32 %v3718_v3, %v10827_v61  ;;  %v10859_v4 = vmov 0.0  }
 0xf37   : > { %v5570_v42 = vsel %vm3804_vm13, 1.0, %v10859_v4  ;;  %v5571_v10 = vsel %vm3805_vm14, 1.0, %v10859_v4  ;;  %v3205_v4 = vmul.f32 %v8376_v45, %v10824_v60 }
 0xf3a   : > { %3756 = vrot.lane.b32.xlu1 %v3726_v7, %s5844_s20  ;;  %3758 = vrot.lane.b32.xlu0 %v3727_v17, %s5844_s20  ;;  %v3731_v7 = vmul.f32 %v3718_v3, %v10662_v19  ;;  %v5738_v17 = vpack.i.bf16 %v5571_v10, %v5570_v42  ;;  %v3200_v3 = vmul.f32 %v8374_v47, %v10752_v26 }
 0xf3b   : > { %v3203_v10 = vmul.f32 %v8376_v45, %v10755_v53  ;;  %v3209_v42 = vmul.f32 %v8380_v0, %v10827_v61 }
 0xf3e   : > { %3760 = vrot.lane.b32.xlu1 %v3728_v56, %s5844_s20  ;;  %3762 = vrot.lane.b32.xlu0 %v3729_v44, %s5844_s20  ;;  %v3201_v56 = vmul.f32 %v8374_v47, %v10753_v1  ;;  %v3204_v44 = vmul.f32 %v8376_v45, %v10823_v38  ;;  %v3211_v38 = vmul.f32 %v8380_v0, %v10662_v19 }
 0xf3f   : > { %v3292_v45 = vsel %vm587_vm5, %v8422_v59, %v8424_v63  ;;  %v3208_v0 = vmul.f32 %v8378_v40, %v10760_v23  ;;  %v3293_v19 = vsel %vm587_vm5, %v8424_v63, %v8426_v51  ;;  %v3313_v59 = vadd.f32 %v8420_v54, %v3205_v4 }
 0xf40   : > { %v3312_v23 = vadd.f32 %v3291_v46, %v3204_v44  ;;  %v3384_v63 = vsel %vm676_vm6, %v8482_v28, %v8484_v21  ;;  %v3386_v46 = vsel %vm676_vm6, %v8488_v32, %v8490_v30  ;;  %v3481_v32 = vsel %vm765_vm7, %v8536_v20, %v8538_v48 }
 0xf41   : > { %v3576_v4 = vsel %vm854_vm8, %v8586_v62, %v8588_v18 }
 0xf42   : > { %3764 = vrot.lane.b32.xlu1 %v3730_v5, %s5844_s20  ;;  %3766 = vrot.lane.b32.xlu0 %v3731_v7, %s5844_s20  ;;  %v3202_v5 = vmul.f32 %v8374_v47, %v10754_v49  ;;  %v3288_v7 = vsel %vm587_vm5, %v8410_v14, %v8412_v22  ;;  %v3289_v47 = vsel %vm587_vm5, %v8412_v22, %v8414_v35 }
 0xf43   : > { %v3207_v49 = vmul.f32 %v8378_v40, %v10826_v43  ;;  %v3290_v14 = vsel %vm587_vm5, %v8416_v57, %v8418_v25  ;;  %v3206_v22 = vmul.f32 %v8378_v40, %v10825_v13  ;;  %v3308_v53 = vadd.f32 %v3288_v7, %v3200_v3 }
 0xf44   : > { %v3309_v57 = vadd.f32 %v3289_v47, %v3201_v56  ;;  %v3310_v43 = vadd.f32 %v8414_v35, %v3202_v5  ;;  %v3294_v25 = vsel %vm587_vm5, %v8428_v12, %v8430_v11  ;;  %v3295_v3 = vsel %vm587_vm5, %v8430_v11, %v8432_v31 }
 0xf45   : > { %v3311_v40 = vadd.f32 %v3290_v14, %v3203_v10  ;;  %v3314_v56 = vadd.f32 %v3292_v45, %v3206_v22  ;;  %v3315_v35 = vadd.f32 %v3293_v19, %v3207_v49  ;;  %v3316_v5 = vadd.f32 %v8426_v51, %v3208_v0 }
 0xf46   : > { %5739 = vrot.lane.b32.xlu1 %v5738_v17, %s5872_s14  ;;  %v3385_v12 = vsel %vm676_vm6, %v8484_v21, %v8486_v33  ;;  %v8756_v11 = vadd.f32 %v8432_v31, %v3211_v38  ;;  %v3317_v47 = vadd.f32 %v3294_v25, %v3209_v42  ;;  %v8758_v13 = vadd.f32 %v3295_v3, %v3210_v58 }
 0xf47   : > { %v3404_v28 = vadd.f32 %v3384_v63, %v3308_v53  ;;  %v3387_v19 = vsel %vm676_vm6, %v8490_v30, %v8492_v29  ;;  %v3388_v49 = vsel %vm676_vm6, %v8494_v34, %v8496_v6  ;;  %v3480_v38 = vsel %vm765_vm7, %v8534_v55, %v8536_v20  ;;  %v10861_v63 = vld [vmem:[#allocation144_spill] sm:$0xff] }
 0xf48   : > { %v3405_v31 = vadd.f32 %v3385_v12, %v3309_v57  ;;  %v3406_v21 = vadd.f32 %v8486_v33, %v3310_v43  ;;  %v3389_v53 = vsel %vm676_vm6, %v8496_v6, %v8498_v15  ;;  %v3407_v30 = vadd.f32 %v3386_v46, %v3311_v40 }
 0xf49   : > { %v3409_v34 = vadd.f32 %v8492_v29, %v3313_v59  ;;  %v3390_v55 = vsel %vm676_vm6, %v8500_v2, %v8502_v36  ;;  %v3408_v43 = vadd.f32 %v3387_v19, %v3312_v23  ;;  %v3410_v33 = vadd.f32 %v3388_v49, %v3314_v56 }
 0xf4a   : > { %v3500_v10 = vadd.f32 %v3480_v38, %v3404_v28  ;;  %v3577_v6 = vsel %vm854_vm8, %v8588_v18, %v8590_v50  ;;  %v3411_v44 = vadd.f32 %v3389_v53, %v3315_v35  ;;  %v8792_v20 = vadd.f32 %v8498_v15, %v3316_v5 }
 0xf4b   : > { %v3501_v29 = vadd.f32 %v3481_v32, %v3405_v31  ;;  %v3672_v2 = vsel %vm943_vm9, %v8638_v27, %v8640_v39  ;;  %v8799_v58 = vadd.f32 %v3390_v55, %v3317_v47  ;;  %v3482_v23 = vsel %vm765_vm7, %v8540_v16, %v8542_v9  ;;  %v10860_v16 = vld [vmem:[#allocation145_spill] sm:$0xff]  ;;  %v10863_v47 = vld [vmem:[#allocation143_spill] sm:$0xff]  ;;  %v10866_v32 = vld [vmem:[#allocation154_spill] sm:$0xff] }
 0xf4c   : > { %v3596_v62 = vadd.f32 %v3576_v4, %v3500_v10  ;;  %v3673_v18 = vsel %vm943_vm9, %v8640_v39, %v8642_v8  ;;  %v3502_v14 = vadd.f32 %v8538_v48, %v3406_v21  ;;  %v3505_v22 = vadd.f32 %v8544_v52, %v3409_v34  ;;  %v10864_v31 = vld [vmem:[#allocation141_spill] sm:$0xff]  ;;  %v10865_v21 = vld [vmem:[#allocation102_spill] sm:$0xff]  ;;  %v10867_v34 = vld [vmem:[#allocation115_spill] sm:$0xff] }
 0xf4d   : > { %v3597_v45 = vadd.f32 %v3577_v6, %v3501_v29  ;;  %v3483_v0 = vsel %vm765_vm7, %v8542_v9, %v8544_v52  ;;  %v3578_v57 = vsel %vm854_vm8, %v10860_v16, %v8594_v37  ;;  %v3503_v3 = vadd.f32 %v3482_v23, %v3407_v30  ;;  %v10868_v55 = vld [vmem:[#allocation151_spill] sm:$0xff]  ;;  %v10869_v29 = vld [vmem:[#allocation138_spill] sm:$0xff] }
 0xf4e   : > { %v3692_v25 = vadd.f32 %v3672_v2, %v3596_v62  ;;  %v3598_v48 = vadd.f32 %v8590_v50, %v3502_v14  ;;  %v3504_v5 = vadd.f32 %v3483_v0, %v3408_v43  ;;  %v3484_v53 = vsel %vm765_vm7, %v10865_v21, %v10864_v31  ;;  %v10870_v2 = vld [vmem:[#allocation140_spill] sm:$0xff]  ;;  %v10872_v16 = vld [vmem:[#allocation146_spill] sm:$0xff] }
 0xf4f   : > { %v3693_v59 = vadd.f32 %v3673_v18, %v3597_v45  ;;  %v3599_v12 = vadd.f32 %v3578_v57, %v3503_v3  ;;  %v3485_v4 = vsel %vm765_vm7, %v10864_v31, %v10868_v55  ;;  %v3601_v6 = vadd.f32 %v10863_v47, %v3505_v22  ;;  %v10871_v14 = vld [vmem:[#allocation152_spill] sm:$0xff]  ;;  %v10875_v3 = vld [vmem:[#allocation149_spill] sm:$0xff] }
 0xf50   : > { %v3694_v50 = vadd.f32 %v8642_v8, %v3598_v48  ;;  %v3580_v23 = vsel %vm854_vm8, %v10870_v2, %v10869_v29  ;;  %v3506_v18 = vadd.f32 %v3484_v53, %v3410_v33  ;;  %v3507_v0 = vadd.f32 %v3485_v4, %v3411_v44  ;;  %v10873_v57 = vld [vmem:[#allocation148_spill] sm:$0xff]  ;;  %v10882_v4 = vld [vmem:[#allocation139_spill] sm:$0xff] }
 0xf51   : > { %v3697_v22 = vadd.f32 %v10866_v32, %v3601_v6  ;;  %v3508_v44 = vadd.f32 %v10868_v55, %v8792_v20 }
 0xf52   : > { %v3602_v48 = vadd.f32 %v3580_v23, %v3506_v18 }
 0xf53   : > { %v3604_v53 = vadd.f32 %v10871_v14, %v3508_v44 }
 0xfa0   : > { %v8690_v24 = vpop.permute.xlu1 %3744  ;;  %v3747_v61 = vpop.permute.xlu0 %3746 }
 0xfa1   : > { %v3768_v27 = vsel %vm1032_vm10, %v8690_v24, %v3747_v61  ;;  %v10862_v24 = vld [vmem:[#allocation142_spill] sm:$0xff] }
 0xfa2   : > { %v3674_v56 = vsel %vm943_vm9, %v10862_v24, %v10861_v63  ;;  %v3788_v35 = vadd.f32 %v3768_v27, %v3692_v25  ;;  %v3676_v25 = vsel %vm943_vm9, %v10873_v57, %v10872_v16 }
 0xfa3   : > { %v3695_v30 = vadd.f32 %v3674_v56, %v3599_v12  ;;  %v10877_v12 = vld [vmem:[#allocation147_spill] sm:$0xff] }
 0xfa4   : > { %v8692_v41 = vpop.permute.xlu1 %3748  ;;  %v3751_v54 = vpop.permute.xlu0 %3750 }
 0xfa5   : > { %v3769_v39 = vsel %vm1032_vm10, %v3747_v61, %v8692_v41  ;;  %v3579_v61 = vsel %vm854_vm8, %v8594_v37, %v10863_v47  ;;  %v3675_v37 = vsel %vm943_vm9, %v10861_v63, %v10866_v32  ;;  %v3790_v10 = vadd.f32 %v8692_v41, %v3694_v50  ;;  %v10878_v47 = vld [vmem:[#allocation153_spill] sm:$0xff]  ;;  %v10880_v32 = vld [vmem:[#allocation156_spill] sm:$0xff] }
 0xfa6   : > { %v3789_v46 = vadd.f32 %v3769_v39, %v3693_v59  ;;  %v3600_v43 = vadd.f32 %v3579_v61, %v3504_v5  ;;  %v3581_v41 = vsel %vm854_vm8, %v10869_v29, %v10871_v14  ;;  %v10876_v59 = vld [vmem:[#allocation150_spill] sm:$0xff]  ;;  %v3582_v61 = vsel %vm854_vm8, %v10878_v47, %v10877_v12 }
 0xfa7   : > { %v3603_v56 = vadd.f32 %v3581_v41, %v3507_v0 }
 0xfa8   : > { %v8709_v17 = vpop.permute.xlu1 %3752  ;;  %v3755_v15 = vpop.permute.xlu0 %3754  ;;  %v3696_v45 = vadd.f32 %v3675_v37, %v3600_v43  ;;  %v10881_v37 = vld [vmem:[#allocation155_spill] sm:$0xff] }
 0xfa9   : > { %v3770_v28 = vsel %vm1032_vm10, %v3751_v54, %v8709_v17  ;;  %v3391_v54 = vsel %vm676_vm6, %v8502_v36, %v10867_v34  ;;  %v3771_v36 = vsel %vm1032_vm10, %v8709_v17, %v3755_v15  ;;  %v10874_v17 = vld [vmem:[#allocation137_spill] sm:$0xff] }
 0xfaa   : > { %v3791_v62 = vadd.f32 %v3770_v28, %v3695_v30  ;;  %v3486_v33 = vsel %vm765_vm7, %v10875_v3, %v10874_v17  ;;  %v3792_v63 = vadd.f32 %v3771_v36, %v3696_v45  ;;  %v3414_v21 = vadd.f32 %v3391_v54, %v8758_v13  ;;  %v10886_v3 = vld [vmem:[#allocation128_spill] sm:$0xff] }
 0xfab   : > { %v3678_v30 = vsel %vm943_vm9, %v10881_v37, %v10880_v32  ;;  %v3700_v54 = vadd.f32 %v10876_v59, %v3604_v53  ;;  %v10901_v53 = vld [vmem:[#allocation13_spill] sm:$0xff] }
 0xfac   : > { %v8745_v7 = vpop.permute.xlu1 %3756  ;;  %v3759_v19 = vpop.permute.xlu0 %3758 }
 0xfad   : > { %v3772_v5 = vsel %vm1032_vm10, %v8745_v7, %v3759_v19 }
 0xfb0   : > { %v8772_v51 = vpop.permute.xlu1 %3760  ;;  %v3763_v24 = vpop.permute.xlu0 %3762 }
 0xfb1   : > { %v3773_v50 = vsel %vm1032_vm10, %v3759_v19, %v8772_v51  ;;  %v3796_v18 = vadd.f32 %v8772_v51, %v3700_v54  ;;  %v10905_v54 = vld [vmem:[#allocation19_spill] sm:$0xff] }
 0xfb4   : > { %v8797_v42 = vpop.permute.xlu1 %3764  ;;  %v3767_v6 = vpop.permute.xlu0 %3766 }
 0xfb5   : > { %v3775_v45 = vsel %vm1032_vm10, %v8797_v42, %v3767_v6 }
 0xfb8   : > { %v5740_v40 = vpop.permute.xlu1 %5739 }
 0xfb9   : > { %v8823_v9 = vunpack.i.h.bf16 %v5740_v40  ;;  %v8825_v52 = vunpack.i.l.bf16 %v5740_v40  ;;  %v3677_v40 = vsel %vm943_vm9, %v10872_v16, %v10876_v59 }
 0xfba   : > { %v3699_v31 = vadd.f32 %v3677_v40, %v3603_v56 }
 0xfbb   : > { %v3823_v49 = vmul.f32 %v8825_v52, %v3788_v35  ;;  %v8836_v38 = vsel %vm3818_vm15, %v8825_v52, %v8823_v9  ;;  %v3825_v27 = vmul.f32 %v8823_v9, %v3790_v10  ;;  %v3826_v39 = vmul.f32 %v8825_v52, %v3791_v62 }
 0xfbc   : > { %v3824_v8 = vmul.f32 %v8836_v38, %v3789_v46  ;;  %v3793_v35 = vadd.f32 %v3755_v15, %v3697_v22  ;;  %v3698_v46 = vadd.f32 %v3676_v25, %v3602_v48  ;;  %v3827_v28 = vmul.f32 %v8836_v38, %v3792_v63 }
 0xfbd   : > { %3847 = vrot.lane.b32.xlu0 %v3823_v49, %s5874_s21  ;;  %v10879_v49 = vld [vmem:[#allocation136_spill] sm:$0xff]  ;;  %v3509_v15 = vadd.f32 %v3486_v33, %v8799_v58  ;;  %v3583_v58 = vsel %vm854_vm8, %v10877_v12, %v10882_v4  ;;  %v3795_v43 = vadd.f32 %v3773_v50, %v3699_v31  ;;  %v3774_v10 = vsel %vm1032_vm10, %v3763_v24, %v8797_v42  ;;  %v10884_v42 = vld [vmem:[#allocation114_spill] sm:$0xff] }
 0xfbe   : > { %3849 = vrot.lane.b32.xlu1 %v3824_v8, %s5874_s21  ;;  %v3487_v20 = vsel %vm765_vm7, %v10874_v17, %v10879_v49  ;;  %v3828_v7 = vmul.f32 %v8823_v9, %v3793_v35  ;;  %v3794_v19 = vadd.f32 %v3772_v5, %v3698_v46  ;;  %v3415_v8 = vadd.f32 %v10867_v34, %v8756_v11  ;;  %v10883_v11 = vld [vmem:[#allocation157_spill] sm:$0xff] }
 0xfbf   : > { %v3605_v55 = vadd.f32 %v3582_v61, %v3509_v15  ;;  %v3510_v13 = vadd.f32 %v3487_v20, %v3414_v21  ;;  %v3679_v34 = vsel %vm943_vm9, %v10880_v32, %v10883_v11  ;;  %v3830_v62 = vmul.f32 %v8836_v38, %v3795_v43  ;;  %v10885_v17 = vld [vmem:[#allocation105_spill] sm:$0xff] }
 0xfc0   : > { %v3829_v29 = vmul.f32 %v8825_v52, %v3794_v19  ;;  %v3511_v2 = vadd.f32 %v10879_v49, %v3415_v8  ;;  %v3831_v0 = vmul.f32 %v8823_v9, %v3796_v18  ;;  %v5875_v33 = vmov 12  }
 0xfc1   : > { %3851 = vrot.lane.b32.xlu0 %v3825_v27, %s5874_s21  ;;  %v3701_v23 = vadd.f32 %v3678_v30, %v3605_v55  ;;  %v3606_v36 = vadd.f32 %v3583_v58, %v3510_v13  ;;  %v10902_v30 = vld [vmem:[#allocation15_spill] sm:$0xff]  ;;  %v10903_v55 = vld [vmem:[#allocation16_spill] sm:$0xff]  ;;  %v10904_v58 = vld [vmem:[#allocation18_spill] sm:$0xff]  ;;  %vm5385_vm15 = vcmask 1041409  }
 0xfc2   : > { %3853 = vrot.lane.b32.xlu1 %v3826_v39, %s5874_s21  ;;  %v3607_v14 = vadd.f32 %v10882_v4, %v3511_v2  ;;  %v10907_v2 = vld [vmem:[#allocation21_spill] sm:$0xff] }
 0xfc3   : > { %v3797_v41 = vadd.f32 %v3774_v10, %v3701_v23  ;;  %v3702_v27 = vadd.f32 %v3679_v34, %v3606_v36  ;;  %v10908_v34 = vld [vmem:[#allocation22_spill] sm:$0xff] }
 0xfc4   : > { %v3703_v22 = vadd.f32 %v10883_v11, %v3607_v14 }
 0xfc5   : > { %3855 = vrot.lane.b32.xlu0 %v3827_v28, %s5874_s21  ;;  %v3832_v16 = vmul.f32 %v8825_v52, %v3797_v41  ;;  %v3798_v57 = vadd.f32 %v3775_v45, %v3702_v27  ;;  %v10887_v52 = vld [vmem:[#allocation127_spill] sm:$0xff] }
 0xfc6   : > { %3857 = vrot.lane.b32.xlu1 %v3828_v7, %s5874_s21  ;;  %v3799_v51 = vadd.f32 %v3767_v6, %v3703_v22  ;;  %v10900_v7 = vld [vmem:[#allocation14_spill] sm:$0xff]  ;;  %v10906_v6 = vld [vmem:[#allocation20_spill] sm:$0xff] }
 0xfc7   : > { %v3833_v25 = vmul.f32 %v8836_v38, %v3798_v57 }
 0xfc8   : > { %v3834_v39 = vmul.f32 %v8823_v9, %v3799_v51  ;;  %v5876_v9 = vmov 19  }
 0xfc9   : > { %3859 = vrot.lane.b32.xlu0 %v3829_v29, %s5874_s21 }
 0xfca   : > { %3861 = vrot.lane.b32.xlu1 %v3830_v62, %s5874_s21  ;;  %v5877_v62 = vmov 26  }
 0xfcd   : > { %3863 = vrot.lane.b32.xlu0 %v3831_v0, %s5874_s21 }
 0xfce   : > { %3865 = vrot.lane.b32.xlu1 %v3832_v16, %s5874_s21 }
 0xfd1   : > { %3867 = vrot.lane.b32.xlu0 %v3833_v25, %s5874_s21 }
 0xfd2   : > { %3869 = vrot.lane.b32.xlu1 %v3834_v39, %s5874_s21 }
 0xfd5   : > { %3897 = vperm.xlu0 %5743, %v10884_v42  }
 0xfd6   : > { %3901 = vperm.xlu1 %5744, %v10885_v17  }
 0xfd9   : > { %3909 = vperm.xlu0 %5743, %v10886_v3  }
 0xfda   : > { %3905 = vperm.xlu1 %5744, %v10887_v52  }
 0xfdd   : > { %5746 = vset.pattern.permute.xlu0 %v5875_v33 }
 0xfde   : > { %5745 = vset.pattern.permute.xlu1 %v5875_v33  ;;  %3941 = vperm.xlu0 %5746, %v10885_v17  }
 0xfdf   : > { %3937 = vperm.xlu1 %5745, %v10884_v42  }
 0xfe2   : > { %5747 = vset.pattern.permute.xlu0 %v5876_v9 }
 0xfe3   : > { %3945 = vperm.xlu1 %5745, %v10887_v52  }
 0xfe7   : > { %3949 = vperm.xlu1 %5745, %v10886_v3  }
 0xfeb   : > { %5748 = vset.pattern.permute.xlu1 %v5876_v9 }
0x102f   : > { %v8936_v38 = vpop.permute.xlu0 %3847 }
0x1030   : > { %10888 = vst [vmem:[#allocation100_spill] sm:$0xff] %v8936_v38  ;;  %v8938_v48 = vpop.permute.xlu1 %3849 }
0x1031   : > { %10889 = vst [vmem:[#allocation111_spill] sm:$0xff] %v8938_v48 }
0x1033   : > { %v8940_v59 = vpop.permute.xlu0 %3851 }
0x1034   : > { %10890 = vst [vmem:[#allocation118_spill] sm:$0xff] %v8940_v59  ;;  %v8942_v40 = vpop.permute.xlu1 %3853 }
0x1035   : > { %10891 = vst [vmem:[#allocation107_spill] sm:$0xff] %v8942_v40 }
0x1037   : > { %v8944_v63 = vpop.permute.xlu0 %3855 }
0x1038   : > { %10892 = vst [vmem:[#allocation145_spill] sm:$0xff] %v8944_v63  ;;  %v8946_v24 = vpop.permute.xlu1 %3857 }
0x1039   : > { %10893 = vst [vmem:[#allocation144_spill] sm:$0xff] %v8946_v24 }
0x103b   : > { %v8948_v44 = vpop.permute.xlu0 %3859 }
0x103c   : > { %10894 = vst [vmem:[#allocation142_spill] sm:$0xff] %v8948_v44  ;;  %v8950_v56 = vpop.permute.xlu1 %3861 }
0x103d   : > { %10895 = vst [vmem:[#allocation143_spill] sm:$0xff] %v8950_v56 }
0x103f   : > { %v8952_v35 = vpop.permute.xlu0 %3863 }
0x1040   : > { %10896 = vst [vmem:[#allocation141_spill] sm:$0xff] %v8952_v35  ;;  %v8954_v5 = vpop.permute.xlu1 %3865 }
0x1041   : > { %10897 = vst [vmem:[#allocation102_spill] sm:$0xff] %v8954_v5 }
0x1043   : > { %v8956_v12 = vpop.permute.xlu0 %3867 }
0x1044   : > { %10898 = vst [vmem:[#allocation154_spill] sm:$0xff] %v8956_v12  ;;  %v8958_v47 = vpop.permute.xlu1 %3869 }
0x1045   : > { %10899 = vst [vmem:[#allocation115_spill] sm:$0xff] %v8958_v47 }
0x1054   : > { %v8960_v61 = vpop.permute.xlu0 %3897 }
0x1055   : > { %v8962_v46 = vpop.permute.xlu1 %3901 }
0x1058   : > { %v8966_v28 = vpop.permute.xlu0 %3909 }
0x1059   : > { %v8964_v50 = vpop.permute.xlu1 %3905 }
0x105d   : > { %v3942_v31 = vpop.permute.xlu0 %3941 }
0x105e   : > { %v3938_v49 = vpop.permute.xlu1 %3937  ;;  %v3955_v21 = vmul.f32 %v3942_v31, %v10900_v7  ;;  %v3956_v19 = vmul.f32 %v3942_v31, %v10902_v30  ;;  %v3957_v8 = vmul.f32 %v3942_v31, %v10824_v60 }
0x105f   : > { %v3952_v20 = vmul.f32 %v3938_v49, %v10752_v26  ;;  %v3953_v15 = vmul.f32 %v3938_v49, %v10753_v1  ;;  %v3954_v32 = vmul.f32 %v3938_v49, %v10901_v53 }
0x1061   : > { %3978 = vrot.lane.b32.xlu1 %v3953_v15, %s5839_s15  ;;  %3976 = vrot.lane.b32.xlu0 %v3952_v20, %s5839_s15 }
0x1062   : > { %v3946_v37 = vpop.permute.xlu1 %3945 }
0x1063   : > { %v3958_v4 = vmul.f32 %v3946_v37, %v10903_v55  ;;  %v3959_v43 = vmul.f32 %v3946_v37, %v10904_v58  ;;  %v3960_v10 = vmul.f32 %v3946_v37, %v10905_v54 }
0x1065   : > { %3980 = vrot.lane.b32.xlu0 %v3954_v32, %s5839_s15  ;;  %3982 = vrot.lane.b32.xlu1 %v3955_v21, %s5839_s15 }
0x1066   : > { %v3950_v13 = vpop.permute.xlu1 %3949 }
0x1067   : > { %v3961_v29 = vmul.f32 %v3950_v13, %v10906_v6  ;;  %v3962_v11 = vmul.f32 %v3950_v13, %v10907_v2  ;;  %v3963_v23 = vmul.f32 %v3950_v13, %v10908_v34 }
0x1069   : > { %3984 = vrot.lane.b32.xlu0 %v3956_v19, %s5839_s15  ;;  %3986 = vrot.lane.b32.xlu1 %v3957_v8, %s5839_s15 }
0x106d   : > { %3988 = vrot.lane.b32.xlu0 %v3958_v4, %s5839_s15  ;;  %3990 = vrot.lane.b32.xlu1 %v3959_v43, %s5839_s15 }
0x1071   : > { %3992 = vrot.lane.b32.xlu0 %v3960_v10, %s5839_s15  ;;  %3994 = vrot.lane.b32.xlu1 %v3961_v29, %s5839_s15  ;;  %v5878_v29 = vmov 33  }
0x1075   : > { %3996 = vrot.lane.b32.xlu0 %v3962_v11, %s5839_s15  ;;  %3998 = vrot.lane.b32.xlu1 %v3963_v23, %s5839_s15 }
0x1079   : > { %4033 = vperm.xlu0 %5747, %v10884_v42   ;;  %4037 = vperm.xlu1 %5748, %v10885_v17  }
0x107d   : > { %4045 = vperm.xlu0 %5747, %v10886_v3   ;;  %4041 = vperm.xlu1 %5748, %v10887_v52  }
0x1081   : > { %5750 = vset.pattern.permute.xlu0 %v5877_v62  ;;  %5749 = vset.pattern.permute.xlu1 %v5877_v62 }
0x10d3   : > { %v8996_v36 = vpop.permute.xlu0 %3976  ;;  %v8998_v18 = vpop.permute.xlu1 %3978 }
0x10d7   : > { %v9000_v14 = vpop.permute.xlu0 %3980  ;;  %v9002_v41 = vpop.permute.xlu1 %3982 }
0x10db   : > { %v9004_v45 = vpop.permute.xlu0 %3984  ;;  %v9006_v27 = vpop.permute.xlu1 %3986 }
0x10df   : > { %v9008_v0 = vpop.permute.xlu0 %3988  ;;  %v9010_v22 = vpop.permute.xlu1 %3990 }
0x10e3   : > { %v9012_v16 = vpop.permute.xlu0 %3992  ;;  %v9014_v57 = vpop.permute.xlu1 %3994 }
0x10e7   : > { %v9016_v51 = vpop.permute.xlu0 %3996  ;;  %v9018_v25 = vpop.permute.xlu1 %3998 }
0x10f8   : > { %v4034_v39 = vpop.permute.xlu0 %4033  ;;  %v4038_v49 = vpop.permute.xlu1 %4037 }
0x10f9   : > { %v4048_v33 = vmul.f32 %v4034_v39, %v10752_v26  ;;  %v4049_v9 = vmul.f32 %v4034_v39, %v10753_v1  ;;  %v4050_v20 = vmul.f32 %v4034_v39, %v10901_v53  ;;  %v4051_v15 = vmul.f32 %v4038_v49, %v10900_v7 }
0x10fa   : > { %v4052_v31 = vmul.f32 %v4038_v49, %v10902_v30  ;;  %v4053_v21 = vmul.f32 %v4038_v49, %v10824_v60 }
0x10fb   : > { %4072 = vrot.lane.b32.xlu1 %v4048_v33, %s5840_s16  ;;  %4074 = vrot.lane.b32.xlu0 %v4049_v9, %s5840_s16 }
0x10fc   : > { %v4042_v32 = vpop.permute.xlu1 %4041  ;;  %v4046_v8 = vpop.permute.xlu0 %4045 }
0x10fd   : > { %v4054_v37 = vmul.f32 %v4042_v32, %v10903_v55  ;;  %v4055_v19 = vmul.f32 %v4042_v32, %v10904_v58  ;;  %v4056_v4 = vmul.f32 %v4042_v32, %v10905_v54  ;;  %v4057_v43 = vmul.f32 %v4046_v8, %v10906_v6 }
0x10fe   : > { %v4058_v13 = vmul.f32 %v4046_v8, %v10907_v2  ;;  %v4059_v10 = vmul.f32 %v4046_v8, %v10908_v34 }
0x10ff   : > { %4076 = vrot.lane.b32.xlu1 %v4050_v20, %s5840_s16  ;;  %4078 = vrot.lane.b32.xlu0 %v4051_v15, %s5840_s16 }
0x1103   : > { %4080 = vrot.lane.b32.xlu1 %v4052_v31, %s5840_s16  ;;  %4082 = vrot.lane.b32.xlu0 %v4053_v21, %s5840_s16 }
0x1107   : > { %4084 = vrot.lane.b32.xlu1 %v4054_v37, %s5840_s16  ;;  %4086 = vrot.lane.b32.xlu0 %v4055_v19, %s5840_s16 }
0x110b   : > { %4088 = vrot.lane.b32.xlu1 %v4056_v4, %s5840_s16  ;;  %4090 = vrot.lane.b32.xlu0 %v4057_v43, %s5840_s16 }
0x110f   : > { %4092 = vrot.lane.b32.xlu1 %v4058_v13, %s5840_s16  ;;  %4094 = vrot.lane.b32.xlu0 %v4059_v10, %s5840_s16 }
0x1113   : > { %4129 = vperm.xlu1 %5749, %v10884_v42   ;;  %4133 = vperm.xlu0 %5750, %v10885_v17  }
0x1117   : > { %4137 = vperm.xlu1 %5749, %v10887_v52   ;;  %5751 = vset.pattern.permute.xlu0 %v5878_v29 }
0x111b   : > { %4141 = vperm.xlu1 %5749, %v10886_v3  }
0x111f   : > { %5752 = vset.pattern.permute.xlu1 %v5878_v29 }
0x116d   : > { %v9048_v11 = vpop.permute.xlu1 %4072  ;;  %v9050_v23 = vpop.permute.xlu0 %4074 }
0x1171   : > { %v9052_v62 = vpop.permute.xlu1 %4076  ;;  %v9054_v39 = vpop.permute.xlu0 %4078 }
0x1175   : > { %v9056_v33 = vpop.permute.xlu1 %4080  ;;  %v9058_v42 = vpop.permute.xlu0 %4082 }
0x1179   : > { %v9060_v17 = vpop.permute.xlu1 %4084  ;;  %v9062_v52 = vpop.permute.xlu0 %4086 }
0x117d   : > { %v9064_v3 = vpop.permute.xlu1 %4088  ;;  %v9066_v9 = vpop.permute.xlu0 %4090 }
0x1181   : > { %v9068_v49 = vpop.permute.xlu1 %4092  ;;  %v9070_v20 = vpop.permute.xlu0 %4094 }
0x1182   : > { %10909 = vst [vmem:[#allocation151_spill] sm:$0xff] %v9070_v20 }
0x1192   : > { %v4130_v15 = vpop.permute.xlu1 %4129  ;;  %v4134_v32 = vpop.permute.xlu0 %4133 }
0x1193   : > { %v4144_v31 = vmul.f32 %v4130_v15, %v10752_v26  ;;  %v4145_v21 = vmul.f32 %v4130_v15, %v10753_v1  ;;  %v4146_v37 = vmul.f32 %v4130_v15, %v10901_v53  ;;  %v4147_v19 = vmul.f32 %v4134_v32, %v10900_v7 }
0x1194   : > { %v4148_v4 = vmul.f32 %v4134_v32, %v10902_v30  ;;  %v4149_v43 = vmul.f32 %v4134_v32, %v10824_v60 }
0x1195   : > { %4170 = vrot.lane.b32.xlu1 %v4145_v21, %s5841_s17  ;;  %4168 = vrot.lane.b32.xlu0 %v4144_v31, %s5841_s17 }
0x1196   : > { %v4138_v8 = vpop.permute.xlu1 %4137 }
0x1197   : > { %v4150_v13 = vmul.f32 %v4138_v8, %v10903_v55  ;;  %v4151_v10 = vmul.f32 %v4138_v8, %v10904_v58  ;;  %v4152_v15 = vmul.f32 %v4138_v8, %v10905_v54  ;;  %v9111_v8 = vld [vmem:[%s10202_s3 + $0x18] sm:$0xff] }
0x1198   : > { %10912 = vst [vmem:[#allocation152_spill] sm:$0xff] %v9111_v8 }
0x1199   : > { %4172 = vrot.lane.b32.xlu0 %v4146_v37, %s5841_s17  ;;  %4174 = vrot.lane.b32.xlu1 %v4147_v19, %s5841_s17  ;;  %v9099_v37 = vld [vmem:[%s10202_s3] sm:$0xff]  ;;  %v9105_v19 = vld [vmem:[%s10202_s3 + $0x8] sm:$0xff] }
0x119a   : > { %v4142_v29 = vpop.permute.xlu1 %4141  ;;  %10910 = vst [vmem:[#allocation138_spill] sm:$0xff] %v9099_v37  ;;  %10911 = vst [vmem:[#allocation140_spill] sm:$0xff] %v9105_v19 }
0x119b   : > { %v4153_v31 = vmul.f32 %v4142_v29, %v10906_v6  ;;  %v4154_v21 = vmul.f32 %v4142_v29, %v10907_v2  ;;  %v4155_v32 = vmul.f32 %v4142_v29, %v10908_v34 }
0x119d   : > { %4176 = vrot.lane.b32.xlu0 %v4148_v4, %s5841_s17  ;;  %4178 = vrot.lane.b32.xlu1 %v4149_v43, %s5841_s17  ;;  %v9117_v4 = vld [vmem:[%s10202_s3 + $0x10] sm:$0xff]  ;;  %v5879_v43 = vmov 40  }
0x119e   : > { %10913 = vst [vmem:[#allocation146_spill] sm:$0xff] %v9117_v4 }
0x11a1   : > { %4180 = vrot.lane.b32.xlu0 %v4150_v13, %s5841_s17  ;;  %4182 = vrot.lane.b32.xlu1 %v4151_v10, %s5841_s17 }
0x11a5   : > { %4184 = vrot.lane.b32.xlu0 %v4152_v15, %s5841_s17  ;;  %4186 = vrot.lane.b32.xlu1 %v4153_v31, %s5841_s17 }
0x11a9   : > { %4188 = vrot.lane.b32.xlu0 %v4154_v21, %s5841_s17  ;;  %4190 = vrot.lane.b32.xlu1 %v4155_v32, %s5841_s17 }
0x11ad   : > { %4225 = vperm.xlu0 %5751, %v9099_v37   ;;  %4229 = vperm.xlu1 %5752, %v9105_v19  }
0x11b1   : > { %4237 = vperm.xlu0 %5751, %v9111_v8   ;;  %4233 = vperm.xlu1 %5752, %v9117_v4  }
0x11b5   : > { %5754 = vset.pattern.permute.xlu0 %v5879_v43  ;;  %5753 = vset.pattern.permute.xlu1 %v5879_v43 }
0x1207   : > { %v9120_v13 = vpop.permute.xlu0 %4168  ;;  %v9122_v10 = vpop.permute.xlu1 %4170 }
0x120b   : > { %v9124_v29 = vpop.permute.xlu0 %4172  ;;  %v9126_v15 = vpop.permute.xlu1 %4174 }
0x120f   : > { %v9128_v31 = vpop.permute.xlu0 %4176  ;;  %v9130_v21 = vpop.permute.xlu1 %4178 }
0x1213   : > { %v9132_v32 = vpop.permute.xlu0 %4180  ;;  %v9134_v24 = vpop.permute.xlu1 %4182 }
0x1214   : > { %10914 = vst [vmem:[#allocation148_spill] sm:$0xff] %v9132_v32  ;;  %10915 = vst [vmem:[#allocation137_spill] sm:$0xff] %v9134_v24 }
0x1217   : > { %v9136_v59 = vpop.permute.xlu0 %4184  ;;  %v9138_v40 = vpop.permute.xlu1 %4186 }
0x1218   : > { %10916 = vst [vmem:[#allocation149_spill] sm:$0xff] %v9136_v59  ;;  %10917 = vst [vmem:[#allocation150_spill] sm:$0xff] %v9138_v40 }
0x121b   : > { %v9140_v43 = vpop.permute.xlu0 %4188  ;;  %v9142_v63 = vpop.permute.xlu1 %4190 }
0x121c   : > { %10918 = vst [vmem:[#allocation147_spill] sm:$0xff] %v9140_v43  ;;  %10919 = vst [vmem:[#allocation153_spill] sm:$0xff] %v9142_v63 }
0x122c   : > { %v4226_v38 = vpop.permute.xlu0 %4225  ;;  %v4230_v44 = vpop.permute.xlu1 %4229 }
0x122d   : > { %v4240_v48 = vmul.f32 %v4226_v38, %v10752_v26  ;;  %v4241_v35 = vmul.f32 %v4226_v38, %v10753_v1  ;;  %v4242_v56 = vmul.f32 %v4226_v38, %v10901_v53  ;;  %v4243_v47 = vmul.f32 %v4230_v44, %v10900_v7 }
0x122e   : > { %v4244_v5 = vmul.f32 %v4230_v44, %v10902_v30  ;;  %v4245_v12 = vmul.f32 %v4230_v44, %v10824_v60 }
0x122f   : > { %4264 = vrot.lane.b32.xlu1 %v4240_v48, %s5842_s18  ;;  %4266 = vrot.lane.b32.xlu0 %v4241_v35, %s5842_s18 }
0x1230   : > { %v4234_v63 = vpop.permute.xlu1 %4233  ;;  %v4238_v38 = vpop.permute.xlu0 %4237 }
0x1231   : > { %v4246_v48 = vmul.f32 %v4234_v63, %v10903_v55  ;;  %v4247_v35 = vmul.f32 %v4234_v63, %v10904_v58  ;;  %v4250_v44 = vmul.f32 %v4238_v38, %v10907_v2 }
0x1233   : > { %4268 = vrot.lane.b32.xlu1 %v4242_v56, %s5842_s18  ;;  %4270 = vrot.lane.b32.xlu0 %v4243_v47, %s5842_s18  ;;  %v4248_v56 = vmul.f32 %v4234_v63, %v10905_v54  ;;  %v4249_v47 = vmul.f32 %v4238_v38, %v10906_v6  ;;  %v5880_v63 = vmov 47  }
0x1237   : > { %4272 = vrot.lane.b32.xlu1 %v4244_v5, %s5842_s18  ;;  %4274 = vrot.lane.b32.xlu0 %v4245_v12, %s5842_s18  ;;  %v4251_v5 = vmul.f32 %v4238_v38, %v10908_v34 }
0x123b   : > { %4276 = vrot.lane.b32.xlu1 %v4246_v48, %s5842_s18  ;;  %4278 = vrot.lane.b32.xlu0 %v4247_v35, %s5842_s18 }
0x123f   : > { %4280 = vrot.lane.b32.xlu1 %v4248_v56, %s5842_s18  ;;  %4282 = vrot.lane.b32.xlu0 %v4249_v47, %s5842_s18 }
0x1243   : > { %4284 = vrot.lane.b32.xlu1 %v4250_v44, %s5842_s18  ;;  %4286 = vrot.lane.b32.xlu0 %v4251_v5, %s5842_s18 }
0x1247   : > { %4321 = vperm.xlu1 %5753, %v9099_v37   ;;  %4325 = vperm.xlu0 %5754, %v9105_v19  }
0x124b   : > { %4329 = vperm.xlu1 %5753, %v9117_v4   ;;  %5755 = vset.pattern.permute.xlu0 %v5880_v63 }
0x124f   : > { %4333 = vperm.xlu1 %5753, %v9111_v8  }
0x1253   : > { %5756 = vset.pattern.permute.xlu1 %v5880_v63 }
0x12a1   : > { %v9172_v12 = vpop.permute.xlu1 %4264  ;;  %v9174_v48 = vpop.permute.xlu0 %4266 }
0x12a5   : > { %v9176_v35 = vpop.permute.xlu1 %4268  ;;  %v9178_v38 = vpop.permute.xlu0 %4270 }
0x12a6   : > { %10920 = vst [vmem:[#allocation136_spill] sm:$0xff] %v9178_v38 }
0x12a9   : > { %v9180_v56 = vpop.permute.xlu1 %4272  ;;  %v9182_v47 = vpop.permute.xlu0 %4274 }
0x12aa   : > { %10921 = vst [vmem:[#allocation156_spill] sm:$0xff] %v9182_v47 }
0x12ad   : > { %v9184_v44 = vpop.permute.xlu1 %4276  ;;  %v9186_v5 = vpop.permute.xlu0 %4278 }
0x12ae   : > { %10922 = vst [vmem:[#allocation155_spill] sm:$0xff] %v9184_v44  ;;  %10923 = vst [vmem:[#allocation139_spill] sm:$0xff] %v9186_v5 }
0x12b1   : > { %v9188_v40 = vpop.permute.xlu1 %4280  ;;  %v9190_v43 = vpop.permute.xlu0 %4282 }
0x12b2   : > { %10924 = vst [vmem:[#allocation157_spill] sm:$0xff] %v9188_v40  ;;  %10925 = vst [vmem:[#allocation114_spill] sm:$0xff] %v9190_v43 }
0x12b5   : > { %v9192_v63 = vpop.permute.xlu1 %4284  ;;  %v9194_v59 = vpop.permute.xlu0 %4286 }
0x12b6   : > { %10926 = vst [vmem:[#allocation105_spill] sm:$0xff] %v9192_v63  ;;  %10927 = vst [vmem:[#allocation128_spill] sm:$0xff] %v9194_v59 }
0x12c6   : > { %v4322_v20 = vpop.permute.xlu1 %4321  ;;  %v4326_v38 = vpop.permute.xlu0 %4325 }
0x12c7   : > { %v4336_v32 = vmul.f32 %v4322_v20, %v10752_v26  ;;  %v4337_v24 = vmul.f32 %v4322_v20, %v10753_v1  ;;  %v4338_v44 = vmul.f32 %v4322_v20, %v10901_v53  ;;  %v4339_v40 = vmul.f32 %v4326_v38, %v10900_v7 }
0x12c8   : > { %v4340_v59 = vmul.f32 %v4326_v38, %v10902_v30  ;;  %v4341_v63 = vmul.f32 %v4326_v38, %v10824_v60 }
0x12c9   : > { %4362 = vrot.lane.b32.xlu1 %v4337_v24, %s5843_s19  ;;  %4360 = vrot.lane.b32.xlu0 %v4336_v32, %s5843_s19 }
0x12ca   : > { %v4330_v43 = vpop.permute.xlu1 %4329 }
0x12cb   : > { %v4342_v24 = vmul.f32 %v4330_v43, %v10903_v55  ;;  %v4343_v32 = vmul.f32 %v4330_v43, %v10904_v58 }
0x12cd   : > { %4364 = vrot.lane.b32.xlu0 %v4338_v44, %s5843_s19  ;;  %4366 = vrot.lane.b32.xlu1 %v4339_v40, %s5843_s19  ;;  %v4344_v40 = vmul.f32 %v4330_v43, %v10905_v54 }
0x12ce   : > { %v4334_v20 = vpop.permute.xlu1 %4333 }
0x12cf   : > { %v4345_v44 = vmul.f32 %v4334_v20, %v10906_v6  ;;  %v4347_v38 = vmul.f32 %v4334_v20, %v10908_v34 }
0x12d1   : > { %4368 = vrot.lane.b32.xlu0 %v4340_v59, %s5843_s19  ;;  %4370 = vrot.lane.b32.xlu1 %v4341_v63, %s5843_s19  ;;  %v4346_v59 = vmul.f32 %v4334_v20, %v10907_v2 }
0x12d5   : > { %4372 = vrot.lane.b32.xlu0 %v4342_v24, %s5843_s19  ;;  %4374 = vrot.lane.b32.xlu1 %v4343_v32, %s5843_s19 }
0x12d9   : > { %4376 = vrot.lane.b32.xlu0 %v4344_v40, %s5843_s19  ;;  %4378 = vrot.lane.b32.xlu1 %v4345_v44, %s5843_s19 }
0x12dd   : > { %4380 = vrot.lane.b32.xlu0 %v4346_v59, %s5843_s19  ;;  %4382 = vrot.lane.b32.xlu1 %v4347_v38, %s5843_s19 }
0x12e1   : > { %4417 = vperm.xlu0 %5755, %v9099_v37   ;;  %4421 = vperm.xlu1 %5756, %v9105_v19  }
0x12e5   : > { %4429 = vperm.xlu0 %5755, %v9111_v8   ;;  %4425 = vperm.xlu1 %5756, %v9117_v4  }
0x133b   : > { %v9224_v43 = vpop.permute.xlu0 %4360  ;;  %v9226_v63 = vpop.permute.xlu1 %4362 }
0x133f   : > { %v9228_v24 = vpop.permute.xlu0 %4364  ;;  %v9230_v32 = vpop.permute.xlu1 %4366 }
0x1340   : > { %10928 = vst [vmem:[#allocation127_spill] sm:$0xff] %v9230_v32 }
0x1343   : > { %v9232_v20 = vpop.permute.xlu0 %4368  ;;  %v9234_v40 = vpop.permute.xlu1 %4370 }
0x1344   : > { %10929 = vst [vmem:[#allocation16_spill] sm:$0xff] %v9232_v20  ;;  %10930 = vst [vmem:[#allocation19_spill] sm:$0xff] %v9234_v40 }
0x1347   : > { %v9236_v44 = vpop.permute.xlu0 %4372  ;;  %v9238_v59 = vpop.permute.xlu1 %4374 }
0x1348   : > { %10931 = vst [vmem:[#allocation21_spill] sm:$0xff] %v9236_v44  ;;  %10932 = vst [vmem:[#allocation160_spill] sm:$0xff] %v9238_v59 }
0x134b   : > { %v9240_v38 = vpop.permute.xlu0 %4376  ;;  %v9242_v37 = vpop.permute.xlu1 %4378 }
0x134c   : > { %10933 = vst [vmem:[#allocation161_spill] sm:$0xff] %v9240_v38  ;;  %10934 = vst [vmem:[#allocation162_spill] sm:$0xff] %v9242_v37 }
0x134f   : > { %v9244_v4 = vpop.permute.xlu0 %4380  ;;  %v9246_v19 = vpop.permute.xlu1 %4382 }
0x1350   : > { %10935 = vst [vmem:[#allocation163_spill] sm:$0xff] %v9244_v4  ;;  %10936 = vst [vmem:[#allocation164_spill] sm:$0xff] %v9246_v19 }
0x1360   : > { %v4418_v8 = vpop.permute.xlu0 %4417  ;;  %v4422_v32 = vpop.permute.xlu1 %4421 }
0x1361   : > { %v4432_v5 = vmul.f32 %v4418_v8, %v10752_v26  ;;  %v4433_v47 = vmul.f32 %v4418_v8, %v10753_v1  ;;  %v4434_v44 = vmul.f32 %v4418_v8, %v10901_v53  ;;  %v4435_v38 = vmul.f32 %v4422_v32, %v10900_v7  ;;  %v10938_v8 = vld [vmem:[#allocation95_spill] sm:$0xff] }
0x1362   : > { %v4436_v19 = vmul.f32 %v4422_v32, %v10902_v30  ;;  %v4437_v37 = vmul.f32 %v4422_v32, %v10824_v60  ;;  %v4513_v40 = vadd.s32 2, %v10938_v8 }
0x1363   : > { %4456 = vrot.lane.b32.xlu1 %v4432_v5, %s5844_s20  ;;  %4458 = vrot.lane.b32.xlu0 %v4433_v47, %s5844_s20  ;;  %v10937_v47 = vld [vmem:[#allocation96_spill] sm:$0xff] }
0x1364   : > { %v4426_v4 = vpop.permute.xlu1 %4425  ;;  %v4512_v59 = vadd.s32 2, %v10937_v47  ;;  %vm4517_vm2 = vcmp.lt.s32.totalorder %v4513_v40, 16  ;;  %v10439_v40 = vmov 6  }
0x1365   : > { %v4438_v5 = vmul.f32 %v4426_v4, %v10903_v55  ;;  %v4439_v20 = vmul.f32 %v4426_v4, %v10904_v58  ;;  %v4440_v32 = vmul.f32 %v4426_v4, %v10905_v54  ;;  %v10441_v4 = vmov 13   ;;  %5762 = vset.pattern.permute.xlu1 %v10439_v40 }
0x1366   : > { %vm4516_vm0 = vcmp.lt.s32.totalorder %v4512_v59, 16  ;;  %5764 = vset.pattern.permute.xlu0 %v10441_v4  ;;  %v3921_v4 = vmul.f32 %v8966_v28, %v10906_v6 }
0x1367   : > { %4460 = vrot.lane.b32.xlu1 %v4434_v44, %s5844_s20  ;;  %4462 = vrot.lane.b32.xlu0 %v4435_v38, %s5844_s20  ;;  %v4430_v44 = vpop.permute.xlu0 %4429 }
0x1368   : > { %v4442_v47 = vmul.f32 %v4430_v44, %v10907_v2 }
0x136b   : > { %4464 = vrot.lane.b32.xlu1 %v4436_v19, %s5844_s20  ;;  %4466 = vrot.lane.b32.xlu0 %v4437_v37, %s5844_s20  ;;  %v4441_v19 = vmul.f32 %v4430_v44, %v10906_v6  ;;  %v10939_v37 = vmov 0.0  }
0x136c   : > { %v5572_v38 = vsel %vm4516_vm0, 1.0, %v10939_v37  ;;  %v5573_v8 = vsel %vm4517_vm2, 1.0, %v10939_v37  ;;  %v4001_v37 = vsel %vm587_vm5, %v8998_v18, %v9000_v14  ;;  %vm5401_vm0 = vcmask 1041408  }
0x136d   : > { %vm5387_vm2 = vcmask 1043459  }
0x136f   : > { %4468 = vrot.lane.b32.xlu1 %v4438_v5, %s5844_s20  ;;  %4470 = vrot.lane.b32.xlu0 %v4439_v20, %s5844_s20  ;;  %v4443_v5 = vmul.f32 %v4430_v44, %v10908_v34  ;;  %v5757_v20 = vpack.i.bf16 %v5573_v8, %v5572_v38  ;;  %v3913_v44 = vmul.f32 %v8960_v61, %v10753_v1 }
0x1370   : > { %v3914_v8 = vmul.f32 %v8960_v61, %v10901_v53  ;;  %v3916_v38 = vmul.f32 %v8962_v46, %v10902_v30  ;;  %v3918_v1 = vmul.f32 %v8964_v50, %v10903_v55 }
0x1373   : > { %4472 = vrot.lane.b32.xlu1 %v4440_v32, %s5844_s20  ;;  %4474 = vrot.lane.b32.xlu0 %v4441_v19, %s5844_s20  ;;  %v3915_v19 = vmul.f32 %v8962_v46, %v10900_v7  ;;  %v3923_v7 = vmul.f32 %v8966_v28, %v10908_v34  ;;  %v4005_v34 = vsel %vm587_vm5, %v9010_v22, %v9012_v16 }
0x1377   : > { %4476 = vrot.lane.b32.xlu1 %v4442_v47, %s5844_s20  ;;  %4478 = vrot.lane.b32.xlu0 %v4443_v5, %s5844_s20  ;;  %v3912_v47 = vmul.f32 %v8960_v61, %v10752_v26  ;;  %v4000_v5 = vsel %vm587_vm5, %v8996_v36, %v8998_v18  ;;  %v3922_v61 = vmul.f32 %v8966_v28, %v10907_v2 }
0x1378   : > { %v3919_v36 = vmul.f32 %v8964_v50, %v10904_v58  ;;  %v4004_v28 = vsel %vm587_vm5, %v9008_v0, %v9010_v22  ;;  %v3920_v18 = vmul.f32 %v8964_v50, %v10905_v54  ;;  %v4022_v26 = vadd.f32 %v9000_v14, %v3914_v8 }
0x1379   : > { %v4020_v53 = vadd.f32 %v4000_v5, %v3912_v47  ;;  %v4007_v47 = vsel %vm587_vm5, %v9016_v51, %v9018_v25  ;;  %v4096_v22 = vsel %vm676_vm6, %v9048_v11, %v9050_v23 }
0x137a   : > { %v4027_v14 = vadd.f32 %v4005_v34, %v3919_v36  ;;  %v9346_v58 = vadd.f32 %v4007_v47, %v3922_v61  ;;  %v4100_v34 = vsel %vm676_vm6, %v9060_v17, %v9062_v52 }
0x137b   : > { %5758 = vrot.lane.b32.xlu1 %v5757_v20, %s5881_s9  ;;  %v3917_v20 = vmul.f32 %v8962_v46, %v10824_v60  ;;  %v4002_v46 = vsel %vm587_vm5, %v9002_v41, %v9004_v45  ;;  %v4003_v60 = vsel %vm587_vm5, %v9004_v45, %v9006_v27  ;;  %v4021_v41 = vadd.f32 %v4001_v37, %v3913_v44 }
0x137c   : > { %v4006_v45 = vsel %vm587_vm5, %v9014_v57, %v9016_v51  ;;  %v4023_v50 = vadd.f32 %v4002_v46, %v3915_v19  ;;  %v4024_v6 = vadd.f32 %v4003_v60, %v3916_v38  ;;  %v4026_v37 = vadd.f32 %v4004_v28, %v3918_v1 }
0x137d   : > { %v4025_v0 = vadd.f32 %v9006_v27, %v3917_v20  ;;  %v4028_v44 = vadd.f32 %v9012_v16, %v3920_v18  ;;  %v4097_v57 = vsel %vm676_vm6, %v9050_v23, %v9052_v62  ;;  %v9344_v51 = vadd.f32 %v9018_v25, %v3923_v7 }
0x137e   : > { %v4029_v8 = vadd.f32 %v4006_v45, %v3921_v4  ;;  %v4098_v60 = vsel %vm676_vm6, %v9054_v39, %v9056_v33  ;;  %v4116_v11 = vadd.f32 %v4096_v22, %v4020_v53  ;;  %v4099_v1 = vsel %vm676_vm6, %v9056_v33, %v9058_v42  ;;  %v10941_v22 = vld [vmem:[#allocation16_spill] sm:$0xff] }
0x137f   : > { %v4192_v7 = vsel %vm765_vm7, %v9120_v13, %v9122_v10  ;;  %v4117_v25 = vadd.f32 %v4097_v57, %v4021_v41  ;;  %v4118_v23 = vadd.f32 %v9052_v62, %v4022_v26  ;;  %v4101_v53 = vsel %vm676_vm6, %v9062_v52, %v9064_v3 }
0x1380   : > { %v4193_v39 = vsel %vm765_vm7, %v9122_v10, %v9124_v29  ;;  %v4119_v33 = vadd.f32 %v4098_v60, %v4023_v50  ;;  %v4121_v17 = vadd.f32 %v9058_v42, %v4025_v0  ;;  %v4102_v13 = vsel %vm676_vm6, %v9066_v9, %v9068_v49 }
0x1381   : > { %v4288_v4 = vsel %vm854_vm8, %v9172_v12, %v9174_v48  ;;  %v4120_v26 = vadd.f32 %v4099_v1, %v4024_v6  ;;  %v4122_v62 = vadd.f32 %v4100_v34, %v4026_v37  ;;  %v4212_v19 = vadd.f32 %v4192_v7, %v4116_v11 }
0x1382   : > { %v4289_v52 = vsel %vm854_vm8, %v9174_v48, %v9176_v35  ;;  %v4123_v38 = vadd.f32 %v4101_v53, %v4027_v14  ;;  %v9380_v10 = vadd.f32 %v9064_v3, %v4028_v44  ;;  %v4213_v42 = vadd.f32 %v4193_v39, %v4117_v25  ;;  %v10944_v25 = vld [vmem:[#allocation137_spill] sm:$0xff]  ;;  %v10946_v39 = vld [vmem:[#allocation19_spill] sm:$0xff] }
0x1383   : > { %v4384_v9 = vsel %vm943_vm9, %v9224_v43, %v9226_v63  ;;  %v9387_v61 = vadd.f32 %v4102_v13, %v4029_v8  ;;  %v4194_v6 = vsel %vm765_vm7, %v9126_v15, %v9128_v31  ;;  %v4308_v12 = vadd.f32 %v4288_v4, %v4212_v19  ;;  %v10940_v15 = vld [vmem:[#allocation136_spill] sm:$0xff]  ;;  %v10948_v13 = vld [vmem:[#allocation149_spill] sm:$0xff] }
0x1384   : > { %v4385_v48 = vsel %vm943_vm9, %v9226_v63, %v9228_v24  ;;  %v4214_v36 = vadd.f32 %v9124_v29, %v4118_v23  ;;  %v4217_v46 = vadd.f32 %v9130_v21, %v4121_v17  ;;  %v4309_v28 = vadd.f32 %v4289_v52, %v4213_v42  ;;  %v10943_v8 = vld [vmem:[#allocation156_spill] sm:$0xff]  ;;  %v10947_v17 = vld [vmem:[#allocation151_spill] sm:$0xff] }
0x1385   : > { %v4195_v18 = vsel %vm765_vm7, %v9128_v31, %v9130_v21  ;;  %v4290_v41 = vsel %vm854_vm8, %v10940_v15, %v9180_v56  ;;  %v4404_v45 = vadd.f32 %v4384_v9, %v4308_v12  ;;  %v4215_v47 = vadd.f32 %v4194_v6, %v4119_v33  ;;  %v10945_v23 = vld [vmem:[#allocation148_spill] sm:$0xff]  ;;  %v10949_v42 = vld [vmem:[#allocation139_spill] sm:$0xff] }
0x1386   : > { %v4310_v29 = vadd.f32 %v9176_v35, %v4214_v36  ;;  %v4405_v0 = vadd.f32 %v4385_v48, %v4309_v28  ;;  %v4216_v44 = vadd.f32 %v4195_v18, %v4120_v26  ;;  %v4196_v53 = vsel %vm765_vm7, %v10945_v23, %v10944_v25  ;;  %v10950_v9 = vld [vmem:[#allocation155_spill] sm:$0xff]  ;;  %v10951_v36 = vld [vmem:[#allocation157_spill] sm:$0xff]  ;;  %v10952_v15 = vld [vmem:[#allocation160_spill] sm:$0xff] }
0x1387   : > { %v4311_v57 = vadd.f32 %v4290_v41, %v4215_v47  ;;  %v4197_v4 = vsel %vm765_vm7, %v10944_v25, %v10948_v13  ;;  %v4313_v52 = vadd.f32 %v10943_v8, %v4217_v46  ;;  %v4292_v6 = vsel %vm854_vm8, %v10950_v9, %v10949_v42  ;;  %v10953_v41 = vld [vmem:[#allocation21_spill] sm:$0xff]  ;;  %v10955_v47 = vld [vmem:[#allocation150_spill] sm:$0xff] }
0x1388   : > { %v4406_v35 = vadd.f32 %v9228_v24, %v4310_v29  ;;  %v4218_v48 = vadd.f32 %v4196_v53, %v4122_v62  ;;  %v4219_v18 = vadd.f32 %v4197_v4, %v4123_v38  ;;  %v4220_v38 = vadd.f32 %v10948_v13, %v9380_v10  ;;  %v10962_v4 = vld [vmem:[#allocation128_spill] sm:$0xff] }
0x1389   : > { %v4409_v46 = vadd.f32 %v10946_v39, %v4313_v52 }
0x138a   : > { %v4314_v29 = vadd.f32 %v4292_v6, %v4218_v48  ;;  %v4316_v53 = vadd.f32 %v10951_v36, %v4220_v38 }
0x13d5   : > { %v9278_v59 = vpop.permute.xlu1 %4456  ;;  %v4459_v30 = vpop.permute.xlu0 %4458 }
0x13d6   : > { %v4480_v43 = vsel %vm1032_vm10, %v9278_v59, %v4459_v30  ;;  %v10942_v59 = vld [vmem:[#allocation127_spill] sm:$0xff] }
0x13d7   : > { %v4386_v37 = vsel %vm943_vm9, %v10942_v59, %v10941_v22  ;;  %v4500_v14 = vadd.f32 %v4480_v43, %v4404_v45  ;;  %v4388_v45 = vsel %vm943_vm9, %v10953_v41, %v10952_v15 }
0x13d8   : > { %v4407_v33 = vadd.f32 %v4386_v37, %v4311_v57  ;;  %v10957_v57 = vld [vmem:[#allocation105_spill] sm:$0xff] }
0x13d9   : > { %v9280_v32 = vpop.permute.xlu1 %4460  ;;  %v4463_v27 = vpop.permute.xlu0 %4462 }
0x13da   : > { %v4481_v63 = vsel %vm1032_vm10, %v4459_v30, %v9280_v32  ;;  %v4291_v30 = vsel %vm854_vm8, %v9180_v56, %v10943_v8  ;;  %v4387_v56 = vsel %vm943_vm9, %v10941_v22, %v10946_v39  ;;  %v4502_v19 = vadd.f32 %v9280_v32, %v4406_v35  ;;  %v10958_v8 = vld [vmem:[#allocation114_spill] sm:$0xff]  ;;  %v10960_v39 = vld [vmem:[#allocation163_spill] sm:$0xff] }
0x13db   : > { %v4501_v60 = vadd.f32 %v4481_v63, %v4405_v0  ;;  %v4312_v26 = vadd.f32 %v4291_v30, %v4216_v44  ;;  %v4293_v32 = vsel %vm854_vm8, %v10949_v42, %v10951_v36  ;;  %v10956_v0 = vld [vmem:[#allocation161_spill] sm:$0xff]  ;;  %v4294_v30 = vsel %vm854_vm8, %v10958_v8, %v10957_v57 }
0x13dc   : > { %v4315_v37 = vadd.f32 %v4293_v32, %v4219_v18 }
0x13dd   : > { %v9297_v40 = vpop.permute.xlu1 %4464  ;;  %v4467_v3 = vpop.permute.xlu0 %4466  ;;  %v4408_v28 = vadd.f32 %v4387_v56, %v4312_v26  ;;  %v10961_v56 = vld [vmem:[#allocation162_spill] sm:$0xff] }
0x13de   : > { %v4482_v11 = vsel %vm1032_vm10, %v4463_v27, %v9297_v40  ;;  %v4103_v27 = vsel %vm676_vm6, %v9068_v49, %v10947_v17  ;;  %v4483_v49 = vsel %vm1032_vm10, %v9297_v40, %v4467_v3  ;;  %v10954_v40 = vld [vmem:[#allocation147_spill] sm:$0xff] }
0x13df   : > { %v4503_v12 = vadd.f32 %v4482_v11, %v4407_v33  ;;  %v4198_v62 = vsel %vm765_vm7, %v10955_v47, %v10954_v40  ;;  %v4504_v22 = vadd.f32 %v4483_v49, %v4408_v28  ;;  %v4126_v23 = vadd.f32 %v4103_v27, %v9346_v58 }
0x13e0   : > { %v4390_v33 = vsel %vm943_vm9, %v10961_v56, %v10960_v39  ;;  %v4412_v27 = vadd.f32 %v10956_v0, %v4316_v53  ;;  %v5885_v47 = vmov 20   ;;  %v10980_v56 = vld [vmem:[#allocation18_spill] sm:$0xff] }
0x13e1   : > { %v9333_v5 = vpop.permute.xlu1 %4468  ;;  %v4471_v1 = vpop.permute.xlu0 %4470 }
0x13e2   : > { %v4484_v44 = vsel %vm1032_vm10, %v9333_v5, %v4471_v1 }
0x13e5   : > { %v9360_v16 = vpop.permute.xlu1 %4472  ;;  %v4475_v59 = vpop.permute.xlu0 %4474 }
0x13e6   : > { %v4485_v35 = vsel %vm1032_vm10, %v4471_v1, %v9360_v16  ;;  %v4508_v48 = vadd.f32 %v9360_v16, %v4412_v27  ;;  %v10984_v27 = vld [vmem:[#allocation13_spill] sm:$0xff] }
0x13e9   : > { %v9385_v20 = vpop.permute.xlu1 %4476  ;;  %v4479_v52 = vpop.permute.xlu0 %4478 }
0x13ea   : > { %v4487_v28 = vsel %vm1032_vm10, %v9385_v20, %v4479_v52 }
0x13ed   : > { %v5759_v50 = vpop.permute.xlu1 %5758 }
0x13ee   : > { %v9411_v31 = vunpack.i.h.bf16 %v5759_v50  ;;  %v9413_v21 = vunpack.i.l.bf16 %v5759_v50  ;;  %v4389_v50 = vsel %vm943_vm9, %v10952_v15, %v10956_v0  ;;  %v5888_v0 = vmov 41  }
0x13ef   : > { %v4411_v25 = vadd.f32 %v4389_v50, %v4315_v37  ;;  %v5889_v50 = vmov 48  }
0x13f0   : > { %v4535_v34 = vmul.f32 %v9413_v21, %v4500_v14  ;;  %v9424_v7 = vsel %vm4530_vm3, %v9413_v21, %v9411_v31  ;;  %v4537_v43 = vmul.f32 %v9411_v31, %v4502_v19  ;;  %v4538_v63 = vmul.f32 %v9413_v21, %v4503_v12 }
0x13f1   : > { %v4536_v24 = vmul.f32 %v9424_v7, %v4501_v60  ;;  %v4505_v14 = vadd.f32 %v4467_v3, %v4409_v46  ;;  %v4410_v60 = vadd.f32 %v4388_v45, %v4314_v29  ;;  %v4539_v11 = vmul.f32 %v9424_v7, %v4504_v22 }
0x13f2   : > { %4559 = vrot.lane.b32.xlu0 %v4535_v34, %s5884_s10  ;;  %v10959_v34 = vld [vmem:[#allocation153_spill] sm:$0xff]  ;;  %v4221_v3 = vadd.f32 %v4198_v62, %v9387_v61  ;;  %v4295_v61 = vsel %vm854_vm8, %v10957_v57, %v10962_v4  ;;  %v4507_v26 = vadd.f32 %v4485_v35, %v4411_v25  ;;  %v4486_v19 = vsel %vm1032_vm10, %v4475_v59, %v9385_v20  ;;  %v10964_v20 = vld [vmem:[#allocation152_spill] sm:$0xff]  ;;  %v10967_v62 = vld [vmem:[#allocation146_spill] sm:$0xff] }
0x13f3   : > { %4561 = vrot.lane.b32.xlu1 %v4536_v24, %s5884_s10  ;;  %v4199_v10 = vsel %vm765_vm7, %v10954_v40, %v10959_v34  ;;  %v4540_v5 = vmul.f32 %v9411_v31, %v4505_v14  ;;  %v4506_v1 = vadd.f32 %v4484_v44, %v4410_v60  ;;  %v4127_v24 = vadd.f32 %v10947_v17, %v9344_v51  ;;  %v10963_v51 = vld [vmem:[#allocation164_spill] sm:$0xff] }
0x13f4   : > { %v4317_v13 = vadd.f32 %v4294_v30, %v4221_v3  ;;  %v4222_v58 = vadd.f32 %v4199_v10, %v4126_v23  ;;  %v4391_v17 = vsel %vm943_vm9, %v10960_v39, %v10963_v51  ;;  %v4542_v12 = vmul.f32 %v9424_v7, %v4507_v26  ;;  %v10965_v40 = vld [vmem:[#allocation140_spill] sm:$0xff]  ;;  %v10983_v26 = vld [vmem:[#allocation22_spill] sm:$0xff] }
0x13f5   : > { %v4541_v42 = vmul.f32 %v9413_v21, %v4506_v1  ;;  %v4223_v9 = vadd.f32 %v10959_v34, %v4127_v24  ;;  %v4543_v18 = vmul.f32 %v9411_v31, %v4508_v48  ;;  %v5887_v29 = vmov 34   ;;  %v10981_v24 = vld [vmem:[#allocation20_spill] sm:$0xff] }
0x13f6   : > { %4563 = vrot.lane.b32.xlu0 %v4537_v43, %s5884_s10  ;;  %v4413_v6 = vadd.f32 %v4390_v33, %v4317_v13  ;;  %v4318_v49 = vadd.f32 %v4295_v61, %v4222_v58  ;;  %v10969_v22 = vmov 6   ;;  %v10970_v59 = vmov 0  }
0x13f7   : > { %4565 = vrot.lane.b32.xlu1 %v4538_v63, %s5884_s10  ;;  %v4319_v36 = vadd.f32 %v10962_v4, %v4223_v9  ;;  %v10982_v4 = vld [vmem:[#allocation12_spill] sm:$0xff]  ;;  %vm5389_vm3 = vcmask 1045509  }
0x13f8   : > { %v4509_v32 = vadd.f32 %v4486_v19, %v4413_v6  ;;  %v4414_v43 = vadd.f32 %v4391_v17, %v4318_v49 }
0x13f9   : > { %v4415_v46 = vadd.f32 %v10963_v51, %v4319_v36  ;;  %v10986_v51 = vld [vmem:[#allocation15_spill] sm:$0xff]  ;;  %v10988_v36 = vld [vmem:[#allocation17_spill] sm:$0xff] }
0x13fa   : > { %4567 = vrot.lane.b32.xlu0 %v4539_v11, %s5884_s10  ;;  %v4544_v15 = vmul.f32 %v9413_v21, %v4509_v32  ;;  %v4510_v41 = vadd.f32 %v4487_v28, %v4414_v43  ;;  %v10966_v21 = vmov 13  }
0x13fb   : > { %4569 = vrot.lane.b32.xlu1 %v4540_v5, %s5884_s10  ;;  %v4511_v16 = vadd.f32 %v4479_v52, %v4415_v46 }
0x13fc   : > { %v4545_v45 = vmul.f32 %v9424_v7, %v4510_v41  ;;  %v10968_v7 = vld [vmem:[#allocation138_spill] sm:$0xff] }
0x13fd   : > { %v4546_v63 = vmul.f32 %v9411_v31, %v4511_v16  ;;  %v5886_v31 = vmov 27  }
0x13fe   : > { %4571 = vrot.lane.b32.xlu0 %v4541_v42, %s5884_s10  ;;  %v10985_v42 = vld [vmem:[#allocation11_spill] sm:$0xff] }
0x13ff   : > { %4573 = vrot.lane.b32.xlu1 %v4542_v12, %s5884_s10  ;;  %v10987_v12 = vld [vmem:[#allocation14_spill] sm:$0xff] }
0x1402   : > { %4575 = vrot.lane.b32.xlu0 %v4543_v18, %s5884_s10 }
0x1403   : > { %4577 = vrot.lane.b32.xlu1 %v4544_v15, %s5884_s10 }
0x1406   : > { %4579 = vrot.lane.b32.xlu0 %v4545_v45, %s5884_s10 }
0x1407   : > { %4581 = vrot.lane.b32.xlu1 %v4546_v63, %s5884_s10 }
0x140a   : > { %4661 = vperm.xlu0 %5764, %v10964_v20  }
0x140b   : > { %4613 = vperm.xlu1 %5762, %v10965_v40  }
0x140e   : > { %5765 = vset.pattern.permute.xlu0 %v5885_v47 }
0x140f   : > { %5763 = vset.pattern.permute.xlu1 %v10966_v21  ;;  %4753 = vperm.xlu0 %5765, %v10967_v62  }
0x1410   : > { %4657 = vperm.xlu1 %5763, %v10967_v62  }
0x1413   : > { %4749 = vperm.xlu0 %5765, %v10965_v40  }
0x1414   : > { %4649 = vperm.xlu1 %5763, %v10968_v7  }
0x1417   : > { %5768 = vset.pattern.permute.xlu0 %v5886_v31 }
0x1418   : > { %4653 = vperm.xlu1 %5763, %v10965_v40   ;;  %4853 = vperm.xlu0 %5768, %v10964_v20  }
0x141c   : > { %5766 = vset.pattern.permute.xlu1 %v5885_v47  ;;  %5769 = vset.pattern.permute.xlu0 %v5887_v29 }
0x141d   : > { %4757 = vperm.xlu1 %5766, %v10964_v20   ;;  %4945 = vperm.xlu0 %5769, %v10967_v62  }
0x1421   : > { %4745 = vperm.xlu1 %5766, %v10968_v7   ;;  %4941 = vperm.xlu0 %5769, %v10965_v40  }
0x1425   : > { %5767 = vset.pattern.permute.xlu1 %v5886_v31  ;;  %5772 = vset.pattern.permute.xlu0 %v5888_v0 }
0x1426   : > { %4849 = vperm.xlu1 %5767, %v10967_v62   ;;  %5045 = vperm.xlu0 %5772, %v10964_v20  }
0x142a   : > { %4841 = vperm.xlu1 %5767, %v10968_v7   ;;  %5773 = vset.pattern.permute.xlu0 %v5889_v50 }
0x142b   : > { %5137 = vperm.xlu0 %5773, %v10967_v62  }
0x142e   : > { %4845 = vperm.xlu1 %5767, %v10965_v40  }
0x142f   : > { %5133 = vperm.xlu0 %5773, %v10965_v40  }
0x1432   : > { %5770 = vset.pattern.permute.xlu1 %v5887_v29 }
0x1433   : > { %4949 = vperm.xlu1 %5770, %v10964_v20   ;;  %5775 = vset.pattern.permute.xlu0 %v10969_v22 }
0x1434   : > { %4609 = vperm.xlu0 %5775, %v10968_v7  }
0x1437   : > { %4937 = vperm.xlu1 %5770, %v10968_v7  }
0x1438   : > { %4621 = vperm.xlu0 %5775, %v10964_v20  }
0x143b   : > { %5771 = vset.pattern.permute.xlu1 %v5888_v0 }
0x143c   : > { %5041 = vperm.xlu1 %5771, %v10967_v62   ;;  %5783 = vset.pattern.permute.xlu0 %v10970_v59 }
0x1440   : > { %5033 = vperm.xlu1 %5771, %v10968_v7  }
0x1444   : > { %5037 = vperm.xlu1 %5771, %v10965_v40  }
0x1448   : > { %5774 = vset.pattern.permute.xlu1 %v5889_v50 }
0x1449   : > { %5141 = vperm.xlu1 %5774, %v10964_v20  }
0x144d   : > { %5129 = vperm.xlu1 %5774, %v10968_v7  }
0x1451   : > { %5776 = vset.pattern.permute.xlu1 %v10969_v22 }
0x1452   : > { %4617 = vperm.xlu1 %5776, %v10967_v62  }
0x1456   : > { %5782 = vset.pattern.permute.xlu1 %v10970_v59 }
0x1464   : > { %v9553_v14 = vpop.permute.xlu0 %4559 }
0x1465   : > { %v9549_v38 = vpop.permute.xlu1 %4561  ;;  %10973 = vst [vmem:[#allocation127_spill] sm:$0xff] %v9553_v14 }
0x1466   : > { %10971 = vst [vmem:[#allocation136_spill] sm:$0xff] %v9549_v38 }
0x1468   : > { %v9557_v57 = vpop.permute.xlu0 %4563 }
0x1469   : > { %v9551_v37 = vpop.permute.xlu1 %4565  ;;  %10975 = vst [vmem:[#allocation137_spill] sm:$0xff] %v9557_v57 }
0x146a   : > { %10972 = vst [vmem:[#allocation16_spill] sm:$0xff] %v9551_v37 }
0x146c   : > { %v9561_v30 = vpop.permute.xlu0 %4567 }
0x146d   : > { %v9555_v44 = vpop.permute.xlu1 %4569  ;;  %10977 = vst [vmem:[#allocation19_spill] sm:$0xff] %v9561_v30 }
0x146e   : > { %10974 = vst [vmem:[#allocation156_spill] sm:$0xff] %v9555_v44 }
0x1470   : > { %v9565_v35 = vpop.permute.xlu0 %4571 }
0x1471   : > { %v9559_v8 = vpop.permute.xlu1 %4573  ;;  %10978 = vst [vmem:[#allocation151_spill] sm:$0xff] %v9565_v35 }
0x1472   : > { %10976 = vst [vmem:[#allocation148_spill] sm:$0xff] %v9559_v8 }
0x1474   : > { %v9569_v34 = vpop.permute.xlu0 %4575 }
0x1475   : > { %v9563_v60 = vpop.permute.xlu1 %4577  ;;  %10979 = vst [vmem:[#allocation149_spill] sm:$0xff] %v9569_v34 }
0x1478   : > { %v9573_v3 = vpop.permute.xlu0 %4579 }
0x1479   : > { %v9567_v11 = vpop.permute.xlu1 %4581 }
0x1489   : > { %v4662_v53 = vpop.permute.xlu0 %4661 }
0x148a   : > { %v9571_v10 = vpop.permute.xlu1 %4613  ;;  %v4674_v39 = vmul.f32 %v4662_v53, %v10907_v2  ;;  %v4673_v13 = vmul.f32 %v4662_v53, %v10981_v24  ;;  %v4675_v58 = vmul.f32 %v4662_v53, %v10983_v26 }
0x148e   : > { %v4754_v6 = vpop.permute.xlu0 %4753 }
0x148f   : > { %v4658_v25 = vpop.permute.xlu1 %4657  ;;  %v4766_v48 = vmul.f32 %v4754_v6, %v10903_v55  ;;  %v4768_v43 = vmul.f32 %v4754_v6, %v10905_v54  ;;  %v4767_v18 = vmul.f32 %v4754_v6, %v10980_v56 }
0x1490   : > { %v4670_v5 = vmul.f32 %v4658_v25, %v10903_v55  ;;  %v4672_v23 = vmul.f32 %v4658_v25, %v10905_v54  ;;  %v4671_v33 = vmul.f32 %v4658_v25, %v10980_v56 }
0x1492   : > { %4700 = vrot.lane.b32.xlu1 %v4670_v5, %s5839_s15  ;;  %4704 = vrot.lane.b32.xlu0 %v4672_v23, %s5839_s15  ;;  %v4750_v20 = vpop.permute.xlu0 %4749 }
0x1493   : > { %v4650_v1 = vpop.permute.xlu1 %4649  ;;  %v4764_v47 = vmul.f32 %v4750_v20, %v10986_v51  ;;  %v4763_v62 = vmul.f32 %v4750_v20, %v10987_v12  ;;  %v4765_v31 = vmul.f32 %v4750_v20, %v10988_v36 }
0x1494   : > { %v4664_v61 = vmul.f32 %v4650_v1, %v10982_v4  ;;  %v4666_v19 = vmul.f32 %v4650_v1, %v10984_v27  ;;  %v4665_v9 = vmul.f32 %v4650_v1, %v10985_v42 }
0x1496   : > { %4702 = vrot.lane.b32.xlu1 %v4671_v33, %s5839_s15  ;;  %4708 = vrot.lane.b32.xlu0 %v4674_v39, %s5839_s15 }
0x1497   : > { %v4654_v52 = vpop.permute.xlu1 %4653  ;;  %v4854_v0 = vpop.permute.xlu0 %4853 }
0x1498   : > { %v4668_v17 = vmul.f32 %v4654_v52, %v10986_v51  ;;  %v4667_v49 = vmul.f32 %v4654_v52, %v10987_v12  ;;  %v4669_v32 = vmul.f32 %v4654_v52, %v10988_v36  ;;  %v4866_v22 = vmul.f32 %v4854_v0, %v10907_v2 }
0x1499   : > { %v4865_v25 = vmul.f32 %v4854_v0, %v10981_v24  ;;  %v4867_v23 = vmul.f32 %v4854_v0, %v10983_v26 }
0x149a   : > { %4688 = vrot.lane.b32.xlu0 %v4664_v61, %s5839_s15  ;;  %4706 = vrot.lane.b32.xlu1 %v4673_v13, %s5839_s15 }
0x149c   : > { %v4758_v28 = vpop.permute.xlu1 %4757  ;;  %v4946_v13 = vpop.permute.xlu0 %4945 }
0x149d   : > { %v4770_v46 = vmul.f32 %v4758_v28, %v10907_v2  ;;  %v4769_v41 = vmul.f32 %v4758_v28, %v10981_v24  ;;  %v4771_v45 = vmul.f32 %v4758_v28, %v10983_v26 }
0x149e   : > { %4692 = vrot.lane.b32.xlu0 %v4666_v19, %s5839_s15  ;;  %4710 = vrot.lane.b32.xlu1 %v4675_v58, %s5839_s15  ;;  %v4958_v58 = vmul.f32 %v4946_v13, %v10903_v55 }
0x14a0   : > { %v4746_v15 = vpop.permute.xlu1 %4745  ;;  %v4942_v28 = vpop.permute.xlu0 %4941 }
0x14a1   : > { %v4760_v16 = vmul.f32 %v4746_v15, %v10982_v4  ;;  %v4762_v63 = vmul.f32 %v4746_v15, %v10984_v27  ;;  %v4761_v40 = vmul.f32 %v4746_v15, %v10985_v42 }
0x14a2   : > { %4696 = vrot.lane.b32.xlu0 %v4668_v17, %s5839_s15  ;;  %4690 = vrot.lane.b32.xlu1 %v4665_v9, %s5839_s15  ;;  %v4960_v9 = vmul.f32 %v4946_v13, %v10905_v54  ;;  %v4959_v17 = vmul.f32 %v4946_v13, %v10980_v56 }
0x14a5   : > { %v4850_v21 = vpop.permute.xlu1 %4849  ;;  %v5046_v15 = vpop.permute.xlu0 %5045 }
0x14a6   : > { %4694 = vrot.lane.b32.xlu1 %v4667_v49, %s5839_s15  ;;  %4796 = vrot.lane.b32.xlu0 %v4766_v48, %s5840_s16  ;;  %v4862_v7 = vmul.f32 %v4850_v21, %v10903_v55  ;;  %v4864_v29 = vmul.f32 %v4850_v21, %v10905_v54  ;;  %v4863_v50 = vmul.f32 %v4850_v21, %v10980_v56 }
0x14a7   : > { %v4957_v21 = vmul.f32 %v4942_v28, %v10988_v36  ;;  %v5058_v0 = vmul.f32 %v5046_v15, %v10907_v2 }
0x14a9   : > { %v4842_v59 = vpop.permute.xlu1 %4841 }
0x14aa   : > { %4698 = vrot.lane.b32.xlu1 %v4669_v32, %s5839_s15  ;;  %4800 = vrot.lane.b32.xlu0 %v4768_v43, %s5840_s16  ;;  %v4856_v5 = vmul.f32 %v4842_v59, %v10982_v4  ;;  %v4858_v53 = vmul.f32 %v4842_v59, %v10984_v27  ;;  %v4857_v33 = vmul.f32 %v4842_v59, %v10985_v42  ;;  %s5890_s15 = smov 6  }
0x14ad   : > { %v4846_v39 = vpop.permute.xlu1 %4845 }
0x14ae   : > { %4798 = vrot.lane.b32.xlu1 %v4767_v18, %s5840_s16  ;;  %4804 = vrot.lane.b32.xlu0 %v4770_v46, %s5840_s16  ;;  %v4860_v1 = vmul.f32 %v4846_v39, %v10986_v51  ;;  %v4859_v61 = vmul.f32 %v4846_v39, %v10987_v12  ;;  %v4861_v52 = vmul.f32 %v4846_v39, %v10988_v36 }
0x14b2   : > { %4802 = vrot.lane.b32.xlu1 %v4769_v41, %s5840_s16  ;;  %4784 = vrot.lane.b32.xlu0 %v4760_v16, %s5840_s16  ;;  %v4950_v19 = vpop.permute.xlu1 %4949 }
0x14b3   : > { %v4962_v49 = vmul.f32 %v4950_v19, %v10907_v2  ;;  %v4961_v48 = vmul.f32 %v4950_v19, %v10981_v24  ;;  %v4963_v18 = vmul.f32 %v4950_v19, %v10983_v26 }
0x14b6   : > { %4806 = vrot.lane.b32.xlu1 %v4771_v45, %s5840_s16  ;;  %4788 = vrot.lane.b32.xlu0 %v4762_v63, %s5840_s16  ;;  %v4938_v6 = vpop.permute.xlu1 %4937  ;;  %v4956_v45 = vmul.f32 %v4942_v28, %v10986_v51  ;;  %v4955_v63 = vmul.f32 %v4942_v28, %v10987_v12 }
0x14b7   : > { %v4952_v32 = vmul.f32 %v4938_v6, %v10982_v4  ;;  %v4954_v46 = vmul.f32 %v4938_v6, %v10984_v27  ;;  %v4953_v41 = vmul.f32 %v4938_v6, %v10985_v42 }
0x14ba   : > { %4786 = vrot.lane.b32.xlu1 %v4761_v40, %s5840_s16  ;;  %4792 = vrot.lane.b32.xlu0 %v4764_v47, %s5840_s16  ;;  %v5138_v40 = vpop.permute.xlu0 %5137 }
0x14bb   : > { %v5042_v43 = vpop.permute.xlu1 %5041  ;;  %v5152_v28 = vmul.f32 %v5138_v40, %v10905_v54 }
0x14bc   : > { %v5054_v20 = vmul.f32 %v5042_v43, %v10903_v55 }
0x14be   : > { %4790 = vrot.lane.b32.xlu1 %v4763_v62, %s5840_s16  ;;  %4892 = vrot.lane.b32.xlu0 %v4862_v7, %s5841_s17  ;;  %v5056_v62 = vmul.f32 %v5042_v43, %v10905_v54  ;;  %v9675_v7 = vpop.permute.xlu0 %5133 }
0x14bf   : > { %v5034_v16 = vpop.permute.xlu1 %5033 }
0x14c0   : > { %v5049_v39 = vmul.f32 %v5034_v16, %v10985_v42 }
0x14c2   : > { %4794 = vrot.lane.b32.xlu1 %v4765_v31, %s5840_s16  ;;  %4896 = vrot.lane.b32.xlu0 %v4864_v29, %s5841_s17  ;;  %v5055_v31 = vmul.f32 %v5042_v43, %v10980_v56  ;;  %v4610_v59 = vpop.permute.xlu0 %4609  ;;  %s5891_s16 = smov 122  }
0x14c3   : > { %v5038_v47 = vpop.permute.xlu1 %5037 }
0x14c6   : > { %4894 = vrot.lane.b32.xlu1 %v4863_v50, %s5841_s17  ;;  %4900 = vrot.lane.b32.xlu0 %v4866_v22, %s5841_s17  ;;  %v5057_v50 = vmul.f32 %v5046_v15, %v10981_v24  ;;  %v5048_v22 = vmul.f32 %v5034_v16, %v10982_v4 }
0x14c8   : > { %v5142_v29 = vpop.permute.xlu1 %5141 }
0x14ca   : > { %4898 = vrot.lane.b32.xlu1 %v4865_v25, %s5841_s17  ;;  %4880 = vrot.lane.b32.xlu0 %v4856_v5, %s5841_s17  ;;  %v5059_v5 = vmul.f32 %v5046_v15, %v10983_v26 }
0x14cc   : > { %v9683_v25 = vpop.permute.xlu1 %5129 }
0x14ce   : > { %4902 = vrot.lane.b32.xlu1 %v4867_v23, %s5841_s17  ;;  %4884 = vrot.lane.b32.xlu0 %v4858_v53, %s5841_s17  ;;  %v5050_v23 = vmul.f32 %v5034_v16, %v10984_v27  ;;  %v9691_v53 = vpop.permute.xlu0 %4621 }
0x14d2   : > { %4882 = vrot.lane.b32.xlu1 %v4857_v33, %s5841_s17  ;;  %4888 = vrot.lane.b32.xlu0 %v4860_v1, %s5841_s17  ;;  %v4618_v33 = vpop.permute.xlu1 %4617  ;;  %v5052_v1 = vmul.f32 %v5038_v47, %v10986_v51 }
0x14d3   : > { %v4632_v13 = vmul.f32 %v4618_v33, %v10905_v54  ;;  %v4630_v6 = vmul.f32 %v4618_v33, %v10903_v55  ;;  %v4626_v54 = vmul.f32 %v4610_v59, %v10984_v27 }
0x14d6   : > { %4886 = vrot.lane.b32.xlu1 %v4859_v61, %s5841_s17  ;;  %4988 = vrot.lane.b32.xlu0 %v4958_v58, %s5842_s18  ;;  %v5051_v61 = vmul.f32 %v5038_v47, %v10987_v12 }
0x14da   : > { %4890 = vrot.lane.b32.xlu1 %v4861_v52, %s5841_s17  ;;  %4992 = vrot.lane.b32.xlu0 %v4960_v9, %s5842_s18  ;;  %v5150_v52 = vmul.f32 %v5138_v40, %v10903_v55 }
0x14de   : > { %4990 = vrot.lane.b32.xlu1 %v4959_v17, %s5842_s18  ;;  %4996 = vrot.lane.b32.xlu0 %v4962_v49, %s5842_s18  ;;  %v5053_v17 = vmul.f32 %v5038_v47, %v10988_v36  ;;  %v4631_v49 = vmul.f32 %v4618_v33, %v10980_v56  ;;  %v5153_v47 = vmul.f32 %v5142_v29, %v10981_v24 }
0x14df   : > { %v4625_v33 = vmul.f32 %v4610_v59, %v10985_v42 }
0x14e2   : > { %4994 = vrot.lane.b32.xlu1 %v4961_v48, %s5842_s18  ;;  %4976 = vrot.lane.b32.xlu0 %v4952_v32, %s5842_s18 }
0x14e6   : > { %4998 = vrot.lane.b32.xlu1 %v4963_v18, %s5842_s18  ;;  %4980 = vrot.lane.b32.xlu0 %v4954_v46, %s5842_s18 }
0x14ea   : > { %4978 = vrot.lane.b32.xlu1 %v4953_v41, %s5842_s18  ;;  %4984 = vrot.lane.b32.xlu0 %v4956_v45, %s5842_s18  ;;  %v5151_v41 = vmul.f32 %v5138_v40, %v10980_v56  ;;  %v5144_v40 = vmul.f32 %v9683_v25, %v10982_v4 }
0x14ee   : > { %4982 = vrot.lane.b32.xlu1 %v4955_v63, %s5842_s18  ;;  %5084 = vrot.lane.b32.xlu0 %v5054_v20, %s5843_s19  ;;  %v5154_v63 = vmul.f32 %v5142_v29, %v10907_v2 }
0x14f2   : > { %4986 = vrot.lane.b32.xlu1 %v4957_v21, %s5842_s18  ;;  %5088 = vrot.lane.b32.xlu0 %v5056_v62, %s5843_s19 }
0x14f6   : > { %5086 = vrot.lane.b32.xlu1 %v5055_v31, %s5843_s19  ;;  %5092 = vrot.lane.b32.xlu0 %v5058_v0, %s5843_s19  ;;  %v10989_v31 = vld [vmem:[#allocation96_spill] sm:$0xff] }
0x14f7   : > { %v5224_v0 = vadd.s32 3, %v10989_v31 }
0x14f9   : > { %vm5228_vm4 = vcmp.lt.s32.totalorder %v5224_v0, 16 }
0x14fa   : > { %5090 = vrot.lane.b32.xlu1 %v5057_v50, %s5843_s19  ;;  %5072 = vrot.lane.b32.xlu0 %v5048_v22, %s5843_s19 }
0x14fe   : > { %5094 = vrot.lane.b32.xlu1 %v5059_v5, %s5843_s19  ;;  %5076 = vrot.lane.b32.xlu0 %v5050_v23, %s5843_s19  ;;  %v10990_v5 = vld [vmem:[#allocation95_spill] sm:$0xff] }
0x14ff   : > { %v5225_v23 = vadd.s32 3, %v10990_v5 }
0x1501   : > { %vm5229_vm11 = vcmp.lt.s32.totalorder %v5225_v23, 16  ;;  %v4633_v23 = vmul.f32 %v9691_v53, %v10981_v24 }
0x1502   : > { %5074 = vrot.lane.b32.xlu1 %v5049_v39, %s5843_s19  ;;  %5080 = vrot.lane.b32.xlu0 %v5052_v1, %s5843_s19  ;;  %v4624_v39 = vmul.f32 %v4610_v59, %v10982_v4  ;;  %v5155_v1 = vmul.f32 %v5142_v29, %v10983_v26  ;;  %v5145_v29 = vmul.f32 %v9683_v25, %v10985_v42 }
0x1504   : > { %v4701_v58 = vpop.permute.xlu1 %4700  ;;  %v4705_v19 = vpop.permute.xlu0 %4704 }
0x1505   : > { %v4740_v9 = vadd.f32 %v4705_v19, %v4632_v13 }
0x1506   : > { %5078 = vrot.lane.b32.xlu1 %v5051_v61, %s5843_s19  ;;  %5180 = vrot.lane.b32.xlu0 %v5150_v52, %s5844_s20 }
0x1508   : > { %v4703_v48 = vpop.permute.xlu1 %4702  ;;  %v4709_v32 = vpop.permute.xlu0 %4708 }
0x1509   : > { %v4716_v43 = vsel %vm587_vm5, %v4701_v58, %v4703_v48  ;;  %v4717_v18 = vsel %vm587_vm5, %v4703_v48, %v4705_v19  ;;  %v5146_v58 = vmul.f32 %v9683_v25, %v10984_v27  ;;  %v5148_v27 = vmul.f32 %v9675_v7, %v10986_v51 }
0x150a   : > { %v4738_v46 = vadd.f32 %v4716_v43, %v4630_v6  ;;  %v4739_v15 = vadd.f32 %v4717_v18, %v4631_v49  ;;  %5082 = vrot.lane.b32.xlu1 %v5053_v17, %s5843_s19  ;;  %5184 = vrot.lane.b32.xlu0 %v5152_v28, %s5844_s20  ;;  %v10991_v49 = vmov 0.0   ;;  %s5579_s19 = sshll.u32 %s11127_s25, 2 }
0x150b   : > { %v5574_v48 = vsel %vm5228_vm4, 1.0, %v10991_v49  ;;  %vm5391_vm4 = vcmask 1047559   ;;  %s292_s12 = scalar_lea.vmem %s10204_s5, %s5579_s19 }
0x150c   : > { %v4707_v16 = vpop.permute.xlu1 %4706  ;;  %v4689_v45 = vpop.permute.xlu0 %4688 }
0x150d   : > { %v4718_v20 = vsel %vm587_vm5, %v4707_v16, %v4709_v32 }
0x150e   : > { %5182 = vrot.lane.b32.xlu1 %v5151_v41, %s5844_s20  ;;  %5188 = vrot.lane.b32.xlu0 %v5154_v63, %s5844_s20  ;;  %v5147_v41 = vmul.f32 %v9675_v7, %v10987_v12 }
0x1510   : > { %v4711_v21 = vpop.permute.xlu1 %4710  ;;  %v4693_v62 = vpop.permute.xlu0 %4692 }
0x1511   : > { %v4719_v50 = vsel %vm587_vm5, %v4709_v32, %v4711_v21  ;;  %v4734_v22 = vadd.f32 %v4693_v62, %v4626_v54  ;;  %v5575_v32 = vsel %vm5229_vm11, 1.0, %v10991_v49  ;;  %v5149_v54 = vmul.f32 %v9675_v7, %v10988_v36 }
0x1512   : > { %5186 = vrot.lane.b32.xlu1 %v5153_v47, %s5844_s20  ;;  %5168 = vrot.lane.b32.xlu0 %v5144_v40, %s5844_s20  ;;  %v5777_v18 = vpack.i.bf16 %v5575_v32, %v5574_v48  ;;  %vm5427_vm11 = vcmask 9216  }
0x1514   : > { %v4691_v13 = vpop.permute.xlu1 %4690  ;;  %v4697_v61 = vpop.permute.xlu0 %4696 }
0x1515   : > { %v4712_v19 = vsel %vm587_vm5, %v4689_v45, %v4691_v13  ;;  %v4713_v52 = vsel %vm587_vm5, %v4691_v13, %v4693_v62  ;;  %v4635_v13 = vmul.f32 %v9691_v53, %v10983_v26 }
0x1516   : > { %v4732_v17 = vadd.f32 %v4712_v19, %v4624_v39  ;;  %v4733_v6 = vadd.f32 %v4713_v52, %v4625_v33  ;;  %5190 = vrot.lane.b32.xlu1 %v5155_v1, %s5844_s20  ;;  %5172 = vrot.lane.b32.xlu0 %v5146_v58, %s5844_s20  ;;  %v4634_v58 = vmul.f32 %v9691_v53, %v10907_v2 }
0x1517   : > { %v4743_v52 = vadd.f32 %v4711_v21, %v4635_v13 }
0x1518   : > { %v4695_v59 = vpop.permute.xlu1 %4694  ;;  %v4797_v43 = vpop.permute.xlu0 %4796 }
0x1519   : > { %v4714_v28 = vsel %vm587_vm5, %v4695_v59, %v4697_v61 }
0x151a   : > { %5170 = vrot.lane.b32.xlu1 %v5145_v29, %s5844_s20  ;;  %5176 = vrot.lane.b32.xlu0 %v5148_v27, %s5844_s20  ;;  %v4742_v29 = vadd.f32 %v4719_v50, %v4634_v58 }
0x151c   : > { %v4699_v25 = vpop.permute.xlu1 %4698  ;;  %v4801_v45 = vpop.permute.xlu0 %4800 }
0x151d   : > { %v4715_v16 = vsel %vm587_vm5, %v4697_v61, %v4699_v25  ;;  %v4836_v63 = vadd.f32 %v4801_v45, %v4740_v9  ;;  %v4741_v9 = vadd.f32 %v4718_v20, %v4633_v23 }
0x151e   : > { %5174 = vrot.lane.b32.xlu1 %v5147_v41, %s5844_s20  ;;  %5778 = vrot.lane.b32.xlu0 %v5777_v18, %s5890_s15  ;;  %v4627_v41 = vmul.f32 %v9571_v10, %v10987_v12 }
0x1520   : > { %v4799_v47 = vpop.permute.xlu1 %4798  ;;  %v4805_v40 = vpop.permute.xlu0 %4804  ;;  %v4735_v21 = vadd.f32 %v4714_v28, %v4627_v41 }
0x1521   : > { %v4812_v62 = vsel %vm676_vm6, %v4797_v43, %v4799_v47  ;;  %v4813_v0 = vsel %vm676_vm6, %v4799_v47, %v4801_v45 }
0x1522   : > { %v4834_v39 = vadd.f32 %v4812_v62, %v4738_v46  ;;  %v4835_v33 = vadd.f32 %v4813_v0, %v4739_v15  ;;  %5178 = vrot.lane.b32.xlu1 %v5149_v54, %s5844_s20  ;;  %v4629_v54 = vmul.f32 %v9571_v10, %v10988_v36 }
0x1524   : > { %v4803_v1 = vpop.permute.xlu1 %4802  ;;  %v4785_v61 = vpop.permute.xlu0 %4784 }
0x1525   : > { %v4814_v7 = vsel %vm676_vm6, %v4803_v1, %v4805_v40 }
0x1526   : > { %v4837_v19 = vadd.f32 %v4814_v7, %v4741_v9 }
0x1528   : > { %v4807_v59 = vpop.permute.xlu1 %4806  ;;  %v4789_v48 = vpop.permute.xlu0 %4788 }
0x1529   : > { %v4815_v46 = vsel %vm676_vm6, %v4805_v40, %v4807_v59  ;;  %v4839_v15 = vadd.f32 %v4807_v59, %v4743_v52  ;;  %v4830_v20 = vadd.f32 %v4789_v48, %v4734_v22  ;;  %v4628_v22 = vmul.f32 %v9571_v10, %v10986_v51 }
0x152a   : > { %v4838_v32 = vadd.f32 %v4815_v46, %v4742_v29  ;;  %v4737_v40 = vadd.f32 %v4699_v25, %v4629_v54 }
0x152b   : > { %v4736_v23 = vadd.f32 %v4715_v16, %v4628_v22 }
0x152c   : > { %v4787_v27 = vpop.permute.xlu1 %4786  ;;  %v4793_v18 = vpop.permute.xlu0 %4792 }
0x152d   : > { %v4808_v43 = vsel %vm676_vm6, %v4785_v61, %v4787_v27  ;;  %v4809_v26 = vsel %vm676_vm6, %v4787_v27, %v4789_v48 }
0x152e   : > { %v4828_v53 = vadd.f32 %v4808_v43, %v4732_v17  ;;  %v4829_v45 = vadd.f32 %v4809_v26, %v4733_v6 }
0x1530   : > { %v4791_v50 = vpop.permute.xlu1 %4790  ;;  %v4893_v62 = vpop.permute.xlu0 %4892 }
0x1531   : > { %v4810_v47 = vsel %vm676_vm6, %v4791_v50, %v4793_v18 }
0x1532   : > { %v4831_v0 = vadd.f32 %v4810_v47, %v4735_v21 }
0x1534   : > { %v4795_v9 = vpop.permute.xlu1 %4794  ;;  %v4897_v17 = vpop.permute.xlu0 %4896 }
0x1535   : > { %v4811_v1 = vsel %vm676_vm6, %v4793_v18, %v4795_v9  ;;  %v4833_v13 = vadd.f32 %v4795_v9, %v4737_v40  ;;  %v4932_v28 = vadd.f32 %v4897_v17, %v4836_v63 }
0x1536   : > { %v4832_v6 = vadd.f32 %v4811_v1, %v4736_v23 }
0x1538   : > { %v4895_v7 = vpop.permute.xlu1 %4894  ;;  %v4901_v58 = vpop.permute.xlu0 %4900 }
0x1539   : > { %v4908_v61 = vsel %vm765_vm7, %v4893_v62, %v4895_v7  ;;  %v4909_v36 = vsel %vm765_vm7, %v4895_v7, %v4897_v17 }
0x153a   : > { %v4930_v52 = vadd.f32 %v4908_v61, %v4834_v39  ;;  %v4931_v29 = vadd.f32 %v4909_v36, %v4835_v33 }
0x153c   : > { %v4899_v59 = vpop.permute.xlu1 %4898  ;;  %v4881_v25 = vpop.permute.xlu0 %4880 }
0x153d   : > { %v4910_v10 = vsel %vm765_vm7, %v4899_v59, %v4901_v58 }
0x153e   : > { %v4933_v16 = vadd.f32 %v4910_v10, %v4837_v19 }
0x1540   : > { %v4903_v46 = vpop.permute.xlu1 %4902  ;;  %v4885_v43 = vpop.permute.xlu0 %4884 }
0x1541   : > { %v4911_v48 = vsel %vm765_vm7, %v4901_v58, %v4903_v46  ;;  %v9773_v27 = vadd.f32 %v4903_v46, %v4839_v15  ;;  %v4926_v26 = vadd.f32 %v4885_v43, %v4830_v20 }
0x1542   : > { %v4934_v63 = vadd.f32 %v4911_v48, %v4838_v32 }
0x1544   : > { %v4883_v18 = vpop.permute.xlu1 %4882  ;;  %v4889_v39 = vpop.permute.xlu0 %4888 }
0x1545   : > { %v4904_v41 = vsel %vm765_vm7, %v4881_v25, %v4883_v18  ;;  %v4905_v21 = vsel %vm765_vm7, %v4883_v18, %v4885_v43 }
0x1546   : > { %v4924_v33 = vadd.f32 %v4904_v41, %v4828_v53  ;;  %v4925_v50 = vadd.f32 %v4905_v21, %v4829_v45 }
0x1548   : > { %v4887_v54 = vpop.permute.xlu1 %4886  ;;  %v4989_v19 = vpop.permute.xlu0 %4988 }
0x1549   : > { %v4906_v47 = vsel %vm765_vm7, %v4887_v54, %v4889_v39 }
0x154a   : > { %v4927_v62 = vadd.f32 %v4906_v47, %v4831_v0 }
0x154c   : > { %v4891_v22 = vpop.permute.xlu1 %4890  ;;  %v4993_v32 = vpop.permute.xlu0 %4992 }
0x154d   : > { %v4907_v15 = vsel %vm765_vm7, %v4889_v39, %v4891_v22  ;;  %v9779_v40 = vadd.f32 %v4891_v22, %v4833_v13  ;;  %v9781_v23 = vadd.f32 %v4993_v32, %v4932_v28 }
0x154e   : > { %v4928_v20 = vadd.f32 %v4907_v15, %v4832_v6 }
0x1550   : > { %v4991_v9 = vpop.permute.xlu1 %4990  ;;  %v4997_v45 = vpop.permute.xlu0 %4996 }
0x1551   : > { %v5004_v1 = vsel %vm854_vm8, %v4989_v19, %v4991_v9  ;;  %v5005_v53 = vsel %vm854_vm8, %v4991_v9, %v4993_v32 }
0x1552   : > { %v5026_v17 = vadd.f32 %v5004_v1, %v4930_v52  ;;  %v5027_v7 = vadd.f32 %v5005_v53, %v4931_v29 }
0x1554   : > { %v4995_v61 = vpop.permute.xlu1 %4994  ;;  %v4977_v36 = vpop.permute.xlu0 %4976 }
0x1555   : > { %v5006_v0 = vsel %vm854_vm8, %v4995_v61, %v4997_v45 }
0x1556   : > { %v5029_v58 = vadd.f32 %v5006_v0, %v4933_v16 }
0x1558   : > { %v4999_v59 = vpop.permute.xlu1 %4998  ;;  %v4981_v10 = vpop.permute.xlu0 %4980 }
0x1559   : > { %v5007_v13 = vsel %vm854_vm8, %v4997_v45, %v4999_v59  ;;  %v9789_v28 = vadd.f32 %v4981_v10, %v4926_v26 }
0x155a   : > { %v9787_v6 = vadd.f32 %v5007_v13, %v4934_v63 }
0x155c   : > { %v4979_v25 = vpop.permute.xlu1 %4978  ;;  %v4985_v52 = vpop.permute.xlu0 %4984 }
0x155d   : > { %v5000_v46 = vsel %vm854_vm8, %v4977_v36, %v4979_v25  ;;  %v5001_v48 = vsel %vm854_vm8, %v4979_v25, %v4981_v10 }
0x155e   : > { %v9793_v29 = vadd.f32 %v5000_v46, %v4924_v33  ;;  %v9795_v43 = vadd.f32 %v5001_v48, %v4925_v50 }
0x1560   : > { %v4983_v18 = vpop.permute.xlu1 %4982  ;;  %v5085_v41 = vpop.permute.xlu0 %5084 }
0x1561   : > { %v5002_v16 = vsel %vm854_vm8, %v4983_v18, %v4985_v52 }
0x1562   : > { %v9798_v21 = vadd.f32 %v5002_v16, %v4927_v62 }
0x1564   : > { %v9800_v63 = vpop.permute.xlu1 %4986  ;;  %v5089_v39 = vpop.permute.xlu0 %5088 }
0x1565   : > { %v5003_v26 = vsel %vm854_vm8, %v4985_v52, %v9800_v63 }
0x1566   : > { %v9804_v54 = vadd.f32 %v5003_v26, %v4928_v20 }
0x1568   : > { %v5087_v47 = vpop.permute.xlu1 %5086  ;;  %v5093_v19 = vpop.permute.xlu0 %5092 }
0x1569   : > { %v5100_v25 = vsel %vm943_vm9, %v5085_v41, %v5087_v47  ;;  %v5101_v48 = vsel %vm943_vm9, %v5087_v47, %v5089_v39  ;;  %v5124_v41 = vadd.f32 %v5089_v39, %v9781_v23 }
0x156a   : > { %v5122_v18 = vadd.f32 %v5100_v25, %v5026_v17  ;;  %v5123_v26 = vadd.f32 %v5101_v48, %v5027_v7  ;;  %v5025_v48 = vadd.f32 %v9800_v63, %v9779_v40 }
0x156c   : > { %v5091_v33 = vpop.permute.xlu1 %5090  ;;  %v5073_v22 = vpop.permute.xlu0 %5072 }
0x156d   : > { %v5102_v37 = vsel %vm943_vm9, %v5091_v33, %v5093_v19  ;;  %v5031_v33 = vadd.f32 %v4999_v59, %v9773_v27 }
0x1570   : > { %v5095_v50 = vpop.permute.xlu1 %5094  ;;  %v9806_v15 = vpop.permute.xlu0 %5076 }
0x1571   : > { %v5103_v17 = vsel %vm943_vm9, %v5093_v19, %v5095_v50 }
0x1572   : > { %v5126_v23 = vadd.f32 %v5103_v17, %v9787_v6  ;;  %v10993_v17 = vld [vmem:[#allocation24_spill] sm:$0xff] }
0x1574   : > { %v5075_v32 = vpop.permute.xlu1 %5074  ;;  %v9808_v9 = vpop.permute.xlu0 %5080 }
0x1578   : > { %v5079_v62 = vpop.permute.xlu1 %5078  ;;  %v5181_v1 = vpop.permute.xlu0 %5180 }
0x1579   : > { %v5098_v59 = vsel %vm943_vm9, %v5079_v62, %v9808_v9 }
0x157c   : > { %v9810_v53 = vpop.permute.xlu1 %5082  ;;  %v5185_v45 = vpop.permute.xlu0 %5184 }
0x157d   : > { %v5220_v7 = vadd.f32 %v5185_v45, %v5124_v41 }
0x1580   : > { %v5183_v61 = vpop.permute.xlu1 %5182  ;;  %v5189_v0 = vpop.permute.xlu0 %5188 }
0x1581   : > { %v5196_v52 = vsel %vm1032_vm10, %v5181_v1, %v5183_v61  ;;  %v5197_v16 = vsel %vm1032_vm10, %v5183_v61, %v5185_v45  ;;  %v5125_v1 = vadd.f32 %v5102_v37, %v5029_v58  ;;  %v5096_v37 = vsel %vm943_vm9, %v5073_v22, %v5075_v32 }
0x1582   : > { %v5218_v30 = vadd.f32 %v5196_v52, %v5122_v18  ;;  %v5219_v34 = vadd.f32 %v5197_v16, %v5123_v26  ;;  %v5116_v27 = vadd.f32 %v5096_v37, %v9793_v29  ;;  %v5099_v29 = vsel %vm943_vm9, %v9808_v9, %v9810_v53 }
0x1583   : > { %v5121_v9 = vadd.f32 %v9810_v53, %v5025_v48  ;;  %v1058_v53 = vadd.s32 4294967293, %v10990_v5  ;;  %v10998_v5 = vld [vmem:[#allocation5_spill] sm:$0xff] }
0x1584   : > { %v5169_v36 = vpop.permute.xlu0 %5168  ;;  %v5187_v20 = vpop.permute.xlu1 %5186 }
0x1585   : > { %v5198_v35 = vsel %vm1032_vm10, %v5187_v20, %v5189_v0  ;;  %vm1060_vm13 = vcmp.ge.s32.totalorder %v1058_v53, 0  ;;  %v11016_v53 = vld [vmem:[#allocation44_spill] sm:$0xff] }
0x1586   : > { %v5221_v25 = vadd.f32 %v5198_v35, %v5125_v1 }
0x1588   : > { %v9812_v13 = vpop.permute.xlu0 %5172  ;;  %v5191_v10 = vpop.permute.xlu1 %5190 }
0x158c   : > { %v5177_v46 = vpop.permute.xlu0 %5176  ;;  %v5171_v57 = vpop.permute.xlu1 %5170 }
0x158d   : > { %v5192_v35 = vsel %vm1032_vm10, %v5169_v36, %v5171_v57  ;;  %v5193_v6 = vsel %vm1032_vm10, %v5171_v57, %v9812_v13  ;;  %v5119_v36 = vadd.f32 %v5098_v59, %v9798_v21  ;;  %v5118_v57 = vadd.f32 %v9806_v15, %v9789_v28  ;;  %v11005_v59 = vld [vmem:[#allocation33_spill] sm:$0xff] }
0x158e   : > { %v5212_v45 = vadd.f32 %v5192_v35, %v5116_v27  ;;  %v5120_v21 = vadd.f32 %v5099_v29, %v9804_v54  ;;  %v5348_v54 = vld [vmem:[%s10203_s4] sm:$0x3]  ;;  %v11011_v29 = vld [vmem:[#allocation40_spill] sm:$0xff] }
0x158f   : > { %v5214_v26 = vadd.f32 %v9812_v13, %v5118_v57  ;;  %v1057_v13 = vadd.s32 4294967293, %v10989_v31 }
0x1590   : > { %v5779_v44 = vpop.permute.xlu0 %5778  ;;  %v5175_v39 = vpop.permute.xlu1 %5174 }
0x1591   : > { %v5781_v14 = vunpack.i.h.bf16 %v5779_v44  ;;  %v5780_v38 = vunpack.i.l.bf16 %v5779_v44  ;;  %v5199_v44 = vsel %vm1032_vm10, %v5189_v0, %v5191_v10  ;;  %v5194_v0 = vsel %vm1032_vm10, %v5175_v39, %v5177_v46 }
0x1592   : > { %v5222_v19 = vadd.f32 %v5199_v44, %v5126_v23  ;;  %v5215_v52 = vadd.f32 %v5194_v0, %v5119_v36  ;;  %v10997_v23 = vld [vmem:[#allocation25_spill] sm:$0xff]  ;;  %v513_v39 = vmul.f32 %v10998_v5, %v10981_v24  ;;  %vm1059_vm14 = vcmp.ge.s32.totalorder %v1057_v13, 0  ;;  %v11017_v13 = vld [vmem:[#allocation46_spill] sm:$0xff] }
0x1593   : > { %v5243_v47 = vsel %vm5242_vm12, %v5780_v38, %v5781_v14  ;;  %v5253_v8 = vmul.f32 %v5780_v38, %v5218_v30  ;;  %v5255_v20 = vmul.f32 %v5781_v14, %v5220_v7  ;;  %v5127_v30 = vadd.f32 %v5095_v50, %v5031_v33  ;;  %v10995_v7 = vld [vmem:[#allocation3_spill] sm:$0xff]  ;;  %v11003_v24 = vld [vmem:[#allocation29_spill] sm:$0xff] }
0x1594   : > { %v5254_v61 = vmul.f32 %v5243_v47, %v5219_v34  ;;  %v5256_v58 = vmul.f32 %v5780_v38, %v5221_v25  ;;  %v5097_v34 = vsel %vm943_vm9, %v5075_v32, %v9806_v15  ;;  %v5257_v22 = vmul.f32 %v5243_v47, %v5222_v19  ;;  %v10996_v25 = vld [vmem:[#allocation2_spill] sm:$0xff] }
0x1595   : > { %5283 = vrot.lane.b32.xlu1 %v5253_v8, %s5891_s16  ;;  %v5223_v8 = vadd.f32 %v5191_v10, %v5127_v30  ;;  %v5117_v50 = vadd.f32 %v5097_v34, %v9795_v43  ;;  %v5179_v10 = vpop.permute.xlu1 %5178  ;;  %v5247_v43 = vmul.f32 %v5780_v38, %v5212_v45  ;;  %v5249_v28 = vmul.f32 %v5781_v14, %v5214_v26  ;;  %v11000_v30 = vld [vmem:[#allocation26_spill] sm:$0xff]  ;;  %v11001_v34 = vld [vmem:[#allocation28_spill] sm:$0xff] }
0x1596   : > { %5285 = vrot.lane.b32.xlu0 %v5254_v61, %s5891_s16  ;;  %v5195_v18 = vsel %vm1032_vm10, %v5177_v46, %v5179_v10  ;;  %v5217_v15 = vadd.f32 %v5179_v10, %v5121_v9  ;;  %v5250_v1 = vmul.f32 %v5780_v38, %v5215_v52  ;;  %v10992_v38 = vld [vmem:[#allocation4_spill] sm:$0xff]  ;;  %v10994_v61 = vld [vmem:[#allocation23_spill] sm:$0xff]  ;;  %v511_v33 = vmul.f32 %v10995_v7, %v10903_v55  ;;  %v11002_v19 = vld [vmem:[#allocation30_spill] sm:$0xff] }
0x1597   : > { %v5258_v32 = vmul.f32 %v5781_v14, %v5223_v8  ;;  %v5213_v62 = vadd.f32 %v5193_v6, %v5117_v50  ;;  %v5216_v41 = vadd.f32 %v5195_v18, %v5120_v21  ;;  %v507_v46 = vmul.f32 %v10992_v38, %v10982_v4  ;;  %v11006_v6 = vld [vmem:[#allocation32_spill] sm:$0xff]  ;;  %v11010_v10 = vld [vmem:[#allocation38_spill] sm:$0xff]  ;;  %v11013_v21 = vld [vmem:[#allocation39_spill] sm:$0xff] }
0x1598   : > { %v5252_v63 = vmul.f32 %v5781_v14, %v5217_v15  ;;  %v588_v14 = vsel %vm587_vm5, %v10994_v61, %v10993_v17  ;;  %v509_v44 = vmul.f32 %v10996_v25, %v10987_v12  ;;  %v589_v31 = vsel %vm587_vm5, %v10993_v17, %v10997_v23  ;;  %v11009_v45 = vld [vmem:[#allocation36_spill] sm:$0xff]  ;;  %v11014_v15 = vld [vmem:[#allocation41_spill] sm:$0xff] }
0x1599   : > { %5287 = vrot.lane.b32.xlu1 %v5255_v20, %s5891_s16  ;;  %v5248_v16 = vmul.f32 %v5243_v47, %v5213_v62  ;;  %v5251_v40 = vmul.f32 %v5243_v47, %v5216_v41  ;;  %v508_v47 = vmul.f32 %v10992_v38, %v10985_v42  ;;  %v510_v4 = vmul.f32 %v10996_v25, %v10986_v51  ;;  %v10999_v42 = vld [vmem:[#allocation27_spill] sm:$0xff]  ;;  %v11012_v62 = vld [vmem:[#allocation37_spill] sm:$0xff] }
0x159a   : > { %5289 = vrot.lane.b32.xlu0 %v5256_v58, %s5891_s16  ;;  %v512_v20 = vmul.f32 %v10995_v7, %v10980_v56  ;;  %v590_v55 = vsel %vm587_vm5, %v11000_v30, %v10999_v42  ;;  %v514_v12 = vmul.f32 %v10998_v5, %v10907_v2  ;;  %v604_v37 = vadd.f32 %v588_v14, %v507_v46  ;;  %v11004_v56 = vld [vmem:[#allocation31_spill] sm:$0xff]  ;;  %v11019_v61 = vld [vmem:[#allocation45_spill] sm:$0xff] }
0x159b   : > { %v605_v58 = vadd.f32 %v589_v31, %v508_v47  ;;  %v591_v51 = vsel %vm587_vm5, %v10999_v42, %v11001_v34  ;;  %v592_v8 = vsel %vm587_vm5, %v11003_v24, %v11002_v19  ;;  %v593_v35 = vsel %vm587_vm5, %v11002_v19, %v11004_v56  ;;  %v11018_v38 = vld [vmem:[#allocation43_spill] sm:$0xff]  ;;  %v11020_v47 = vld [vmem:[#allocation48_spill] sm:$0xff]  ;;  %v11022_v25 = vld [vmem:[#allocation49_spill] sm:$0xff] }
0x159c   : > { %v606_v27 = vadd.f32 %v590_v55, %v509_v44  ;;  %v594_v2 = vsel %vm587_vm5, %v11006_v6, %v11005_v59  ;;  %v679_v57 = vsel %vm676_vm6, %v11012_v62, %v11011_v29  ;;  %v9918_v48 = vsel %vm1059_vm14, 1.0, %v10991_v49  ;;  %v11021_v7 = vld [vmem:[#allocation47_spill] sm:$0xff]  ;;  %v11026_v42 = vld [vmem:[#allocation54_spill] sm:$0xff]  ;;  %v11027_v30 = vld [vmem:[#allocation53_spill] sm:$0xff] }
0x159d   : > { %5291 = vrot.lane.b32.xlu1 %v5257_v22, %s5891_s16  ;;  %v11007_v22 = vld [vmem:[#allocation34_spill] sm:$0xff]  ;;  %v607_v52 = vadd.f32 %v591_v51, %v510_v4  ;;  %v608_v18 = vadd.f32 %v592_v8, %v511_v33  ;;  %v680_v26 = vsel %vm676_vm6, %v11011_v29, %v11013_v21  ;;  %v610_v9 = vadd.f32 %v594_v2, %v513_v39  ;;  %v11023_v31 = vld [vmem:[#allocation51_spill] sm:$0xff]  ;;  %v11025_v39 = vld [vmem:[#allocation52_spill] sm:$0xff] }
0x159e   : > { %5293 = vrot.lane.b32.xlu0 %v5258_v32, %s5891_s16  ;;  %v595_v50 = vsel %vm587_vm5, %v11005_v59, %v11007_v22  ;;  %v11008_v32 = vld [vmem:[#allocation35_spill] sm:$0xff]  ;;  %v683_v46 = vsel %vm676_vm6, %v11018_v38, %v11017_v13  ;;  %v684_v14 = vsel %vm676_vm6, %v11017_v13, %v11019_v61  ;;  %v766_v33 = vsel %vm765_vm7, %v11021_v7, %v11020_v47  ;;  %v11024_v4 = vld [vmem:[#allocation50_spill] sm:$0xff]  ;;  %v11029_v51 = vld [vmem:[#allocation57_spill] sm:$0xff] }
0x159f   : > { %v677_v0 = vsel %vm676_vm6, %v11009_v45, %v11008_v32  ;;  %v678_v36 = vsel %vm676_vm6, %v11008_v32, %v11010_v10  ;;  %v611_v41 = vadd.f32 %v595_v50, %v514_v12  ;;  %v696_v17 = vadd.f32 %v680_v26, %v607_v52  ;;  %v11030_v19 = vld [vmem:[#allocation56_spill] sm:$0xff]  ;;  %v11032_v50 = vld [vmem:[#allocation59_spill] sm:$0xff]  ;;  %v11038_v26 = vld [vmem:[#allocation65_spill] sm:$0xff] }
0x15a0   : > { %v767_v44 = vsel %vm765_vm7, %v11020_v47, %v11022_v25  ;;  %v768_v5 = vsel %vm765_vm7, %v11024_v4, %v11023_v31  ;;  %v770_v55 = vsel %vm765_vm7, %v11027_v30, %v11026_v42  ;;  %v772_v24 = vsel %vm765_vm7, %v11030_v19, %v11029_v51  ;;  %v11033_v32 = vld [vmem:[#allocation60_spill] sm:$0xff]  ;;  %v11045_v38 = vld [vmem:[#allocation71_spill] sm:$0xff]  ;;  %v11050_v30 = vld [vmem:[#allocation78_spill] sm:$0xff] }
0x15a1   : > { %5271 = vrot.lane.b32.xlu1 %v5247_v43, %s5891_s16  ;;  %v9915_v43 = vsel %vm1060_vm13, 1.0, %v10991_v49  ;;  %v682_v49 = vsel %vm676_vm6, %v11014_v15, %v11016_v53  ;;  %v700_v8 = vadd.f32 %v684_v14, %v611_v41  ;;  %v855_v45 = vsel %vm854_vm8, %v11033_v32, %v11032_v50  ;;  %v11035_v62 = vld [vmem:[#allocation64_spill] sm:$0xff]  ;;  %v11043_v53 = vld [vmem:[#allocation69_spill] sm:$0xff]  ;;  %v11047_v7 = vld [vmem:[#allocation75_spill] sm:$0xff] }
0x15a2   : > { %5273 = vrot.lane.b32.xlu0 %v5248_v16, %s5891_s16  ;;  %v609_v16 = vadd.f32 %v593_v35, %v512_v20  ;;  %v769_v20 = vsel %vm765_vm7, %v11023_v31, %v11025_v39  ;;  %v11044_v13 = vld [vmem:[#allocation72_spill] sm:$0xff]  ;;  %v11046_v14 = vld [vmem:[#allocation73_spill] sm:$0xff]  ;;  %v11053_v19 = vld [vmem:[#allocation83_spill] sm:$0xff]  ;;  %vm1771_vm5 = vcmask 1039360  }
0x15a3   : > { %v785_v2 = vadd.f32 %v769_v20, %v696_v17  ;;  %v945_v47 = vsel %vm943_vm9, %v11044_v13, %v11046_v14  ;;  %v11049_v4 = vld [vmem:[#allocation76_spill] sm:$0xff] }
0x15a4   : > { %v698_v12 = vadd.f32 %v682_v49, %v609_v16  ;;  %v11037_v16 = vld [vmem:[#allocation63_spill] sm:$0xff] }
0x15a5   : > { %5275 = vrot.lane.b32.xlu1 %v5249_v28, %s5891_s16  ;;  %v693_v28 = vadd.f32 %v677_v0, %v604_v37  ;;  %v699_v37 = vadd.f32 %v683_v46, %v610_v9  ;;  %v858_v21 = vsel %vm854_vm8, %v11035_v62, %v11037_v16  ;;  %v11039_v9 = vld [vmem:[#allocation66_spill] sm:$0xff]  ;;  %v944_v46 = vsel %vm943_vm9, %v11045_v38, %v11044_v13 }
0x15a6   : > { %5277 = vrot.lane.b32.xlu0 %v5250_v1, %s5891_s16  ;;  %v11015_v1 = vld [vmem:[#allocation42_spill] sm:$0xff]  ;;  %v859_v41 = vsel %vm854_vm8, %v11039_v9, %v11038_v26  ;;  %v11065_v9 = vld [vmem:[#allocation93_spill] sm:$0xff] }
0x15a7   : > { %v782_v56 = vadd.f32 %v766_v33, %v693_v28  ;;  %v788_v10 = vadd.f32 %v772_v24, %v699_v37  ;;  %v11040_v28 = vld [vmem:[#allocation68_spill] sm:$0xff]  ;;  %v11048_v33 = vld [vmem:[#allocation74_spill] sm:$0xff] }
0x15a8   : > { %v946_v25 = vsel %vm943_vm9, %v11048_v33, %v11047_v7  ;;  %v11054_v24 = vld [vmem:[#allocation84_spill] sm:$0xff]  ;;  %v11069_v33 = vld [vmem:[#allocation101_spill] sm:$0xff] }
0x15a9   : > { %5279 = vrot.lane.b32.xlu1 %v5251_v40, %s5891_s16  ;;  %v681_v40 = vsel %vm676_vm6, %v11015_v1, %v11014_v15  ;;  %v860_v15 = vsel %vm854_vm8, %v11038_v26, %v11040_v28  ;;  %v871_v1 = vadd.f32 %v855_v45, %v782_v56  ;;  %vm2482_vm6 = vcmask 1031168  }
0x15aa   : > { %5281 = vrot.lane.b32.xlu0 %v5252_v63, %s5891_s16  ;;  %v694_v63 = vadd.f32 %v678_v36, %v605_v58  ;;  %v697_v23 = vadd.f32 %v681_v40, %v608_v18  ;;  %v11028_v58 = vld [vmem:[#allocation55_spill] sm:$0xff]  ;;  %v11034_v36 = vld [vmem:[#allocation62_spill] sm:$0xff] }
0x15ab   : > { %v771_v34 = vsel %vm765_vm7, %v11026_v42, %v11028_v58  ;;  %v856_v29 = vsel %vm854_vm8, %v11032_v50, %v11034_v36  ;;  %v11041_v40 = vld [vmem:[#allocation70_spill] sm:$0xff]  ;;  %v960_v42 = vadd.f32 %v944_v46, %v871_v1  ;;  %v11059_v50 = vld [vmem:[#allocation88_spill] sm:$0xff]  ;;  %v11061_v36 = vld [vmem:[#allocation85_spill] sm:$0xff] }
0x15ac   : > { %v783_v35 = vadd.f32 %v767_v44, %v694_v63  ;;  %v786_v22 = vadd.f32 %v770_v55, %v697_v23  ;;  %v787_v0 = vadd.f32 %v771_v34, %v698_v12  ;;  %v11042_v63 = vld [vmem:[#allocation67_spill] sm:$0xff]  ;;  %v862_v49 = vsel %vm854_vm8, %v11041_v40, %v11043_v53  ;;  %v11051_v55 = vld [vmem:[#allocation77_spill] sm:$0xff] }
0x15ad   : > { %5351 = vperm.xlu1 %5782, %v5348_v54   ;;  %v695_v54 = vadd.f32 %v679_v57, %v606_v27  ;;  %v11031_v27 = vld [vmem:[#allocation58_spill] sm:$0xff]  ;;  %v11036_v57 = vld [vmem:[#allocation61_spill] sm:$0xff]  ;;  %v874_v44 = vadd.f32 %v858_v21, %v785_v2  ;;  %v948_v12 = vsel %vm943_vm9, %v11051_v55, %v11050_v30  ;;  %v11052_v34 = vld [vmem:[#allocation79_spill] sm:$0xff] }
0x15ae   : > { %v773_v59 = vsel %vm765_vm7, %v11029_v51, %v11031_v27  ;;  %v857_v52 = vsel %vm854_vm8, %v11036_v57, %v11035_v62  ;;  %v872_v17 = vadd.f32 %v856_v29, %v783_v35  ;;  %v875_v23 = vadd.f32 %v859_v41, %v786_v22  ;;  %v11055_v35 = vld [vmem:[#allocation82_spill] sm:$0xff]  ;;  %v11056_v27 = vld [vmem:[#allocation81_spill] sm:$0xff]  ;;  %v11058_v22 = vld [vmem:[#allocation87_spill] sm:$0xff] }
0x15af   : > { %v784_v6 = vadd.f32 %v768_v5, %v695_v54  ;;  %v789_v18 = vadd.f32 %v773_v59, %v700_v8  ;;  %v861_v54 = vsel %vm854_vm8, %v11042_v63, %v11041_v40  ;;  %v876_v31 = vadd.f32 %v860_v15, %v787_v0  ;;  %v11060_v0 = vld [vmem:[#allocation80_spill] sm:$0xff]  ;;  %v11062_v62 = vld [vmem:[#allocation89_spill] sm:$0xff]  ;;  %v11063_v57 = vld [vmem:[#allocation90_spill] sm:$0xff] }
0x15b0   : > { %v947_v5 = vsel %vm943_vm9, %v11047_v7, %v11049_v4  ;;  %v877_v39 = vadd.f32 %v861_v54, %v788_v10  ;;  %v961_v37 = vadd.f32 %v945_v47, %v872_v17  ;;  %v949_v51 = vsel %vm943_vm9, %v11050_v30, %v11052_v34  ;;  %v11064_v21 = vld [vmem:[#allocation92_spill] sm:$0xff]  ;;  %v11066_v41 = vld [vmem:[#allocation94_spill] sm:$0xff]  ;;  %v11067_v63 = vld [vmem:[#allocation91_spill] sm:$0xff] }
0x15b1   : > { %v873_v61 = vadd.f32 %v857_v52, %v784_v6  ;;  %v878_v20 = vadd.f32 %v862_v49, %v789_v18  ;;  %v1033_v8 = vsel %vm1032_vm10, %v11054_v24, %v11053_v19  ;;  %v963_v56 = vadd.f32 %v947_v5, %v874_v44  ;;  %v11057_v6 = vld [vmem:[#allocation86_spill] sm:$0xff]  ;;  %v11068_v7 = vld [vmem:[#allocation8_spill] sm:$0xff] }
0x15b2   : > { %v951_v59 = vsel %vm943_vm9, %v11056_v27, %v11055_v35  ;;  %v1034_v2 = vsel %vm1032_vm10, %v11053_v19, %v11057_v6  ;;  %v1036_v32 = vsel %vm1032_vm10, %v11059_v50, %v11058_v22  ;;  %v964_v45 = vadd.f32 %v948_v12, %v875_v23  ;;  %v11070_v44 = vld [vmem:[#allocation104_spill] sm:$0xff]  ;;  %v11071_v4 = vld [vmem:[#allocation122_spill] sm:$0xff]  ;;  %v11079_v6 = vld [vmem:[#allocation9_spill] sm:$0xff] }
0x15b3   : > { %v962_v58 = vadd.f32 %v946_v25, %v873_v61  ;;  %v950_v10 = vsel %vm943_vm9, %v11060_v0, %v11056_v27  ;;  %v1035_v29 = vsel %vm1032_vm10, %v11061_v36, %v11059_v50  ;;  %v1037_v52 = vsel %vm1032_vm10, %v11063_v57, %v11062_v62  ;;  %v11072_v5 = vld [vmem:[#allocation116_spill] sm:$0xff]  ;;  %v11077_v19 = vld [vmem:[#allocation126_spill] sm:$0xff] }
0x15b4   : > { %v965_v18 = vadd.f32 %v949_v51, %v876_v31  ;;  %v1049_v16 = vadd.f32 %v1033_v8, %v960_v42  ;;  %v1038_v26 = vsel %vm1032_vm10, %v11062_v62, %v11064_v21  ;;  %v1040_v28 = vsel %vm1032_vm10, %v11066_v41, %v11065_v9  ;;  %v11074_v42 = vld [vmem:[#allocation109_spill] sm:$0xff]  ;;  %v11076_v51 = vld [vmem:[#allocation103_spill] sm:$0xff]  ;;  %v11078_v27 = vld [vmem:[#allocation112_spill] sm:$0xff] }
0x15b5   : > { %v967_v15 = vadd.f32 %v951_v59, %v878_v20  ;;  %v1050_v1 = vadd.f32 %v1034_v2, %v961_v37  ;;  %v1052_v40 = vadd.f32 %v1036_v32, %v963_v56  ;;  %v1039_v54 = vsel %vm1032_vm10, %v11067_v63, %v11066_v41  ;;  %v11073_v20 = vld [vmem:[#allocation129_spill] sm:$0xff]  ;;  %v11081_v0 = vld [vmem:[#allocation134_spill] sm:$0xff] }
0x15b6   : > { %v966_v53 = vadd.f32 %v950_v10, %v877_v39  ;;  %v1051_v49 = vadd.f32 %v1035_v29, %v962_v58  ;;  %v1053_v13 = vadd.f32 %v1037_v52, %v964_v45  ;;  %v1054_v38 = vadd.f32 %v1038_v26, %v965_v18  ;;  %v11075_v58 = vld [vmem:[#allocation113_spill] sm:$0xff]  ;;  %v11082_v36 = vld [vmem:[#allocation98_spill] sm:$0xff]  ;;  %v11085_v18 = vld [vmem:[#allocation99_spill] sm:$0xff] }
0x15b7   : > { %v1056_v46 = vadd.f32 %v1040_v28, %v967_v15  ;;  %v1069_v61 = vmul.f32 %v9918_v48, %v1049_v16  ;;  %v1070_v14 = vmul.f32 %v9915_v43, %v1050_v1  ;;  %v10034_v47 = vmul.f32 %v9915_v43, %v1052_v40  ;;  %v11080_v45 = vld [vmem:[#allocation133_spill] sm:$0xff]  ;;  %v11084_v57 = vld [vmem:[#allocation10_spill] sm:$0xff]  ;;  %v11086_v26 = vld [vmem:[#allocation131_spill] sm:$0xff] }
0x15b8   : > { %v1055_v17 = vadd.f32 %v1039_v54, %v966_v53  ;;  %v1773_v25 = vsel %vm1771_vm5, %v11069_v33, %v11068_v7  ;;  %v1772_v23 = vsel %vm1771_vm5, %v11070_v44, %v11069_v33  ;;  %v1071_v31 = vmul.f32 %v9918_v48, %v1051_v49  ;;  %v11087_v9 = vld [vmem:[#allocation110_spill] sm:$0xff]  ;;  %v11088_v28 = vld [vmem:[#allocation119_spill] sm:$0xff]  ;;  %v11089_v1 = vld [vmem:[#allocation132_spill] sm:$0xff] }
0x15b9   : > { %v1774_v39 = vsel %vm1771_vm5, %v11072_v5, %v11071_v4  ;;  %v1777_v30 = vsel %vm1771_vm5, %v11074_v42, %v11073_v20  ;;  %v1073_v55 = vmul.f32 %v9918_v48, %v1053_v13  ;;  %v1074_v12 = vmul.f32 %v9915_v43, %v1054_v38  ;;  %v11090_v40 = vld [vmem:[#allocation124_spill] sm:$0xff]  ;;  %v11092_v53 = vld [vmem:[#allocation135_spill] sm:$0xff]  ;;  %v11094_v33 = vld [vmem:[#allocation106_spill] sm:$0xff] }
0x15ba   : > { %v1076_v37 = vmul.f32 %v9915_v43, %v1056_v46  ;;  %v1776_v34 = vsel %vm1771_vm5, %v11075_v58, %v11074_v42  ;;  %v1778_v24 = vsel %vm1771_vm5, %v11077_v19, %v11076_v51  ;;  %v10058_v8 = vadd.f32 %v1773_v25, %v1070_v14  ;;  %v11091_v54 = vld [vmem:[#allocation108_spill] sm:$0xff]  ;;  %v11095_v44 = vld [vmem:[#allocation154_spill] sm:$0xff]  ;;  %v11100_v58 = vld [vmem:[#allocation141_spill] sm:$0xff] }
0x15bb   : > { %v1788_v56 = vadd.f32 %v1772_v23, %v1069_v61  ;;  %v1075_v35 = vmul.f32 %v9918_v48, %v1055_v17  ;;  %v1779_v59 = vsel %vm1771_vm5, %v11076_v51, %v11078_v27  ;;  %v1775_v43 = vsel %vm1771_vm5, %v11071_v4, %v11079_v6  ;;  %v11083_v48 = vld [vmem:[#allocation97_spill] sm:$0xff]  ;;  %v11096_v23 = vld [vmem:[#allocation102_spill] sm:$0xff]  ;;  %v11102_v6 = vld [vmem:[#allocation123_spill] sm:$0xff] }
0x15bc   : > { %v10067_v2 = vadd.f32 %v1774_v39, %v1071_v31  ;;  %v1793_v22 = vadd.f32 %v1777_v30, %v1074_v12  ;;  %v1792_v50 = vadd.f32 %v1776_v34, %v1073_v55  ;;  %v2487_v10 = vsel %vm2482_vm6, %v11081_v0, %v11080_v45  ;;  %v11093_v17 = vld [vmem:[#allocation117_spill] sm:$0xff]  ;;  %v11097_v39 = vld [vmem:[#allocation115_spill] sm:$0xff]  ;;  %v11099_v12 = vld [vmem:[#allocation142_spill] sm:$0xff] }
0x15bd   : > { %v1794_v32 = vadd.f32 %v1778_v24, %v1075_v35  ;;  %v2489_v29 = vsel %vm2482_vm6, %v11083_v48, %v11082_v36  ;;  %v1795_v62 = vadd.f32 %v1779_v59, %v1076_v37  ;;  %v2488_v52 = vsel %vm2482_vm6, %v11080_v45, %v11084_v57  ;;  %v11098_v55 = vld [vmem:[#allocation143_spill] sm:$0xff]  ;;  %v11101_v59 = vld [vmem:[#allocation120_spill] sm:$0xff] }
0x15be   : > { %v2490_v16 = vsel %vm2482_vm6, %v11082_v36, %v11085_v18  ;;  %vm3159_vm7 = vcmask 1022976   ;;  %v2483_v41 = vsel %vm2482_vm6, %v11087_v9, %v11086_v26  ;;  %v2484_v15 = vsel %vm2482_vm6, %v11086_v26, %v11088_v28  ;;  %v11104_v45 = vld [vmem:[#allocation151_spill] sm:$0xff]  ;;  %v11106_v36 = vld [vmem:[#allocation130_spill] sm:$0xff] }
0x15bf   : > { %v3164_v63 = vsel %vm3159_vm7, %v11090_v40, %v11089_v1  ;;  %v3166_v49 = vsel %vm3159_vm7, %v11092_v53, %v11091_v54  ;;  %v2503_v38 = vadd.f32 %v2487_v10, %v1792_v50  ;;  %v2505_v46 = vadd.f32 %v2489_v29, %v1794_v32  ;;  %v11103_v32 = vld [vmem:[#allocation148_spill] sm:$0xff]  ;;  %v11105_v10 = vld [vmem:[#allocation149_spill] sm:$0xff]  ;;  %v11107_v53 = vld [vmem:[#allocation158_spill] sm:$0xff] }
0x15c0   : > { %v3167_v61 = vsel %vm3159_vm7, %v11091_v54, %v11093_v17  ;;  %vm3871_vm8 = vcmask 1014784   ;;  %v2504_v14 = vadd.f32 %v2488_v52, %v1793_v22  ;;  %v2506_v7 = vadd.f32 %v2490_v16, %v1795_v62  ;;  %v11109_v17 = vld [vmem:[#allocation6_spill] sm:$0xff] }
0x15c1   : > { %v3165_v25 = vsel %vm3159_vm7, %v11089_v1, %v11094_v33  ;;  %v3878_v31 = vsel %vm3871_vm8, %v11096_v23, %v11095_v44  ;;  %v3180_v4 = vadd.f32 %v3164_v63, %v2503_v38  ;;  %v3182_v5 = vadd.f32 %v3166_v49, %v2505_v46  ;;  %v11108_v49 = vld [vmem:[#allocation159_spill] sm:$0xff] }
0x15c2   : > { %v3879_v20 = vsel %vm3871_vm8, %v11095_v44, %v11097_v39  ;;  %vm4583_vm9 = vcmask 1006592   ;;  %v3183_v30 = vadd.f32 %v3167_v61, %v2506_v7  ;;  %v3876_v37 = vsel %vm3871_vm8, %v11099_v12, %v11098_v55  ;;  %v11111_v61 = vld [vmem:[#allocation7_spill] sm:$0xff]  ;;  %v11115_v39 = vld [vmem:[#allocation145_spill] sm:$0xff] }
0x15c3   : > { %v3877_v34 = vsel %vm3871_vm8, %v11098_v55, %v11100_v58  ;;  %v4590_v51 = vsel %vm4583_vm9, %v9563_v60, %v9573_v3  ;;  %v3181_v24 = vadd.f32 %v3165_v25, %v2504_v14  ;;  %v3894_v35 = vadd.f32 %v3878_v31, %v3182_v5  ;;  %v11113_v31 = vld [vmem:[#allocation111_spill] sm:$0xff] }
0x15c4   : > { %v4591_v27 = vsel %vm4583_vm9, %v9573_v3, %v9567_v11  ;;  %vm5295_vm10 = vcmask 998400   ;;  %v2485_v22 = vsel %vm2482_vm6, %v11102_v6, %v11101_v59  ;;  %v3895_v50 = vadd.f32 %v3879_v20, %v3183_v30  ;;  %v11116_v20 = vld [vmem:[#allocation107_spill] sm:$0xff] }
0x15c5   : > { %v4588_v0 = vsel %vm4583_vm9, %v11104_v45, %v11103_v32  ;;  %v4589_v60 = vsel %vm4583_vm9, %v11103_v32, %v11105_v10  ;;  %v2486_v48 = vsel %vm2482_vm6, %v11101_v59, %v11106_v36  ;;  %v3892_v29 = vadd.f32 %v3876_v37, %v3180_v4  ;;  %v11114_v4 = vld [vmem:[#allocation100_spill] sm:$0xff]  ;;  %v11117_v37 = vld [vmem:[#allocation118_spill] sm:$0xff]  ;;  %v11122_v32 = vld [vmem:[#allocation19_spill] sm:$0xff] }
0x15c6   : > { %v3893_v11 = vadd.f32 %v3877_v34, %v3181_v24  ;;  %v4606_v3 = vadd.f32 %v4590_v51, %v3894_v35  ;;  %v4607_v57 = vadd.f32 %v4591_v27, %v3895_v50  ;;  %v1791_v63 = vadd.f32 %v1775_v43, %v10034_v47  ;;  %v11112_v43 = vld [vmem:[#allocation125_spill] sm:$0xff]  ;;  %v11118_v34 = vld [vmem:[#allocation144_spill] sm:$0xff]  ;;  %v11120_v24 = vld [vmem:[#allocation127_spill] sm:$0xff] }
0x15c7   : > { %v4604_v9 = vadd.f32 %v4588_v0, %v3892_v29  ;;  %v2499_v54 = vadd.f32 %v2483_v41, %v1788_v56  ;;  %v3160_v38 = vsel %vm3159_vm7, %v11108_v49, %v11107_v53  ;;  %v2500_v44 = vadd.f32 %v2484_v15, %v10058_v8  ;;  %v11123_v45 = vld [vmem:[#allocation16_spill] sm:$0xff] }
0x15c8   : > { %v4605_v28 = vadd.f32 %v4589_v60, %v3893_v11  ;;  %v2501_v47 = vadd.f32 %v2485_v22, %v10067_v2  ;;  %v2502_v56 = vadd.f32 %v2486_v48, %v1791_v63  ;;  %v3872_v5 = vsel %vm3871_vm8, %v11114_v4, %v11113_v31  ;;  %v11121_v22 = vld [vmem:[#allocation137_spill] sm:$0xff]  ;;  %v11124_v60 = vld [vmem:[#allocation156_spill] sm:$0xff] }
0x15c9   : > { %v3176_v12 = vadd.f32 %v3160_v38, %v2499_v54  ;;  %v3873_v58 = vsel %vm3871_vm8, %v11113_v31, %v11117_v37  ;;  %v3875_v51 = vsel %vm3871_vm8, %v11115_v39, %v11118_v34  ;;  %v4586_v0 = vsel %vm4583_vm9, %v11123_v45, %v11122_v32 }
0x15ca   : > { %v4587_v36 = vsel %vm4583_vm9, %v11122_v32, %v11124_v60 }
0x15cb   : > { %v3888_v59 = vadd.f32 %v3872_v5, %v3176_v12 }
0x1607   : > { %v5284_v21 = vpop.permute.xlu1 %5283 }
0x1608   : > { %v5286_v13 = vpop.permute.xlu0 %5285 }
0x1609   : > { %v5300_v52 = vsel %vm5295_vm10, %v5284_v21, %v5286_v13  ;;  %v3161_v21 = vsel %vm3159_vm7, %v11107_v53, %v11109_v17 }
0x160a   : > { %v5316_v7 = vadd.f32 %v5300_v52, %v4604_v9  ;;  %v3177_v8 = vadd.f32 %v3161_v21, %v2500_v44 }
0x160b   : > { %v5288_v42 = vpop.permute.xlu1 %5287 }
0x160c   : > { %v5290_v19 = vpop.permute.xlu0 %5289  ;;  %v5301_v18 = vsel %vm5295_vm10, %v5286_v13, %v5288_v42  ;;  %v11110_v13 = vld [vmem:[#allocation121_spill] sm:$0xff]  ;;  %v3874_v42 = vsel %vm3871_vm8, %v11116_v20, %v11115_v39 }
0x160d   : > { %v3162_v14 = vsel %vm3159_vm7, %v11111_v61, %v11110_v13  ;;  %v5317_v33 = vadd.f32 %v5301_v18, %v4605_v28  ;;  %v3163_v41 = vsel %vm3159_vm7, %v11110_v13, %v11112_v43 }
0x160e   : > { %v3178_v15 = vadd.f32 %v3162_v14, %v2501_v47  ;;  %v3179_v2 = vadd.f32 %v3163_v41, %v2502_v56  ;;  %v5892_v41 = vmov 1983009808  }
0x160f   : > { %v5292_v62 = vpop.permute.xlu1 %5291 }
0x1610   : > { %v5302_v16 = vsel %vm5295_vm10, %v5290_v19, %v5292_v62  ;;  %v5294_v26 = vpop.permute.xlu0 %5293  ;;  %v11119_v19 = vld [vmem:[#allocation136_spill] sm:$0xff]  ;;  %v3890_v6 = vadd.f32 %v3874_v42, %v3178_v15 }
0x1611   : > { %v5318_v1 = vadd.f32 %v5302_v16, %v4606_v3  ;;  %v5303_v40 = vsel %vm5295_vm10, %v5292_v62, %v5294_v26  ;;  %v4584_v35 = vsel %vm4583_vm9, %v11120_v24, %v11119_v19  ;;  %v4585_v50 = vsel %vm4583_vm9, %v11119_v19, %v11121_v22 }
0x1612   : > { %v5319_v46 = vadd.f32 %v5303_v40, %v4607_v57  ;;  %v3889_v3 = vadd.f32 %v3873_v58, %v3177_v8  ;;  %v3891_v62 = vadd.f32 %v3875_v51, %v3179_v2  ;;  %v4600_v57 = vadd.f32 %v4584_v35, %v3888_v59 }
0x1613   : > { %v5272_v25 = vpop.permute.xlu1 %5271  ;;  %v5334_v30 = vadd.f32 %v5318_v1, %v5316_v7  ;;  %v4602_v52 = vadd.f32 %v4586_v0, %v3890_v6 }
0x1614   : > { %v5274_v23 = vpop.permute.xlu0 %5273  ;;  %v5341_v55 = vadd.f32 %v5319_v46, %v5317_v33  ;;  %v4601_v26 = vadd.f32 %v4585_v50, %v3889_v3  ;;  %v4603_v9 = vadd.f32 %v4587_v36, %v3891_v62 }
0x1615   : > { %v5335_v48 = vrot.slane %v5334_v30, 4  ;;  %v5296_v11 = vsel %vm5295_vm10, %v5272_v25, %v5274_v23 }
0x1616   : > { %v5342_v29 = vrot.slane %v5341_v55, 4  ;;  %v5312_v28 = vadd.f32 %v5296_v11, %v4600_v57 }
0x1617   : > { %v5276_v27 = vpop.permute.xlu1 %5275  ;;  %v5336_v63 = vadd.f32 %v5335_v48, %v5334_v30 }
0x1618   : > { %v5278_v10 = vpop.permute.xlu0 %5277  ;;  %v5297_v18 = vsel %vm5295_vm10, %v5274_v23, %v5276_v27  ;;  %v5343_v54 = vadd.f32 %v5342_v29, %v5341_v55  ;;  %v5366_v23 = vunpack.c.l.s4 %v5892_v41  ;;  %v11125_v55 = vlaneseq }
0x1619   : > { %v5313_v38 = vadd.f32 %v5297_v18, %v4601_v26  ;;  %v5337_v13 = vrot.slane %v5336_v63, 2 }
0x161a   : > { %v5344_v61 = vrot.slane %v5343_v54, 2  ;;  %v5367_v30 = vunpack.c.0.s8 %v5366_v23  ;;  %v5369_v12 = vshrl.u32 %v11125_v55, 7 }
0x161b   : > { %v5280_v16 = vpop.permute.xlu1 %5279  ;;  %v5338_v44 = vadd.f32 %v5337_v13, %v5336_v63 }
0x161c   : > { %v5298_v1 = vsel %vm5295_vm10, %v5278_v10, %v5280_v16  ;;  %v5282_v40 = vpop.permute.xlu0 %5281  ;;  %v5345_v47 = vadd.f32 %v5344_v61, %v5343_v54  ;;  %v5370_v24 = vsub.s32 %v5367_v30, %v5369_v12 }
0x161d   : > { %v5314_v53 = vadd.f32 %v5298_v1, %v4602_v52  ;;  %v5299_v49 = vsel %vm5295_vm10, %v5280_v16, %v5282_v40  ;;  %v5339_v5 = vrot.slane %v5338_v44, 1 }
0x161e   : > { %v5315_v46 = vadd.f32 %v5299_v49, %v4603_v9  ;;  %v5346_v39 = vrot.slane %v5345_v47, 1 }
0x161f   : > { %v5320_v17 = vadd.f32 %v5314_v53, %v5312_v28  ;;  %v5340_v37 = vadd.f32 %v5339_v5, %v5338_v44 }
0x1620   : > { %v5327_v21 = vadd.f32 %v5315_v46, %v5313_v38  ;;  %v5347_v58 = vadd.f32 %v5346_v39, %v5345_v47 }
0x1621   : > { %v5321_v14 = vrot.slane %v5320_v17, 4 }
0x1622   : > { %v5328_v7 = vrot.slane %v5327_v21, 4 }
0x1623   : > { %v5322_v33 = vadd.f32 %v5321_v14, %v5320_v17 }
0x1624   : > { %v5329_v25 = vadd.f32 %v5328_v7, %v5327_v21 }
0x1625   : > { %v5323_v56 = vrot.slane %v5322_v33, 2 }
0x1626   : > { %v5330_v43 = vrot.slane %v5329_v25, 2 }
0x1627   : > { %v5324_v31 = vadd.f32 %v5323_v56, %v5322_v33 }
0x1628   : > { %v5331_v4 = vadd.f32 %v5330_v43, %v5329_v25 }
0x1629   : > { %v5325_v20 = vrot.slane %v5324_v31, 1 }
0x162a   : > { %v5332_v42 = vrot.slane %v5331_v4, 1 }
0x162b   : > { %v5326_v8 = vadd.f32 %v5325_v20, %v5324_v31 }
0x162c   : > { %v5352_v15 = vpop.permute.xlu1 %5351  ;;  %v5333_v2 = vadd.f32 %v5332_v42, %v5331_v4 }
0x162d   : > { %v5353_v34 = vrot.slane %v5352_v15, 1  ;;  %v5356_v51 = vadd.f32 %v5352_v15, %v5326_v8 }
0x162e   : > { %v5357_v19 = vadd.f32 %v5352_v15, %v5333_v2 }
0x162f   : > { %v5358_v35 = vadd.f32 %v5353_v34, %v5340_v37  ;;  %v5359_v27 = vadd.f32 %v5353_v34, %v5347_v58  ;;  %v5407_v45 = vmul.f32 %v5356_v51, %v5356_v51 }
0x1630   : > { %v5364_v59 = vcombine.low %v5356_v51, %v5357_v19  ;;  %v5408_v29 = vmul.f32 %v5357_v19, %v5357_v19 }
0x1631   : > { %v5372_v6 = vcombine.low %v5358_v35, %v5359_v27  ;;  %v5395_v22 = vrot.slane %v5358_v35, 7  ;;  %v5397_v50 = vrot.slane %v5359_v27, 7  ;;  %v5409_v32 = vmul.f32 %v5358_v35, %v5358_v35 }
0x1632   : > { %v5410_v0 = vmul.f32 %v5359_v27, %v5359_v27  ;;  %v5371_v57 = vrot.slane %v5364_v59, %v5370_v24 }
0x1633   : > { %v5379_v10 = vrot.slane %v5372_v6, %v5370_v24  ;;  %v5396_v60 = vsel %vm5385_vm15, %v5395_v22, %v5356_v51  ;;  %v5398_v36 = vsel %vm5385_vm15, %v5397_v50, %v5357_v19  ;;  %v5415_v48 = vrot.slane %v5409_v32, 7 }
0x1634   : > { %v5402_v11 = vsel %vm5401_vm0, %v5396_v60, 0.0  ;;  %v5403_v3 = vsel %vm5401_vm0, %v5398_v36, 0.0  ;;  %v5417_v62 = vrot.slane %v5410_v0, 7 }
0x1635   : > { %v5384_v52 = vrot.slane %v5379_v10, 7  ;;  %v5404_v18 = vadd.f32 %v5403_v3, %v5402_v11  ;;  %v5416_v16 = vsel %vm5385_vm15, %v5415_v48, %v5407_v45 }
0x1636   : > { %v5418_v26 = vsel %vm5385_vm15, %v5417_v62, %v5408_v29  ;;  %v5421_v9 = vsel %vm5401_vm0, %v5416_v16, 0.0 }
0x1637   : > { %5405 = vadd.xlane.f32.xlu0 %v5404_v18  ;;  %v5386_v28 = vsel %vm5385_vm15, %v5384_v52, %v5371_v57  ;;  %v5422_v1 = vsel %vm5401_vm0, %v5418_v26, 0.0 }
0x1638   : > { %v5388_v40 = vsel %vm5387_vm2, %v5384_v52, %v5386_v28  ;;  %v5423_v63 = vadd.f32 %v5422_v1, %v5421_v9 }
0x1639   : > { %v5390_v54 = vsel %vm5389_vm3, %v5384_v52, %v5388_v40 }
0x163a   : > { %v5392_v53 = vsel %vm5391_vm4, %v5384_v52, %v5390_v54  ;;  %5424 = vadd.xlane.f32.xlu1 %v5423_v63 }
0x163b   : > { %5394 = vst [vmem:[%s292_s12] sm:$0xf] %v5392_v53 }
0x16c4   : > { %v5406_v49 = vpop.xlane.xlu0 %5405 }
0x16c7   : > { %v5425_v38 = vpop.xlane.xlu1 %5424 }
0x16c8   : > { %v5426_v46 = vsel %vm394_vm1, %v5406_v49, %v5425_v38 }
0x16c9   : > { %5428 = vst.msk [vmem:[%s301_s22] sm:$0x3] %vm5427_vm11, %v5426_v46 }
0x16ca PF: > { %s18_s24 = sadd.s32 1, %s5822_s24  }
0x16cb   : > { %p15_p4 = scmp.ge.s32.totalorder %s18_s24, 4  }
0x16cd   :  { %17 = sbr.rel (!%p15_p4) target bundleno = 1 (0x1), region = 94 }

</bundles_post_ra>
